<compile_context>
chip_gen: v5e
topology: v5e:2x2
jax: 0.10.0
libtpu: 0.0.40
codegen_flags: <defaults>
</compile_context>

<pallas_src>
import math

import jax
import jax.numpy as jnp
from jax.experimental import pallas as pl
from jax.experimental.pallas import tpu as pltpu

# ---- module constants (mirroring the PyTorch file; num_steps shrunk for the demo) ----
D_K = D_V = 2
D_MODEL = 16
N_HEADS = 8
D_FF = 128
INPUT_SIZE = 1
N_LAYERS = 3
NUM_STEPS = 8            # PyTorch module hard-codes 1500; small seq len for this demo
LN_EPS = 1e-5
ATTN_LANES = N_LAYERS * N_HEADS * NUM_STEPS   # 192 (lane-dense attention output)


def _layernorm(x):
    # nn.LayerNorm(d_model) freshly constructed each forward -> weight=1, bias=0,
    # biased variance, eps=1e-5, normalized over the last axis.
    mean = jnp.mean(x, axis=-1, keepdims=True)
    var = jnp.mean((x - mean) ** 2, axis=-1, keepdims=True)
    return (x - mean) * jax.lax.rsqrt(var + LN_EPS)


def encoder_kernel(x_ref, pe_ref, wemb_ref, bemb_ref,
                   wqkv_ref, wo_ref, w1_ref, w2_ref,
                   out_ref, attn_ref):
    Bt, S, _ = x_ref.shape
    R = Bt * S

    # src_emb (Linear(1,16) with bias) + positional encoding.
    # The K=1 matmul is degenerate -> do a VPU broadcast multiply instead.
    # TODO(synk): PositionalEncoding's nn.Dropout(p=0.1) is treated as identity
    # (eval-mode semantics); a stochastic train-mode dropout is not reproduced.
    x = x_ref[...]                                                   # [Bt, S, 1]
    h = (x * wemb_ref[...][None, :, :]
         + bemb_ref[...][None, :, :]
         + pe_ref[...][None, :, :])                                  # [Bt, S, 16]
    h2 = h.reshape(R, D_MODEL)                                       # rows = Bt*S

    scale = 1.0 / math.sqrt(D_K)
    layer_attns = []
    for l in range(N_LAYERS):                                        # static unroll (3)
        # ---------------- multi-head self attention ----------------
        # fused Q/K/V projection: one [R,16]x[16,48] matmul per layer
        qkv = jnp.dot(h2, wqkv_ref[l], preferred_element_type=jnp.float32)   # [R, 48]
        q = qkv[:, 0 * D_MODEL:1 * D_MODEL].reshape(Bt, S, D_MODEL)
        k = qkv[:, 1 * D_MODEL:2 * D_MODEL].reshape(Bt, S, D_MODEL)
        v = qkv[:, 2 * D_MODEL:3 * D_MODEL].reshape(Bt, S, D_MODEL)

        head_attns, head_ctx = [], []
        for hd in range(N_HEADS):                                    # static unroll (8)
            qh = q[:, :, hd * D_K:(hd + 1) * D_K]                    # [Bt, S, 2]
            kh = k[:, :, hd * D_K:(hd + 1) * D_K]
            vh = v[:, :, hd * D_V:(hd + 1) * D_V]
            # batched over the batch tile (dot_general batch dim), not per sample
            s = jnp.einsum('bqd,bkd->bqk', qh, kh,
                           preferred_element_type=jnp.float32) * scale      # [Bt,S,S]
            s = s - jnp.max(s, axis=-1, keepdims=True)
            e = jnp.exp(s)
            # softmax denominator via EUP approximate reciprocal (frees VALU slots)
            a = e * pl.reciprocal(jnp.sum(e, axis=-1, keepdims=True), approx=True)
            head_attns.append(a)
            head_ctx.append(jnp.einsum('bqk,bkd->bqd', a, vh,
                                       preferred_element_type=jnp.float32))  # [Bt,S,2]
        # stage this layer's attention lane-dense: lanes ordered (head, key)
        layer_attns.append(jnp.concatenate(head_attns, axis=-1))     # [Bt, S, H*S]

        ctx = jnp.concatenate(head_ctx, axis=-1).reshape(R, N_HEADS * D_V)   # [R, 16]
        attn_out = jnp.dot(ctx, wo_ref[l], preferred_element_type=jnp.float32)
        h2 = _layernorm(attn_out + h2)                               # add & norm

        # ---------------- position-wise feed forward ----------------
        f = jnp.maximum(jnp.dot(h2, w1_ref[l], preferred_element_type=jnp.float32), 0.0)
        f = jnp.dot(f, w2_ref[l], preferred_element_type=jnp.float32)
        h2 = _layernorm(f + h2)                                      # add & norm

    out_ref[...] = h2.reshape(Bt, S, D_MODEL)
    # single lane-dense store for all layers: lanes ordered (layer, head, key)
    attn_ref[...] = jnp.concatenate(layer_attns, axis=-1)            # [Bt, S, 192]


def _pick_batch_tile(B):
    """Rows per step = Bt*S.  Target >=256 rows, cap Bt (VMEM on v7x), and keep
    at least 2 grid steps when possible so v7x's two TensorCores both get work."""
    if B <= 1:
        return 1
    return min(32, max(1, B // 2))


def encoder_forward(enc_inputs, params):
    # PyTorch: enc_inputs.reshape(-1, num_steps, input_size)
    B = (enc_inputs.shape[0] * enc_inputs.shape[1]) // NUM_STEPS
    x = enc_inputs.reshape(B, NUM_STEPS, INPUT_SIZE).astype(jnp.float32)
    S = NUM_STEPS

    Bt = _pick_batch_tile(B)
    grid_b = -(-B // Bt)
    Bpad = grid_b * Bt
    if Bpad != B:
        x = jnp.pad(x, ((0, Bpad - B), (0, 0), (0, 0)))

    # fused QKV weight: one matmul per layer instead of three
    wqkv = jnp.concatenate([params["wq"], params["wk"], params["wv"]], axis=-1)

    def full(shape):
        return pl.BlockSpec(shape, lambda g, _s=shape: (0,) * len(_s))

    in_specs = [
        pl.BlockSpec((Bt, S, INPUT_SIZE), lambda g: (g, 0, 0)),      # x (batch tile)
        full((S, D_MODEL)),                                          # pe
        full((1, D_MODEL)),                                          # w_emb row
        full((1, D_MODEL)),                                          # b_emb
        full((N_LAYERS, D_MODEL, 3 * D_MODEL)),                      # wqkv
        full((N_LAYERS, D_MODEL, D_MODEL)),                          # wo
        full((N_LAYERS, D_MODEL, D_FF)),                             # w1
        full((N_LAYERS, D_FF, D_MODEL)),                             # w2
    ]
    out_specs = (
        pl.BlockSpec((Bt, S, D_MODEL), lambda g: (g, 0, 0)),
        pl.BlockSpec((Bt, S, ATTN_LANES), lambda g: (g, 0, 0)),
    )
    out_shape = (
        jax.ShapeDtypeStruct((Bpad, S, D_MODEL), jnp.float32),
        jax.ShapeDtypeStruct((Bpad, S, ATTN_LANES), jnp.float32),
    )

    out, attn_flat = pl.pallas_call(
        encoder_kernel,
        out_shape=out_shape,
        grid=(grid_b,),
        in_specs=in_specs,
        out_specs=out_specs,
        compiler_params=pltpu.CompilerParams(dimension_semantics=("parallel",)),
    )(x, params["pe"], params["w_emb"], params["b_emb"],
      wqkv, params["wo"], params["w1"], params["w2"])

    out = out[:B]
    # un-flatten the lane-dense attention in the wrapper (free / XLA-side)
    attn = (attn_flat[:B]
            .reshape(B, S, N_LAYERS, N_HEADS, S)
            .transpose(2, 0, 3, 1, 4))                               # [L, B, H, S, S]
    # Mimic the PyTorch return: (enc_outputs, list of per-layer attentions)
    return out, [attn[l] for l in range(N_LAYERS)]


def encoder_reference(enc_inputs, params):
    """Pure-JAX reference for correctness checking."""
    B = (enc_inputs.shape[0] * enc_inputs.shape[1]) // NUM_STEPS
    x = enc_inputs.reshape(B, NUM_STEPS, INPUT_SIZE).astype(jnp.float32)
    h = x @ params["w_emb"] + params["b_emb"] + params["pe"]
    attns = []
    for l in range(N_LAYERS):
        q = (h @ params["wq"][l]).reshape(B, NUM_STEPS, N_HEADS, D_K).transpose(0, 2, 1, 3)
        k = (h @ params["wk"][l]).reshape(B, NUM_STEPS, N_HEADS, D_K).transpose(0, 2, 1, 3)
        v = (h @ params["wv"][l]).reshape(B, NUM_STEPS, N_HEADS, D_V).transpose(0, 2, 1, 3)
        s = jnp.einsum('bhqd,bhkd->bhqk', q, k) / math.sqrt(D_K)
        a = jax.nn.softmax(s, axis=-1)
        attns.append(a)
        ctx = jnp.einsum('bhqk,bhkd->bhqd', a, v).transpose(0, 2, 1, 3)
        ctx = ctx.reshape(B, NUM_STEPS, N_HEADS * D_V)
        h = _layernorm(ctx @ params["wo"][l] + h)
        f = jnp.maximum(h @ params["w1"][l], 0.0) @ params["w2"][l]
        h = _layernorm(f + h)
    return h, attns


def init_params(key):
    keys = jax.random.split(key, 8)

    def init(k, shape, fan_in):
        bound = 1.0 / math.sqrt(fan_in)
        return jax.random.uniform(k, shape, jnp.float32, -bound, bound)

    params = {
        "w_emb": init(keys[0], (INPUT_SIZE, D_MODEL), INPUT_SIZE),   # [in, out]
        "b_emb": init(keys[1], (1, D_MODEL), INPUT_SIZE),
        "wq": init(keys[2], (N_LAYERS, D_MODEL, D_MODEL), D_MODEL),
        "wk": init(keys[3], (N_LAYERS, D_MODEL, D_MODEL), D_MODEL),
        "wv": init(keys[4], (N_LAYERS, D_MODEL, D_MODEL), D_MODEL),
        "wo": init(keys[5], (N_LAYERS, D_MODEL, D_MODEL), N_HEADS * D_V),
        "w1": init(keys[6], (N_LAYERS, D_MODEL, D_FF), D_MODEL),
        "w2": init(keys[7], (N_LAYERS, D_FF, D_MODEL), D_FF),
    }
    # Positional encoding table (same formula as the PyTorch PositionalEncoding).
    pos = jnp.arange(NUM_STEPS, dtype=jnp.float32)[:, None]
    div = jnp.exp(jnp.arange(0, D_MODEL, 2, dtype=jnp.float32)
                  * (-math.log(10000.0) / D_MODEL))
    pe = jnp.stack([jnp.sin(pos * div), jnp.cos(pos * div)], axis=-1)
    params["pe"] = pe.reshape(NUM_STEPS, D_MODEL)
    return params


if __name__ == "__main__":
    key = jax.random.PRNGKey(0)
    pkey, xkey = jax.random.split(key)
    params = init_params(pkey)

    B = 8
    enc_inputs = jax.random.normal(xkey, (B, NUM_STEPS), dtype=jnp.float32)

    out, attns = encoder_forward(enc_inputs, params)
    out = jax.block_until_ready(out)
    attns = [jax.block_until_ready(a) for a in attns]

    ref_out, ref_attns = encoder_reference(enc_inputs, params)
    assert out.shape == (B, NUM_STEPS, D_MODEL)
    assert all(a.shape == (B, N_HEADS, NUM_STEPS, NUM_STEPS) for a in attns)
    # tolerances account for the EUP approximate-reciprocal softmax
    assert jnp.allclose(out, ref_out, atol=5e-3, rtol=5e-3)
    for a, ra in zip(attns, ref_attns):
        assert jnp.allclose(a, ra, atol=2e-3, rtol=2e-3)

    print("KERNEL_OK")
</pallas_src>

<mosaic_0001>
module attributes {stable_mosaic.version = 11 : i64} {
  func.func @encoder_kernel(%arg0: i32, %arg1: memref<4x8x1xf32, #tpu.memory_space<vmem>>, %arg2: memref<8x16xf32, #tpu.memory_space<vmem>>, %arg3: memref<1x16xf32, #tpu.memory_space<vmem>>, %arg4: memref<1x16xf32, #tpu.memory_space<vmem>>, %arg5: memref<3x16x48xf32, #tpu.memory_space<vmem>>, %arg6: memref<3x16x16xf32, #tpu.memory_space<vmem>>, %arg7: memref<3x16x128xf32, #tpu.memory_space<vmem>>, %arg8: memref<3x128x16xf32, #tpu.memory_space<vmem>>, %arg9: memref<4x8x16xf32, #tpu.memory_space<vmem>>, %arg10: memref<4x8x192xf32, #tpu.memory_space<vmem>>) attributes {dimension_semantics = [#tpu.dimension_semantics<parallel>], iteration_bounds = array<i64: 2>, scalar_prefetch = 0 : i64, scratch_operands = 0 : i64, tpu.core_type = #tpu.core_type<tc>, window_params = [{transform_indices = @transform_0, window_bounds = array<i64: 4, 8, 1>}, {pipeline_mode = #tpu.pipeline_mode<synchronous>, transform_indices = @transform_1, window_bounds = array<i64: 8, 16>}, {pipeline_mode = #tpu.pipeline_mode<synchronous>, transform_indices = @transform_2, window_bounds = array<i64: 1, 16>}, {pipeline_mode = #tpu.pipeline_mode<synchronous>, transform_indices = @transform_3, window_bounds = array<i64: 1, 16>}, {pipeline_mode = #tpu.pipeline_mode<synchronous>, transform_indices = @transform_4, window_bounds = array<i64: 3, 16, 48>}, {pipeline_mode = #tpu.pipeline_mode<synchronous>, transform_indices = @transform_5, window_bounds = array<i64: 3, 16, 16>}, {pipeline_mode = #tpu.pipeline_mode<synchronous>, transform_indices = @transform_6, window_bounds = array<i64: 3, 16, 128>}, {pipeline_mode = #tpu.pipeline_mode<synchronous>, transform_indices = @transform_7, window_bounds = array<i64: 3, 128, 16>}, {transform_indices = @transform_8, window_bounds = array<i64: 4, 8, 16>}, {transform_indices = @transform_9, window_bounds = array<i64: 4, 8, 192>}]} {
    %c0 = arith.constant 0 : index
    %c0_0 = arith.constant 0 : index
    %c0_1 = arith.constant 0 : index
    %0 = vector.load %arg1[%c0, %c0_0, %c0_1] : memref<4x8x1xf32, #tpu.memory_space<vmem>>, vector<4x8x1xf32>
    %c0_2 = arith.constant 0 : index
    %c0_3 = arith.constant 0 : index
    %1 = vector.load %arg3[%c0_2, %c0_3] : memref<1x16xf32, #tpu.memory_space<vmem>>, vector<1x16xf32>
    %2 = vector.shape_cast %1 : vector<1x16xf32> to vector<1x1x16xf32>
    %3 = vector.broadcast %0 : vector<4x8x1xf32> to vector<4x8x16xf32>
    %4 = vector.broadcast %2 : vector<1x1x16xf32> to vector<4x8x16xf32>
    %5 = arith.mulf %3, %4 : vector<4x8x16xf32>
    %c0_4 = arith.constant 0 : index
    %c0_5 = arith.constant 0 : index
    %6 = vector.load %arg4[%c0_4, %c0_5] : memref<1x16xf32, #tpu.memory_space<vmem>>, vector<1x16xf32>
    %7 = vector.shape_cast %6 : vector<1x16xf32> to vector<1x1x16xf32>
    %8 = vector.broadcast %7 : vector<1x1x16xf32> to vector<4x8x16xf32>
    %9 = arith.addf %5, %8 : vector<4x8x16xf32>
    %c0_6 = arith.constant 0 : index
    %c0_7 = arith.constant 0 : index
    %10 = vector.load %arg2[%c0_6, %c0_7] : memref<8x16xf32, #tpu.memory_space<vmem>>, vector<8x16xf32>
    %11 = vector.shape_cast %10 : vector<8x16xf32> to vector<1x8x16xf32>
    %12 = vector.broadcast %11 : vector<1x8x16xf32> to vector<4x8x16xf32>
    %13 = arith.addf %9, %12 : vector<4x8x16xf32>
    %14 = vector.shape_cast %13 : vector<4x8x16xf32> to vector<32x16xf32>
    %c0_8 = arith.constant 0 : index
    %c0_9 = arith.constant 0 : index
    %c0_10 = arith.constant 0 : index
    %15 = vector.load %arg5[%c0_8, %c0_9, %c0_10] : memref<3x16x48xf32, #tpu.memory_space<vmem>>, vector<1x16x48xf32>
    %16 = vector.shape_cast %15 : vector<1x16x48xf32> to vector<16x48xf32>
    %cst = arith.constant dense<0.000000e+00> : vector<32x48xf32>
    %17 = tpu.matmul %14, %16, %cst {dimension_numbers = #tpu.dot_dimension_numbers<[1], [0], [0], [1], [0, 0, 1, 1], [], []>} : vector<32x16xf32>, vector<16x48xf32>, vector<32x48xf32> -> vector<32x48xf32>
    %18 = vector.extract_strided_slice %17 {offsets = [0, 0], sizes = [32, 16], strides = [1, 1]} : vector<32x48xf32> to vector<32x16xf32>
    %19 = vector.shape_cast %18 : vector<32x16xf32> to vector<4x8x16xf32>
    %20 = vector.extract_strided_slice %17 {offsets = [0, 16], sizes = [32, 16], strides = [1, 1]} : vector<32x48xf32> to vector<32x16xf32>
    %21 = vector.shape_cast %20 : vector<32x16xf32> to vector<4x8x16xf32>
    %22 = vector.extract_strided_slice %17 {offsets = [0, 32], sizes = [32, 16], strides = [1, 1]} : vector<32x48xf32> to vector<32x16xf32>
    %23 = vector.shape_cast %22 : vector<32x16xf32> to vector<4x8x16xf32>
    %24 = vector.extract_strided_slice %19 {offsets = [0, 0, 0], sizes = [4, 8, 2], strides = [1, 1, 1]} : vector<4x8x16xf32> to vector<4x8x2xf32>
    %25 = vector.extract_strided_slice %21 {offsets = [0, 0, 0], sizes = [4, 8, 2], strides = [1, 1, 1]} : vector<4x8x16xf32> to vector<4x8x2xf32>
    %26 = vector.extract_strided_slice %23 {offsets = [0, 0, 0], sizes = [4, 8, 2], strides = [1, 1, 1]} : vector<4x8x16xf32> to vector<4x8x2xf32>
    "tpu.trace_start"() <{level = 10 : i32, message = "bqd,bkd->bqk"}> : () -> ()
    %cst_11 = arith.constant dense<0.000000e+00> : vector<4x8x8xf32>
    %27 = tpu.matmul %24, %25, %cst_11 {dimension_numbers = #tpu.dot_dimension_numbers<[2], [2], [1], [1], [0, 0, 0, 1, 1, 1], [0], [0]>} : vector<4x8x2xf32>, vector<4x8x2xf32>, vector<4x8x8xf32> -> vector<4x8x8xf32>
    "tpu.trace_stop"() : () -> ()
    %cst_12 = arith.constant 0.707106769 : f32
    %28 = vector.broadcast %cst_12 : f32 to vector<4x8x8xf32>
    %29 = arith.mulf %27, %28 : vector<4x8x8xf32>
    %cst_13 = arith.constant dense<0xFF800000> : vector<4x8xf32>
    %30 = vector.multi_reduction <maximumf>, %29, %cst_13 [2] : vector<4x8x8xf32> to vector<4x8xf32>
    %31 = vector.shape_cast %30 : vector<4x8xf32> to vector<4x8x1xf32>
    %32 = vector.broadcast %31 : vector<4x8x1xf32> to vector<4x8x8xf32>
    %33 = arith.subf %29, %32 : vector<4x8x8xf32>
    %34 = math.exp %33 : vector<4x8x8xf32>
    %cst_14 = arith.constant dense<0.000000e+00> : vector<4x8xf32>
    %35 = vector.multi_reduction <add>, %34, %cst_14 [2] : vector<4x8x8xf32> to vector<4x8xf32>
    %36 = vector.shape_cast %35 : vector<4x8xf32> to vector<4x8x1xf32>
    %37 = tpu.reciprocal %36 {approx = true} : vector<4x8x1xf32> -> vector<4x8x1xf32>
    %38 = vector.broadcast %37 : vector<4x8x1xf32> to vector<4x8x8xf32>
    %39 = arith.mulf %34, %38 : vector<4x8x8xf32>
    "tpu.trace_start"() <{level = 10 : i32, message = "bqk,bkd->bqd"}> : () -> ()
    %cst_15 = arith.constant dense<0.000000e+00> : vector<4x8x2xf32>
    %40 = tpu.matmul %39, %26, %cst_15 {dimension_numbers = #tpu.dot_dimension_numbers<[2], [1], [1], [2], [0, 0, 0, 1, 1, 2], [0], [0]>} : vector<4x8x8xf32>, vector<4x8x2xf32>, vector<4x8x2xf32> -> vector<4x8x2xf32>
    "tpu.trace_stop"() : () -> ()
    %41 = vector.extract_strided_slice %19 {offsets = [0, 0, 2], sizes = [4, 8, 2], strides = [1, 1, 1]} : vector<4x8x16xf32> to vector<4x8x2xf32>
    %42 = vector.extract_strided_slice %21 {offsets = [0, 0, 2], sizes = [4, 8, 2], strides = [1, 1, 1]} : vector<4x8x16xf32> to vector<4x8x2xf32>
    %43 = vector.extract_strided_slice %23 {offsets = [0, 0, 2], sizes = [4, 8, 2], strides = [1, 1, 1]} : vector<4x8x16xf32> to vector<4x8x2xf32>
    "tpu.trace_start"() <{level = 10 : i32, message = "bqd,bkd->bqk"}> : () -> ()
    %cst_16 = arith.constant dense<0.000000e+00> : vector<4x8x8xf32>
    %44 = tpu.matmul %41, %42, %cst_16 {dimension_numbers = #tpu.dot_dimension_numbers<[2], [2], [1], [1], [0, 0, 0, 1, 1, 1], [0], [0]>} : vector<4x8x2xf32>, vector<4x8x2xf32>, vector<4x8x8xf32> -> vector<4x8x8xf32>
    "tpu.trace_stop"() : () -> ()
    %cst_17 = arith.constant 0.707106769 : f32
    %45 = vector.broadcast %cst_17 : f32 to vector<4x8x8xf32>
    %46 = arith.mulf %44, %45 : vector<4x8x8xf32>
    %cst_18 = arith.constant dense<0xFF800000> : vector<4x8xf32>
    %47 = vector.multi_reduction <maximumf>, %46, %cst_18 [2] : vector<4x8x8xf32> to vector<4x8xf32>
    %48 = vector.shape_cast %47 : vector<4x8xf32> to vector<4x8x1xf32>
    %49 = vector.broadcast %48 : vector<4x8x1xf32> to vector<4x8x8xf32>
    %50 = arith.subf %46, %49 : vector<4x8x8xf32>
    %51 = math.exp %50 : vector<4x8x8xf32>
    %cst_19 = arith.constant dense<0.000000e+00> : vector<4x8xf32>
    %52 = vector.multi_reduction <add>, %51, %cst_19 [2] : vector<4x8x8xf32> to vector<4x8xf32>
    %53 = vector.shape_cast %52 : vector<4x8xf32> to vector<4x8x1xf32>
    %54 = tpu.reciprocal %53 {approx = true} : vector<4x8x1xf32> -> vector<4x8x1xf32>
    %55 = vector.broadcast %54 : vector<4x8x1xf32> to vector<4x8x8xf32>
    %56 = arith.mulf %51, %55 : vector<4x8x8xf32>
    "tpu.trace_start"() <{level = 10 : i32, message = "bqk,bkd->bqd"}> : () -> ()
    %cst_20 = arith.constant dense<0.000000e+00> : vector<4x8x2xf32>
    %57 = tpu.matmul %56, %43, %cst_20 {dimension_numbers = #tpu.dot_dimension_numbers<[2], [1], [1], [2], [0, 0, 0, 1, 1, 2], [0], [0]>} : vector<4x8x8xf32>, vector<4x8x2xf32>, vector<4x8x2xf32> -> vector<4x8x2xf32>
    "tpu.trace_stop"() : () -> ()
    %58 = vector.extract_strided_slice %19 {offsets = [0, 0, 4], sizes = [4, 8, 2], strides = [1, 1, 1]} : vector<4x8x16xf32> to vector<4x8x2xf32>
    %59 = vector.extract_strided_slice %21 {offsets = [0, 0, 4], sizes = [4, 8, 2], strides = [1, 1, 1]} : vector<4x8x16xf32> to vector<4x8x2xf32>
    %60 = vector.extract_strided_slice %23 {offsets = [0, 0, 4], sizes = [4, 8, 2], strides = [1, 1, 1]} : vector<4x8x16xf32> to vector<4x8x2xf32>
    "tpu.trace_start"() <{level = 10 : i32, message = "bqd,bkd->bqk"}> : () -> ()
    %cst_21 = arith.constant dense<0.000000e+00> : vector<4x8x8xf32>
    %61 = tpu.matmul %58, %59, %cst_21 {dimension_numbers = #tpu.dot_dimension_numbers<[2], [2], [1], [1], [0, 0, 0, 1, 1, 1], [0], [0]>} : vector<4x8x2xf32>, vector<4x8x2xf32>, vector<4x8x8xf32> -> vector<4x8x8xf32>
    "tpu.trace_stop"() : () -> ()
    %cst_22 = arith.constant 0.707106769 : f32
    %62 = vector.broadcast %cst_22 : f32 to vector<4x8x8xf32>
    %63 = arith.mulf %61, %62 : vector<4x8x8xf32>
    %cst_23 = arith.constant dense<0xFF800000> : vector<4x8xf32>
    %64 = vector.multi_reduction <maximumf>, %63, %cst_23 [2] : vector<4x8x8xf32> to vector<4x8xf32>
    %65 = vector.shape_cast %64 : vector<4x8xf32> to vector<4x8x1xf32>
    %66 = vector.broadcast %65 : vector<4x8x1xf32> to vector<4x8x8xf32>
    %67 = arith.subf %63, %66 : vector<4x8x8xf32>
    %68 = math.exp %67 : vector<4x8x8xf32>
    %cst_24 = arith.constant dense<0.000000e+00> : vector<4x8xf32>
    %69 = vector.multi_reduction <add>, %68, %cst_24 [2] : vector<4x8x8xf32> to vector<4x8xf32>
    %70 = vector.shape_cast %69 : vector<4x8xf32> to vector<4x8x1xf32>
    %71 = tpu.reciprocal %70 {approx = true} : vector<4x8x1xf32> -> vector<4x8x1xf32>
    %72 = vector.broadcast %71 : vector<4x8x1xf32> to vector<4x8x8xf32>
    %73 = arith.mulf %68, %72 : vector<4x8x8xf32>
    "tpu.trace_start"() <{level = 10 : i32, message = "bqk,bkd->bqd"}> : () -> ()
    %cst_25 = arith.constant dense<0.000000e+00> : vector<4x8x2xf32>
    %74 = tpu.matmul %73, %60, %cst_25 {dimension_numbers = #tpu.dot_dimension_numbers<[2], [1], [1], [2], [0, 0, 0, 1, 1, 2], [0], [0]>} : vector<4x8x8xf32>, vector<4x8x2xf32>, vector<4x8x2xf32> -> vector<4x8x2xf32>
    "tpu.trace_stop"() : () -> ()
    %75 = vector.extract_strided_slice %19 {offsets = [0, 0, 6], sizes = [4, 8, 2], strides = [1, 1, 1]} : vector<4x8x16xf32> to vector<4x8x2xf32>
    %76 = vector.extract_strided_slice %21 {offsets = [0, 0, 6], sizes = [4, 8, 2], strides = [1, 1, 1]} : vector<4x8x16xf32> to vector<4x8x2xf32>
    %77 = vector.extract_strided_slice %23 {offsets = [0, 0, 6], sizes = [4, 8, 2], strides = [1, 1, 1]} : vector<4x8x16xf32> to vector<4x8x2xf32>
    "tpu.trace_start"() <{level = 10 : i32, message = "bqd,bkd->bqk"}> : () -> ()
    %cst_26 = arith.constant dense<0.000000e+00> : vector<4x8x8xf32>
    %78 = tpu.matmul %75, %76, %cst_26 {dimension_numbers = #tpu.dot_dimension_numbers<[2], [2], [1], [1], [0, 0, 0, 1, 1, 1], [0], [0]>} : vector<4x8x2xf32>, vector<4x8x2xf32>, vector<4x8x8xf32> -> vector<4x8x8xf32>
    "tpu.trace_stop"() : () -> ()
    %cst_27 = arith.constant 0.707106769 : f32
    %79 = vector.broadcast %cst_27 : f32 to vector<4x8x8xf32>
    %80 = arith.mulf %78, %79 : vector<4x8x8xf32>
    %cst_28 = arith.constant dense<0xFF800000> : vector<4x8xf32>
    %81 = vector.multi_reduction <maximumf>, %80, %cst_28 [2] : vector<4x8x8xf32> to vector<4x8xf32>
    %82 = vector.shape_cast %81 : vector<4x8xf32> to vector<4x8x1xf32>
    %83 = vector.broadcast %82 : vector<4x8x1xf32> to vector<4x8x8xf32>
    %84 = arith.subf %80, %83 : vector<4x8x8xf32>
    %85 = math.exp %84 : vector<4x8x8xf32>
    %cst_29 = arith.constant dense<0.000000e+00> : vector<4x8xf32>
    %86 = vector.multi_reduction <add>, %85, %cst_29 [2] : vector<4x8x8xf32> to vector<4x8xf32>
    %87 = vector.shape_cast %86 : vector<4x8xf32> to vector<4x8x1xf32>
    %88 = tpu.reciprocal %87 {approx = true} : vector<4x8x1xf32> -> vector<4x8x1xf32>
    %89 = vector.broadcast %88 : vector<4x8x1xf32> to vector<4x8x8xf32>
    %90 = arith.mulf %85, %89 : vector<4x8x8xf32>
    "tpu.trace_start"() <{level = 10 : i32, message = "bqk,bkd->bqd"}> : () -> ()
    %cst_30 = arith.constant dense<0.000000e+00> : vector<4x8x2xf32>
    %91 = tpu.matmul %90, %77, %cst_30 {dimension_numbers = #tpu.dot_dimension_numbers<[2], [1], [1], [2], [0, 0, 0, 1, 1, 2], [0], [0]>} : vector<4x8x8xf32>, vector<4x8x2xf32>, vector<4x8x2xf32> -> vector<4x8x2xf32>
    "tpu.trace_stop"() : () -> ()
    %92 = vector.extract_strided_slice %19 {offsets = [0, 0, 8], sizes = [4, 8, 2], strides = [1, 1, 1]} : vector<4x8x16xf32> to vector<4x8x2xf32>
    %93 = vector.extract_strided_slice %21 {offsets = [0, 0, 8], sizes = [4, 8, 2], strides = [1, 1, 1]} : vector<4x8x16xf32> to vector<4x8x2xf32>
    %94 = vector.extract_strided_slice %23 {offsets = [0, 0, 8], sizes = [4, 8, 2], strides = [1, 1, 1]} : vector<4x8x16xf32> to vector<4x8x2xf32>
    "tpu.trace_start"() <{level = 10 : i32, message = "bqd,bkd->bqk"}> : () -> ()
    %cst_31 = arith.constant dense<0.000000e+00> : vector<4x8x8xf32>
    %95 = tpu.matmul %92, %93, %cst_31 {dimension_numbers = #tpu.dot_dimension_numbers<[2], [2], [1], [1], [0, 0, 0, 1, 1, 1], [0], [0]>} : vector<4x8x2xf32>, vector<4x8x2xf32>, vector<4x8x8xf32> -> vector<4x8x8xf32>
    "tpu.trace_stop"() : () -> ()
    %cst_32 = arith.constant 0.707106769 : f32
    %96 = vector.broadcast %cst_32 : f32 to vector<4x8x8xf32>
    %97 = arith.mulf %95, %96 : vector<4x8x8xf32>
    %cst_33 = arith.constant dense<0xFF800000> : vector<4x8xf32>
    %98 = vector.multi_reduction <maximumf>, %97, %cst_33 [2] : vector<4x8x8xf32> to vector<4x8xf32>
    %99 = vector.shape_cast %98 : vector<4x8xf32> to vector<4x8x1xf32>
    %100 = vector.broadcast %99 : vector<4x8x1xf32> to vector<4x8x8xf32>
    %101 = arith.subf %97, %100 : vector<4x8x8xf32>
    %102 = math.exp %101 : vector<4x8x8xf32>
    %cst_34 = arith.constant dense<0.000000e+00> : vector<4x8xf32>
    %103 = vector.multi_reduction <add>, %102, %cst_34 [2] : vector<4x8x8xf32> to vector<4x8xf32>
    %104 = vector.shape_cast %103 : vector<4x8xf32> to vector<4x8x1xf32>
    %105 = tpu.reciprocal %104 {approx = true} : vector<4x8x1xf32> -> vector<4x8x1xf32>
    %106 = vector.broadcast %105 : vector<4x8x1xf32> to vector<4x8x8xf32>
    %107 = arith.mulf %102, %106 : vector<4x8x8xf32>
    "tpu.trace_start"() <{level = 10 : i32, message = "bqk,bkd->bqd"}> : () -> ()
    %cst_35 = arith.constant dense<0.000000e+00> : vector<4x8x2xf32>
    %108 = tpu.matmul %107, %94, %cst_35 {dimension_numbers = #tpu.dot_dimension_numbers<[2], [1], [1], [2], [0, 0, 0, 1, 1, 2], [0], [0]>} : vector<4x8x8xf32>, vector<4x8x2xf32>, vector<4x8x2xf32> -> vector<4x8x2xf32>
    "tpu.trace_stop"() : () -> ()
    %109 = vector.extract_strided_slice %19 {offsets = [0, 0, 10], sizes = [4, 8, 2], strides = [1, 1, 1]} : vector<4x8x16xf32> to vector<4x8x2xf32>
    %110 = vector.extract_strided_slice %21 {offsets = [0, 0, 10], sizes = [4, 8, 2], strides = [1, 1, 1]} : vector<4x8x16xf32> to vector<4x8x2xf32>
    %111 = vector.extract_strided_slice %23 {offsets = [0, 0, 10], sizes = [4, 8, 2], strides = [1, 1, 1]} : vector<4x8x16xf32> to vector<4x8x2xf32>
    "tpu.trace_start"() <{level = 10 : i32, message = "bqd,bkd->bqk"}> : () -> ()
    %cst_36 = arith.constant dense<0.000000e+00> : vector<4x8x8xf32>
    %112 = tpu.matmul %109, %110, %cst_36 {dimension_numbers = #tpu.dot_dimension_numbers<[2], [2], [1], [1], [0, 0, 0, 1, 1, 1], [0], [0]>} : vector<4x8x2xf32>, vector<4x8x2xf32>, vector<4x8x8xf32> -> vector<4x8x8xf32>
    "tpu.trace_stop"() : () -> ()
    %cst_37 = arith.constant 0.707106769 : f32
    %113 = vector.broadcast %cst_37 : f32 to vector<4x8x8xf32>
    %114 = arith.mulf %112, %113 : vector<4x8x8xf32>
    %cst_38 = arith.constant dense<0xFF800000> : vector<4x8xf32>
    %115 = vector.multi_reduction <maximumf>, %114, %cst_38 [2] : vector<4x8x8xf32> to vector<4x8xf32>
    %116 = vector.shape_cast %115 : vector<4x8xf32> to vector<4x8x1xf32>
    %117 = vector.broadcast %116 : vector<4x8x1xf32> to vector<4x8x8xf32>
    %118 = arith.subf %114, %117 : vector<4x8x8xf32>
    %119 = math.exp %118 : vector<4x8x8xf32>
    %cst_39 = arith.constant dense<0.000000e+00> : vector<4x8xf32>
    %120 = vector.multi_reduction <add>, %119, %cst_39 [2] : vector<4x8x8xf32> to vector<4x8xf32>
    %121 = vector.shape_cast %120 : vector<4x8xf32> to vector<4x8x1xf32>
    %122 = tpu.reciprocal %121 {approx = true} : vector<4x8x1xf32> -> vector<4x8x1xf32>
    %123 = vector.broadcast %122 : vector<4x8x1xf32> to vector<4x8x8xf32>
    %124 = arith.mulf %119, %123 : vector<4x8x8xf32>
    "tpu.trace_start"() <{level = 10 : i32, message = "bqk,bkd->bqd"}> : () -> ()
    %cst_40 = arith.constant dense<0.000000e+00> : vector<4x8x2xf32>
    %125 = tpu.matmul %124, %111, %cst_40 {dimension_numbers = #tpu.dot_dimension_numbers<[2], [1], [1], [2], [0, 0, 0, 1, 1, 2], [0], [0]>} : vector<4x8x8xf32>, vector<4x8x2xf32>, vector<4x8x2xf32> -> vector<4x8x2xf32>
    "tpu.trace_stop"() : () -> ()
    %126 = vector.extract_strided_slice %19 {offsets = [0, 0, 12], sizes = [4, 8, 2], strides = [1, 1, 1]} : vector<4x8x16xf32> to vector<4x8x2xf32>
    %127 = vector.extract_strided_slice %21 {offsets = [0, 0, 12], sizes = [4, 8, 2], strides = [1, 1, 1]} : vector<4x8x16xf32> to vector<4x8x2xf32>
    %128 = vector.extract_strided_slice %23 {offsets = [0, 0, 12], sizes = [4, 8, 2], strides = [1, 1, 1]} : vector<4x8x16xf32> to vector<4x8x2xf32>
    "tpu.trace_start"() <{level = 10 : i32, message = "bqd,bkd->bqk"}> : () -> ()
    %cst_41 = arith.constant dense<0.000000e+00> : vector<4x8x8xf32>
    %129 = tpu.matmul %126, %127, %cst_41 {dimension_numbers = #tpu.dot_dimension_numbers<[2], [2], [1], [1], [0, 0, 0, 1, 1, 1], [0], [0]>} : vector<4x8x2xf32>, vector<4x8x2xf32>, vector<4x8x8xf32> -> vector<4x8x8xf32>
    "tpu.trace_stop"() : () -> ()
    %cst_42 = arith.constant 0.707106769 : f32
    %130 = vector.broadcast %cst_42 : f32 to vector<4x8x8xf32>
    %131 = arith.mulf %129, %130 : vector<4x8x8xf32>
    %cst_43 = arith.constant dense<0xFF800000> : vector<4x8xf32>
    %132 = vector.multi_reduction <maximumf>, %131, %cst_43 [2] : vector<4x8x8xf32> to vector<4x8xf32>
    %133 = vector.shape_cast %132 : vector<4x8xf32> to vector<4x8x1xf32>
    %134 = vector.broadcast %133 : vector<4x8x1xf32> to vector<4x8x8xf32>
    %135 = arith.subf %131, %134 : vector<4x8x8xf32>
    %136 = math.exp %135 : vector<4x8x8xf32>
    %cst_44 = arith.constant dense<0.000000e+00> : vector<4x8xf32>
    %137 = vector.multi_reduction <add>, %136, %cst_44 [2] : vector<4x8x8xf32> to vector<4x8xf32>
    %138 = vector.shape_cast %137 : vector<4x8xf32> to vector<4x8x1xf32>
    %139 = tpu.reciprocal %138 {approx = true} : vector<4x8x1xf32> -> vector<4x8x1xf32>
    %140 = vector.broadcast %139 : vector<4x8x1xf32> to vector<4x8x8xf32>
    %141 = arith.mulf %136, %140 : vector<4x8x8xf32>
    "tpu.trace_start"() <{level = 10 : i32, message = "bqk,bkd->bqd"}> : () -> ()
    %cst_45 = arith.constant dense<0.000000e+00> : vector<4x8x2xf32>
    %142 = tpu.matmul %141, %128, %cst_45 {dimension_numbers = #tpu.dot_dimension_numbers<[2], [1], [1], [2], [0, 0, 0, 1, 1, 2], [0], [0]>} : vector<4x8x8xf32>, vector<4x8x2xf32>, vector<4x8x2xf32> -> vector<4x8x2xf32>
    "tpu.trace_stop"() : () -> ()
    %143 = vector.extract_strided_slice %19 {offsets = [0, 0, 14], sizes = [4, 8, 2], strides = [1, 1, 1]} : vector<4x8x16xf32> to vector<4x8x2xf32>
    %144 = vector.extract_strided_slice %21 {offsets = [0, 0, 14], sizes = [4, 8, 2], strides = [1, 1, 1]} : vector<4x8x16xf32> to vector<4x8x2xf32>
    %145 = vector.extract_strided_slice %23 {offsets = [0, 0, 14], sizes = [4, 8, 2], strides = [1, 1, 1]} : vector<4x8x16xf32> to vector<4x8x2xf32>
    "tpu.trace_start"() <{level = 10 : i32, message = "bqd,bkd->bqk"}> : () -> ()
    %cst_46 = arith.constant dense<0.000000e+00> : vector<4x8x8xf32>
    %146 = tpu.matmul %143, %144, %cst_46 {dimension_numbers = #tpu.dot_dimension_numbers<[2], [2], [1], [1], [0, 0, 0, 1, 1, 1], [0], [0]>} : vector<4x8x2xf32>, vector<4x8x2xf32>, vector<4x8x8xf32> -> vector<4x8x8xf32>
    "tpu.trace_stop"() : () -> ()
    %cst_47 = arith.constant 0.707106769 : f32
    %147 = vector.broadcast %cst_47 : f32 to vector<4x8x8xf32>
    %148 = arith.mulf %146, %147 : vector<4x8x8xf32>
    %cst_48 = arith.constant dense<0xFF800000> : vector<4x8xf32>
    %149 = vector.multi_reduction <maximumf>, %148, %cst_48 [2] : vector<4x8x8xf32> to vector<4x8xf32>
    %150 = vector.shape_cast %149 : vector<4x8xf32> to vector<4x8x1xf32>
    %151 = vector.broadcast %150 : vector<4x8x1xf32> to vector<4x8x8xf32>
    %152 = arith.subf %148, %151 : vector<4x8x8xf32>
    %153 = math.exp %152 : vector<4x8x8xf32>
    %cst_49 = arith.constant dense<0.000000e+00> : vector<4x8xf32>
    %154 = vector.multi_reduction <add>, %153, %cst_49 [2] : vector<4x8x8xf32> to vector<4x8xf32>
    %155 = vector.shape_cast %154 : vector<4x8xf32> to vector<4x8x1xf32>
    %156 = tpu.reciprocal %155 {approx = true} : vector<4x8x1xf32> -> vector<4x8x1xf32>
    %157 = vector.broadcast %156 : vector<4x8x1xf32> to vector<4x8x8xf32>
    %158 = arith.mulf %153, %157 : vector<4x8x8xf32>
    "tpu.trace_start"() <{level = 10 : i32, message = "bqk,bkd->bqd"}> : () -> ()
    %cst_50 = arith.constant dense<0.000000e+00> : vector<4x8x2xf32>
    %159 = tpu.matmul %158, %145, %cst_50 {dimension_numbers = #tpu.dot_dimension_numbers<[2], [1], [1], [2], [0, 0, 0, 1, 1, 2], [0], [0]>} : vector<4x8x8xf32>, vector<4x8x2xf32>, vector<4x8x2xf32> -> vector<4x8x2xf32>
    "tpu.trace_stop"() : () -> ()
    %160 = tpu.concatenate %39, %56, %73, %90, %107, %124, %141, %158 in 2 : vector<4x8x8xf32>, vector<4x8x8xf32>, vector<4x8x8xf32>, vector<4x8x8xf32>, vector<4x8x8xf32>, vector<4x8x8xf32>, vector<4x8x8xf32>, vector<4x8x8xf32> -> vector<4x8x64xf32>
    %161 = tpu.concatenate %40, %57, %74, %91, %108, %125, %142, %159 in 2 : vector<4x8x2xf32>, vector<4x8x2xf32>, vector<4x8x2xf32>, vector<4x8x2xf32>, vector<4x8x2xf32>, vector<4x8x2xf32>, vector<4x8x2xf32>, vector<4x8x2xf32> -> vector<4x8x16xf32>
    %162 = vector.shape_cast %161 : vector<4x8x16xf32> to vector<32x16xf32>
    %c0_51 = arith.constant 0 : index
    %c0_52 = arith.constant 0 : index
    %c0_53 = arith.constant 0 : index
    %163 = vector.load %arg6[%c0_51, %c0_52, %c0_53] : memref<3x16x16xf32, #tpu.memory_space<vmem>>, vector<1x16x16xf32>
    %164 = vector.shape_cast %163 : vector<1x16x16xf32> to vector<16x16xf32>
    %cst_54 = arith.constant dense<0.000000e+00> : vector<32x16xf32>
    %165 = tpu.matmul %162, %164, %cst_54 {dimension_numbers = #tpu.dot_dimension_numbers<[1], [0], [0], [1], [0, 0, 1, 1], [], []>} : vector<32x16xf32>, vector<16x16xf32>, vector<32x16xf32> -> vector<32x16xf32>
    %166 = arith.addf %165, %14 : vector<32x16xf32>
    %cst_55 = arith.constant dense<0.000000e+00> : vector<32xf32>
    %167 = vector.multi_reduction <add>, %166, %cst_55 [1] : vector<32x16xf32> to vector<32xf32>
    %168 = vector.shape_cast %167 : vector<32xf32> to vector<32x1xf32>
    %cst_56 = arith.constant 1.600000e+01 : f32
    %169 = vector.broadcast %cst_56 : f32 to vector<32x1xf32>
    %170 = arith.divf %168, %169 : vector<32x1xf32>
    %171 = vector.broadcast %170 : vector<32x1xf32> to vector<32x16xf32>
    %172 = arith.subf %166, %171 : vector<32x16xf32>
    %173 = arith.mulf %172, %172 : vector<32x16xf32>
    %cst_57 = arith.constant dense<0.000000e+00> : vector<32xf32>
    %174 = vector.multi_reduction <add>, %173, %cst_57 [1] : vector<32x16xf32> to vector<32xf32>
    %175 = vector.shape_cast %174 : vector<32xf32> to vector<32x1xf32>
    %cst_58 = arith.constant 1.600000e+01 : f32
    %176 = vector.broadcast %cst_58 : f32 to vector<32x1xf32>
    %177 = arith.divf %175, %176 : vector<32x1xf32>
    %178 = vector.broadcast %170 : vector<32x1xf32> to vector<32x16xf32>
    %179 = arith.subf %166, %178 : vector<32x16xf32>
    %cst_59 = arith.constant 9.99999974E-6 : f32
    %180 = vector.broadcast %cst_59 : f32 to vector<32x1xf32>
    %181 = arith.addf %177, %180 : vector<32x1xf32>
    %182 = math.rsqrt %181 : vector<32x1xf32>
    %183 = vector.broadcast %182 : vector<32x1xf32> to vector<32x16xf32>
    %184 = arith.mulf %179, %183 : vector<32x16xf32>
    %c0_60 = arith.constant 0 : index
    %c0_61 = arith.constant 0 : index
    %c0_62 = arith.constant 0 : index
    %185 = vector.load %arg7[%c0_60, %c0_61, %c0_62] : memref<3x16x128xf32, #tpu.memory_space<vmem>>, vector<1x16x128xf32>
    %186 = vector.shape_cast %185 : vector<1x16x128xf32> to vector<16x128xf32>
    %cst_63 = arith.constant dense<0.000000e+00> : vector<32x128xf32>
    %187 = tpu.matmul %184, %186, %cst_63 {dimension_numbers = #tpu.dot_dimension_numbers<[1], [0], [0], [1], [0, 0, 1, 1], [], []>} : vector<32x16xf32>, vector<16x128xf32>, vector<32x128xf32> -> vector<32x128xf32>
    %cst_64 = arith.constant 0.000000e+00 : f32
    %188 = vector.broadcast %cst_64 : f32 to vector<32x128xf32>
    %189 = arith.maximumf %187, %188 : vector<32x128xf32>
    %c0_65 = arith.constant 0 : index
    %c0_66 = arith.constant 0 : index
    %c0_67 = arith.constant 0 : index
    %190 = vector.load %arg8[%c0_65, %c0_66, %c0_67] : memref<3x128x16xf32, #tpu.memory_space<vmem>>, vector<1x128x16xf32>
    %191 = vector.shape_cast %190 : vector<1x128x16xf32> to vector<128x16xf32>
    %cst_68 = arith.constant dense<0.000000e+00> : vector<32x16xf32>
    %192 = tpu.matmul %189, %191, %cst_68 {dimension_numbers = #tpu.dot_dimension_numbers<[1], [0], [0], [1], [0, 0, 1, 1], [], []>} : vector<32x128xf32>, vector<128x16xf32>, vector<32x16xf32> -> vector<32x16xf32>
    %193 = arith.addf %192, %184 : vector<32x16xf32>
    %cst_69 = arith.constant dense<0.000000e+00> : vector<32xf32>
    %194 = vector.multi_reduction <add>, %193, %cst_69 [1] : vector<32x16xf32> to vector<32xf32>
    %195 = vector.shape_cast %194 : vector<32xf32> to vector<32x1xf32>
    %cst_70 = arith.constant 1.600000e+01 : f32
    %196 = vector.broadcast %cst_70 : f32 to vector<32x1xf32>
    %197 = arith.divf %195, %196 : vector<32x1xf32>
    %198 = vector.broadcast %197 : vector<32x1xf32> to vector<32x16xf32>
    %199 = arith.subf %193, %198 : vector<32x16xf32>
    %200 = arith.mulf %199, %199 : vector<32x16xf32>
    %cst_71 = arith.constant dense<0.000000e+00> : vector<32xf32>
    %201 = vector.multi_reduction <add>, %200, %cst_71 [1] : vector<32x16xf32> to vector<32xf32>
    %202 = vector.shape_cast %201 : vector<32xf32> to vector<32x1xf32>
    %cst_72 = arith.constant 1.600000e+01 : f32
    %203 = vector.broadcast %cst_72 : f32 to vector<32x1xf32>
    %204 = arith.divf %202, %203 : vector<32x1xf32>
    %205 = vector.broadcast %197 : vector<32x1xf32> to vector<32x16xf32>
    %206 = arith.subf %193, %205 : vector<32x16xf32>
    %cst_73 = arith.constant 9.99999974E-6 : f32
    %207 = vector.broadcast %cst_73 : f32 to vector<32x1xf32>
    %208 = arith.addf %204, %207 : vector<32x1xf32>
    %209 = math.rsqrt %208 : vector<32x1xf32>
    %210 = vector.broadcast %209 : vector<32x1xf32> to vector<32x16xf32>
    %211 = arith.mulf %206, %210 : vector<32x16xf32>
    %c1 = arith.constant 1 : index
    %c0_74 = arith.constant 0 : index
    %c0_75 = arith.constant 0 : index
    %212 = vector.load %arg5[%c1, %c0_74, %c0_75] : memref<3x16x48xf32, #tpu.memory_space<vmem>>, vector<1x16x48xf32>
    %213 = vector.shape_cast %212 : vector<1x16x48xf32> to vector<16x48xf32>
    %cst_76 = arith.constant dense<0.000000e+00> : vector<32x48xf32>
    %214 = tpu.matmul %211, %213, %cst_76 {dimension_numbers = #tpu.dot_dimension_numbers<[1], [0], [0], [1], [0, 0, 1, 1], [], []>} : vector<32x16xf32>, vector<16x48xf32>, vector<32x48xf32> -> vector<32x48xf32>
    %215 = vector.extract_strided_slice %214 {offsets = [0, 0], sizes = [32, 16], strides = [1, 1]} : vector<32x48xf32> to vector<32x16xf32>
    %216 = vector.shape_cast %215 : vector<32x16xf32> to vector<4x8x16xf32>
    %217 = vector.extract_strided_slice %214 {offsets = [0, 16], sizes = [32, 16], strides = [1, 1]} : vector<32x48xf32> to vector<32x16xf32>
    %218 = vector.shape_cast %217 : vector<32x16xf32> to vector<4x8x16xf32>
    %219 = vector.extract_strided_slice %214 {offsets = [0, 32], sizes = [32, 16], strides = [1, 1]} : vector<32x48xf32> to vector<32x16xf32>
    %220 = vector.shape_cast %219 : vector<32x16xf32> to vector<4x8x16xf32>
    %221 = vector.extract_strided_slice %216 {offsets = [0, 0, 0], sizes = [4, 8, 2], strides = [1, 1, 1]} : vector<4x8x16xf32> to vector<4x8x2xf32>
    %222 = vector.extract_strided_slice %218 {offsets = [0, 0, 0], sizes = [4, 8, 2], strides = [1, 1, 1]} : vector<4x8x16xf32> to vector<4x8x2xf32>
    %223 = vector.extract_strided_slice %220 {offsets = [0, 0, 0], sizes = [4, 8, 2], strides = [1, 1, 1]} : vector<4x8x16xf32> to vector<4x8x2xf32>
    "tpu.trace_start"() <{level = 10 : i32, message = "bqd,bkd->bqk"}> : () -> ()
    %cst_77 = arith.constant dense<0.000000e+00> : vector<4x8x8xf32>
    %224 = tpu.matmul %221, %222, %cst_77 {dimension_numbers = #tpu.dot_dimension_numbers<[2], [2], [1], [1], [0, 0, 0, 1, 1, 1], [0], [0]>} : vector<4x8x2xf32>, vector<4x8x2xf32>, vector<4x8x8xf32> -> vector<4x8x8xf32>
    "tpu.trace_stop"() : () -> ()
    %cst_78 = arith.constant 0.707106769 : f32
    %225 = vector.broadcast %cst_78 : f32 to vector<4x8x8xf32>
    %226 = arith.mulf %224, %225 : vector<4x8x8xf32>
    %cst_79 = arith.constant dense<0xFF800000> : vector<4x8xf32>
    %227 = vector.multi_reduction <maximumf>, %226, %cst_79 [2] : vector<4x8x8xf32> to vector<4x8xf32>
    %228 = vector.shape_cast %227 : vector<4x8xf32> to vector<4x8x1xf32>
    %229 = vector.broadcast %228 : vector<4x8x1xf32> to vector<4x8x8xf32>
    %230 = arith.subf %226, %229 : vector<4x8x8xf32>
    %231 = math.exp %230 : vector<4x8x8xf32>
    %cst_80 = arith.constant dense<0.000000e+00> : vector<4x8xf32>
    %232 = vector.multi_reduction <add>, %231, %cst_80 [2] : vector<4x8x8xf32> to vector<4x8xf32>
    %233 = vector.shape_cast %232 : vector<4x8xf32> to vector<4x8x1xf32>
    %234 = tpu.reciprocal %233 {approx = true} : vector<4x8x1xf32> -> vector<4x8x1xf32>
    %235 = vector.broadcast %234 : vector<4x8x1xf32> to vector<4x8x8xf32>
    %236 = arith.mulf %231, %235 : vector<4x8x8xf32>
    "tpu.trace_start"() <{level = 10 : i32, message = "bqk,bkd->bqd"}> : () -> ()
    %cst_81 = arith.constant dense<0.000000e+00> : vector<4x8x2xf32>
    %237 = tpu.matmul %236, %223, %cst_81 {dimension_numbers = #tpu.dot_dimension_numbers<[2], [1], [1], [2], [0, 0, 0, 1, 1, 2], [0], [0]>} : vector<4x8x8xf32>, vector<4x8x2xf32>, vector<4x8x2xf32> -> vector<4x8x2xf32>
    "tpu.trace_stop"() : () -> ()
    %238 = vector.extract_strided_slice %216 {offsets = [0, 0, 2], sizes = [4, 8, 2], strides = [1, 1, 1]} : vector<4x8x16xf32> to vector<4x8x2xf32>
    %239 = vector.extract_strided_slice %218 {offsets = [0, 0, 2], sizes = [4, 8, 2], strides = [1, 1, 1]} : vector<4x8x16xf32> to vector<4x8x2xf32>
    %240 = vector.extract_strided_slice %220 {offsets = [0, 0, 2], sizes = [4, 8, 2], strides = [1, 1, 1]} : vector<4x8x16xf32> to vector<4x8x2xf32>
    "tpu.trace_start"() <{level = 10 : i32, message = "bqd,bkd->bqk"}> : () -> ()
    %cst_82 = arith.constant dense<0.000000e+00> : vector<4x8x8xf32>
    %241 = tpu.matmul %238, %239, %cst_82 {dimension_numbers = #tpu.dot_dimension_numbers<[2], [2], [1], [1], [0, 0, 0, 1, 1, 1], [0], [0]>} : vector<4x8x2xf32>, vector<4x8x2xf32>, vector<4x8x8xf32> -> vector<4x8x8xf32>
    "tpu.trace_stop"() : () -> ()
    %cst_83 = arith.constant 0.707106769 : f32
    %242 = vector.broadcast %cst_83 : f32 to vector<4x8x8xf32>
    %243 = arith.mulf %241, %242 : vector<4x8x8xf32>
    %cst_84 = arith.constant dense<0xFF800000> : vector<4x8xf32>
    %244 = vector.multi_reduction <maximumf>, %243, %cst_84 [2] : vector<4x8x8xf32> to vector<4x8xf32>
    %245 = vector.shape_cast %244 : vector<4x8xf32> to vector<4x8x1xf32>
    %246 = vector.broadcast %245 : vector<4x8x1xf32> to vector<4x8x8xf32>
    %247 = arith.subf %243, %246 : vector<4x8x8xf32>
    %248 = math.exp %247 : vector<4x8x8xf32>
    %cst_85 = arith.constant dense<0.000000e+00> : vector<4x8xf32>
    %249 = vector.multi_reduction <add>, %248, %cst_85 [2] : vector<4x8x8xf32> to vector<4x8xf32>
    %250 = vector.shape_cast %249 : vector<4x8xf32> to vector<4x8x1xf32>
    %251 = tpu.reciprocal %250 {approx = true} : vector<4x8x1xf32> -> vector<4x8x1xf32>
    %252 = vector.broadcast %251 : vector<4x8x1xf32> to vector<4x8x8xf32>
    %253 = arith.mulf %248, %252 : vector<4x8x8xf32>
    "tpu.trace_start"() <{level = 10 : i32, message = "bqk,bkd->bqd"}> : () -> ()
    %cst_86 = arith.constant dense<0.000000e+00> : vector<4x8x2xf32>
    %254 = tpu.matmul %253, %240, %cst_86 {dimension_numbers = #tpu.dot_dimension_numbers<[2], [1], [1], [2], [0, 0, 0, 1, 1, 2], [0], [0]>} : vector<4x8x8xf32>, vector<4x8x2xf32>, vector<4x8x2xf32> -> vector<4x8x2xf32>
    "tpu.trace_stop"() : () -> ()
    %255 = vector.extract_strided_slice %216 {offsets = [0, 0, 4], sizes = [4, 8, 2], strides = [1, 1, 1]} : vector<4x8x16xf32> to vector<4x8x2xf32>
    %256 = vector.extract_strided_slice %218 {offsets = [0, 0, 4], sizes = [4, 8, 2], strides = [1, 1, 1]} : vector<4x8x16xf32> to vector<4x8x2xf32>
    %257 = vector.extract_strided_slice %220 {offsets = [0, 0, 4], sizes = [4, 8, 2], strides = [1, 1, 1]} : vector<4x8x16xf32> to vector<4x8x2xf32>
    "tpu.trace_start"() <{level = 10 : i32, message = "bqd,bkd->bqk"}> : () -> ()
    %cst_87 = arith.constant dense<0.000000e+00> : vector<4x8x8xf32>
    %258 = tpu.matmul %255, %256, %cst_87 {dimension_numbers = #tpu.dot_dimension_numbers<[2], [2], [1], [1], [0, 0, 0, 1, 1, 1], [0], [0]>} : vector<4x8x2xf32>, vector<4x8x2xf32>, vector<4x8x8xf32> -> vector<4x8x8xf32>
    "tpu.trace_stop"() : () -> ()
    %cst_88 = arith.constant 0.707106769 : f32
    %259 = vector.broadcast %cst_88 : f32 to vector<4x8x8xf32>
    %260 = arith.mulf %258, %259 : vector<4x8x8xf32>
    %cst_89 = arith.constant dense<0xFF800000> : vector<4x8xf32>
    %261 = vector.multi_reduction <maximumf>, %260, %cst_89 [2] : vector<4x8x8xf32> to vector<4x8xf32>
    %262 = vector.shape_cast %261 : vector<4x8xf32> to vector<4x8x1xf32>
    %263 = vector.broadcast %262 : vector<4x8x1xf32> to vector<4x8x8xf32>
    %264 = arith.subf %260, %263 : vector<4x8x8xf32>
    %265 = math.exp %264 : vector<4x8x8xf32>
    %cst_90 = arith.constant dense<0.000000e+00> : vector<4x8xf32>
    %266 = vector.multi_reduction <add>, %265, %cst_90 [2] : vector<4x8x8xf32> to vector<4x8xf32>
    %267 = vector.shape_cast %266 : vector<4x8xf32> to vector<4x8x1xf32>
    %268 = tpu.reciprocal %267 {approx = true} : vector<4x8x1xf32> -> vector<4x8x1xf32>
    %269 = vector.broadcast %268 : vector<4x8x1xf32> to vector<4x8x8xf32>
    %270 = arith.mulf %265, %269 : vector<4x8x8xf32>
    "tpu.trace_start"() <{level = 10 : i32, message = "bqk,bkd->bqd"}> : () -> ()
    %cst_91 = arith.constant dense<0.000000e+00> : vector<4x8x2xf32>
    %271 = tpu.matmul %270, %257, %cst_91 {dimension_numbers = #tpu.dot_dimension_numbers<[2], [1], [1], [2], [0, 0, 0, 1, 1, 2], [0], [0]>} : vector<4x8x8xf32>, vector<4x8x2xf32>, vector<4x8x2xf32> -> vector<4x8x2xf32>
    "tpu.trace_stop"() : () -> ()
    %272 = vector.extract_strided_slice %216 {offsets = [0, 0, 6], sizes = [4, 8, 2], strides = [1, 1, 1]} : vector<4x8x16xf32> to vector<4x8x2xf32>
    %273 = vector.extract_strided_slice %218 {offsets = [0, 0, 6], sizes = [4, 8, 2], strides = [1, 1, 1]} : vector<4x8x16xf32> to vector<4x8x2xf32>
    %274 = vector.extract_strided_slice %220 {offsets = [0, 0, 6], sizes = [4, 8, 2], strides = [1, 1, 1]} : vector<4x8x16xf32> to vector<4x8x2xf32>
    "tpu.trace_start"() <{level = 10 : i32, message = "bqd,bkd->bqk"}> : () -> ()
    %cst_92 = arith.constant dense<0.000000e+00> : vector<4x8x8xf32>
    %275 = tpu.matmul %272, %273, %cst_92 {dimension_numbers = #tpu.dot_dimension_numbers<[2], [2], [1], [1], [0, 0, 0, 1, 1, 1], [0], [0]>} : vector<4x8x2xf32>, vector<4x8x2xf32>, vector<4x8x8xf32> -> vector<4x8x8xf32>
    "tpu.trace_stop"() : () -> ()
    %cst_93 = arith.constant 0.707106769 : f32
    %276 = vector.broadcast %cst_93 : f32 to vector<4x8x8xf32>
    %277 = arith.mulf %275, %276 : vector<4x8x8xf32>
    %cst_94 = arith.constant dense<0xFF800000> : vector<4x8xf32>
    %278 = vector.multi_reduction <maximumf>, %277, %cst_94 [2] : vector<4x8x8xf32> to vector<4x8xf32>
    %279 = vector.shape_cast %278 : vector<4x8xf32> to vector<4x8x1xf32>
    %280 = vector.broadcast %279 : vector<4x8x1xf32> to vector<4x8x8xf32>
    %281 = arith.subf %277, %280 : vector<4x8x8xf32>
    %282 = math.exp %281 : vector<4x8x8xf32>
    %cst_95 = arith.constant dense<0.000000e+00> : vector<4x8xf32>
    %283 = vector.multi_reduction <add>, %282, %cst_95 [2] : vector<4x8x8xf32> to vector<4x8xf32>
    %284 = vector.shape_cast %283 : vector<4x8xf32> to vector<4x8x1xf32>
    %285 = tpu.reciprocal %284 {approx = true} : vector<4x8x1xf32> -> vector<4x8x1xf32>
    %286 = vector.broadcast %285 : vector<4x8x1xf32> to vector<4x8x8xf32>
    %287 = arith.mulf %282, %286 : vector<4x8x8xf32>
    "tpu.trace_start"() <{level = 10 : i32, message = "bqk,bkd->bqd"}> : () -> ()
    %cst_96 = arith.constant dense<0.000000e+00> : vector<4x8x2xf32>
    %288 = tpu.matmul %287, %274, %cst_96 {dimension_numbers = #tpu.dot_dimension_numbers<[2], [1], [1], [2], [0, 0, 0, 1, 1, 2], [0], [0]>} : vector<4x8x8xf32>, vector<4x8x2xf32>, vector<4x8x2xf32> -> vector<4x8x2xf32>
    "tpu.trace_stop"() : () -> ()
    %289 = vector.extract_strided_slice %216 {offsets = [0, 0, 8], sizes = [4, 8, 2], strides = [1, 1, 1]} : vector<4x8x16xf32> to vector<4x8x2xf32>
    %290 = vector.extract_strided_slice %218 {offsets = [0, 0, 8], sizes = [4, 8, 2], strides = [1, 1, 1]} : vector<4x8x16xf32> to vector<4x8x2xf32>
    %291 = vector.extract_strided_slice %220 {offsets = [0, 0, 8], sizes = [4, 8, 2], strides = [1, 1, 1]} : vector<4x8x16xf32> to vector<4x8x2xf32>
    "tpu.trace_start"() <{level = 10 : i32, message = "bqd,bkd->bqk"}> : () -> ()
    %cst_97 = arith.constant dense<0.000000e+00> : vector<4x8x8xf32>
    %292 = tpu.matmul %289, %290, %cst_97 {dimension_numbers = #tpu.dot_dimension_numbers<[2], [2], [1], [1], [0, 0, 0, 1, 1, 1], [0], [0]>} : vector<4x8x2xf32>, vector<4x8x2xf32>, vector<4x8x8xf32> -> vector<4x8x8xf32>
    "tpu.trace_stop"() : () -> ()
    %cst_98 = arith.constant 0.707106769 : f32
    %293 = vector.broadcast %cst_98 : f32 to vector<4x8x8xf32>
    %294 = arith.mulf %292, %293 : vector<4x8x8xf32>
    %cst_99 = arith.constant dense<0xFF800000> : vector<4x8xf32>
    %295 = vector.multi_reduction <maximumf>, %294, %cst_99 [2] : vector<4x8x8xf32> to vector<4x8xf32>
    %296 = vector.shape_cast %295 : vector<4x8xf32> to vector<4x8x1xf32>
    %297 = vector.broadcast %296 : vector<4x8x1xf32> to vector<4x8x8xf32>
    %298 = arith.subf %294, %297 : vector<4x8x8xf32>
    %299 = math.exp %298 : vector<4x8x8xf32>
    %cst_100 = arith.constant dense<0.000000e+00> : vector<4x8xf32>
    %300 = vector.multi_reduction <add>, %299, %cst_100 [2] : vector<4x8x8xf32> to vector<4x8xf32>
    %301 = vector.shape_cast %300 : vector<4x8xf32> to vector<4x8x1xf32>
    %302 = tpu.reciprocal %301 {approx = true} : vector<4x8x1xf32> -> vector<4x8x1xf32>
    %303 = vector.broadcast %302 : vector<4x8x1xf32> to vector<4x8x8xf32>
    %304 = arith.mulf %299, %303 : vector<4x8x8xf32>
    "tpu.trace_start"() <{level = 10 : i32, message = "bqk,bkd->bqd"}> : () -> ()
    %cst_101 = arith.constant dense<0.000000e+00> : vector<4x8x2xf32>
    %305 = tpu.matmul %304, %291, %cst_101 {dimension_numbers = #tpu.dot_dimension_numbers<[2], [1], [1], [2], [0, 0, 0, 1, 1, 2], [0], [0]>} : vector<4x8x8xf32>, vector<4x8x2xf32>, vector<4x8x2xf32> -> vector<4x8x2xf32>
    "tpu.trace_stop"() : () -> ()
    %306 = vector.extract_strided_slice %216 {offsets = [0, 0, 10], sizes = [4, 8, 2], strides = [1, 1, 1]} : vector<4x8x16xf32> to vector<4x8x2xf32>
    %307 = vector.extract_strided_slice %218 {offsets = [0, 0, 10], sizes = [4, 8, 2], strides = [1, 1, 1]} : vector<4x8x16xf32> to vector<4x8x2xf32>
    %308 = vector.extract_strided_slice %220 {offsets = [0, 0, 10], sizes = [4, 8, 2], strides = [1, 1, 1]} : vector<4x8x16xf32> to vector<4x8x2xf32>
    "tpu.trace_start"() <{level = 10 : i32, message = "bqd,bkd->bqk"}> : () -> ()
    %cst_102 = arith.constant dense<0.000000e+00> : vector<4x8x8xf32>
    %309 = tpu.matmul %306, %307, %cst_102 {dimension_numbers = #tpu.dot_dimension_numbers<[2], [2], [1], [1], [0, 0, 0, 1, 1, 1], [0], [0]>} : vector<4x8x2xf32>, vector<4x8x2xf32>, vector<4x8x8xf32> -> vector<4x8x8xf32>
    "tpu.trace_stop"() : () -> ()
    %cst_103 = arith.constant 0.707106769 : f32
    %310 = vector.broadcast %cst_103 : f32 to vector<4x8x8xf32>
    %311 = arith.mulf %309, %310 : vector<4x8x8xf32>
    %cst_104 = arith.constant dense<0xFF800000> : vector<4x8xf32>
    %312 = vector.multi_reduction <maximumf>, %311, %cst_104 [2] : vector<4x8x8xf32> to vector<4x8xf32>
    %313 = vector.shape_cast %312 : vector<4x8xf32> to vector<4x8x1xf32>
    %314 = vector.broadcast %313 : vector<4x8x1xf32> to vector<4x8x8xf32>
    %315 = arith.subf %311, %314 : vector<4x8x8xf32>
    %316 = math.exp %315 : vector<4x8x8xf32>
    %cst_105 = arith.constant dense<0.000000e+00> : vector<4x8xf32>
    %317 = vector.multi_reduction <add>, %316, %cst_105 [2] : vector<4x8x8xf32> to vector<4x8xf32>
    %318 = vector.shape_cast %317 : vector<4x8xf32> to vector<4x8x1xf32>
    %319 = tpu.reciprocal %318 {approx = true} : vector<4x8x1xf32> -> vector<4x8x1xf32>
    %320 = vector.broadcast %319 : vector<4x8x1xf32> to vector<4x8x8xf32>
    %321 = arith.mulf %316, %320 : vector<4x8x8xf32>
    "tpu.trace_start"() <{level = 10 : i32, message = "bqk,bkd->bqd"}> : () -> ()
    %cst_106 = arith.constant dense<0.000000e+00> : vector<4x8x2xf32>
    %322 = tpu.matmul %321, %308, %cst_106 {dimension_numbers = #tpu.dot_dimension_numbers<[2], [1], [1], [2], [0, 0, 0, 1, 1, 2], [0], [0]>} : vector<4x8x8xf32>, vector<4x8x2xf32>, vector<4x8x2xf32> -> vector<4x8x2xf32>
    "tpu.trace_stop"() : () -> ()
    %323 = vector.extract_strided_slice %216 {offsets = [0, 0, 12], sizes = [4, 8, 2], strides = [1, 1, 1]} : vector<4x8x16xf32> to vector<4x8x2xf32>
    %324 = vector.extract_strided_slice %218 {offsets = [0, 0, 12], sizes = [4, 8, 2], strides = [1, 1, 1]} : vector<4x8x16xf32> to vector<4x8x2xf32>
    %325 = vector.extract_strided_slice %220 {offsets = [0, 0, 12], sizes = [4, 8, 2], strides = [1, 1, 1]} : vector<4x8x16xf32> to vector<4x8x2xf32>
    "tpu.trace_start"() <{level = 10 : i32, message = "bqd,bkd->bqk"}> : () -> ()
    %cst_107 = arith.constant dense<0.000000e+00> : vector<4x8x8xf32>
    %326 = tpu.matmul %323, %324, %cst_107 {dimension_numbers = #tpu.dot_dimension_numbers<[2], [2], [1], [1], [0, 0, 0, 1, 1, 1], [0], [0]>} : vector<4x8x2xf32>, vector<4x8x2xf32>, vector<4x8x8xf32> -> vector<4x8x8xf32>
    "tpu.trace_stop"() : () -> ()
    %cst_108 = arith.constant 0.707106769 : f32
    %327 = vector.broadcast %cst_108 : f32 to vector<4x8x8xf32>
    %328 = arith.mulf %326, %327 : vector<4x8x8xf32>
    %cst_109 = arith.constant dense<0xFF800000> : vector<4x8xf32>
    %329 = vector.multi_reduction <maximumf>, %328, %cst_109 [2] : vector<4x8x8xf32> to vector<4x8xf32>
    %330 = vector.shape_cast %329 : vector<4x8xf32> to vector<4x8x1xf32>
    %331 = vector.broadcast %330 : vector<4x8x1xf32> to vector<4x8x8xf32>
    %332 = arith.subf %328, %331 : vector<4x8x8xf32>
    %333 = math.exp %332 : vector<4x8x8xf32>
    %cst_110 = arith.constant dense<0.000000e+00> : vector<4x8xf32>
    %334 = vector.multi_reduction <add>, %333, %cst_110 [2] : vector<4x8x8xf32> to vector<4x8xf32>
    %335 = vector.shape_cast %334 : vector<4x8xf32> to vector<4x8x1xf32>
    %336 = tpu.reciprocal %335 {approx = true} : vector<4x8x1xf32> -> vector<4x8x1xf32>
    %337 = vector.broadcast %336 : vector<4x8x1xf32> to vector<4x8x8xf32>
    %338 = arith.mulf %333, %337 : vector<4x8x8xf32>
    "tpu.trace_start"() <{level = 10 : i32, message = "bqk,bkd->bqd"}> : () -> ()
    %cst_111 = arith.constant dense<0.000000e+00> : vector<4x8x2xf32>
    %339 = tpu.matmul %338, %325, %cst_111 {dimension_numbers = #tpu.dot_dimension_numbers<[2], [1], [1], [2], [0, 0, 0, 1, 1, 2], [0], [0]>} : vector<4x8x8xf32>, vector<4x8x2xf32>, vector<4x8x2xf32> -> vector<4x8x2xf32>
    "tpu.trace_stop"() : () -> ()
    %340 = vector.extract_strided_slice %216 {offsets = [0, 0, 14], sizes = [4, 8, 2], strides = [1, 1, 1]} : vector<4x8x16xf32> to vector<4x8x2xf32>
    %341 = vector.extract_strided_slice %218 {offsets = [0, 0, 14], sizes = [4, 8, 2], strides = [1, 1, 1]} : vector<4x8x16xf32> to vector<4x8x2xf32>
    %342 = vector.extract_strided_slice %220 {offsets = [0, 0, 14], sizes = [4, 8, 2], strides = [1, 1, 1]} : vector<4x8x16xf32> to vector<4x8x2xf32>
    "tpu.trace_start"() <{level = 10 : i32, message = "bqd,bkd->bqk"}> : () -> ()
    %cst_112 = arith.constant dense<0.000000e+00> : vector<4x8x8xf32>
    %343 = tpu.matmul %340, %341, %cst_112 {dimension_numbers = #tpu.dot_dimension_numbers<[2], [2], [1], [1], [0, 0, 0, 1, 1, 1], [0], [0]>} : vector<4x8x2xf32>, vector<4x8x2xf32>, vector<4x8x8xf32> -> vector<4x8x8xf32>
    "tpu.trace_stop"() : () -> ()
    %cst_113 = arith.constant 0.707106769 : f32
    %344 = vector.broadcast %cst_113 : f32 to vector<4x8x8xf32>
    %345 = arith.mulf %343, %344 : vector<4x8x8xf32>
    %cst_114 = arith.constant dense<0xFF800000> : vector<4x8xf32>
    %346 = vector.multi_reduction <maximumf>, %345, %cst_114 [2] : vector<4x8x8xf32> to vector<4x8xf32>
    %347 = vector.shape_cast %346 : vector<4x8xf32> to vector<4x8x1xf32>
    %348 = vector.broadcast %347 : vector<4x8x1xf32> to vector<4x8x8xf32>
    %349 = arith.subf %345, %348 : vector<4x8x8xf32>
    %350 = math.exp %349 : vector<4x8x8xf32>
    %cst_115 = arith.constant dense<0.000000e+00> : vector<4x8xf32>
    %351 = vector.multi_reduction <add>, %350, %cst_115 [2] : vector<4x8x8xf32> to vector<4x8xf32>
    %352 = vector.shape_cast %351 : vector<4x8xf32> to vector<4x8x1xf32>
    %353 = tpu.reciprocal %352 {approx = true} : vector<4x8x1xf32> -> vector<4x8x1xf32>
    %354 = vector.broadcast %353 : vector<4x8x1xf32> to vector<4x8x8xf32>
    %355 = arith.mulf %350, %354 : vector<4x8x8xf32>
    "tpu.trace_start"() <{level = 10 : i32, message = "bqk,bkd->bqd"}> : () -> ()
    %cst_116 = arith.constant dense<0.000000e+00> : vector<4x8x2xf32>
    %356 = tpu.matmul %355, %342, %cst_116 {dimension_numbers = #tpu.dot_dimension_numbers<[2], [1], [1], [2], [0, 0, 0, 1, 1, 2], [0], [0]>} : vector<4x8x8xf32>, vector<4x8x2xf32>, vector<4x8x2xf32> -> vector<4x8x2xf32>
    "tpu.trace_stop"() : () -> ()
    %357 = tpu.concatenate %236, %253, %270, %287, %304, %321, %338, %355 in 2 : vector<4x8x8xf32>, vector<4x8x8xf32>, vector<4x8x8xf32>, vector<4x8x8xf32>, vector<4x8x8xf32>, vector<4x8x8xf32>, vector<4x8x8xf32>, vector<4x8x8xf32> -> vector<4x8x64xf32>
    %358 = tpu.concatenate %237, %254, %271, %288, %305, %322, %339, %356 in 2 : vector<4x8x2xf32>, vector<4x8x2xf32>, vector<4x8x2xf32>, vector<4x8x2xf32>, vector<4x8x2xf32>, vector<4x8x2xf32>, vector<4x8x2xf32>, vector<4x8x2xf32> -> vector<4x8x16xf32>
    %359 = vector.shape_cast %358 : vector<4x8x16xf32> to vector<32x16xf32>
    %c1_117 = arith.constant 1 : index
    %c0_118 = arith.constant 0 : index
    %c0_119 = arith.constant 0 : index
    %360 = vector.load %arg6[%c1_117, %c0_118, %c0_119] : memref<3x16x16xf32, #tpu.memory_space<vmem>>, vector<1x16x16xf32>
    %361 = vector.shape_cast %360 : vector<1x16x16xf32> to vector<16x16xf32>
    %cst_120 = arith.constant dense<0.000000e+00> : vector<32x16xf32>
    %362 = tpu.matmul %359, %361, %cst_120 {dimension_numbers = #tpu.dot_dimension_numbers<[1], [0], [0], [1], [0, 0, 1, 1], [], []>} : vector<32x16xf32>, vector<16x16xf32>, vector<32x16xf32> -> vector<32x16xf32>
    %363 = arith.addf %362, %211 : vector<32x16xf32>
    %cst_121 = arith.constant dense<0.000000e+00> : vector<32xf32>
    %364 = vector.multi_reduction <add>, %363, %cst_121 [1] : vector<32x16xf32> to vector<32xf32>
    %365 = vector.shape_cast %364 : vector<32xf32> to vector<32x1xf32>
    %cst_122 = arith.constant 1.600000e+01 : f32
    %366 = vector.broadcast %cst_122 : f32 to vector<32x1xf32>
    %367 = arith.divf %365, %366 : vector<32x1xf32>
    %368 = vector.broadcast %367 : vector<32x1xf32> to vector<32x16xf32>
    %369 = arith.subf %363, %368 : vector<32x16xf32>
    %370 = arith.mulf %369, %369 : vector<32x16xf32>
    %cst_123 = arith.constant dense<0.000000e+00> : vector<32xf32>
    %371 = vector.multi_reduction <add>, %370, %cst_123 [1] : vector<32x16xf32> to vector<32xf32>
    %372 = vector.shape_cast %371 : vector<32xf32> to vector<32x1xf32>
    %cst_124 = arith.constant 1.600000e+01 : f32
    %373 = vector.broadcast %cst_124 : f32 to vector<32x1xf32>
    %374 = arith.divf %372, %373 : vector<32x1xf32>
    %375 = vector.broadcast %367 : vector<32x1xf32> to vector<32x16xf32>
    %376 = arith.subf %363, %375 : vector<32x16xf32>
    %cst_125 = arith.constant 9.99999974E-6 : f32
    %377 = vector.broadcast %cst_125 : f32 to vector<32x1xf32>
    %378 = arith.addf %374, %377 : vector<32x1xf32>
    %379 = math.rsqrt %378 : vector<32x1xf32>
    %380 = vector.broadcast %379 : vector<32x1xf32> to vector<32x16xf32>
    %381 = arith.mulf %376, %380 : vector<32x16xf32>
    %c1_126 = arith.constant 1 : index
    %c0_127 = arith.constant 0 : index
    %c0_128 = arith.constant 0 : index
    %382 = vector.load %arg7[%c1_126, %c0_127, %c0_128] : memref<3x16x128xf32, #tpu.memory_space<vmem>>, vector<1x16x128xf32>
    %383 = vector.shape_cast %382 : vector<1x16x128xf32> to vector<16x128xf32>
    %cst_129 = arith.constant dense<0.000000e+00> : vector<32x128xf32>
    %384 = tpu.matmul %381, %383, %cst_129 {dimension_numbers = #tpu.dot_dimension_numbers<[1], [0], [0], [1], [0, 0, 1, 1], [], []>} : vector<32x16xf32>, vector<16x128xf32>, vector<32x128xf32> -> vector<32x128xf32>
    %cst_130 = arith.constant 0.000000e+00 : f32
    %385 = vector.broadcast %cst_130 : f32 to vector<32x128xf32>
    %386 = arith.maximumf %384, %385 : vector<32x128xf32>
    %c1_131 = arith.constant 1 : index
    %c0_132 = arith.constant 0 : index
    %c0_133 = arith.constant 0 : index
    %387 = vector.load %arg8[%c1_131, %c0_132, %c0_133] : memref<3x128x16xf32, #tpu.memory_space<vmem>>, vector<1x128x16xf32>
    %388 = vector.shape_cast %387 : vector<1x128x16xf32> to vector<128x16xf32>
    %cst_134 = arith.constant dense<0.000000e+00> : vector<32x16xf32>
    %389 = tpu.matmul %386, %388, %cst_134 {dimension_numbers = #tpu.dot_dimension_numbers<[1], [0], [0], [1], [0, 0, 1, 1], [], []>} : vector<32x128xf32>, vector<128x16xf32>, vector<32x16xf32> -> vector<32x16xf32>
    %390 = arith.addf %389, %381 : vector<32x16xf32>
    %cst_135 = arith.constant dense<0.000000e+00> : vector<32xf32>
    %391 = vector.multi_reduction <add>, %390, %cst_135 [1] : vector<32x16xf32> to vector<32xf32>
    %392 = vector.shape_cast %391 : vector<32xf32> to vector<32x1xf32>
    %cst_136 = arith.constant 1.600000e+01 : f32
    %393 = vector.broadcast %cst_136 : f32 to vector<32x1xf32>
    %394 = arith.divf %392, %393 : vector<32x1xf32>
    %395 = vector.broadcast %394 : vector<32x1xf32> to vector<32x16xf32>
    %396 = arith.subf %390, %395 : vector<32x16xf32>
    %397 = arith.mulf %396, %396 : vector<32x16xf32>
    %cst_137 = arith.constant dense<0.000000e+00> : vector<32xf32>
    %398 = vector.multi_reduction <add>, %397, %cst_137 [1] : vector<32x16xf32> to vector<32xf32>
    %399 = vector.shape_cast %398 : vector<32xf32> to vector<32x1xf32>
    %cst_138 = arith.constant 1.600000e+01 : f32
    %400 = vector.broadcast %cst_138 : f32 to vector<32x1xf32>
    %401 = arith.divf %399, %400 : vector<32x1xf32>
    %402 = vector.broadcast %394 : vector<32x1xf32> to vector<32x16xf32>
    %403 = arith.subf %390, %402 : vector<32x16xf32>
    %cst_139 = arith.constant 9.99999974E-6 : f32
    %404 = vector.broadcast %cst_139 : f32 to vector<32x1xf32>
    %405 = arith.addf %401, %404 : vector<32x1xf32>
    %406 = math.rsqrt %405 : vector<32x1xf32>
    %407 = vector.broadcast %406 : vector<32x1xf32> to vector<32x16xf32>
    %408 = arith.mulf %403, %407 : vector<32x16xf32>
    %c2 = arith.constant 2 : index
    %c0_140 = arith.constant 0 : index
    %c0_141 = arith.constant 0 : index
    %409 = vector.load %arg5[%c2, %c0_140, %c0_141] : memref<3x16x48xf32, #tpu.memory_space<vmem>>, vector<1x16x48xf32>
    %410 = vector.shape_cast %409 : vector<1x16x48xf32> to vector<16x48xf32>
    %cst_142 = arith.constant dense<0.000000e+00> : vector<32x48xf32>
    %411 = tpu.matmul %408, %410, %cst_142 {dimension_numbers = #tpu.dot_dimension_numbers<[1], [0], [0], [1], [0, 0, 1, 1], [], []>} : vector<32x16xf32>, vector<16x48xf32>, vector<32x48xf32> -> vector<32x48xf32>
    %412 = vector.extract_strided_slice %411 {offsets = [0, 0], sizes = [32, 16], strides = [1, 1]} : vector<32x48xf32> to vector<32x16xf32>
    %413 = vector.shape_cast %412 : vector<32x16xf32> to vector<4x8x16xf32>
    %414 = vector.extract_strided_slice %411 {offsets = [0, 16], sizes = [32, 16], strides = [1, 1]} : vector<32x48xf32> to vector<32x16xf32>
    %415 = vector.shape_cast %414 : vector<32x16xf32> to vector<4x8x16xf32>
    %416 = vector.extract_strided_slice %411 {offsets = [0, 32], sizes = [32, 16], strides = [1, 1]} : vector<32x48xf32> to vector<32x16xf32>
    %417 = vector.shape_cast %416 : vector<32x16xf32> to vector<4x8x16xf32>
    %418 = vector.extract_strided_slice %413 {offsets = [0, 0, 0], sizes = [4, 8, 2], strides = [1, 1, 1]} : vector<4x8x16xf32> to vector<4x8x2xf32>
    %419 = vector.extract_strided_slice %415 {offsets = [0, 0, 0], sizes = [4, 8, 2], strides = [1, 1, 1]} : vector<4x8x16xf32> to vector<4x8x2xf32>
    %420 = vector.extract_strided_slice %417 {offsets = [0, 0, 0], sizes = [4, 8, 2], strides = [1, 1, 1]} : vector<4x8x16xf32> to vector<4x8x2xf32>
    "tpu.trace_start"() <{level = 10 : i32, message = "bqd,bkd->bqk"}> : () -> ()
    %cst_143 = arith.constant dense<0.000000e+00> : vector<4x8x8xf32>
    %421 = tpu.matmul %418, %419, %cst_143 {dimension_numbers = #tpu.dot_dimension_numbers<[2], [2], [1], [1], [0, 0, 0, 1, 1, 1], [0], [0]>} : vector<4x8x2xf32>, vector<4x8x2xf32>, vector<4x8x8xf32> -> vector<4x8x8xf32>
    "tpu.trace_stop"() : () -> ()
    %cst_144 = arith.constant 0.707106769 : f32
    %422 = vector.broadcast %cst_144 : f32 to vector<4x8x8xf32>
    %423 = arith.mulf %421, %422 : vector<4x8x8xf32>
    %cst_145 = arith.constant dense<0xFF800000> : vector<4x8xf32>
    %424 = vector.multi_reduction <maximumf>, %423, %cst_145 [2] : vector<4x8x8xf32> to vector<4x8xf32>
    %425 = vector.shape_cast %424 : vector<4x8xf32> to vector<4x8x1xf32>
    %426 = vector.broadcast %425 : vector<4x8x1xf32> to vector<4x8x8xf32>
    %427 = arith.subf %423, %426 : vector<4x8x8xf32>
    %428 = math.exp %427 : vector<4x8x8xf32>
    %cst_146 = arith.constant dense<0.000000e+00> : vector<4x8xf32>
    %429 = vector.multi_reduction <add>, %428, %cst_146 [2] : vector<4x8x8xf32> to vector<4x8xf32>
    %430 = vector.shape_cast %429 : vector<4x8xf32> to vector<4x8x1xf32>
    %431 = tpu.reciprocal %430 {approx = true} : vector<4x8x1xf32> -> vector<4x8x1xf32>
    %432 = vector.broadcast %431 : vector<4x8x1xf32> to vector<4x8x8xf32>
    %433 = arith.mulf %428, %432 : vector<4x8x8xf32>
    "tpu.trace_start"() <{level = 10 : i32, message = "bqk,bkd->bqd"}> : () -> ()
    %cst_147 = arith.constant dense<0.000000e+00> : vector<4x8x2xf32>
    %434 = tpu.matmul %433, %420, %cst_147 {dimension_numbers = #tpu.dot_dimension_numbers<[2], [1], [1], [2], [0, 0, 0, 1, 1, 2], [0], [0]>} : vector<4x8x8xf32>, vector<4x8x2xf32>, vector<4x8x2xf32> -> vector<4x8x2xf32>
    "tpu.trace_stop"() : () -> ()
    %435 = vector.extract_strided_slice %413 {offsets = [0, 0, 2], sizes = [4, 8, 2], strides = [1, 1, 1]} : vector<4x8x16xf32> to vector<4x8x2xf32>
    %436 = vector.extract_strided_slice %415 {offsets = [0, 0, 2], sizes = [4, 8, 2], strides = [1, 1, 1]} : vector<4x8x16xf32> to vector<4x8x2xf32>
    %437 = vector.extract_strided_slice %417 {offsets = [0, 0, 2], sizes = [4, 8, 2], strides = [1, 1, 1]} : vector<4x8x16xf32> to vector<4x8x2xf32>
    "tpu.trace_start"() <{level = 10 : i32, message = "bqd,bkd->bqk"}> : () -> ()
    %cst_148 = arith.constant dense<0.000000e+00> : vector<4x8x8xf32>
    %438 = tpu.matmul %435, %436, %cst_148 {dimension_numbers = #tpu.dot_dimension_numbers<[2], [2], [1], [1], [0, 0, 0, 1, 1, 1], [0], [0]>} : vector<4x8x2xf32>, vector<4x8x2xf32>, vector<4x8x8xf32> -> vector<4x8x8xf32>
    "tpu.trace_stop"() : () -> ()
    %cst_149 = arith.constant 0.707106769 : f32
    %439 = vector.broadcast %cst_149 : f32 to vector<4x8x8xf32>
    %440 = arith.mulf %438, %439 : vector<4x8x8xf32>
    %cst_150 = arith.constant dense<0xFF800000> : vector<4x8xf32>
    %441 = vector.multi_reduction <maximumf>, %440, %cst_150 [2] : vector<4x8x8xf32> to vector<4x8xf32>
    %442 = vector.shape_cast %441 : vector<4x8xf32> to vector<4x8x1xf32>
    %443 = vector.broadcast %442 : vector<4x8x1xf32> to vector<4x8x8xf32>
    %444 = arith.subf %440, %443 : vector<4x8x8xf32>
    %445 = math.exp %444 : vector<4x8x8xf32>
    %cst_151 = arith.constant dense<0.000000e+00> : vector<4x8xf32>
    %446 = vector.multi_reduction <add>, %445, %cst_151 [2] : vector<4x8x8xf32> to vector<4x8xf32>
    %447 = vector.shape_cast %446 : vector<4x8xf32> to vector<4x8x1xf32>
    %448 = tpu.reciprocal %447 {approx = true} : vector<4x8x1xf32> -> vector<4x8x1xf32>
    %449 = vector.broadcast %448 : vector<4x8x1xf32> to vector<4x8x8xf32>
    %450 = arith.mulf %445, %449 : vector<4x8x8xf32>
    "tpu.trace_start"() <{level = 10 : i32, message = "bqk,bkd->bqd"}> : () -> ()
    %cst_152 = arith.constant dense<0.000000e+00> : vector<4x8x2xf32>
    %451 = tpu.matmul %450, %437, %cst_152 {dimension_numbers = #tpu.dot_dimension_numbers<[2], [1], [1], [2], [0, 0, 0, 1, 1, 2], [0], [0]>} : vector<4x8x8xf32>, vector<4x8x2xf32>, vector<4x8x2xf32> -> vector<4x8x2xf32>
    "tpu.trace_stop"() : () -> ()
    %452 = vector.extract_strided_slice %413 {offsets = [0, 0, 4], sizes = [4, 8, 2], strides = [1, 1, 1]} : vector<4x8x16xf32> to vector<4x8x2xf32>
    %453 = vector.extract_strided_slice %415 {offsets = [0, 0, 4], sizes = [4, 8, 2], strides = [1, 1, 1]} : vector<4x8x16xf32> to vector<4x8x2xf32>
    %454 = vector.extract_strided_slice %417 {offsets = [0, 0, 4], sizes = [4, 8, 2], strides = [1, 1, 1]} : vector<4x8x16xf32> to vector<4x8x2xf32>
    "tpu.trace_start"() <{level = 10 : i32, message = "bqd,bkd->bqk"}> : () -> ()
    %cst_153 = arith.constant dense<0.000000e+00> : vector<4x8x8xf32>
    %455 = tpu.matmul %452, %453, %cst_153 {dimension_numbers = #tpu.dot_dimension_numbers<[2], [2], [1], [1], [0, 0, 0, 1, 1, 1], [0], [0]>} : vector<4x8x2xf32>, vector<4x8x2xf32>, vector<4x8x8xf32> -> vector<4x8x8xf32>
    "tpu.trace_stop"() : () -> ()
    %cst_154 = arith.constant 0.707106769 : f32
    %456 = vector.broadcast %cst_154 : f32 to vector<4x8x8xf32>
    %457 = arith.mulf %455, %456 : vector<4x8x8xf32>
    %cst_155 = arith.constant dense<0xFF800000> : vector<4x8xf32>
    %458 = vector.multi_reduction <maximumf>, %457, %cst_155 [2] : vector<4x8x8xf32> to vector<4x8xf32>
    %459 = vector.shape_cast %458 : vector<4x8xf32> to vector<4x8x1xf32>
    %460 = vector.broadcast %459 : vector<4x8x1xf32> to vector<4x8x8xf32>
    %461 = arith.subf %457, %460 : vector<4x8x8xf32>
    %462 = math.exp %461 : vector<4x8x8xf32>
    %cst_156 = arith.constant dense<0.000000e+00> : vector<4x8xf32>
    %463 = vector.multi_reduction <add>, %462, %cst_156 [2] : vector<4x8x8xf32> to vector<4x8xf32>
    %464 = vector.shape_cast %463 : vector<4x8xf32> to vector<4x8x1xf32>
    %465 = tpu.reciprocal %464 {approx = true} : vector<4x8x1xf32> -> vector<4x8x1xf32>
    %466 = vector.broadcast %465 : vector<4x8x1xf32> to vector<4x8x8xf32>
    %467 = arith.mulf %462, %466 : vector<4x8x8xf32>
    "tpu.trace_start"() <{level = 10 : i32, message = "bqk,bkd->bqd"}> : () -> ()
    %cst_157 = arith.constant dense<0.000000e+00> : vector<4x8x2xf32>
    %468 = tpu.matmul %467, %454, %cst_157 {dimension_numbers = #tpu.dot_dimension_numbers<[2], [1], [1], [2], [0, 0, 0, 1, 1, 2], [0], [0]>} : vector<4x8x8xf32>, vector<4x8x2xf32>, vector<4x8x2xf32> -> vector<4x8x2xf32>
    "tpu.trace_stop"() : () -> ()
    %469 = vector.extract_strided_slice %413 {offsets = [0, 0, 6], sizes = [4, 8, 2], strides = [1, 1, 1]} : vector<4x8x16xf32> to vector<4x8x2xf32>
    %470 = vector.extract_strided_slice %415 {offsets = [0, 0, 6], sizes = [4, 8, 2], strides = [1, 1, 1]} : vector<4x8x16xf32> to vector<4x8x2xf32>
    %471 = vector.extract_strided_slice %417 {offsets = [0, 0, 6], sizes = [4, 8, 2], strides = [1, 1, 1]} : vector<4x8x16xf32> to vector<4x8x2xf32>
    "tpu.trace_start"() <{level = 10 : i32, message = "bqd,bkd->bqk"}> : () -> ()
    %cst_158 = arith.constant dense<0.000000e+00> : vector<4x8x8xf32>
    %472 = tpu.matmul %469, %470, %cst_158 {dimension_numbers = #tpu.dot_dimension_numbers<[2], [2], [1], [1], [0, 0, 0, 1, 1, 1], [0], [0]>} : vector<4x8x2xf32>, vector<4x8x2xf32>, vector<4x8x8xf32> -> vector<4x8x8xf32>
    "tpu.trace_stop"() : () -> ()
    %cst_159 = arith.constant 0.707106769 : f32
    %473 = vector.broadcast %cst_159 : f32 to vector<4x8x8xf32>
    %474 = arith.mulf %472, %473 : vector<4x8x8xf32>
    %cst_160 = arith.constant dense<0xFF800000> : vector<4x8xf32>
    %475 = vector.multi_reduction <maximumf>, %474, %cst_160 [2] : vector<4x8x8xf32> to vector<4x8xf32>
    %476 = vector.shape_cast %475 : vector<4x8xf32> to vector<4x8x1xf32>
    %477 = vector.broadcast %476 : vector<4x8x1xf32> to vector<4x8x8xf32>
    %478 = arith.subf %474, %477 : vector<4x8x8xf32>
    %479 = math.exp %478 : vector<4x8x8xf32>
    %cst_161 = arith.constant dense<0.000000e+00> : vector<4x8xf32>
    %480 = vector.multi_reduction <add>, %479, %cst_161 [2] : vector<4x8x8xf32> to vector<4x8xf32>
    %481 = vector.shape_cast %480 : vector<4x8xf32> to vector<4x8x1xf32>
    %482 = tpu.reciprocal %481 {approx = true} : vector<4x8x1xf32> -> vector<4x8x1xf32>
    %483 = vector.broadcast %482 : vector<4x8x1xf32> to vector<4x8x8xf32>
    %484 = arith.mulf %479, %483 : vector<4x8x8xf32>
    "tpu.trace_start"() <{level = 10 : i32, message = "bqk,bkd->bqd"}> : () -> ()
    %cst_162 = arith.constant dense<0.000000e+00> : vector<4x8x2xf32>
    %485 = tpu.matmul %484, %471, %cst_162 {dimension_numbers = #tpu.dot_dimension_numbers<[2], [1], [1], [2], [0, 0, 0, 1, 1, 2], [0], [0]>} : vector<4x8x8xf32>, vector<4x8x2xf32>, vector<4x8x2xf32> -> vector<4x8x2xf32>
    "tpu.trace_stop"() : () -> ()
    %486 = vector.extract_strided_slice %413 {offsets = [0, 0, 8], sizes = [4, 8, 2], strides = [1, 1, 1]} : vector<4x8x16xf32> to vector<4x8x2xf32>
    %487 = vector.extract_strided_slice %415 {offsets = [0, 0, 8], sizes = [4, 8, 2], strides = [1, 1, 1]} : vector<4x8x16xf32> to vector<4x8x2xf32>
    %488 = vector.extract_strided_slice %417 {offsets = [0, 0, 8], sizes = [4, 8, 2], strides = [1, 1, 1]} : vector<4x8x16xf32> to vector<4x8x2xf32>
    "tpu.trace_start"() <{level = 10 : i32, message = "bqd,bkd->bqk"}> : () -> ()
    %cst_163 = arith.constant dense<0.000000e+00> : vector<4x8x8xf32>
    %489 = tpu.matmul %486, %487, %cst_163 {dimension_numbers = #tpu.dot_dimension_numbers<[2], [2], [1], [1], [0, 0, 0, 1, 1, 1], [0], [0]>} : vector<4x8x2xf32>, vector<4x8x2xf32>, vector<4x8x8xf32> -> vector<4x8x8xf32>
    "tpu.trace_stop"() : () -> ()
    %cst_164 = arith.constant 0.707106769 : f32
    %490 = vector.broadcast %cst_164 : f32 to vector<4x8x8xf32>
    %491 = arith.mulf %489, %490 : vector<4x8x8xf32>
    %cst_165 = arith.constant dense<0xFF800000> : vector<4x8xf32>
    %492 = vector.multi_reduction <maximumf>, %491, %cst_165 [2] : vector<4x8x8xf32> to vector<4x8xf32>
    %493 = vector.shape_cast %492 : vector<4x8xf32> to vector<4x8x1xf32>
    %494 = vector.broadcast %493 : vector<4x8x1xf32> to vector<4x8x8xf32>
    %495 = arith.subf %491, %494 : vector<4x8x8xf32>
    %496 = math.exp %495 : vector<4x8x8xf32>
    %cst_166 = arith.constant dense<0.000000e+00> : vector<4x8xf32>
    %497 = vector.multi_reduction <add>, %496, %cst_166 [2] : vector<4x8x8xf32> to vector<4x8xf32>
    %498 = vector.shape_cast %497 : vector<4x8xf32> to vector<4x8x1xf32>
    %499 = tpu.reciprocal %498 {approx = true} : vector<4x8x1xf32> -> vector<4x8x1xf32>
    %500 = vector.broadcast %499 : vector<4x8x1xf32> to vector<4x8x8xf32>
    %501 = arith.mulf %496, %500 : vector<4x8x8xf32>
    "tpu.trace_start"() <{level = 10 : i32, message = "bqk,bkd->bqd"}> : () -> ()
    %cst_167 = arith.constant dense<0.000000e+00> : vector<4x8x2xf32>
    %502 = tpu.matmul %501, %488, %cst_167 {dimension_numbers = #tpu.dot_dimension_numbers<[2], [1], [1], [2], [0, 0, 0, 1, 1, 2], [0], [0]>} : vector<4x8x8xf32>, vector<4x8x2xf32>, vector<4x8x2xf32> -> vector<4x8x2xf32>
    "tpu.trace_stop"() : () -> ()
    %503 = vector.extract_strided_slice %413 {offsets = [0, 0, 10], sizes = [4, 8, 2], strides = [1, 1, 1]} : vector<4x8x16xf32> to vector<4x8x2xf32>
    %504 = vector.extract_strided_slice %415 {offsets = [0, 0, 10], sizes = [4, 8, 2], strides = [1, 1, 1]} : vector<4x8x16xf32> to vector<4x8x2xf32>
    %505 = vector.extract_strided_slice %417 {offsets = [0, 0, 10], sizes = [4, 8, 2], strides = [1, 1, 1]} : vector<4x8x16xf32> to vector<4x8x2xf32>
    "tpu.trace_start"() <{level = 10 : i32, message = "bqd,bkd->bqk"}> : () -> ()
    %cst_168 = arith.constant dense<0.000000e+00> : vector<4x8x8xf32>
    %506 = tpu.matmul %503, %504, %cst_168 {dimension_numbers = #tpu.dot_dimension_numbers<[2], [2], [1], [1], [0, 0, 0, 1, 1, 1], [0], [0]>} : vector<4x8x2xf32>, vector<4x8x2xf32>, vector<4x8x8xf32> -> vector<4x8x8xf32>
    "tpu.trace_stop"() : () -> ()
    %cst_169 = arith.constant 0.707106769 : f32
    %507 = vector.broadcast %cst_169 : f32 to vector<4x8x8xf32>
    %508 = arith.mulf %506, %507 : vector<4x8x8xf32>
    %cst_170 = arith.constant dense<0xFF800000> : vector<4x8xf32>
    %509 = vector.multi_reduction <maximumf>, %508, %cst_170 [2] : vector<4x8x8xf32> to vector<4x8xf32>
    %510 = vector.shape_cast %509 : vector<4x8xf32> to vector<4x8x1xf32>
    %511 = vector.broadcast %510 : vector<4x8x1xf32> to vector<4x8x8xf32>
    %512 = arith.subf %508, %511 : vector<4x8x8xf32>
    %513 = math.exp %512 : vector<4x8x8xf32>
    %cst_171 = arith.constant dense<0.000000e+00> : vector<4x8xf32>
    %514 = vector.multi_reduction <add>, %513, %cst_171 [2] : vector<4x8x8xf32> to vector<4x8xf32>
    %515 = vector.shape_cast %514 : vector<4x8xf32> to vector<4x8x1xf32>
    %516 = tpu.reciprocal %515 {approx = true} : vector<4x8x1xf32> -> vector<4x8x1xf32>
    %517 = vector.broadcast %516 : vector<4x8x1xf32> to vector<4x8x8xf32>
    %518 = arith.mulf %513, %517 : vector<4x8x8xf32>
    "tpu.trace_start"() <{level = 10 : i32, message = "bqk,bkd->bqd"}> : () -> ()
    %cst_172 = arith.constant dense<0.000000e+00> : vector<4x8x2xf32>
    %519 = tpu.matmul %518, %505, %cst_172 {dimension_numbers = #tpu.dot_dimension_numbers<[2], [1], [1], [2], [0, 0, 0, 1, 1, 2], [0], [0]>} : vector<4x8x8xf32>, vector<4x8x2xf32>, vector<4x8x2xf32> -> vector<4x8x2xf32>
    "tpu.trace_stop"() : () -> ()
    %520 = vector.extract_strided_slice %413 {offsets = [0, 0, 12], sizes = [4, 8, 2], strides = [1, 1, 1]} : vector<4x8x16xf32> to vector<4x8x2xf32>
    %521 = vector.extract_strided_slice %415 {offsets = [0, 0, 12], sizes = [4, 8, 2], strides = [1, 1, 1]} : vector<4x8x16xf32> to vector<4x8x2xf32>
    %522 = vector.extract_strided_slice %417 {offsets = [0, 0, 12], sizes = [4, 8, 2], strides = [1, 1, 1]} : vector<4x8x16xf32> to vector<4x8x2xf32>
    "tpu.trace_start"() <{level = 10 : i32, message = "bqd,bkd->bqk"}> : () -> ()
    %cst_173 = arith.constant dense<0.000000e+00> : vector<4x8x8xf32>
    %523 = tpu.matmul %520, %521, %cst_173 {dimension_numbers = #tpu.dot_dimension_numbers<[2], [2], [1], [1], [0, 0, 0, 1, 1, 1], [0], [0]>} : vector<4x8x2xf32>, vector<4x8x2xf32>, vector<4x8x8xf32> -> vector<4x8x8xf32>
    "tpu.trace_stop"() : () -> ()
    %cst_174 = arith.constant 0.707106769 : f32
    %524 = vector.broadcast %cst_174 : f32 to vector<4x8x8xf32>
    %525 = arith.mulf %523, %524 : vector<4x8x8xf32>
    %cst_175 = arith.constant dense<0xFF800000> : vector<4x8xf32>
    %526 = vector.multi_reduction <maximumf>, %525, %cst_175 [2] : vector<4x8x8xf32> to vector<4x8xf32>
    %527 = vector.shape_cast %526 : vector<4x8xf32> to vector<4x8x1xf32>
    %528 = vector.broadcast %527 : vector<4x8x1xf32> to vector<4x8x8xf32>
    %529 = arith.subf %525, %528 : vector<4x8x8xf32>
    %530 = math.exp %529 : vector<4x8x8xf32>
    %cst_176 = arith.constant dense<0.000000e+00> : vector<4x8xf32>
    %531 = vector.multi_reduction <add>, %530, %cst_176 [2] : vector<4x8x8xf32> to vector<4x8xf32>
    %532 = vector.shape_cast %531 : vector<4x8xf32> to vector<4x8x1xf32>
    %533 = tpu.reciprocal %532 {approx = true} : vector<4x8x1xf32> -> vector<4x8x1xf32>
    %534 = vector.broadcast %533 : vector<4x8x1xf32> to vector<4x8x8xf32>
    %535 = arith.mulf %530, %534 : vector<4x8x8xf32>
    "tpu.trace_start"() <{level = 10 : i32, message = "bqk,bkd->bqd"}> : () -> ()
    %cst_177 = arith.constant dense<0.000000e+00> : vector<4x8x2xf32>
    %536 = tpu.matmul %535, %522, %cst_177 {dimension_numbers = #tpu.dot_dimension_numbers<[2], [1], [1], [2], [0, 0, 0, 1, 1, 2], [0], [0]>} : vector<4x8x8xf32>, vector<4x8x2xf32>, vector<4x8x2xf32> -> vector<4x8x2xf32>
    "tpu.trace_stop"() : () -> ()
    %537 = vector.extract_strided_slice %413 {offsets = [0, 0, 14], sizes = [4, 8, 2], strides = [1, 1, 1]} : vector<4x8x16xf32> to vector<4x8x2xf32>
    %538 = vector.extract_strided_slice %415 {offsets = [0, 0, 14], sizes = [4, 8, 2], strides = [1, 1, 1]} : vector<4x8x16xf32> to vector<4x8x2xf32>
    %539 = vector.extract_strided_slice %417 {offsets = [0, 0, 14], sizes = [4, 8, 2], strides = [1, 1, 1]} : vector<4x8x16xf32> to vector<4x8x2xf32>
    "tpu.trace_start"() <{level = 10 : i32, message = "bqd,bkd->bqk"}> : () -> ()
    %cst_178 = arith.constant dense<0.000000e+00> : vector<4x8x8xf32>
    %540 = tpu.matmul %537, %538, %cst_178 {dimension_numbers = #tpu.dot_dimension_numbers<[2], [2], [1], [1], [0, 0, 0, 1, 1, 1], [0], [0]>} : vector<4x8x2xf32>, vector<4x8x2xf32>, vector<4x8x8xf32> -> vector<4x8x8xf32>
    "tpu.trace_stop"() : () -> ()
    %cst_179 = arith.constant 0.707106769 : f32
    %541 = vector.broadcast %cst_179 : f32 to vector<4x8x8xf32>
    %542 = arith.mulf %540, %541 : vector<4x8x8xf32>
    %cst_180 = arith.constant dense<0xFF800000> : vector<4x8xf32>
    %543 = vector.multi_reduction <maximumf>, %542, %cst_180 [2] : vector<4x8x8xf32> to vector<4x8xf32>
    %544 = vector.shape_cast %543 : vector<4x8xf32> to vector<4x8x1xf32>
    %545 = vector.broadcast %544 : vector<4x8x1xf32> to vector<4x8x8xf32>
    %546 = arith.subf %542, %545 : vector<4x8x8xf32>
    %547 = math.exp %546 : vector<4x8x8xf32>
    %cst_181 = arith.constant dense<0.000000e+00> : vector<4x8xf32>
    %548 = vector.multi_reduction <add>, %547, %cst_181 [2] : vector<4x8x8xf32> to vector<4x8xf32>
    %549 = vector.shape_cast %548 : vector<4x8xf32> to vector<4x8x1xf32>
    %550 = tpu.reciprocal %549 {approx = true} : vector<4x8x1xf32> -> vector<4x8x1xf32>
    %551 = vector.broadcast %550 : vector<4x8x1xf32> to vector<4x8x8xf32>
    %552 = arith.mulf %547, %551 : vector<4x8x8xf32>
    "tpu.trace_start"() <{level = 10 : i32, message = "bqk,bkd->bqd"}> : () -> ()
    %cst_182 = arith.constant dense<0.000000e+00> : vector<4x8x2xf32>
    %553 = tpu.matmul %552, %539, %cst_182 {dimension_numbers = #tpu.dot_dimension_numbers<[2], [1], [1], [2], [0, 0, 0, 1, 1, 2], [0], [0]>} : vector<4x8x8xf32>, vector<4x8x2xf32>, vector<4x8x2xf32> -> vector<4x8x2xf32>
    "tpu.trace_stop"() : () -> ()
    %554 = tpu.concatenate %433, %450, %467, %484, %501, %518, %535, %552 in 2 : vector<4x8x8xf32>, vector<4x8x8xf32>, vector<4x8x8xf32>, vector<4x8x8xf32>, vector<4x8x8xf32>, vector<4x8x8xf32>, vector<4x8x8xf32>, vector<4x8x8xf32> -> vector<4x8x64xf32>
    %555 = tpu.concatenate %434, %451, %468, %485, %502, %519, %536, %553 in 2 : vector<4x8x2xf32>, vector<4x8x2xf32>, vector<4x8x2xf32>, vector<4x8x2xf32>, vector<4x8x2xf32>, vector<4x8x2xf32>, vector<4x8x2xf32>, vector<4x8x2xf32> -> vector<4x8x16xf32>
    %556 = vector.shape_cast %555 : vector<4x8x16xf32> to vector<32x16xf32>
    %c2_183 = arith.constant 2 : index
    %c0_184 = arith.constant 0 : index
    %c0_185 = arith.constant 0 : index
    %557 = vector.load %arg6[%c2_183, %c0_184, %c0_185] : memref<3x16x16xf32, #tpu.memory_space<vmem>>, vector<1x16x16xf32>
    %558 = vector.shape_cast %557 : vector<1x16x16xf32> to vector<16x16xf32>
    %cst_186 = arith.constant dense<0.000000e+00> : vector<32x16xf32>
    %559 = tpu.matmul %556, %558, %cst_186 {dimension_numbers = #tpu.dot_dimension_numbers<[1], [0], [0], [1], [0, 0, 1, 1], [], []>} : vector<32x16xf32>, vector<16x16xf32>, vector<32x16xf32> -> vector<32x16xf32>
    %560 = arith.addf %559, %408 : vector<32x16xf32>
    %cst_187 = arith.constant dense<0.000000e+00> : vector<32xf32>
    %561 = vector.multi_reduction <add>, %560, %cst_187 [1] : vector<32x16xf32> to vector<32xf32>
    %562 = vector.shape_cast %561 : vector<32xf32> to vector<32x1xf32>
    %cst_188 = arith.constant 1.600000e+01 : f32
    %563 = vector.broadcast %cst_188 : f32 to vector<32x1xf32>
    %564 = arith.divf %562, %563 : vector<32x1xf32>
    %565 = vector.broadcast %564 : vector<32x1xf32> to vector<32x16xf32>
    %566 = arith.subf %560, %565 : vector<32x16xf32>
    %567 = arith.mulf %566, %566 : vector<32x16xf32>
    %cst_189 = arith.constant dense<0.000000e+00> : vector<32xf32>
    %568 = vector.multi_reduction <add>, %567, %cst_189 [1] : vector<32x16xf32> to vector<32xf32>
    %569 = vector.shape_cast %568 : vector<32xf32> to vector<32x1xf32>
    %cst_190 = arith.constant 1.600000e+01 : f32
    %570 = vector.broadcast %cst_190 : f32 to vector<32x1xf32>
    %571 = arith.divf %569, %570 : vector<32x1xf32>
    %572 = vector.broadcast %564 : vector<32x1xf32> to vector<32x16xf32>
    %573 = arith.subf %560, %572 : vector<32x16xf32>
    %cst_191 = arith.constant 9.99999974E-6 : f32
    %574 = vector.broadcast %cst_191 : f32 to vector<32x1xf32>
    %575 = arith.addf %571, %574 : vector<32x1xf32>
    %576 = math.rsqrt %575 : vector<32x1xf32>
    %577 = vector.broadcast %576 : vector<32x1xf32> to vector<32x16xf32>
    %578 = arith.mulf %573, %577 : vector<32x16xf32>
    %c2_192 = arith.constant 2 : index
    %c0_193 = arith.constant 0 : index
    %c0_194 = arith.constant 0 : index
    %579 = vector.load %arg7[%c2_192, %c0_193, %c0_194] : memref<3x16x128xf32, #tpu.memory_space<vmem>>, vector<1x16x128xf32>
    %580 = vector.shape_cast %579 : vector<1x16x128xf32> to vector<16x128xf32>
    %cst_195 = arith.constant dense<0.000000e+00> : vector<32x128xf32>
    %581 = tpu.matmul %578, %580, %cst_195 {dimension_numbers = #tpu.dot_dimension_numbers<[1], [0], [0], [1], [0, 0, 1, 1], [], []>} : vector<32x16xf32>, vector<16x128xf32>, vector<32x128xf32> -> vector<32x128xf32>
    %cst_196 = arith.constant 0.000000e+00 : f32
    %582 = vector.broadcast %cst_196 : f32 to vector<32x128xf32>
    %583 = arith.maximumf %581, %582 : vector<32x128xf32>
    %c2_197 = arith.constant 2 : index
    %c0_198 = arith.constant 0 : index
    %c0_199 = arith.constant 0 : index
    %584 = vector.load %arg8[%c2_197, %c0_198, %c0_199] : memref<3x128x16xf32, #tpu.memory_space<vmem>>, vector<1x128x16xf32>
    %585 = vector.shape_cast %584 : vector<1x128x16xf32> to vector<128x16xf32>
    %cst_200 = arith.constant dense<0.000000e+00> : vector<32x16xf32>
    %586 = tpu.matmul %583, %585, %cst_200 {dimension_numbers = #tpu.dot_dimension_numbers<[1], [0], [0], [1], [0, 0, 1, 1], [], []>} : vector<32x128xf32>, vector<128x16xf32>, vector<32x16xf32> -> vector<32x16xf32>
    %587 = arith.addf %586, %578 : vector<32x16xf32>
    %cst_201 = arith.constant dense<0.000000e+00> : vector<32xf32>
    %588 = vector.multi_reduction <add>, %587, %cst_201 [1] : vector<32x16xf32> to vector<32xf32>
    %589 = vector.shape_cast %588 : vector<32xf32> to vector<32x1xf32>
    %cst_202 = arith.constant 1.600000e+01 : f32
    %590 = vector.broadcast %cst_202 : f32 to vector<32x1xf32>
    %591 = arith.divf %589, %590 : vector<32x1xf32>
    %592 = vector.broadcast %591 : vector<32x1xf32> to vector<32x16xf32>
    %593 = arith.subf %587, %592 : vector<32x16xf32>
    %594 = arith.mulf %593, %593 : vector<32x16xf32>
    %cst_203 = arith.constant dense<0.000000e+00> : vector<32xf32>
    %595 = vector.multi_reduction <add>, %594, %cst_203 [1] : vector<32x16xf32> to vector<32xf32>
    %596 = vector.shape_cast %595 : vector<32xf32> to vector<32x1xf32>
    %cst_204 = arith.constant 1.600000e+01 : f32
    %597 = vector.broadcast %cst_204 : f32 to vector<32x1xf32>
    %598 = arith.divf %596, %597 : vector<32x1xf32>
    %599 = vector.broadcast %591 : vector<32x1xf32> to vector<32x16xf32>
    %600 = arith.subf %587, %599 : vector<32x16xf32>
    %cst_205 = arith.constant 9.99999974E-6 : f32
    %601 = vector.broadcast %cst_205 : f32 to vector<32x1xf32>
    %602 = arith.addf %598, %601 : vector<32x1xf32>
    %603 = math.rsqrt %602 : vector<32x1xf32>
    %604 = vector.broadcast %603 : vector<32x1xf32> to vector<32x16xf32>
    %605 = arith.mulf %600, %604 : vector<32x16xf32>
    %606 = vector.shape_cast %605 : vector<32x16xf32> to vector<4x8x16xf32>
    %c0_206 = arith.constant 0 : index
    %c0_207 = arith.constant 0 : index
    %c0_208 = arith.constant 0 : index
    %607 = vector.load %arg9[%c0_206, %c0_207, %c0_208] : memref<4x8x16xf32, #tpu.memory_space<vmem>>, vector<4x8x16xf32>
    tpu.vector_store %arg9[%c0_206, %c0_207, %c0_208], %606 {strides = array<i32>} : memref<4x8x16xf32, #tpu.memory_space<vmem>>, vector<4x8x16xf32>,
    %608 = tpu.concatenate %160, %357, %554 in 2 : vector<4x8x64xf32>, vector<4x8x64xf32>, vector<4x8x64xf32> -> vector<4x8x192xf32>
    %c0_209 = arith.constant 0 : index
    %c0_210 = arith.constant 0 : index
    %c0_211 = arith.constant 0 : index
    %609 = vector.load %arg10[%c0_209, %c0_210, %c0_211] : memref<4x8x192xf32, #tpu.memory_space<vmem>>, vector<4x8x192xf32>
    tpu.vector_store %arg10[%c0_209, %c0_210, %c0_211], %608 {strides = array<i32>} : memref<4x8x192xf32, #tpu.memory_space<vmem>>, vector<4x8x192xf32>,
    return
  }
  func.func @transform_0(%arg0: i32) -> (i32, i32, i32) {
    %c0_i32 = arith.constant 0 : i32
    %c0_i32_0 = arith.constant 0 : i32
    %c0_i32_1 = arith.constant 0 : i32
    return %arg0, %c0_i32, %c0_i32_0 : i32, i32, i32
  }
  func.func @transform_1(%arg0: i32) -> (i32, i32) {
    %c0_i32 = arith.constant 0 : i32
    %c0_i32_0 = arith.constant 0 : i32
    %c0_i32_1 = arith.constant 0 : i32
    return %c0_i32, %c0_i32_0 : i32, i32
  }
  func.func @transform_2(%arg0: i32) -> (i32, i32) {
    %c0_i32 = arith.constant 0 : i32
    %c0_i32_0 = arith.constant 0 : i32
    %c0_i32_1 = arith.constant 0 : i32
    return %c0_i32, %c0_i32_0 : i32, i32
  }
  func.func @transform_3(%arg0: i32) -> (i32, i32) {
    %c0_i32 = arith.constant 0 : i32
    %c0_i32_0 = arith.constant 0 : i32
    %c0_i32_1 = arith.constant 0 : i32
    return %c0_i32, %c0_i32_0 : i32, i32
  }
  func.func @transform_4(%arg0: i32) -> (i32, i32, i32) {
    %c0_i32 = arith.constant 0 : i32
    %c0_i32_0 = arith.constant 0 : i32
    %c0_i32_1 = arith.constant 0 : i32
    %c0_i32_2 = arith.constant 0 : i32
    return %c0_i32, %c0_i32_0, %c0_i32_1 : i32, i32, i32
  }
  func.func @transform_5(%arg0: i32) -> (i32, i32, i32) {
    %c0_i32 = arith.constant 0 : i32
    %c0_i32_0 = arith.constant 0 : i32
    %c0_i32_1 = arith.constant 0 : i32
    %c0_i32_2 = arith.constant 0 : i32
    return %c0_i32, %c0_i32_0, %c0_i32_1 : i32, i32, i32
  }
  func.func @transform_6(%arg0: i32) -> (i32, i32, i32) {
    %c0_i32 = arith.constant 0 : i32
    %c0_i32_0 = arith.constant 0 : i32
    %c0_i32_1 = arith.constant 0 : i32
    %c0_i32_2 = arith.constant 0 : i32
    return %c0_i32, %c0_i32_0, %c0_i32_1 : i32, i32, i32
  }
  func.func @transform_7(%arg0: i32) -> (i32, i32, i32) {
    %c0_i32 = arith.constant 0 : i32
    %c0_i32_0 = arith.constant 0 : i32
    %c0_i32_1 = arith.constant 0 : i32
    %c0_i32_2 = arith.constant 0 : i32
    return %c0_i32, %c0_i32_0, %c0_i32_1 : i32, i32, i32
  }
  func.func @transform_8(%arg0: i32) -> (i32, i32, i32) {
    %c0_i32 = arith.constant 0 : i32
    %c0_i32_0 = arith.constant 0 : i32
    %c0_i32_1 = arith.constant 0 : i32
    return %arg0, %c0_i32, %c0_i32_0 : i32, i32, i32
  }
  func.func @transform_9(%arg0: i32) -> (i32, i32, i32) {
    %c0_i32 = arith.constant 0 : i32
    %c0_i32_0 = arith.constant 0 : i32
    %c0_i32_1 = arith.constant 0 : i32
    return %arg0, %c0_i32, %c0_i32_0 : i32, i32, i32
  }
}

</mosaic_0001>

<bundles_post_ra>
// kernel: tpu_custom_call.1
= control target key start
LH: loop header
LB: loop body
LE: loop exit
PB: predicated region body
PF: predicated region fallthrough
CT: control target
= control target key end

     0   :  { %s12618_s0 = inlined_call_operand.vmem [shape: f32[8,8,1], index: 0, kind: input, shape index: {}]   ;;  %s12619_s1 = inlined_call_operand.vmem [shape: f32[8,16], index: 1, kind: input, shape index: {}]   ;;  %s12620_s2 = inlined_call_operand.vmem [shape: f32[1,16], index: 2, kind: input, shape index: {}]   ;;  %s12621_s3 = inlined_call_operand.vmem [shape: f32[1,16], index: 3, kind: input, shape index: {}]   ;;  %s12622_s4 = inlined_call_operand.vmem [shape: f32[3,16,48], index: 4, kind: input, shape index: {}]   ;;  %s12623_s5 = inlined_call_operand.vmem [shape: f32[3,16,16], index: 5, kind: input, shape index: {}]   ;;  %s12624_s6 = inlined_call_operand.vmem [shape: f32[3,16,128], index: 6, kind: input, shape index: {}]   ;;  %s12625_s7 = inlined_call_operand.vmem [shape: f32[3,128,16], index: 7, kind: input, shape index: {}]   ;;  %s12626_s8 = inlined_call_operand.hbm [shape: f32[8,8,16], index: 8, kind: output, shape index: {0}]   ;;  %s12627_s9 = inlined_call_operand.hbm [shape: f32[8,8,192], index: 9, kind: output, shape index: {1}]  }
   0x1   :  { %12785 = sst [smem:[#allocation91_spill]] %s12618_s0 }
   0x2   :  { %12786 = sst [smem:[#allocation92_spill]] %s12619_s1 }
   0x3   :  { %12787 = sst [smem:[#allocation93_spill]] %s12620_s2 }
   0x4   :  { %12788 = sst [smem:[#allocation94_spill]] %s12621_s3 }
   0x5   :  { %12789 = sst [smem:[#allocation95_spill]] %s12623_s5 }
   0x6   :  { %12790 = sst [smem:[#allocation96_spill]] %s12624_s6 }
   0x7   :  { %12791 = sst [smem:[#allocation97_spill]] %s12626_s8 }
   0x8   :  { %12792 = sst [smem:[#allocation98_spill]] %s12627_s9 }
   0x9   :  { %15 = vsyncpa [#allocation3], 0 }
   0xa   :  { %17 = vsyncpa [#allocation3 + $0x1], 0 }
   0xb   :  { %18 = vsyncpa [#allocation5], 0 }
   0xc   :  { %20 = vsyncpa [#allocation5 + $0x1], 0  ;;  %s9901_s30 = smov 0   ;;  %s9903_s10 = smov 0  }
   0xd   :  { %s9905_s11 = smov 0   ;;  %s9907_s12 = smov 0  }
   0xe LB: > { %12793 = sst [smem:[#allocation8_spill]] %s9796_s30  ;;  %s9922_s13 = sadd.s32 4294967295, %s9808_s12   ;;  %s9808_s12 = sphi %s9907_s12, %s13008_s12   ;;  %s9804_s11 = sphi %s9905_s11, %s13011_s11   ;;  %s9800_s10 = sphi %s9903_s10, %s13010_s10   ;;  %s9796_s30 = sphi %s9901_s30, %s13009_s30  }
   0xf   : > { %12794 = sst [smem:[#allocation9_spill]] %s9800_s10  ;;  %s8728_s14 = sadd.s32 4294967294, %s9808_s12  }
  0x10   : > { %12795 = sst [smem:[#allocation10_spill]] %s9804_s11  ;;  %s9926_s15 = sadd.s32 1, %s9808_s12  }
  0x11   : > { %12796 = sst [smem:[#allocation11_spill]] %s9808_s12  ;;  %s206_s16 = sadd.s32 1, %s9804_s11 }
  0x12   : > { %12797 = sst [smem:[#allocation12_spill]] %s9922_s13  ;;  %s203_s17 = ssub.s32 %s9808_s12, %s9926_s15 }
  0x13   : > { %12798 = sst [smem:[#allocation13_spill]] %s9926_s15  ;;  %p216_p0 = scmp.ne.s32.totalorder %s9804_s11, %s9800_s10 }
  0x14   : > { %p204_p1 = scmp.eq.s32.totalorder %s203_s17, 0  ;;  %p217_p2 = scmp.eq.s32.totalorder %s9922_s13, 1 }
  0x15   : > { %p222_p3 = scmp.ne.s32.totalorder %s9800_s10, %s9796_s30  ;;  %p223_p4 = scmp.eq.s32.totalorder %s8728_s14, 1 }
  0x16   : > { %s9937_s18 = scalar_select %p204_p1, %s9804_s11, %s206_s16  }
  0x17   : > { %p9939_p5 = por %p217_p2, %p216_p0  ;;  %p9943_p6 = por %p223_p4, %p222_p3 }
  0x18   : > { %12799 = sst [smem:[#allocation14_spill]] %s9937_s18  ;;  %p8731_p7 = scmp.ge.s32.totalorder %s9808_s12, 1 }
  0x19   : > { %s12800_s19 = scalar_select %p9939_p5, 1, 0 }
  0x1a   : > { %s12802_s20 = scalar_select %p9943_p6, 1, 0 }
  0x1b   : > { %12801 = sst [smem:[#allocation15_spill]] %s12800_s19  ;;  %p297_p8 = scmp.lt.s32.totalorder %s9808_s12, 3 }
  0x1c   : > { %12803 = sst [smem:[#allocation16_spill]] %s12802_s20 }
  0x1d   : > { %p298_p9 = pnand %p8731_p7, %p297_p8 }
  0x1f   : > { %301 = sbr.rel (%p298_p9) target bundleno = 14603 (0x390b), region = 52 }
  0x24   : > { %s8734_s21 = sshll.u32 %s9922_s13, 2  ;;  %v9810_v0 = vmov 0   ;;  %s12804_s0 = sld [smem:[#allocation91_spill]]  ;;  %v392_v5 = vld [vmem:[%s12622_s4 + $0x8] sm:$0xff]  ;;  %v391_v6 = vld [vmem:[%s12622_s4] sm:$0xff]  ;;  %vm393_vm0 = vcmask 130048  }
  0x25   : > { %9201 = vset.pattern.permute.xlu0 %v9810_v0  ;;  %p339_p10 = scmp.lt.s32.totalorder %s8734_s21, 7  ;;  %9202 = vset.pattern.permute.xlu1 %v9810_v0  ;;  %s12805_s2 = sld [smem:[#allocation93_spill]]  ;;  %vm438_vm1 = vcmask 15360   ;;  %vm548_vm2 = vcmask 64512   ;;  %vm2778_vm3 = vcmask 31744   ;;  %vm2783_vm4 = vcmask 48128  }
  0x26   : > { %420 = vmatpush.msra.mxu0 %v392_v5  ;;  %s12806_s3 = sld [smem:[#allocation94_spill]]  ;;  %s12701_s24 = smov 112   ;;  %vm2792_vm5 = vcmask 80896   ;;  %vm2797_vm6 = vcmask 97280   ;;  %vm2802_vm7 = vcmask 113664  }
  0x27   : > { %s13013_s21 = smov (!%p339_p10, %s8734_s21), 7  ;;  %s12807_s1 = sld [smem:[#allocation92_spill]] }
  0x28   : > { %s8735_s22 = sshll.u32 %s13013_s21, 3  ;;  %421 = vmatpush.msra.mxu0 %v391_v6  ;;  %s12696_s26 = smov 126  }
  0x29   : > { %s12698_s27 = smov 96   ;;  %s12680_s28 = smov 108  }
  0x2a   : > { %s342_s25 = scalar_lea.vmem %s12804_s0, %s8735_s22  ;;  %s12676_s29 = smov 124  }
  0x2b   : > { %v346_v1 = vld [vmem:[%s342_s25] sm:$0xff]  ;;  %v348_v2 = vld [vmem:[%s342_s25 + $0x10] sm:$0xff]  ;;  %v347_v3 = vld [vmem:[%s342_s25 + $0x8] sm:$0xff]  ;;  %s12674_s14 = smov 94   ;;  %s12640_s16 = smov 122  }
  0x2c   : > { %353 = vperm.xlu0 %9201, %v346_v1   ;;  %363 = vperm.xlu1 %9202, %v348_v2   ;;  %v349_v4 = vld [vmem:[%s342_s25 + $0x18] sm:$0xff]  ;;  %v9278_v7 = vld [vmem:[%s12805_s2] ss:$0 sm:$0xff]  ;;  %s12682_s25 = smov 110   ;;  %s12672_s17 = smov 106  }
  0x2d   : > { %v9279_v8 = vld [vmem:[%s12806_s3] ss:$0 sm:$0xff]  ;;  %s12628_s21 = smov 92   ;;  %s12632_s22 = smov 104  }
  0x2e   : > { %v386_v11 = vld [vmem:[%s12807_s1] sm:$0xff]  ;;  %s12634_s23 = smov 120   ;;  %s12840_s5 = sld [smem:[#allocation95_spill]] }
  0x2f   : > { %s12841_s6 = sld [smem:[#allocation96_spill]]  ;;  %s12858_s0 = smov 88  }
  0x30   : > { %s12860_s1 = smov 100   ;;  %s12863_s2 = smov 86  }
  0x31   : > { %s12864_s3 = smov 116   ;;  %s12866_s18 = smov 98  }
  0x32   : > { %s12870_s11 = smov 84   ;;  %s12871_s15 = smov 114  }
  0x33   : > { %s12876_s20 = smov 82   ;;  %s12877_s30 = smov 2  }
  0x34   : > { %358 = vperm.xlu0 %9201, %v347_v3   ;;  %368 = vperm.xlu1 %9202, %v349_v4   ;;  %s12878_s12 = smov 6   ;;  %s12879_s19 = smov 10  }
  0x35   : > { %s12880_s8 = smov 8   ;;  %s12881_s9 = smov 4  }
  0x36   : > { %s12882_s13 = smov 12   ;;  %s12885_s10 = smov 14  }
  0x9e   : > { %v354_v9 = vpop.permute.xlu0 %353  ;;  %v364_v14 = vpop.permute.xlu1 %363 }
  0x9f   : > { %v374_v10 = vmul.f32 %v9278_v7, %v354_v9  ;;  %v376_v17 = vmul.f32 %v9278_v7, %v364_v14 }
  0xa1   : > { %v382_v12 = vadd.f32 %v9279_v8, %v374_v10  ;;  %v384_v20 = vadd.f32 %v9279_v8, %v376_v17 }
  0xa3   : > { %v9968_v13 = vadd.f32 %v386_v11, %v382_v12  ;;  %v9976_v22 = vadd.f32 %v386_v11, %v384_v20 }
  0xa5   : > { %8736 = vmatmul.msk.f32.vlgmr.msra.gmra.mxu0 %vm393_vm0, %v9968_v13 }
  0xa6   : > { %v359_v15 = vpop.permute.xlu0 %358  ;;  %v369_v21 = vpop.permute.xlu1 %368 }
  0xa7   : > { %v375_v16 = vmul.f32 %v9278_v7, %v359_v15  ;;  %v377_v23 = vmul.f32 %v9278_v7, %v369_v21 }
  0xa9   : > { %v383_v18 = vadd.f32 %v9279_v8, %v375_v16  ;;  %v385_v24 = vadd.f32 %v9279_v8, %v377_v23 }
  0xab   : > { %v9972_v19 = vadd.f32 %v386_v11, %v383_v18  ;;  %v9980_v25 = vadd.f32 %v386_v11, %v385_v24 }
  0xad   : > { %8737 = vmatmul.msk.f32.gmra.mxu0 %vm393_vm0, %v9972_v19 }
  0xb5   : > { %8738 = vmatmul.msk.f32.gmra.mxu0 %vm393_vm0, %v9976_v22 }
  0xbd   : > { %8739 = vmatmul.msk.f32.gmra.mxu0 %vm393_vm0, %v9980_v25 }
 0x122   : > { %v9984_v26 = vpop.f32.mrf.mxu0 }
 0x12a   : > { %v9986_v27 = vpop.f32.mrf.mxu0 }
 0x12b   : > { %464 = vrot.lane.b32.xlu2 %v9986_v27, %s12701_s24  ;;  %v9203_v46 = vpack.i.bf16 %v9984_v26, %v9986_v27 }
 0x132   : > { %v9990_v28 = vpop.f32.mrf.mxu0 }
 0x133   : > { %436 = vrot.lane.b32.xlu2 %v9984_v26, %s12701_s24  ;;  %491 = vrot.lane.b32.xlu0 %v9990_v28, %s12701_s24 }
 0x13a   : > { %v9996_v29 = vpop.f32.mrf.mxu0 }
 0x13b   : > { %518 = vrot.lane.b32.xlu1 %v9996_v29, %s12701_s24  ;;  %v9208_v47 = vpack.i.bf16 %v9996_v29, %v9990_v28 }
 0x185   : > { %v465_v30 = vpop.permute.xlu2 %464 }
 0x186   : > { %8742 = vmatpush.xpose.msk.msra.mxu2 %vm438_vm1, %v465_v30 }
 0x189   : > { %8743 = vmatmul.msk.f32.vlgmr.msra.gmra.mxu2 %vm438_vm1, %v9986_v27 }
 0x18d   : > { %v437_v31 = vpop.permute.xlu2 %436 }
 0x18e   : > { %8740 = vmatpush.xpose.msk.msra.mxu1 %vm438_vm1, %v437_v31 }
 0x191   : > { %8741 = vmatmul.msk.f32.vlgmr.msra.gmra.mxu1 %vm438_vm1, %v9984_v26 }
 0x1a5   : > { %v492_v32 = vpop.permute.xlu0 %491 }
 0x1a6   : > { %8744 = vmatpush.xpose.msk.msra.mxu3 %vm438_vm1, %v492_v32 }
 0x1a9   : > { %8745 = vmatmul.msk.f32.vlgmr.msra.gmra.mxu3 %vm438_vm1, %v9990_v28 }
 0x1ad   : > { %v519_v33 = vpop.permute.xlu1 %518 }
 0x1ae   : > { %8746 = vmatpush.xpose.msk.msrb.mxu1 %vm438_vm1, %v519_v33 }
 0x1b1   : > { %8747 = vmatmul.msk.f32.vlgmr.msrb.gmra.mxu1 %vm438_vm1, %v9996_v29 }
 0x20c   : > { %v487_v34 = vpop.f32.mrf.mxu2 }
 0x20d   : > { %v545_v35 = vmul.f32 0.70710677, %v487_v34 }
 0x20e   : > { %v460_v36 = vpop.f32.mrf.mxu1 }
 0x20f   : > { %v544_v37 = vmul.f32 0.70710677, %v460_v36  ;;  %v552_v38 = vsel %vm548_vm2, %v545_v35, -inf }
 0x210   : > { %553 = vmax.xlane.f32.xlu2 %v552_v38 }
 0x211   : > { %v549_v39 = vsel %vm548_vm2, %v544_v37, -inf }
 0x212   : > { %550 = vmax.xlane.f32.xlu0 %v549_v39 }
 0x226   : > { %699 = vrot.lane.b32.xlu0 %v9984_v26, %s12682_s25 }
 0x22c   : > { %v514_v40 = vpop.f32.mrf.mxu3 }
 0x22d   : > { %v546_v41 = vmul.f32 0.70710677, %v514_v40 }
 0x22e   : > { %727 = vrot.lane.b32.xlu0 %v9986_v27, %s12682_s25  ;;  %v541_v42 = vpop.f32.mrf.mxu1 }
 0x22f   : > { %v547_v43 = vmul.f32 0.70710677, %v541_v42  ;;  %v555_v44 = vsel %vm548_vm2, %v546_v41, -inf }
 0x230   : > { %556 = vmax.xlane.f32.xlu1 %v555_v44 }
 0x231   : > { %v558_v45 = vsel %vm548_vm2, %v547_v43, -inf }
 0x232   : > { %559 = vmax.xlane.f32.xlu2 %v558_v45 }
 0x236   : > { %725 = vrot.lane.b32.xlu0 %v9986_v27, %s12696_s26 }
 0x249   : > { %9204 = vrot.lane.b32.xlu1 %v9203_v46, %s12698_s27 }
 0x24a   : > { %697 = vrot.lane.b32.xlu2 %v9984_v26, %s12696_s26 }
 0x251   : > { %9209 = vrot.lane.b32.xlu1 %v9208_v47, %s12698_s27 }
 0x259   : > { %755 = vrot.lane.b32.xlu1 %v9990_v28, %s12682_s25 }
 0x261   : > { %753 = vrot.lane.b32.xlu1 %v9990_v28, %s12696_s26 }
 0x283   : > { %v554_v48 = vpop.xlane.xlu2 %553 }
 0x284   : > { %v562_v49 = vsub.f32 %v545_v35, %v554_v48  ;;  %v10083_v48 = vpack.i.bf16 %v9986_v27, %v9984_v26 }
 0x285   : > { %v551_v50 = vpop.xlane.xlu0 %550 }
 0x286   : > { %v567_v51 = vmul.f32 1.442695, %v562_v49  ;;  %v561_v52 = vsub.f32 %v544_v37, %v551_v50 }
 0x288   : > { %9280 = vpow2.f32 %v567_v51  ;;  %v565_v53 = vmul.f32 1.442695, %v561_v52 }
 0x28a   : > { %9282 = vpow2.f32 %v565_v53 }
 0x28e   : > { %v9281_v54 = vpop.eup %9280 }
 0x28f   : > { %v576_v55 = vsel %vm548_vm2, %v9281_v54, 0.0 }
 0x290   : > { %v9283_v56 = vpop.eup %9282  ;;  %577 = vadd.xlane.f32.xlu2 %v576_v55 }
 0x291   : > { %v573_v57 = vsel %vm548_vm2, %v9283_v56, 0.0 }
 0x292   : > { %574 = vadd.xlane.f32.xlu0 %v573_v57 }
 0x298   : > { %v700_v5 = vpop.permute.xlu0 %699 }
 0x2a0   : > { %v728_v11 = vpop.permute.xlu0 %727 }
 0x2a3   : > { %v557_v58 = vpop.xlane.xlu1 %556 }
 0x2a4   : > { %v563_v59 = vsub.f32 %v546_v41, %v557_v58 }
 0x2a5   : > { %v560_v60 = vpop.xlane.xlu2 %559 }
 0x2a6   : > { %v569_v61 = vmul.f32 1.442695, %v563_v59  ;;  %v564_v62 = vsub.f32 %v547_v43, %v560_v60  ;;  %783 = vrot.lane.b32.xlu0 %v9996_v29, %s12682_s25  ;;  %s12848_s25 = smov 124  }
 0x2a8   : > { %9284 = vpow2.f32 %v569_v61  ;;  %v571_v63 = vmul.f32 1.442695, %v564_v62  ;;  %v726_v14 = vpop.permute.xlu0 %725 }
 0x2aa   : > { %9286 = vpow2.f32 %v571_v63 }
 0x2ad   : > { %v698_v12 = vpop.permute.xlu2 %697 }
 0x2ae   : > { %v9285_v0 = vpop.eup %9284  ;;  %963 = vrot.lane.b32.xlu0 %v9984_v26, %s12680_s28 }
 0x2af   : > { %v579_v1 = vsel %vm548_vm2, %v9285_v0, 0.0 }
 0x2b0   : > { %580 = vadd.xlane.f32.xlu2 %v579_v1  ;;  %v9287_v2 = vpop.eup %9286 }
 0x2b1   : > { %v582_v3 = vsel %vm548_vm2, %v9287_v2, 0.0 }
 0x2b6   : > { %991 = vrot.lane.b32.xlu0 %v9986_v27, %s12680_s28 }
 0x2b8   : > { %583 = vadd.xlane.f32.xlu2 %v582_v3 }
 0x2bb   : > { %v9205_v4 = vpop.permute.xlu1 %9204 }
 0x2bc   : > { %v9207_v6 = vunpack.i.h.bf16 %v9205_v4  ;;  %v9206_v7 = vunpack.i.l.bf16 %v9205_v4 }
 0x2be   : > { %614 = vmatpush.msrb.mxu2 %v9207_v6  ;;  %640 = vmatpush.msrb.mxu3 %v9206_v7 }
 0x2c0   : > { %8752 = vmatpush.xpose.msk.msra.mxu3 %vm438_vm1, %v700_v5 }
 0x2c3   : > { %v9210_v8 = vpop.permute.xlu1 %9209 }
 0x2c4   : > { %v9212_v9 = vunpack.i.h.bf16 %v9210_v8  ;;  %v9211_v10 = vunpack.i.l.bf16 %v9210_v8 }
 0x2c6   : > { %666 = vmatpush.msra.mxu1 %v9211_v10  ;;  %692 = vmatpush.msra.mxu2 %v9212_v9 }
 0x2c8   : > { %8754 = vmatpush.xpose.msk.msrb.mxu1 %vm438_vm1, %v728_v11 }
 0x2cb   : > { %v756_v23 = vpop.permute.xlu1 %755 }
 0x2d0   : > { %781 = vrot.lane.b32.xlu2 %v9996_v29, %s12696_s26 }
 0x2d3   : > { %v754_v39 = vpop.permute.xlu1 %753 }
 0x2d8   : > { %961 = vrot.lane.b32.xlu2 %v9984_v26, %s12676_s29 }
 0x303   : > { %v578_v15 = vpop.xlane.xlu2 %577 }
 0x304   : > { %9288 = vrcp.f32 %v578_v15 }
 0x305   : > { %v575_v16 = vpop.xlane.xlu0 %574 }
 0x306   : > { %9290 = vrcp.f32 %v575_v16 }
 0x30a   : > { %v9289_v17 = vpop.eup %9288 }
 0x30b   : > { %v10050_v18 = vmul.f32 %v9289_v17, %v9281_v54 }
 0x30c   : > { %v9291_v20 = vpop.eup %9290 }
 0x30d   : > { %12808 = vst [vmem:[#allocation17_spill] sm:$0xff] %v10050_v18  ;;  %8749 = vmatmul.msk.f32.vlgmr.msrb.gmra.mxu3 %vm548_vm2, %v10050_v18  ;;  %v10054_v21 = vmul.f32 %v9291_v20, %v9283_v56 }
 0x30f   : > { %12809 = vst [vmem:[#allocation18_spill] sm:$0xff] %v10054_v21  ;;  %8748 = vmatmul.msk.f32.vlgmr.msrb.gmra.mxu2 %vm548_vm2, %v10054_v21 }
 0x310   : > { %8756 = vmatpush.xpose.msk.msrb.mxu2 %vm438_vm1, %v756_v23 }
 0x315   : > { %8753 = vmatmul.msk.f32.vlgmr.msra.gmra.mxu3 %vm438_vm1, %v698_v12 }
 0x318   : > { %v784_v24 = vpop.permute.xlu0 %783 }
 0x319   : > { %8758 = vmatpush.xpose.msk.msrb.mxu3 %vm438_vm1, %v784_v24 }
 0x320   : > { %v964_v30 = vpop.permute.xlu0 %963 }
 0x321   : > { %8764 = vmatpush.xpose.msk.msrb.mxu0 %vm438_vm1, %v964_v30 }
 0x323   : > { %v581_v31 = vpop.xlane.xlu2 %580 }
 0x324   : > { %9292 = vrcp.f32 %v581_v31 }
 0x328   : > { %v992_v62 = vpop.permute.xlu0 %991 }
 0x32a   : > { %v9293_v32 = vpop.eup %9292 }
 0x32b   : > { %v10062_v33 = vmul.f32 %v9293_v32, %v9285_v0  ;;  %v584_v34 = vpop.xlane.xlu2 %583 }
 0x32c   : > { %9294 = vrcp.f32 %v584_v34 }
 0x32d   : > { %12810 = vst [vmem:[#allocation19_spill] sm:$0xff] %v10062_v33  ;;  %8750 = vmatmul.msk.f32.vlgmr.msra.gmra.mxu1 %vm548_vm2, %v10062_v33 }
 0x332   : > { %v9295_v35 = vpop.eup %9294 }
 0x333   : > { %v10066_v36 = vmul.f32 %v9295_v35, %v9287_v2  ;;  %v782_v37 = vpop.permute.xlu2 %781 }
 0x334   : > { %8759 = vmatmul.msk.f32.vlgmr.msrb.gmra.mxu3 %vm438_vm1, %v782_v37 }
 0x335   : > { %12811 = vst [vmem:[#allocation20_spill] sm:$0xff] %v10066_v36  ;;  %8751 = vmatmul.msk.f32.vlgmr.msra.gmra.mxu2 %vm548_vm2, %v10066_v36  ;;  %8755 = vmatmul.msk.f32.vlgmr.msrb.gmra.mxu1 %vm438_vm1, %v726_v14 }
 0x33b   : > { %v962_v38 = vpop.permute.xlu2 %961 }
 0x33c   : > { %8765 = vmatmul.msk.f32.vlgmr.msrb.gmra.mxu0 %vm438_vm1, %v962_v38 }
 0x33d   : > { %8757 = vmatmul.msk.f32.vlgmr.msrb.gmra.mxu2 %vm438_vm1, %v754_v39 }
 0x390   : > { %v10074_v40 = vpop.f32.mrf.mxu3 }
 0x392   : > { %v10079_v45 = vpop.f32.mrf.mxu2 }
 0x398   : > { %v722_v41 = vpop.f32.mrf.mxu3 }
 0x399   : > { %v809_v42 = vmul.f32 0.70710677, %v722_v41 }
 0x39b   : > { %v813_v43 = vsel %vm548_vm2, %v809_v42, -inf }
 0x39c   : > { %814 = vmax.xlane.f32.xlu1 %v813_v43 }
 0x3aa   : > { %v10077_v44 = vpop.f32.mrf.mxu1 }
 0x3b2   : > { %v750_v46 = vpop.f32.mrf.mxu1 }
 0x3b3   : > { %v810_v47 = vmul.f32 0.70710677, %v750_v46 }
 0x3b5   : > { %9214 = vrot.lane.b32.xlu1 %v10083_v48, %s12674_s14  ;;  %v816_v49 = vsel %vm548_vm2, %v810_v47, -inf }
 0x3b6   : > { %817 = vmax.xlane.f32.xlu0 %v816_v49 }
 0x3b7   : > { %v806_v54 = vpop.f32.mrf.mxu3 }
 0x3b8   : > { %v10088_v50 = vpop.f32.mrf.mxu2  ;;  %v812_v55 = vmul.f32 0.70710677, %v806_v54 }
 0x3b9   : > { %v986_v10 = vpop.f32.mrf.mxu0 }
 0x3ba   : > { %v822_v56 = vsel %vm548_vm2, %v812_v55, -inf  ;;  %v1073_v12 = vmul.f32 0.70710677, %v986_v10 }
 0x3bc   : > { %v1077_v15 = vsel %vm548_vm2, %v1073_v12, -inf }
 0x3c0   : > { %v778_v51 = vpop.f32.mrf.mxu2 }
 0x3c1   : > { %v811_v52 = vmul.f32 0.70710677, %v778_v51 }
 0x3c3   : > { %v819_v53 = vsel %vm548_vm2, %v811_v52, -inf }
 0x3c4   : > { %820 = vmax.xlane.f32.xlu2 %v819_v53 }
 0x3ca   : > { %989 = vrot.lane.b32.xlu0 %v9986_v27, %s12676_s29 }
 0x3df   : > { %823 = vmax.xlane.f32.xlu1 %v822_v56 }
 0x3f8   : > { %909 = vrot.lane.b32.xlu1 %v9990_v28, %s12674_s14 }
 0x40f   : > { %v815_v57 = vpop.xlane.xlu1 %814 }
 0x410   : > { %v825_v58 = vsub.f32 %v809_v42, %v815_v57 }
 0x412   : > { %v829_v59 = vmul.f32 1.442695, %v825_v58 }
 0x414   : > { %9296 = vpow2.f32 %v829_v59 }
 0x41a   : > { %v9297_v60 = vpop.eup %9296 }
 0x41b   : > { %v837_v61 = vsel %vm548_vm2, %v9297_v60, 0.0 }
 0x41c   : > { %838 = vadd.xlane.f32.xlu0 %v837_v61 }
 0x427   : > { %v9215_v63 = vpop.permute.xlu1 %9214 }
 0x428   : > { %v9217_v0 = vunpack.i.h.bf16 %v9215_v63  ;;  %v9216_v1 = vunpack.i.l.bf16 %v9215_v63 }
 0x429   : > { %v818_v2 = vpop.xlane.xlu0 %817 }
 0x42a   : > { %v826_v3 = vsub.f32 %v810_v47, %v818_v2  ;;  %878 = vmatpush.msra.mxu1 %v9216_v1 }
 0x42c   : > { %904 = vmatpush.msrb.mxu1 %v9217_v0  ;;  %v831_v4 = vmul.f32 1.442695, %v826_v3 }
 0x42e   : > { %9298 = vpow2.f32 %v831_v4 }
 0x430   : > { %1017 = vrot.lane.b32.xlu0 %v9990_v28, %s12676_s29 }
 0x434   : > { %v9299_v5 = vpop.eup %9298 }
 0x435   : > { %v840_v6 = vsel %vm548_vm2, %v9299_v5, 0.0 }
 0x436   : > { %841 = vadd.xlane.f32.xlu2 %v840_v6 }
 0x437   : > { %v821_v16 = vpop.xlane.xlu2 %820 }
 0x438   : > { %1047 = vrot.lane.b32.xlu0 %v9996_v29, %s12680_s28  ;;  %v827_v20 = vsub.f32 %v811_v52, %v821_v16 }
 0x43a   : > { %v833_v23 = vmul.f32 1.442695, %v827_v20 }
 0x43c   : > { %v990_v31 = vpop.permute.xlu0 %989 }
 0x44e   : > { %1019 = vrot.lane.b32.xlu2 %v9990_v28, %s12680_s28  ;;  %s12849_s28 = smov 94  }
 0x452   : > { %v824_v7 = vpop.xlane.xlu1 %823 }
 0x453   : > { %v828_v8 = vsub.f32 %v812_v55, %v824_v7 }
 0x455   : > { %v835_v9 = vmul.f32 1.442695, %v828_v8 }
 0x456   : > { %935 = vrot.lane.b32.xlu2 %v9996_v29, %s12674_s14  ;;  %s12690_s14 = smov 8  }
 0x457   : > { %9300 = vpow2.f32 %v835_v9 }
 0x458   : > { %9302 = vpow2.f32 %v833_v23 }
 0x45d   : > { %v9301_v11 = vpop.eup %9300 }
 0x45e   : > { %v846_v14 = vsel %vm548_vm2, %v9301_v11, 0.0  ;;  %v9303_v24 = vpop.eup %9302 }
 0x45f   : > { %847 = vadd.xlane.f32.xlu1 %v846_v14  ;;  %v843_v30 = vsel %vm548_vm2, %v9303_v24, 0.0 }
 0x462   : > { %1078 = vmax.xlane.f32.xlu0 %v1077_v15 }
 0x46a   : > { %v910_v17 = vpop.permute.xlu1 %909 }
 0x46b   : > { %930 = vmatpush.msra.mxu2 %v910_v17 }
 0x476   : > { %1225 = vrot.lane.b32.xlu0 %v9984_v26, %s12640_s16 }
 0x47e   : > { %1255 = vrot.lane.b32.xlu0 %v9986_v27, %s12672_s17 }
 0x47f   : > { %844 = vadd.xlane.f32.xlu2 %v843_v30 }
 0x486   : > { %1173 = vrot.lane.b32.xlu0 %v9990_v28, %s12628_s21 }
 0x48f   : > { %v839_v32 = vpop.xlane.xlu0 %838 }
 0x490   : > { %9304 = vrcp.f32 %v839_v32 }
 0x496   : > { %v9305_v34 = vpop.eup %9304 }
 0x497   : > { %v10115_v35 = vmul.f32 %v9305_v34, %v9297_v60  ;;  %1045 = vrot.lane.b32.xlu2 %v9996_v29, %s12676_s29  ;;  %s12694_s29 = smov 6  }
 0x499   : > { %12812 = vst [vmem:[#allocation21_spill] sm:$0xff] %v10115_v35  ;;  %8760 = vmatmul.msk.f32.vlgmr.msra.gmra.mxu1 %vm548_vm2, %v10115_v35 }
 0x49a   : > { %8766 = vmatpush.xpose.msk.msra.mxu1 %vm438_vm1, %v992_v62 }
 0x4a2   : > { %v1018_v39 = vpop.permute.xlu0 %1017 }
 0x4a9   : > { %v842_v37 = vpop.xlane.xlu2 %841 }
 0x4aa   : > { %9306 = vrcp.f32 %v842_v37  ;;  %v1048_v46 = vpop.permute.xlu0 %1047 }
 0x4b0   : > { %v9307_v38 = vpop.eup %9306 }
 0x4b1   : > { %v10122_v41 = vmul.f32 %v9307_v38, %v9299_v5  ;;  %v1020_v42 = vpop.permute.xlu2 %1019 }
 0x4b2   : > { %8768 = vmatpush.xpose.msk.msrb.mxu2 %vm438_vm1, %v1020_v42 }
 0x4b3   : > { %12813 = vst [vmem:[#allocation22_spill] sm:$0xff] %v10122_v41  ;;  %8761 = vmatmul.msk.f32.vlgmr.msrb.gmra.mxu1 %vm548_vm2, %v10122_v41 }
 0x4b9   : > { %v936_v43 = vpop.permute.xlu2 %935 }
 0x4ba   : > { %956 = vmatpush.msra.mxu3 %v936_v43 }
 0x4bb   : > { %8767 = vmatmul.msk.f32.vlgmr.msra.gmra.mxu1 %vm438_vm1, %v990_v31 }
 0x4bc   : > { %8770 = vmatpush.xpose.msk.msrb.mxu3 %vm438_vm1, %v1048_v46 }
 0x4d2   : > { %v848_v47 = vpop.xlane.xlu1 %847 }
 0x4d3   : > { %9308 = vrcp.f32 %v848_v47 }
 0x4d5   : > { %v1079_v49 = vpop.xlane.xlu0 %1078 }
 0x4d6   : > { %v1089_v51 = vsub.f32 %v1073_v12, %v1079_v49 }
 0x4d8   : > { %v1093_v52 = vmul.f32 1.442695, %v1089_v51 }
 0x4d9   : > { %v9309_v53 = vpop.eup %9308 }
 0x4da   : > { %v10129_v54 = vmul.f32 %v9309_v53, %v9301_v11  ;;  %9310 = vpow2.f32 %v1093_v52 }
 0x4dc   : > { %12814 = vst [vmem:[#allocation23_spill] sm:$0xff] %v10129_v54  ;;  %8763 = vmatmul.msk.f32.vlgmr.msra.gmra.mxu3 %vm548_vm2, %v10129_v54 }
 0x4e0   : > { %v10133_v55 = vpop.eup %9310 }
 0x4e1   : > { %v1101_v56 = vsel %vm548_vm2, %v10133_v55, 0.0 }
 0x4e2   : > { %1102 = vadd.xlane.f32.xlu1 %v1101_v56 }
 0x4e8   : > { %v10137_v57 = vpop.permute.xlu0 %1225 }
 0x4f0   : > { %v10139_v58 = vpop.permute.xlu0 %1255 }
 0x4f2   : > { %v845_v59 = vpop.xlane.xlu2 %844 }
 0x4f3   : > { %9312 = vrcp.f32 %v845_v59 }
 0x4f8   : > { %v1174_v63 = vpop.permute.xlu0 %1173 }
 0x4f9   : > { %v9313_v60 = vpop.eup %9312 }
 0x4fa   : > { %v10141_v61 = vmul.f32 %v9313_v60, %v9303_v24  ;;  %v1046_v62 = vpop.permute.xlu2 %1045 }
 0x4fb   : > { %8771 = vmatmul.msk.f32.vlgmr.msrb.gmra.mxu3 %vm438_vm1, %v1046_v62 }
 0x4fc   : > { %12815 = vst [vmem:[#allocation24_spill] sm:$0xff] %v10141_v61  ;;  %8762 = vmatmul.msk.f32.vlgmr.msra.gmra.mxu2 %vm548_vm2, %v10141_v61 }
 0x4fd   : > { %1194 = vmatpush.msra.mxu2 %v1174_v63 }
 0x504   : > { %8769 = vmatmul.msk.f32.vlgmr.msrb.gmra.mxu2 %vm438_vm1, %v1018_v39 }
 0x516   : > { %v10147_v0 = vpop.f32.mrf.mxu1 }
 0x530   : > { %v10149_v1 = vpop.f32.mrf.mxu1 }
 0x538   : > { %v1014_v2 = vpop.f32.mrf.mxu1 }
 0x539   : > { %v1074_v3 = vmul.f32 0.70710677, %v1014_v2 }
 0x53b   : > { %v1080_v4 = vsel %vm548_vm2, %v1074_v3, -inf }
 0x53c   : > { %1081 = vmax.xlane.f32.xlu2 %v1080_v4 }
 0x554   : > { %1227 = vrot.lane.b32.xlu2 %v9984_v26, %s12672_s17 }
 0x555   : > { %v1103_v23 = vpop.xlane.xlu1 %1102 }
 0x55c   : > { %1253 = vrot.lane.b32.xlu2 %v9986_v27, %s12640_s16 }
 0x55f   : > { %v10156_v5 = vpop.f32.mrf.mxu3 }
 0x57e   : > { %v1070_v6 = vpop.f32.mrf.mxu3 }
 0x57f   : > { %v1076_v7 = vmul.f32 0.70710677, %v1070_v6  ;;  %v10158_v8 = vpop.f32.mrf.mxu2 }
 0x581   : > { %v1086_v9 = vsel %vm548_vm2, %v1076_v7, -inf }
 0x582   : > { %1087 = vmax.xlane.f32.xlu1 %v1086_v9 }
 0x587   : > { %v1042_v10 = vpop.f32.mrf.mxu2 }
 0x588   : > { %v1075_v11 = vmul.f32 0.70710677, %v1042_v10 }
 0x58a   : > { %v1083_v12 = vsel %vm548_vm2, %v1075_v11, -inf }
 0x58b   : > { %1084 = vmax.xlane.f32.xlu1 %v1083_v12 }
 0x5a4   : > { %9219 = vrot.lane.b32.xlu1 %v10083_v48, %s12628_s21 }
 0x5af   : > { %v1082_v14 = vpop.xlane.xlu2 %1081 }
 0x5b0   : > { %v1090_v15 = vsub.f32 %v1074_v3, %v1082_v14 }
 0x5b2   : > { %v1095_v16 = vmul.f32 1.442695, %v1090_v15 }
 0x5b4   : > { %9314 = vpow2.f32 %v1095_v16 }
 0x5b7   : > { %v1228_v53 = vpop.permute.xlu2 %1227 }
 0x5ba   : > { %v9315_v17 = vpop.eup %9314 }
 0x5bb   : > { %v1104_v20 = vsel %vm548_vm2, %v9315_v17, 0.0 }
 0x5bc   : > { %1105 = vadd.xlane.f32.xlu0 %v1104_v20 }
 0x5bf   : > { %v1254_v60 = vpop.permute.xlu2 %1253 }
 0x5d0   : > { %1283 = vrot.lane.b32.xlu0 %v9990_v28, %s12672_s17 }
 0x5d8   : > { %1281 = vrot.lane.b32.xlu0 %v9990_v28, %s12640_s16 }
 0x5e0   : > { %1199 = vrot.lane.b32.xlu0 %v9996_v29, %s12628_s21  ;;  %s12630_s21 = smov 90  }
 0x5e8   : > { %1311 = vrot.lane.b32.xlu0 %v9996_v29, %s12672_s17  ;;  %s12703_s17 = smov 2  }
 0x5f5   : > { %v1088_v24 = vpop.xlane.xlu1 %1087 }
 0x5f6   : > { %v1092_v30 = vsub.f32 %v1076_v7, %v1088_v24 }
 0x5f8   : > { %v1099_v31 = vmul.f32 1.442695, %v1092_v30 }
 0x5fa   : > { %9316 = vpow2.f32 %v1099_v31 }
 0x5fe   : > { %v1085_v32 = vpop.xlane.xlu1 %1084 }
 0x5ff   : > { %v1091_v34 = vsub.f32 %v1075_v11, %v1085_v32 }
 0x600   : > { %v9317_v37 = vpop.eup %9316 }
 0x601   : > { %v1097_v38 = vmul.f32 1.442695, %v1091_v34  ;;  %v1110_v39 = vsel %vm548_vm2, %v9317_v37, 0.0 }
 0x602   : > { %1111 = vadd.xlane.f32.xlu2 %v1110_v39 }
 0x603   : > { %9318 = vpow2.f32 %v1097_v38 }
 0x604   : > { %9320 = vrcp.f32 %v1103_v23 }
 0x609   : > { %v9319_v42 = vpop.eup %9318 }
 0x60a   : > { %v1107_v43 = vsel %vm548_vm2, %v9319_v42, 0.0  ;;  %v9321_v46 = vpop.eup %9320 }
 0x60b   : > { %1108 = vadd.xlane.f32.xlu1 %v1107_v43  ;;  %v10176_v52 = vmul.f32 %v9321_v46, %v10133_v55 }
 0x60d   : > { %12816 = vst [vmem:[#allocation25_spill] sm:$0xff] %v10176_v52 }
 0x616   : > { %v9220_v47 = vpop.permute.xlu1 %9219 }
 0x617   : > { %v9222_v49 = vunpack.i.h.bf16 %v9220_v47  ;;  %v9221_v51 = vunpack.i.l.bf16 %v9220_v47 }
 0x619   : > { %1142 = vmatpush.msra.mxu0 %v9221_v51  ;;  %1168 = vmatpush.msrb.mxu1 %v9222_v49 }
 0x61a   : > { %8772 = vmatmul.msk.f32.vlgmr.msra.gmra.mxu0 %vm548_vm2, %v10176_v52 }
 0x61b   : > { %8778 = vmatpush.xpose.msk.msra.mxu1 %vm438_vm1, %v10139_v58  ;;  %8776 = vmatpush.xpose.msk.msrb.mxu0 %vm438_vm1, %v1228_v53 }
 0x622   : > { %8777 = vmatmul.msk.f32.vlgmr.msrb.gmra.mxu0 %vm438_vm1, %v10137_v57 }
 0x624   : > { %1309 = vrot.lane.b32.xlu1 %v9996_v29, %s12640_s16  ;;  %s12648_s16 = smov 116  }
 0x62f   : > { %v1106_v56 = vpop.xlane.xlu0 %1105 }
 0x630   : > { %9322 = vrcp.f32 %v1106_v56 }
 0x636   : > { %v9323_v55 = vpop.eup %9322 }
 0x637   : > { %v10187_v59 = vmul.f32 %v9323_v55, %v9315_v17 }
 0x639   : > { %12817 = vst [vmem:[#allocation26_spill] sm:$0xff] %v10187_v59  ;;  %8773 = vmatmul.msk.f32.vlgmr.msrb.gmra.mxu1 %vm548_vm2, %v10187_v59 }
 0x641   : > { %8779 = vmatmul.msk.f32.vlgmr.msra.gmra.mxu1 %vm438_vm1, %v1254_v60 }
 0x642   : > { %v1284_v58 = vpop.permute.xlu0 %1283 }
 0x643   : > { %8780 = vmatpush.xpose.msk.msrb.mxu2 %vm438_vm1, %v1284_v58 }
 0x64a   : > { %v1282_v62 = vpop.permute.xlu0 %1281 }
 0x652   : > { %v1200_v63 = vpop.permute.xlu0 %1199 }
 0x653   : > { %1220 = vmatpush.msra.mxu3 %v1200_v63 }
 0x65a   : > { %v1312_v57 = vpop.permute.xlu0 %1311 }
 0x65b   : > { %8782 = vmatpush.xpose.msk.msrb.mxu3 %vm438_vm1, %v1312_v57 }
 0x675   : > { %v1112_v2 = vpop.xlane.xlu2 %1111 }
 0x676   : > { %9324 = vrcp.f32 %v1112_v2 }
 0x67c   : > { %v9325_v3 = vpop.eup %9324 }
 0x67d   : > { %v10194_v4 = vmul.f32 %v9325_v3, %v9317_v37 }
 0x67e   : > { %v1109_v6 = vpop.xlane.xlu1 %1108 }
 0x67f   : > { %12818 = vst [vmem:[#allocation27_spill] sm:$0xff] %v10194_v4  ;;  %9326 = vrcp.f32 %v1109_v6  ;;  %8775 = vmatmul.msk.f32.vlgmr.msra.gmra.mxu3 %vm548_vm2, %v10194_v4 }
 0x685   : > { %v9327_v7 = vpop.eup %9326 }
 0x686   : > { %v10198_v9 = vmul.f32 %v9327_v7, %v9319_v42 }
 0x688   : > { %12819 = vst [vmem:[#allocation28_spill] sm:$0xff] %v10198_v9  ;;  %8774 = vmatmul.msk.f32.vlgmr.msra.gmra.mxu2 %vm548_vm2, %v10198_v9 }
 0x690   : > { %8781 = vmatmul.msk.f32.vlgmr.msrb.gmra.mxu2 %vm438_vm1, %v1282_v62 }
 0x696   : > { %v1310_v10 = vpop.permute.xlu1 %1309 }
 0x697   : > { %v10203_v11 = vpop.f32.mrf.mxu0  ;;  %8783 = vmatmul.msk.f32.vlgmr.msrb.gmra.mxu3 %vm438_vm1, %v1310_v10 }
 0x69f   : > { %v1250_v12 = vpop.f32.mrf.mxu0 }
 0x6a0   : > { %v1337_v14 = vmul.f32 0.70710677, %v1250_v12 }
 0x6a2   : > { %v1341_v15 = vsel %vm548_vm2, %v1337_v14, -inf }
 0x6a3   : > { %1342 = vmax.xlane.f32.xlu0 %v1341_v15 }
 0x6b6   : > { %v10229_v42 = vpop.f32.mrf.mxu1 }
 0x6b7   : > { %1491 = vrot.lane.b32.xlu0 %v9984_v26, %s12632_s22 }
 0x6be   : > { %v1278_v46 = vpop.f32.mrf.mxu1 }
 0x6bf   : > { %1517 = vrot.lane.b32.xlu0 %v9986_v27, %s12634_s23  ;;  %v1338_v47 = vmul.f32 0.70710677, %v1278_v46 }
 0x6c1   : > { %v1344_v49 = vsel %vm548_vm2, %v1338_v47, -inf }
 0x6c7   : > { %1437 = vrot.lane.b32.xlu0 %v9990_v28, %s12630_s21 }
 0x702   : > { %v10213_v16 = vpop.f32.mrf.mxu3 }
 0x70b   : > { %v10233_v43 = vpop.f32.mrf.mxu2 }
 0x713   : > { %v1306_v51 = vpop.f32.mrf.mxu2 }
 0x714   : > { %v1339_v53 = vmul.f32 0.70710677, %v1306_v51 }
 0x716   : > { %v1343_v17 = vpop.xlane.xlu0 %1342  ;;  %v1347_v56 = vsel %vm548_vm2, %v1339_v53, -inf }
 0x717   : > { %v1353_v20 = vsub.f32 %v1337_v14, %v1343_v17 }
 0x719   : > { %v1357_v23 = vmul.f32 1.442695, %v1353_v20 }
 0x71a   : > { %v1334_v24 = vpop.f32.mrf.mxu3 }
 0x71b   : > { %9328 = vpow2.f32 %v1357_v23  ;;  %v1340_v30 = vmul.f32 0.70710677, %v1334_v24 }
 0x71d   : > { %v1350_v31 = vsel %vm548_vm2, %v1340_v30, -inf }
 0x71e   : > { %1351 = vmax.xlane.f32.xlu1 %v1350_v31 }
 0x721   : > { %v9329_v32 = vpop.eup %9328 }
 0x722   : > { %v1365_v34 = vsel %vm548_vm2, %v9329_v32, 0.0 }
 0x723   : > { %1366 = vadd.xlane.f32.xlu2 %v1365_v34 }
 0x729   : > { %v1492_v37 = vpop.permute.xlu0 %1491 }
 0x731   : > { %v10217_v38 = vpop.permute.xlu0 %1517 }
 0x737   : > { %1519 = vrot.lane.b32.xlu1 %v9986_v27, %s12632_s22 }
 0x739   : > { %v1438_v39 = vpop.permute.xlu0 %1437 }
 0x73a   : > { %1458 = vmatpush.msra.mxu2 %v1438_v39 }
 0x73b   : > { %9224 = vrot.lane.b32.xlu2 %v10083_v48, %s12630_s21 }
 0x73f   : > { %1547 = vrot.lane.b32.xlu1 %v9990_v28, %s12632_s22 }
 0x747   : > { %1545 = vrot.lane.b32.xlu1 %v9990_v28, %s12634_s23 }
 0x74f   : > { %1463 = vrot.lane.b32.xlu1 %v9996_v29, %s12630_s21  ;;  %s12638_s21 = smov 102  }
 0x757   : > { %1573 = vrot.lane.b32.xlu1 %v9996_v29, %s12634_s23 }
 0x764   : > { %1345 = vmax.xlane.f32.xlu2 %v1344_v49 }
 0x76c   : > { %1348 = vmax.xlane.f32.xlu2 %v1347_v56 }
 0x784   : > { %1489 = vrot.lane.b32.xlu2 %v9984_v26, %s12634_s23  ;;  %s12670_s23 = smov 118  }
 0x791   : > { %v1352_v55 = vpop.xlane.xlu1 %1351 }
 0x792   : > { %v1356_v60 = vsub.f32 %v1340_v30, %v1352_v55 }
 0x794   : > { %v1363_v58 = vmul.f32 1.442695, %v1356_v60 }
 0x796   : > { %9330 = vpow2.f32 %v1363_v58  ;;  %v1367_v62 = vpop.xlane.xlu2 %1366 }
 0x797   : > { %9332 = vrcp.f32 %v1367_v62 }
 0x79c   : > { %v9331_v63 = vpop.eup %9330 }
 0x79d   : > { %v9333_v57 = vpop.eup %9332  ;;  %v1374_v2 = vsel %vm548_vm2, %v9331_v63, 0.0 }
 0x79e   : > { %1375 = vadd.xlane.f32.xlu0 %v1374_v2  ;;  %v9225_v3 = vpop.permute.xlu2 %9224  ;;  %v10240_v10 = vmul.f32 %v9333_v57, %v9329_v32 }
 0x79f   : > { %v9227_v6 = vunpack.i.h.bf16 %v9225_v3  ;;  %v9226_v7 = vunpack.i.l.bf16 %v9225_v3 }
 0x7a0   : > { %12820 = vst [vmem:[#allocation29_spill] sm:$0xff] %v10240_v10 }
 0x7a1   : > { %1406 = vmatpush.msra.mxu0 %v9226_v7  ;;  %1432 = vmatpush.msrb.mxu1 %v9227_v6 }
 0x7a2   : > { %8784 = vmatmul.msk.f32.vlgmr.msra.gmra.mxu0 %vm548_vm2, %v10240_v10 }
 0x7a3   : > { %8788 = vmatpush.xpose.msk.msrb.mxu0 %vm438_vm1, %v1492_v37 }
 0x7a9   : > { %v1520_v12 = vpop.permute.xlu1 %1519 }
 0x7aa   : > { %8790 = vmatpush.xpose.msk.msra.mxu1 %vm438_vm1, %v1520_v12 }
 0x7b1   : > { %v1548_v14 = vpop.permute.xlu1 %1547 }
 0x7b2   : > { %8792 = vmatpush.xpose.msk.msrb.mxu2 %vm438_vm1, %v1548_v14 }
 0x7b9   : > { %v1546_v15 = vpop.permute.xlu1 %1545 }
 0x7c1   : > { %v1464_v17 = vpop.permute.xlu1 %1463 }
 0x7c2   : > { %1484 = vmatpush.msra.mxu3 %v1464_v17 }
 0x7c9   : > { %v1574_v12 = vpop.permute.xlu1 %1573 }
 0x7d7   : > { %v1346_v20 = vpop.xlane.xlu2 %1345 }
 0x7d8   : > { %v1354_v23 = vsub.f32 %v1338_v47, %v1346_v20 }
 0x7da   : > { %v1359_v24 = vmul.f32 1.442695, %v1354_v23 }
 0x7dc   : > { %9334 = vpow2.f32 %v1359_v24 }
 0x7df   : > { %v1349_v30 = vpop.xlane.xlu2 %1348 }
 0x7e0   : > { %v1355_v31 = vsub.f32 %v1339_v53, %v1349_v30 }
 0x7e2   : > { %v9335_v32 = vpop.eup %9334  ;;  %v1361_v34 = vmul.f32 1.442695, %v1355_v31 }
 0x7e3   : > { %v1368_v39 = vsel %vm548_vm2, %v9335_v32, 0.0 }
 0x7e4   : > { %9336 = vpow2.f32 %v1361_v34  ;;  %1369 = vadd.xlane.f32.xlu2 %v1368_v39 }
 0x7e7   : > { %v1490_v37 = vpop.permute.xlu2 %1489 }
 0x7e8   : > { %8789 = vmatmul.msk.f32.vlgmr.msrb.gmra.mxu0 %vm438_vm1, %v1490_v37 }
 0x7ea   : > { %v9337_v46 = vpop.eup %9336 }
 0x7eb   : > { %v1371_v49 = vsel %vm548_vm2, %v9337_v46, 0.0 }
 0x7ec   : > { %1372 = vadd.xlane.f32.xlu2 %v1371_v49 }
 0x804   : > { %1575 = vrot.lane.b32.xlu2 %v9996_v29, %s12632_s22  ;;  %s12636_s22 = smov 88  }
 0x811   : > { %v1376_v47 = vpop.xlane.xlu0 %1375 }
 0x812   : > { %9338 = vrcp.f32 %v1376_v47 }
 0x818   : > { %v9339_v51 = vpop.eup %9338 }
 0x819   : > { %v10252_v53 = vmul.f32 %v9339_v51, %v9331_v63 }
 0x81b   : > { %12821 = vst [vmem:[#allocation30_spill] sm:$0xff] %v10252_v53  ;;  %8787 = vmatmul.msk.f32.vlgmr.msra.gmra.mxu3 %vm548_vm2, %v10252_v53 }
 0x81f   : > { %v10256_v55 = vpop.f32.mrf.mxu0 }
 0x857   : > { %v1370_v56 = vpop.xlane.xlu2 %1369 }
 0x858   : > { %9340 = vrcp.f32 %v1370_v56 }
 0x85e   : > { %v9341_v60 = vpop.eup %9340 }
 0x85f   : > { %v10258_v58 = vmul.f32 %v9341_v60, %v9335_v32  ;;  %v1373_v62 = vpop.xlane.xlu2 %1372 }
 0x860   : > { %9342 = vrcp.f32 %v1373_v62 }
 0x861   : > { %12822 = vst [vmem:[#allocation31_spill] sm:$0xff] %v10258_v58  ;;  %8785 = vmatmul.msk.f32.vlgmr.msrb.gmra.mxu1 %vm548_vm2, %v10258_v58 }
 0x865   : > { %v1514_v57 = vpop.f32.mrf.mxu0 }
 0x866   : > { %v9343_v2 = vpop.eup %9342  ;;  %v1601_v3 = vmul.f32 0.70710677, %v1514_v57 }
 0x867   : > { %v10262_v63 = vmul.f32 %v9343_v2, %v9337_v46  ;;  %v1576_v6 = vpop.permute.xlu2 %1575 }
 0x868   : > { %8794 = vmatpush.xpose.msk.msrb.mxu3 %vm438_vm1, %v1576_v6  ;;  %v1605_v7 = vsel %vm548_vm2, %v1601_v3, -inf }
 0x869   : > { %12823 = vst [vmem:[#allocation32_spill] sm:$0xff] %v10262_v63  ;;  %1606 = vmax.xlane.f32.xlu1 %v1605_v7  ;;  %8786 = vmatmul.msk.f32.vlgmr.msra.gmra.mxu2 %vm548_vm2, %v10262_v63 }
 0x86a   : > { %8791 = vmatmul.msk.f32.vlgmr.msra.gmra.mxu1 %vm438_vm1, %v10217_v38 }
 0x86b   : > { %8795 = vmatmul.msk.f32.vlgmr.msrb.gmra.mxu3 %vm438_vm1, %v1574_v12 }
 0x871   : > { %8793 = vmatmul.msk.f32.vlgmr.msrb.gmra.mxu2 %vm438_vm1, %v1546_v15 }
 0x882   : > { %1755 = vrot.lane.b32.xlu1 %v9984_v26, %s12638_s21 }
 0x89e   : > { %v10274_v23 = vpop.f32.mrf.mxu3 }
 0x8dc   : > { %v1607_v14 = vpop.xlane.xlu1 %1606 }
 0x8dd   : > { %v1617_v17 = vsub.f32 %v1601_v3, %v1607_v14 }
 0x8de   : > { %v10288_v15 = vpop.f32.mrf.mxu1 }
 0x8df   : > { %v1621_v20 = vmul.f32 1.442695, %v1617_v17 }
 0x8e1   : > { %9344 = vpow2.f32 %v1621_v20 }
 0x8e7   : > { %v9345_v24 = vpop.eup %9344  ;;  %v1542_v34 = vpop.f32.mrf.mxu1 }
 0x8e8   : > { %v1629_v30 = vsel %vm548_vm2, %v9345_v24, 0.0  ;;  %v1602_v39 = vmul.f32 0.70710677, %v1542_v34 }
 0x8e9   : > { %1630 = vadd.xlane.f32.xlu0 %v1629_v30 }
 0x8ea   : > { %v1608_v37 = vsel %vm548_vm2, %v1602_v39, -inf }
 0x8ec   : > { %v10297_v46 = vpop.f32.mrf.mxu2 }
 0x8ee   : > { %v1598_v31 = vpop.f32.mrf.mxu3 }
 0x8ef   : > { %v1604_v38 = vmul.f32 0.70710677, %v1598_v31 }
 0x8f1   : > { %v1614_v32 = vsel %vm548_vm2, %v1604_v38, -inf }
 0x8f2   : > { %1615 = vmax.xlane.f32.xlu2 %v1614_v32 }
 0x8f4   : > { %v1570_v49 = vpop.f32.mrf.mxu2  ;;  %v1756_v12 = vpop.permute.xlu1 %1755 }
 0x8f5   : > { %v1603_v56 = vmul.f32 0.70710677, %v1570_v49 }
 0x8f7   : > { %v1611_v60 = vsel %vm548_vm2, %v1603_v56, -inf }
 0x8fd   : > { %9229 = vrot.lane.b32.xlu0 %v10083_v48, %s12636_s22 }
 0x905   : > { %1753 = vrot.lane.b32.xlu0 %v9984_v26, %s12670_s23 }
 0x90a   : > { %1783 = vrot.lane.b32.xlu2 %v9986_v27, %s12638_s21 }
 0x912   : > { %1811 = vrot.lane.b32.xlu2 %v9990_v28, %s12638_s21 }
 0x91a   : > { %1809 = vrot.lane.b32.xlu2 %v9990_v28, %s12670_s23 }
 0x922   : > { %1727 = vrot.lane.b32.xlu2 %v9996_v29, %s12636_s22 }
 0x92a   : > { %1839 = vrot.lane.b32.xlu2 %v9996_v29, %s12638_s21  ;;  %s12646_s21 = smov 86  }
 0x92f   : > { %1609 = vmax.xlane.f32.xlu0 %v1608_v37 }
 0x943   : > { %1781 = vrot.lane.b32.xlu0 %v9986_v27, %s12670_s23 }
 0x95c   : > { %v1631_v47 = vpop.xlane.xlu0 %1630 }
 0x95d   : > { %9346 = vrcp.f32 %v1631_v47 }
 0x963   : > { %v9347_v57 = vpop.eup %9346 }
 0x964   : > { %v10300_v7 = vmul.f32 %v9347_v57, %v9345_v24 }
 0x965   : > { %v1616_v51 = vpop.xlane.xlu2 %1615 }
 0x966   : > { %12824 = vst [vmem:[#allocation33_spill] sm:$0xff] %v10300_v7 }
 0x96d   : > { %1612 = vmax.xlane.f32.xlu0 %v1611_v60  ;;  %v1784_v62 = vpop.permute.xlu2 %1783  ;;  %v1620_v60 = vsub.f32 %v1604_v38, %v1616_v51 }
 0x96f   : > { %v9230_v2 = vpop.permute.xlu0 %9229 }
 0x970   : > { %v9232_v3 = vunpack.i.h.bf16 %v9230_v2  ;;  %v9231_v6 = vunpack.i.l.bf16 %v9230_v2 }
 0x972   : > { %1670 = vmatpush.msra.mxu0 %v9231_v6  ;;  %1696 = vmatpush.msrb.mxu1 %v9232_v3 }
 0x973   : > { %8796 = vmatmul.msk.f32.vlgmr.msra.gmra.mxu0 %vm548_vm2, %v10300_v7 }
 0x974   : > { %8802 = vmatpush.xpose.msk.msra.mxu1 %vm438_vm1, %v1784_v62  ;;  %8800 = vmatpush.xpose.msk.msrb.mxu0 %vm438_vm1, %v1756_v12  ;;  %v1627_v62 = vmul.f32 1.442695, %v1620_v60 }
 0x975   : > { %v1812_v14 = vpop.permute.xlu2 %1811 }
 0x977   : > { %v1754_v17 = vpop.permute.xlu0 %1753 }
 0x97b   : > { %8801 = vmatmul.msk.f32.vlgmr.msrb.gmra.mxu0 %vm438_vm1, %v1754_v17 }
 0x97d   : > { %v1810_v20 = vpop.permute.xlu2 %1809 }
 0x985   : > { %v1728_v30 = vpop.permute.xlu2 %1727 }
 0x986   : > { %1748 = vmatpush.msra.mxu3 %v1728_v30 }
 0x98d   : > { %v1840_v31 = vpop.permute.xlu2 %1839 }
 0x98e   : > { %8806 = vmatpush.xpose.msk.msrb.mxu3 %vm438_vm1, %v1840_v31 }
 0x9a2   : > { %v1610_v24 = vpop.xlane.xlu0 %1609 }
 0x9a3   : > { %v1618_v32 = vsub.f32 %v1602_v39, %v1610_v24 }
 0x9a5   : > { %v1623_v34 = vmul.f32 1.442695, %v1618_v32 }
 0x9a7   : > { %9348 = vpow2.f32 %v1623_v34 }
 0x9a8   : > { %9350 = vpow2.f32 %v1627_v62 }
 0x9ad   : > { %v9349_v37 = vpop.eup %9348 }
 0x9ae   : > { %v1632_v49 = vsel %vm548_vm2, %v9349_v37, 0.0  ;;  %v9351_v6 = vpop.eup %9350 }
 0x9af   : > { %1633 = vadd.xlane.f32.xlu0 %v1632_v49  ;;  %v1638_v39 = vsel %vm548_vm2, %v9351_v6, 0.0 }
 0x9b5   : > { %v1782_v47 = vpop.permute.xlu0 %1781 }
 0x9c3   : > { %1701 = vrot.lane.b32.xlu0 %v9990_v28, %s12636_s22  ;;  %s12655_s22 = smov 100  }
 0x9e0   : > { %v1613_v57 = vpop.xlane.xlu0 %1612 }
 0x9e1   : > { %v1619_v2 = vsub.f32 %v1603_v56, %v1613_v57 }
 0x9e3   : > { %v1625_v3 = vmul.f32 1.442695, %v1619_v2 }
 0x9e5   : > { %9352 = vpow2.f32 %v1625_v3 }
 0x9eb   : > { %v9353_v12 = vpop.eup %9352 }
 0x9ec   : > { %v1635_v17 = vsel %vm548_vm2, %v9353_v12, 0.0 }
 0x9ed   : > { %1639 = vadd.xlane.f32.xlu0 %v1638_v39  ;;  %1636 = vadd.xlane.f32.xlu1 %v1635_v17 }
 0x9f0   : > { %v10313_v30 = vpop.f32.mrf.mxu0 }
 0x9f8   : > { %v1778_v31 = vpop.f32.mrf.mxu0 }
 0x9f9   : > { %v1865_v24 = vmul.f32 0.70710677, %v1778_v31 }
 0x9fb   : > { %v1869_v38 = vsel %vm548_vm2, %v1865_v24, -inf }
 0x9fc   : > { %1870 = vmax.xlane.f32.xlu2 %v1869_v38 }
 0xa01   : > { %2019 = vrot.lane.b32.xlu0 %v9984_v26, %s12655_s22 }
 0xa06   : > { %1837 = vrot.lane.b32.xlu1 %v9996_v29, %s12670_s23  ;;  %s12692_s23 = smov 10  }
 0xa14   : > { %9234 = vrot.lane.b32.xlu2 %v10083_v48, %s12646_s21 }
 0xa1c   : > { %2045 = vrot.lane.b32.xlu2 %v9986_v27, %s12648_s16 }
 0xa22   : > { %v1634_v51 = vpop.xlane.xlu0 %1633 }
 0xa23   : > { %9354 = vrcp.f32 %v1634_v51 }
 0xa24   : > { %1965 = vrot.lane.b32.xlu2 %v9990_v28, %s12646_s21 }
 0xa29   : > { %v9355_v56 = vpop.eup %9354 }
 0xa2a   : > { %v10326_v32 = vmul.f32 %v9355_v56, %v9349_v37 }
 0xa2c   : > { %12825 = vst [vmem:[#allocation34_spill] sm:$0xff] %v10326_v32  ;;  %8797 = vmatmul.msk.f32.vlgmr.msrb.gmra.mxu1 %vm548_vm2, %v10326_v32 }
 0xa34   : > { %8803 = vmatmul.msk.f32.vlgmr.msra.gmra.mxu1 %vm438_vm1, %v1782_v47 }
 0xa35   : > { %v1702_v34 = vpop.permute.xlu0 %1701 }
 0xa36   : > { %1722 = vmatpush.msra.mxu2 %v1702_v34 }
 0xa38   : > { %8804 = vmatpush.xpose.msk.msrb.mxu2 %vm438_vm1, %v1812_v14 }
 0xa60   : > { %v1637_v49 = vpop.xlane.xlu1 %1636  ;;  %v1640_v60 = vpop.xlane.xlu0 %1639 }
 0xa61   : > { %9356 = vrcp.f32 %v1637_v49 }
 0xa62   : > { %9358 = vrcp.f32 %v1640_v60 }
 0xa67   : > { %v9357_v62 = vpop.eup %9356 }
 0xa68   : > { %v9359_v57 = vpop.eup %9358  ;;  %v10332_v2 = vmul.f32 %v9357_v62, %v9353_v12 }
 0xa69   : > { %v10334_v3 = vmul.f32 %v9359_v57, %v9351_v6 }
 0xa6a   : > { %12826 = vst [vmem:[#allocation35_spill] sm:$0xff] %v10332_v2  ;;  %8798 = vmatmul.msk.f32.vlgmr.msra.gmra.mxu2 %vm548_vm2, %v10332_v2 }
 0xa6b   : > { %12827 = vst [vmem:[#allocation36_spill] sm:$0xff] %v10334_v3  ;;  %8799 = vmatmul.msk.f32.vlgmr.msra.gmra.mxu3 %vm548_vm2, %v10334_v3 }
 0xa6f   : > { %v1871_v37 = vpop.xlane.xlu2 %1870 }
 0xa70   : > { %v1881_v47 = vsub.f32 %v1865_v24, %v1871_v37 }
 0xa72   : > { %v1885_v39 = vmul.f32 1.442695, %v1881_v47  ;;  %8805 = vmatmul.msk.f32.vlgmr.msrb.gmra.mxu2 %vm438_vm1, %v1810_v20 }
 0xa73   : > { %v2020_v12 = vpop.permute.xlu0 %2019 }
 0xa74   : > { %9360 = vpow2.f32 %v1885_v39 }
 0xa77   : > { %v9235_v14 = vpop.permute.xlu2 %9234 }
 0xa78   : > { %v9237_v17 = vunpack.i.h.bf16 %v9235_v14  ;;  %v9236_v31 = vunpack.i.l.bf16 %v9235_v14  ;;  %v1838_v38 = vpop.permute.xlu1 %1837 }
 0xa79   : > { %8807 = vmatmul.msk.f32.vlgmr.msrb.gmra.mxu3 %vm438_vm1, %v1838_v38 }
 0xa7a   : > { %v9361_v6 = vpop.eup %9360  ;;  %1934 = vmatpush.msra.mxu0 %v9236_v31  ;;  %1960 = vmatpush.msrb.mxu1 %v9237_v17 }
 0xa7b   : > { %v1893_v51 = vsel %vm548_vm2, %v9361_v6, 0.0 }
 0xa7c   : > { %8812 = vmatpush.xpose.msk.msrb.mxu0 %vm438_vm1, %v2020_v12  ;;  %1894 = vadd.xlane.f32.xlu1 %v1893_v51 }
 0xa7f   : > { %v10344_v24 = vpop.permute.xlu2 %2045 }
 0xa87   : > { %v1966_v56 = vpop.permute.xlu2 %1965 }
 0xa88   : > { %1986 = vmatpush.msra.mxu2 %v1966_v56 }
 0xa95   : > { %2047 = vrot.lane.b32.xlu1 %v9986_v27, %s12655_s22 }
 0xa9d   : > { %2075 = vrot.lane.b32.xlu1 %v9990_v28, %s12655_s22 }
 0xaa5   : > { %2073 = vrot.lane.b32.xlu1 %v9990_v28, %s12648_s16 }
 0xaa9   : > { %v10352_v20 = vpop.f32.mrf.mxu1 }
 0xaad   : > { %1991 = vrot.lane.b32.xlu1 %v9996_v29, %s12646_s21  ;;  %s12666_s21 = smov 84  }
 0xab1   : > { %v1806_v34 = vpop.f32.mrf.mxu1 }
 0xab2   : > { %v1866_v49 = vmul.f32 0.70710677, %v1806_v34 }
 0xab4   : > { %v1872_v60 = vsel %vm548_vm2, %v1866_v49, -inf }
 0xab5   : > { %1873 = vmax.xlane.f32.xlu0 %v1872_v60  ;;  %2101 = vrot.lane.b32.xlu1 %v9996_v29, %s12648_s16 }
 0xaed   : > { %v10361_v47 = vpop.f32.mrf.mxu2 }
 0xaee   : > { %v10359_v57 = vpop.f32.mrf.mxu3 }
 0xaef   : > { %v1895_v62 = vpop.xlane.xlu1 %1894 }
 0xaf0   : > { %9362 = vrcp.f32 %v1895_v62 }
 0xaf5   : > { %v1834_v38 = vpop.f32.mrf.mxu2 }
 0xaf6   : > { %v9363_v37 = vpop.eup %9362  ;;  %v1867_v12 = vmul.f32 0.70710677, %v1834_v38 }
 0xaf7   : > { %v10363_v39 = vmul.f32 %v9363_v37, %v9361_v6 }
 0xaf8   : > { %v1875_v56 = vsel %vm548_vm2, %v1867_v12, -inf }
 0xaf9   : > { %12828 = vst [vmem:[#allocation37_spill] sm:$0xff] %v10363_v39  ;;  %8808 = vmatmul.msk.f32.vlgmr.msra.gmra.mxu0 %vm548_vm2, %v10363_v39 }
 0xafc   : > { %v1862_v14 = vpop.f32.mrf.mxu3 }
 0xafd   : > { %v1868_v17 = vmul.f32 0.70710677, %v1862_v14 }
 0xaff   : > { %v1878_v31 = vsel %vm548_vm2, %v1868_v17, -inf }
 0xb00   : > { %1879 = vmax.xlane.f32.xlu0 %v1878_v31 }
 0xb07   : > { %v2048_v51 = vpop.permute.xlu1 %2047 }
 0xb08   : > { %1876 = vmax.xlane.f32.xlu0 %v1875_v56  ;;  %8814 = vmatpush.xpose.msk.msra.mxu1 %vm438_vm1, %v2048_v51 }
 0xb0f   : > { %v2076_v34 = vpop.permute.xlu1 %2075 }
 0xb10   : > { %8816 = vmatpush.xpose.msk.msrb.mxu2 %vm438_vm1, %v2076_v34 }
 0xb17   : > { %v2074_v6 = vpop.permute.xlu1 %2073 }
 0xb1f   : > { %v1992_v60 = vpop.permute.xlu1 %1991 }
 0xb20   : > { %2012 = vmatpush.msra.mxu3 %v1992_v60 }
 0xb28   : > { %v1874_v62 = vpop.xlane.xlu0 %1873 }
 0xb29   : > { %v1882_v37 = vsub.f32 %v1866_v49, %v1874_v62 }
 0xb2b   : > { %v1887_v14 = vmul.f32 1.442695, %v1882_v37 }
 0xb2d   : > { %9364 = vpow2.f32 %v1887_v14 }
 0xb33   : > { %v9365_v33 = vpop.eup %9364 }
 0xb34   : > { %v1896_v31 = vsel %vm548_vm2, %v9365_v33, 0.0 }
 0xb35   : > { %1897 = vadd.xlane.f32.xlu0 %v1896_v31 }
 0xb49   : > { %2017 = vrot.lane.b32.xlu0 %v9984_v26, %s12648_s16  ;;  %s12668_s16 = smov 98  }
 0xb73   : > { %v1880_v38 = vpop.xlane.xlu0 %1879 }
 0xb74   : > { %v1884_v56 = vsub.f32 %v1868_v17, %v1880_v38 }
 0xb76   : > { %v1891_v51 = vmul.f32 1.442695, %v1884_v56 }
 0xb78   : > { %9366 = vpow2.f32 %v1891_v51 }
 0xb7b   : > { %v1877_v36 = vpop.xlane.xlu0 %1876 }
 0xb7c   : > { %v1883_v34 = vsub.f32 %v1867_v12, %v1877_v36 }
 0xb7e   : > { %v9367_v21 = vpop.eup %9366  ;;  %v1889_v18 = vmul.f32 1.442695, %v1883_v34  ;;  %v2102_v34 = vpop.permute.xlu1 %2101 }
 0xb7f   : > { %v1902_v60 = vsel %vm548_vm2, %v9367_v21, 0.0 }
 0xb80   : > { %9368 = vpow2.f32 %v1889_v18  ;;  %1903 = vadd.xlane.f32.xlu2 %v1902_v60 }
 0xb86   : > { %v9369_v49 = vpop.eup %9368 }
 0xb87   : > { %v1899_v62 = vsel %vm548_vm2, %v9369_v49, 0.0 }
 0xb88   : > { %1900 = vadd.xlane.f32.xlu0 %v1899_v62  ;;  %v10400_v62 = vpop.f32.mrf.mxu0 }
 0xb98   : > { %9239 = vrot.lane.b32.xlu2 %v10083_v48, %s12666_s21 }
 0xb9c   : > { %2103 = vrot.lane.b32.xlu0 %v9996_v29, %s12655_s22  ;;  %s12664_s22 = smov 114  }
 0xba8   : > { %v1898_v17 = vpop.xlane.xlu0 %1897 }
 0xba9   : > { %9370 = vrcp.f32 %v1898_v17 }
 0xbaf   : > { %v9371_v36 = vpop.eup %9370 }
 0xbb0   : > { %v10380_v12 = vmul.f32 %v9371_v36, %v9365_v33 }
 0xbb2   : > { %12829 = vst [vmem:[#allocation38_spill] sm:$0xff] %v10380_v12  ;;  %8809 = vmatmul.msk.f32.vlgmr.msrb.gmra.mxu1 %vm548_vm2, %v10380_v12 }
 0xbba   : > { %8815 = vmatmul.msk.f32.vlgmr.msra.gmra.mxu1 %vm438_vm1, %v10344_v24 }
 0xbbb   : > { %v2018_v18 = vpop.permute.xlu0 %2017 }
 0xbbc   : > { %8813 = vmatmul.msk.f32.vlgmr.msrb.gmra.mxu0 %vm438_vm1, %v2018_v18 }
 0xbf3   : > { %v1904_v37 = vpop.xlane.xlu2 %1903 }
 0xbf4   : > { %9372 = vrcp.f32 %v1904_v37 }
 0xbfa   : > { %v9373_v48 = vpop.eup %9372 }
 0xbfb   : > { %v10387_v14 = vmul.f32 %v9373_v48, %v9367_v21  ;;  %v1901_v31 = vpop.xlane.xlu0 %1900  ;;  %v9240_v38 = vpop.permute.xlu2 %9239 }
 0xbfc   : > { %9374 = vrcp.f32 %v1901_v31  ;;  %v9242_v56 = vunpack.i.h.bf16 %v9240_v38  ;;  %v9241_v33 = vunpack.i.l.bf16 %v9240_v38 }
 0xbfd   : > { %12830 = vst [vmem:[#allocation39_spill] sm:$0xff] %v10387_v14  ;;  %8811 = vmatmul.msk.f32.vlgmr.msra.gmra.mxu3 %vm548_vm2, %v10387_v14 }
 0xbfe   : > { %2198 = vmatpush.msra.mxu0 %v9241_v33  ;;  %2224 = vmatpush.msrb.mxu1 %v9242_v56 }
 0xc02   : > { %v9375_v51 = vpop.eup %9374 }
 0xc03   : > { %v10391_v24 = vmul.f32 %v9375_v51, %v9369_v49 }
 0xc05   : > { %12831 = vst [vmem:[#allocation40_spill] sm:$0xff] %v10391_v24  ;;  %8810 = vmatmul.msk.f32.vlgmr.msra.gmra.mxu2 %vm548_vm2, %v10391_v24 }
 0xc0d   : > { %8817 = vmatmul.msk.f32.vlgmr.msrb.gmra.mxu2 %vm438_vm1, %v2074_v6 }
 0xc0e   : > { %v2104_v21 = vpop.permute.xlu0 %2103 }
 0xc0f   : > { %8818 = vmatpush.xpose.msk.msrb.mxu3 %vm438_vm1, %v2104_v21 }
 0xc12   : > { %8819 = vmatmul.msk.f32.vlgmr.msrb.gmra.mxu3 %vm438_vm1, %v2102_v34 }
 0xc2f   : > { %v10398_v60 = vpop.f32.mrf.mxu1 }
 0xc37   : > { %v2070_v17 = vpop.f32.mrf.mxu1 }
 0xc38   : > { %v2130_v36 = vmul.f32 0.70710677, %v2070_v17 }
 0xc39   : > { %v2042_v18 = vpop.f32.mrf.mxu0 }
 0xc3a   : > { %v2129_v49 = vmul.f32 0.70710677, %v2042_v18  ;;  %v2136_v37 = vsel %vm548_vm2, %v2130_v36, -inf }
 0xc3b   : > { %2137 = vmax.xlane.f32.xlu2 %v2136_v37 }
 0xc3c   : > { %v2133_v48 = vsel %vm548_vm2, %v2129_v49, -inf }
 0xc3d   : > { %2134 = vmax.xlane.f32.xlu1 %v2133_v48 }
 0xc53   : > { %2311 = vrot.lane.b32.xlu2 %v9986_v27, %s12668_s16 }
 0xc56   : > { %2283 = vrot.lane.b32.xlu1 %v9984_v26, %s12668_s16 }
 0xc80   : > { %v10408_v6 = vpop.f32.mrf.mxu3 }
 0xc88   : > { %v10410_v31 = vpop.f32.mrf.mxu2 }
 0xc90   : > { %v2098_v51 = vpop.f32.mrf.mxu2 }
 0xc91   : > { %v2131_v21 = vmul.f32 0.70710677, %v2098_v51 }
 0xc93   : > { %v2139_v34 = vsel %vm548_vm2, %v2131_v21, -inf }
 0xc95   : > { %v2126_v38 = vpop.f32.mrf.mxu3 }
 0xc96   : > { %v2132_v56 = vmul.f32 0.70710677, %v2126_v38 }
 0xc98   : > { %v2142_v33 = vsel %vm548_vm2, %v2132_v56, -inf }
 0xc99   : > { %2143 = vmax.xlane.f32.xlu2 %v2142_v33 }
 0xca1   : > { %2140 = vmax.xlane.f32.xlu2 %v2139_v34 }
 0xcae   : > { %v2138_v17 = vpop.xlane.xlu2 %2137 }
 0xcaf   : > { %v2146_v18 = vsub.f32 %v2130_v36, %v2138_v17 }
 0xcb0   : > { %v2135_v37 = vpop.xlane.xlu1 %2134 }
 0xcb1   : > { %v2151_v48 = vmul.f32 1.442695, %v2146_v18  ;;  %v2145_v14 = vsub.f32 %v2129_v49, %v2135_v37 }
 0xcb3   : > { %9376 = vpow2.f32 %v2151_v48  ;;  %v2149_v24 = vmul.f32 1.442695, %v2145_v14 }
 0xcb5   : > { %9378 = vpow2.f32 %v2149_v24 }
 0xcb6   : > { %v2312_v39 = vpop.permute.xlu2 %2311 }
 0xcb7   : > { %8826 = vmatpush.xpose.msk.msra.mxu1 %vm438_vm1, %v2312_v39 }
 0xcb9   : > { %v9377_v38 = vpop.eup %9376 }
 0xcba   : > { %v2160_v12 = vsel %vm548_vm2, %v9377_v38, 0.0 }
 0xcbb   : > { %v9379_v2 = vpop.eup %9378  ;;  %2161 = vadd.xlane.f32.xlu2 %v2160_v12 }
 0xcbc   : > { %v2157_v33 = vsel %vm548_vm2, %v9379_v2, 0.0 }
 0xcbd   : > { %2158 = vadd.xlane.f32.xlu0 %v2157_v33 }
 0xcc8   : > { %v2284_v51 = vpop.permute.xlu1 %2283 }
 0xcc9   : > { %8824 = vmatpush.xpose.msk.msrb.mxu0 %vm438_vm1, %v2284_v51 }
 0xcd1   : > { %2281 = vrot.lane.b32.xlu0 %v9984_v26, %s12664_s22 }
 0xcd3   : > { %2309 = vrot.lane.b32.xlu2 %v9986_v27, %s12664_s22 }
 0xcd9   : > { %2229 = vrot.lane.b32.xlu0 %v9990_v28, %s12666_s21 }
 0xce1   : > { %2339 = vrot.lane.b32.xlu0 %v9990_v28, %s12668_s16 }
 0xce9   : > { %2337 = vrot.lane.b32.xlu0 %v9990_v28, %s12664_s22 }
 0xcf1   : > { %2255 = vrot.lane.b32.xlu0 %v9996_v29, %s12666_s21  ;;  %s12686_s21 = smov 12  }
 0xcf9   : > { %2367 = vrot.lane.b32.xlu0 %v9996_v29, %s12668_s16  ;;  %s12688_s16 = smov 4  }
 0xd0c   : > { %v2144_v39 = vpop.xlane.xlu2 %2143 }
 0xd0d   : > { %v2148_v12 = vsub.f32 %v2132_v56, %v2144_v39 }
 0xd0f   : > { %v2155_v14 = vmul.f32 1.442695, %v2148_v12 }
 0xd11   : > { %9380 = vpow2.f32 %v2155_v14 }
 0xd14   : > { %v2141_v24 = vpop.xlane.xlu2 %2140 }
 0xd15   : > { %v2147_v36 = vsub.f32 %v2131_v21, %v2141_v24 }
 0xd17   : > { %v9381_v49 = vpop.eup %9380  ;;  %v2153_v34 = vmul.f32 1.442695, %v2147_v36 }
 0xd18   : > { %v2166_v17 = vsel %vm548_vm2, %v9381_v49, 0.0 }
 0xd19   : > { %9382 = vpow2.f32 %v2153_v34  ;;  %2167 = vadd.xlane.f32.xlu2 %v2166_v17 }
 0xd1f   : > { %v9383_v18 = vpop.eup %9382 }
 0xd20   : > { %v2163_v37 = vsel %vm548_vm2, %v9383_v18, 0.0 }
 0xd21   : > { %2164 = vadd.xlane.f32.xlu1 %v2163_v37 }
 0xd2e   : > { %v2162_v48 = vpop.xlane.xlu2 %2161 }
 0xd2f   : > { %9384 = vrcp.f32 %v2162_v48 }
 0xd30   : > { %v2159_v33 = vpop.xlane.xlu0 %2158 }
 0xd31   : > { %9386 = vrcp.f32 %v2159_v33 }
 0xd35   : > { %v9385_v51 = vpop.eup %9384 }
 0xd36   : > { %v10434_v56 = vmul.f32 %v9385_v51, %v9377_v38  ;;  %v2310_v21 = vpop.permute.xlu2 %2309 }
 0xd37   : > { %v9387_v39 = vpop.eup %9386 }
 0xd38   : > { %12832 = vst [vmem:[#allocation41_spill] sm:$0xff] %v10434_v56  ;;  %v10436_v12 = vmul.f32 %v9387_v39, %v9379_v2  ;;  %8821 = vmatmul.msk.f32.vlgmr.msrb.gmra.mxu1 %vm548_vm2, %v10434_v56 }
 0xd3a   : > { %12833 = vst [vmem:[#allocation42_spill] sm:$0xff] %v10436_v12  ;;  %2365 = vrot.lane.b32.xlu1 %v9996_v29, %s12664_s22  ;;  %8820 = vmatmul.msk.f32.vlgmr.msra.gmra.mxu0 %vm548_vm2, %v10436_v12  ;;  %s12678_s22 = smov 82  }
 0xd40   : > { %8827 = vmatmul.msk.f32.vlgmr.msra.gmra.mxu1 %vm438_vm1, %v2310_v21 }
 0xd43   : > { %v2282_v14 = vpop.permute.xlu0 %2281 }
 0xd44   : > { %8825 = vmatmul.msk.f32.vlgmr.msrb.gmra.mxu0 %vm438_vm1, %v2282_v14 }
 0xd4b   : > { %v2230_v38 = vpop.permute.xlu0 %2229 }
 0xd4c   : > { %2250 = vmatpush.msra.mxu2 %v2230_v38 }
 0xd53   : > { %v2340_v24 = vpop.permute.xlu0 %2339 }
 0xd54   : > { %8828 = vmatpush.xpose.msk.msrb.mxu2 %vm438_vm1, %v2340_v24 }
 0xd5b   : > { %v2338_v2 = vpop.permute.xlu0 %2337 }
 0xd63   : > { %v2256_v36 = vpop.permute.xlu0 %2255 }
 0xd64   : > { %2276 = vmatpush.msra.mxu3 %v2256_v36 }
 0xd6b   : > { %v2368_v34 = vpop.permute.xlu0 %2367 }
 0xd6c   : > { %8830 = vmatpush.xpose.msk.msrb.mxu3 %vm438_vm1, %v2368_v34 }
 0xd8c   : > { %v2168_v17 = vpop.xlane.xlu2 %2167 }
 0xd8d   : > { %9388 = vrcp.f32 %v2168_v17 }
 0xd93   : > { %v9389_v37 = vpop.eup %9388 }
 0xd94   : > { %v10448_v48 = vmul.f32 %v9389_v37, %v9381_v49  ;;  %v2165_v33 = vpop.xlane.xlu1 %2164 }
 0xd95   : > { %9390 = vrcp.f32 %v2165_v33 }
 0xd96   : > { %12834 = vst [vmem:[#allocation43_spill] sm:$0xff] %v10448_v48  ;;  %8823 = vmatmul.msk.f32.vlgmr.msra.gmra.mxu3 %vm548_vm2, %v10448_v48 }
 0xd9b   : > { %v9391_v51 = vpop.eup %9390 }
 0xd9c   : > { %v10452_v39 = vmul.f32 %v9391_v51, %v9383_v18 }
 0xd9e   : > { %12835 = vst [vmem:[#allocation44_spill] sm:$0xff] %v10452_v39  ;;  %8822 = vmatmul.msk.f32.vlgmr.msra.gmra.mxu2 %vm548_vm2, %v10452_v39 }
 0xda6   : > { %8829 = vmatmul.msk.f32.vlgmr.msrb.gmra.mxu2 %vm438_vm1, %v2338_v2 }
 0xdac   : > { %v2366_v21 = vpop.permute.xlu1 %2365 }
 0xdad   : > { %8831 = vmatmul.msk.f32.vlgmr.msrb.gmra.mxu3 %vm438_vm1, %v2366_v21 }
 0xdb5   : > { %v10458_v14 = vpop.f32.mrf.mxu1 }
 0xdb7   : > { %v2200_v49 = vpop.f32.mrf.mxu0 }
 0xdbd   : > { %v2334_v38 = vpop.f32.mrf.mxu1 }
 0xdbe   : > { %v2394_v24 = vmul.f32 0.70710677, %v2334_v38 }
 0xdc0   : > { %v2400_v36 = vsel %vm548_vm2, %v2394_v24, -inf }
 0xdc1   : > { %2401 = vmax.xlane.f32.xlu2 %v2400_v36  ;;  %v2306_v34 = vpop.f32.mrf.mxu0 }
 0xdc2   : > { %v2393_v17 = vmul.f32 0.70710677, %v2306_v34 }
 0xdc4   : > { %v2397_v18 = vsel %vm548_vm2, %v2393_v17, -inf }
 0xdc5   : > { %2398 = vmax.xlane.f32.xlu0 %v2397_v18 }
 0xe19   : > { %v10462_v37 = vpop.f32.mrf.mxu3 }
 0xe21   : > { %v10465_v39 = vpop.f32.mrf.mxu2 }
 0xe29   : > { %v2362_v3 = vpop.f32.mrf.mxu2 }
 0xe2a   : > { %v2395_v53 = vmul.f32 0.70710677, %v2362_v3 }
 0xe30   : > { %v2390_v33 = vpop.f32.mrf.mxu3 }
 0xe31   : > { %v2396_v2 = vmul.f32 0.70710677, %v2390_v33 }
 0xe33   : > { %v2406_v51 = vsel %vm548_vm2, %v2396_v2, -inf }
 0xe34   : > { %v2402_v21 = vpop.xlane.xlu2 %2401  ;;  %2407 = vmax.xlane.f32.xlu0 %v2406_v51 }
 0xe35   : > { %v2410_v48 = vsub.f32 %v2394_v24, %v2402_v21  ;;  %v2403_v24 = vsel %vm548_vm2, %v2395_v53, -inf }
 0xe37   : > { %v2415_v56 = vmul.f32 1.442695, %v2410_v48 }
 0xe38   : > { %v2399_v12 = vpop.xlane.xlu0 %2398 }
 0xe39   : > { %9392 = vpow2.f32 %v2415_v56  ;;  %v2409_v38 = vsub.f32 %v2393_v17, %v2399_v12 }
 0xe3b   : > { %v2413_v36 = vmul.f32 1.442695, %v2409_v38 }
 0xe3d   : > { %9394 = vpow2.f32 %v2413_v36 }
 0xe3f   : > { %v9393_v34 = vpop.eup %9392 }
 0xe40   : > { %v2424_v18 = vsel %vm548_vm2, %v9393_v34, 0.0 }
 0xe41   : > { %2425 = vadd.xlane.f32.xlu1 %v2424_v18 }
 0xe43   : > { %v9395_v32 = vpop.eup %9394 }
 0xe44   : > { %v2421_v33 = vsel %vm548_vm2, %v9395_v32, 0.0 }
 0xe45   : > { %2422 = vadd.xlane.f32.xlu2 %v2421_v33 }
 0xe4d   : > { %2404 = vmax.xlane.f32.xlu2 %v2403_v24 }
 0xe5a   : > { %2519 = vrot.lane.b32.xlu1 %v9996_v29, %s12678_s22 }
 0xe62   : > { %2746 = vrot.lane.b32.xlu1 %v2200_v49, %s12686_s21 }
 0xe65   : > { %2441 = vrot.lane.b32.xlu2 %v9984_v26, %s12678_s22 }
 0xe6a   : > { %2684 = vrot.lane.b32.xlu1 %v10229_v42, %s12688_s16 }
 0xe6d   : > { %2467 = vrot.lane.b32.xlu2 %v9986_v27, %s12678_s22 }
 0xe72   : > { %2732 = vrot.lane.b32.xlu1 %v10398_v60, %s12692_s23 }
 0xe75   : > { %2493 = vrot.lane.b32.xlu2 %v9990_v28, %s12678_s22  ;;  %s12684_s22 = smov 14  }
 0xe7a   : > { %2670 = vrot.lane.b32.xlu1 %v10158_v8, %s12703_s17 }
 0xe7d   : > { %2666 = vrot.lane.b32.xlu2 %v10147_v0, %s12703_s17 }
 0xe82   : > { %2718 = vrot.lane.b32.xlu1 %v10361_v47, %s12690_s14 }
 0xe85   : > { %2698 = vrot.lane.b32.xlu2 %v10256_v55, %s12694_s29 }
 0xe8d   : > { %2714 = vrot.lane.b32.xlu2 %v10313_v30, %s12690_s14 }
 0xea7   : > { %v2408_v27 = vpop.xlane.xlu0 %2407 }
 0xea8   : > { %v2412_v8 = vsub.f32 %v2396_v2, %v2408_v27 }
 0xeaa   : > { %v2419_v60 = vmul.f32 1.442695, %v2412_v8 }
 0xeb4   : > { %v2426_v3 = vpop.xlane.xlu1 %2425 }
 0xeb8   : > { %v2423_v26 = vpop.xlane.xlu2 %2422 }
 0xeb9   : > { %9396 = vrcp.f32 %v2423_v26 }
 0xebf   : > { %v9397_v0 = vpop.eup %9396 }
 0xec0   : > { %v2405_v28 = vpop.xlane.xlu2 %2404  ;;  %v10493_v47 = vmul.f32 %v9397_v0, %v9395_v32 }
 0xec1   : > { %v2411_v29 = vsub.f32 %v2395_v53, %v2405_v28 }
 0xec2   : > { %12836 = vst [vmem:[#allocation45_spill] sm:$0xff] %v10493_v47 }
 0xec3   : > { %v2417_v42 = vmul.f32 1.442695, %v2411_v29 }
 0xec5   : > { %9398 = vpow2.f32 %v2417_v42 }
 0xec6   : > { %9400 = vrcp.f32 %v2426_v3 }
 0xec7   : > { %9402 = vpow2.f32 %v2419_v60 }
 0xec8   : > { %v2442_v56 = vpop.permute.xlu2 %2441 }
 0xec9   : > { %2462 = vmatpush.msra.mxu0 %v2442_v56 }
 0xeca   : > { %8832 = vmatmul.msk.f32.vlgmr.msra.gmra.mxu0 %vm548_vm2, %v10493_v47 }
 0xecb   : > { %v9399_v55 = vpop.eup %9398 }
 0xecc   : > { %v2520_v30 = vpop.permute.xlu1 %2519  ;;  %v2427_v12 = vsel %vm548_vm2, %v9399_v55, 0.0  ;;  %v9401_v53 = vpop.eup %9400 }
 0xecd   : > { %2428 = vadd.xlane.f32.xlu0 %v2427_v12  ;;  %2540 = vmatpush.msra.mxu3 %v2520_v30  ;;  %v10498_v48 = vmul.f32 %v9401_v53, %v9393_v34  ;;  %v9403_v17 = vpop.eup %9402 }
 0xece   : > { %v2430_v32 = vsel %vm548_vm2, %v9403_v17, 0.0 }
 0xecf   : > { %12837 = vst [vmem:[#allocation46_spill] sm:$0xff] %v10498_v48 }
 0xed0   : > { %v2468_v49 = vpop.permute.xlu2 %2467 }
 0xed1   : > { %2488 = vmatpush.msrb.mxu1 %v2468_v49 }
 0xed2   : > { %8833 = vmatmul.msk.f32.vlgmr.msrb.gmra.mxu1 %vm548_vm2, %v10498_v48 }
 0xed4   : > { %v2747_v33 = vpop.permute.xlu1 %2746 }
 0xed5   : > { %2431 = vadd.xlane.f32.xlu0 %v2430_v32 }
 0xed8   : > { %v2494_v2 = vpop.permute.xlu2 %2493 }
 0xed9   : > { %2514 = vmatpush.msra.mxu2 %v2494_v2 }
 0xedc   : > { %v2685_v29 = vpop.permute.xlu1 %2684 }
 0xee9   : > { %2682 = vrot.lane.b32.xlu0 %v10203_v11, %s12688_s16 }
 0xef1   : > { %2730 = vrot.lane.b32.xlu0 %v10400_v62, %s12692_s23 }
 0xef9   : > { %2668 = vrot.lane.b32.xlu0 %v10149_v1, %s12703_s17 }
 0xf01   : > { %2716 = vrot.lane.b32.xlu0 %v10352_v20, %s12690_s14  ;;  %v2808_v20 = vld [vmem:[%s12840_s5 + $0x8] sm:$0xff] }
 0xf02   : > { %2835 = vmatpush.msrb.mxu0 %v2808_v20 }
 0xf40   : > { %v2429_v51 = vpop.xlane.xlu0 %2428 }
 0xf41   : > { %9404 = vrcp.f32 %v2429_v51 }
 0xf47   : > { %v9405_v21 = vpop.eup %9404  ;;  %v2464_v38 = vpop.f32.mrf.mxu0 }
 0xf48   : > { %v10511_v36 = vmul.f32 %v9405_v21, %v9399_v55  ;;  %2762 = vrot.lane.b32.xlu2 %v2464_v38, %s12684_s22  ;;  %v2432_v34 = vpop.xlane.xlu0 %2431  ;;  %v2733_v55 = vpop.permute.xlu1 %2732 }
 0xf49   : > { %9406 = vrcp.f32 %v2432_v34 }
 0xf4a   : > { %12838 = vst [vmem:[#allocation47_spill] sm:$0xff] %v10511_v36  ;;  %8834 = vmatmul.msk.f32.vlgmr.msra.gmra.mxu2 %vm548_vm2, %v10511_v36 }
 0xf4f   : > { %v9407_v11 = vpop.eup %9406  ;;  %v2490_v62 = vpop.f32.mrf.mxu1 }
 0xf50   : > { %v10516_v1 = vmul.f32 %v9407_v11, %v9403_v17  ;;  %2700 = vrot.lane.b32.xlu2 %v10288_v15, %s12694_s29  ;;  %2764 = vrot.lane.b32.xlu0 %v2490_v62, %s12684_s22  ;;  %v2667_v15 = vpop.permute.xlu2 %2666  ;;  %v2671_v38 = vpop.permute.xlu1 %2670 }
 0xf51   : > { %v2776_v62 = vsel %vm438_vm1, %v10077_v44, %v2671_v38 }
 0xf52   : > { %12839 = vst [vmem:[#allocation48_spill] sm:$0xff] %v10516_v1  ;;  %8835 = vmatmul.msk.f32.vlgmr.msra.gmra.mxu3 %vm548_vm2, %v10516_v1 }
 0xf58   : > { %2748 = vrot.lane.b32.xlu2 %v10458_v14, %s12686_s21  ;;  %2702 = vrot.lane.b32.xlu0 %v10297_v46, %s12694_s29  ;;  %v2699_v46 = vpop.permute.xlu2 %2698  ;;  %v2719_v20 = vpop.permute.xlu1 %2718 }
 0xf60   : > { %2686 = vrot.lane.b32.xlu2 %v10233_v43, %s12688_s16  ;;  %2750 = vrot.lane.b32.xlu0 %v10465_v39, %s12686_s21  ;;  %v2807_v43 = vld [vmem:[%s12840_s5] sm:$0xff]  ;;  %v2715_v39 = vpop.permute.xlu2 %2714 }
 0xf61   : > { %2836 = vmatpush.msrb.mxu0 %v2807_v43 }
 0xf68   : > { %2734 = vrot.lane.b32.xlu2 %v10410_v31, %s12692_s23  ;;  %2688 = vrot.lane.b32.xlu0 %v10213_v16, %s12688_s16  ;;  %v2683_v31 = vpop.permute.xlu0 %2682  ;;  %v2774_v16 = vsel %vm438_vm1, %v10079_v45, %v2667_v15  ;;  %s12853_s16 = smov 120  }
 0xf70   : > { %2672 = vrot.lane.b32.xlu2 %v10156_v5, %s12703_s17  ;;  %2736 = vrot.lane.b32.xlu0 %v10408_v6, %s12692_s23  ;;  %v2779_v5 = vsel %vm2778_vm3, %v2774_v16, %v2683_v31  ;;  %s12844_s23 = smov 108   ;;  %s12857_s17 = smov 102  }
 0xf71   : > { %v2784_v6 = vsel %vm2783_vm4, %v2779_v5, %v2699_v46 }
 0xf72   : > { %v2788_v14 = vsel %vm548_vm2, %v2784_v6, %v2715_v39 }
 0xf78   : > { %2720 = vrot.lane.b32.xlu2 %v10359_v57, %s12690_s14  ;;  %v2731_v57 = vpop.permute.xlu0 %2730  ;;  %s12852_s14 = smov 92  }
 0xf79   : > { %v2793_v18 = vsel %vm2792_vm5, %v2788_v14, %v2731_v57 }
 0xf7a   : > { %v2798_v26 = vsel %vm2797_vm6, %v2793_v18, %v2747_v33 }
 0xf80   : > { %v2669_v27 = vpop.permute.xlu0 %2668 }
 0xf81   : > { %v2775_v8 = vsel %vm438_vm1, %v10074_v40, %v2669_v27 }
 0xf82   : > { %v2780_v3 = vsel %vm2778_vm3, %v2775_v8, %v2685_v29 }
 0xf88   : > { %v2717_v42 = vpop.permute.xlu0 %2716 }
 0xfa2   : > { %v2763_v24 = vpop.permute.xlu2 %2762 }
 0xfa3   : > { %v2803_v45 = vsel %vm2802_vm7, %v2798_v26, %v2763_v24 }
 0xfa4   : > { %8836 = vmatmul.msk.f32.vlgmr.msrb.gmra.mxu0 %vm393_vm0, %v2803_v45 }
 0xfaa   : > { %v2701_v28 = vpop.permute.xlu2 %2700 }
 0xfab   : > { %v2785_v0 = vsel %vm2783_vm4, %v2780_v3, %v2701_v28 }
 0xfac   : > { %v2789_v60 = vsel %vm548_vm2, %v2785_v0, %v2717_v42 }
 0xfad   : > { %v2794_v30 = vsel %vm2792_vm5, %v2789_v60, %v2733_v55 }
 0xfb2   : > { %v2749_v56 = vpop.permute.xlu2 %2748 }
 0xfb3   : > { %v2799_v12 = vsel %vm2797_vm6, %v2794_v30, %v2749_v56 }
 0xfba   : > { %v2687_v21 = vpop.permute.xlu2 %2686 }
 0xfc2   : > { %v2765_v53 = vpop.permute.xlu0 %2764  ;;  %v2735_v11 = vpop.permute.xlu2 %2734 }
 0xfc3   : > { %v2804_v49 = vsel %vm2802_vm7, %v2799_v12, %v2765_v53 }
 0xfc4   : > { %8837 = vmatmul.msk.f32.gmra.mxu0 %vm393_vm0, %v2804_v49 }
 0xfca   : > { %v2703_v34 = vpop.permute.xlu0 %2702  ;;  %v2673_v46 = vpop.permute.xlu2 %2672 }
 0xfcb   : > { %v2777_v14 = vsel %vm438_vm1, %v10088_v50, %v2673_v46  ;;  %v9841_v50 = vmov 16.0  }
 0xfcc   : > { %9408 = vrcp.f32 %v9841_v50  ;;  %v3001_v50 = vld [vmem:[%s12625_s7 + $0x48] sm:$0xff] }
 0xfcd   : > { %v2516_v17 = vpop.f32.mrf.mxu2 }
 0xfce   : > { %2766 = vrot.lane.b32.xlu1 %v2516_v17, %s12684_s22 }
 0xfd2   : > { %v2751_v15 = vpop.permute.xlu0 %2750  ;;  %v2721_v33 = vpop.permute.xlu2 %2720 }
 0xfd3   : > { %v9409_v3 = vpop.eup %9408 }
 0xfd4   : > { %v2863_v0 = vmul.f32 16.0, %v9409_v3  ;;  %vm2867_vm8 = vweird.f32 %v9409_v3 }
 0xfd5   : > { %v2542_v40 = vpop.f32.mrf.mxu3 }
 0xfd6   : > { %2704 = vrot.lane.b32.xlu1 %v10274_v23, %s12694_s29  ;;  %2768 = vrot.lane.b32.xlu2 %v2542_v40, %s12684_s22  ;;  %v2781_v23 = vsel %vm2778_vm3, %v2776_v62, %v2687_v21  ;;  %v2864_v60 = vsub.f32 1.0, %v2863_v0  ;;  %v3000_v0 = vld [vmem:[%s12625_s7 + $0x40] sm:$0xff]  ;;  %s12842_s29 = smov 110   ;;  %s12851_s22 = smov 122  }
 0xfd7   : > { %v2786_v43 = vsel %vm2783_vm4, %v2781_v23, %v2703_v34 }
 0xfd8   : > { %v2865_v56 = vmul.f32 %v9409_v3, %v2864_v60 }
 0xfda   : > { %v2689_v57 = vpop.permute.xlu0 %2688  ;;  %v2866_v55 = vadd.f32 %v9409_v3, %v2865_v56  ;;  %v2999_v56 = vld [vmem:[%s12625_s7 + $0x38] sm:$0xff] }
 0xfdb   : > { %v2782_v24 = vsel %vm2778_vm3, %v2777_v14, %v2689_v57  ;;  %v3007_v14 = vld [vmem:[%s12625_s7 + $0x78] sm:$0xff] }
 0xfdc   : > { %v10593_v30 = vsel %vm2867_vm8, %v9409_v3, %v2866_v55  ;;  %3008 = vmatpush.msrb.mxu2 %v3007_v14 }
 0xfde   : > { %2752 = vrot.lane.b32.xlu1 %v10462_v37, %s12686_s21  ;;  %v2790_v37 = vsel %vm548_vm2, %v2786_v43, %v2719_v20  ;;  %s12850_s21 = smov 106  }
 0xfe2   : > { %v2737_v27 = vpop.permute.xlu0 %2736 }
0x1021   : > { %v2838_v32 = vpop.f32.mrf.mxu0 }
0x1022   : > { %v2839_v2 = vadd.f32 %v2838_v32, %v9968_v13  ;;  %v2795_v13 = vsel %vm2792_vm5, %v2790_v37, %v2735_v11 }
0x1023   : > { %v2800_v31 = vsel %vm2797_vm6, %v2795_v13, %v2751_v15  ;;  %v2946_v15 = vld [vmem:[%s12841_s6 + $0x8] sm:$0xff] }
0x1024   : > { %v2850_v51 = vsel %vm393_vm0, %v2839_v2, 0.0  ;;  %2973 = vmatpush.msra.mxu1 %v2946_v15 }
0x1025   : > { %2851 = vadd.xlane.f32.xlu0 %v2850_v51 }
0x1030   : > { %v2769_v29 = vpop.permute.xlu2 %2768 }
0x1040   : > { %v2767_v16 = vpop.permute.xlu1 %2766 }
0x1041   : > { %v2841_v5 = vpop.f32.mrf.mxu0  ;;  %v2805_v39 = vsel %vm2802_vm7, %v2800_v31, %v2767_v16 }
0x1042   : > { %v2842_v6 = vadd.f32 %v2841_v5, %v9972_v19  ;;  %8838 = vmatmul.msk.f32.gmra.mxu0 %vm393_vm0, %v2805_v39 }
0x1044   : > { %v2853_v44 = vsel %vm393_vm0, %v2842_v6, 0.0 }
0x1045   : > { %2854 = vadd.xlane.f32.xlu1 %v2853_v44 }
0x1048   : > { %v2705_v18 = vpop.permute.xlu1 %2704 }
0x1049   : > { %v2787_v26 = vsel %vm2783_vm4, %v2782_v24, %v2705_v18  ;;  %v3006_v18 = vld [vmem:[%s12625_s7 + $0x70] sm:$0xff] }
0x104a   : > { %v2791_v45 = vsel %vm548_vm2, %v2787_v26, %v2721_v33  ;;  %v3005_v33 = vld [vmem:[%s12625_s7 + $0x68] sm:$0xff]  ;;  %3009 = vmatpush.msrb.mxu2 %v3006_v18  ;;  %v3004_v26 = vld [vmem:[%s12625_s7 + $0x60] sm:$0xff] }
0x104b   : > { %v2796_v19 = vsel %vm2792_vm5, %v2791_v45, %v2737_v27  ;;  %v3003_v27 = vld [vmem:[%s12625_s7 + $0x58] sm:$0xff] }
0x104c   : > { %3010 = vmatpush.msrb.mxu2 %v3005_v33 }
0x104e   : > { %3011 = vmatpush.msrb.mxu2 %v3004_v26 }
0x1050   : > { %v2753_v28 = vpop.permute.xlu1 %2752  ;;  %3012 = vmatpush.msrb.mxu2 %v3003_v27 }
0x1051   : > { %v2801_v8 = vsel %vm2797_vm6, %v2796_v19, %v2753_v28 }
0x1052   : > { %v2806_v42 = vsel %vm2802_vm7, %v2801_v8, %v2769_v29  ;;  %v3002_v8 = vld [vmem:[%s12625_s7 + $0x50] sm:$0xff] }
0x1053   : > { %8839 = vmatmul.msk.f32.gmra.mxu0 %vm393_vm0, %v2806_v42  ;;  %3013 = vmatpush.msrb.mxu2 %v3002_v8 }
0x1055   : > { %3014 = vmatpush.msrb.mxu2 %v3001_v50 }
0x1057   : > { %3015 = vmatpush.msrb.mxu2 %v3000_v0 }
0x1059   : > { %3016 = vmatpush.msrb.mxu2 %v2999_v56 }
0x1098   : > { %v2852_v12 = vpop.xlane.xlu0 %2851 }
0x1099   : > { %v2869_v53 = vmul.f32 %v10593_v30, %v2852_v12 }
0x109b   : > { %v2873_v49 = vsub.f32 %v2839_v2, %v2869_v53  ;;  %v2998_v53 = vld [vmem:[%s12625_s7 + $0x30] sm:$0xff] }
0x109c   : > { %3017 = vmatpush.msrb.mxu2 %v2998_v53 }
0x109d   : > { %v2877_v17 = vmul.f32 %v2873_v49, %v2873_v49 }
0x109f   : > { %v2881_v40 = vsel %vm393_vm0, %v2877_v17, 0.0  ;;  %v2997_v17 = vld [vmem:[%s12625_s7 + $0x28] sm:$0xff] }
0x10a0   : > { %2882 = vadd.xlane.f32.xlu2 %v2881_v40  ;;  %3018 = vmatpush.msrb.mxu2 %v2997_v17 }
0x10b8   : > { %v2855_v32 = vpop.xlane.xlu1 %2854 }
0x10b9   : > { %v2870_v51 = vmul.f32 %v10593_v30, %v2855_v32  ;;  %v2996_v32 = vld [vmem:[%s12625_s7 + $0x20] sm:$0xff] }
0x10ba   : > { %3019 = vmatpush.msrb.mxu2 %v2996_v32 }
0x10bb   : > { %v10598_v21 = vsub.f32 %v2842_v6, %v2870_v51 }
0x10bd   : > { %v2878_v38 = vmul.f32 %v10598_v21, %v10598_v21 }
0x10bf   : > { %v2844_v34 = vpop.f32.mrf.mxu0  ;;  %v2884_v11 = vsel %vm393_vm0, %v2878_v38, 0.0  ;;  %v2995_v38 = vld [vmem:[%s12625_s7 + $0x18] sm:$0xff] }
0x10c0   : > { %v2845_v62 = vadd.f32 %v2844_v34, %v9976_v22  ;;  %2885 = vadd.xlane.f32.xlu0 %v2884_v11  ;;  %v2945_v22 = vld [vmem:[%s12841_s6] sm:$0xff]  ;;  %3020 = vmatpush.msrb.mxu2 %v2995_v38 }
0x10c1   : > { %2974 = vmatpush.msra.mxu1 %v2945_v22 }
0x10c2   : > { %v2856_v2 = vsel %vm393_vm0, %v2845_v62, 0.0 }
0x10c3   : > { %2857 = vadd.xlane.f32.xlu2 %v2856_v2 }
0x10d0   : > { %v2847_v20 = vpop.f32.mrf.mxu0 }
0x10d1   : > { %v10606_v23 = vadd.f32 %v2847_v20, %v9980_v25 }
0x10d3   : > { %v2859_v43 = vsel %vm393_vm0, %v10606_v23, 0.0 }
0x10d4   : > { %2860 = vadd.xlane.f32.xlu1 %v2859_v43 }
0x1113   : > { %v2883_v37 = vpop.xlane.xlu2 %2882 }
0x1114   : > { %v2893_v46 = vmul.f32 %v2883_v37, %v10593_v30 }
0x1116   : > { %v2897_v13 = vadd.f32 1e-05, %v2893_v46  ;;  %v2993_v46 = vld [vmem:[%s12625_s7 + $0x8] sm:$0xff] }
0x1118   : > { %9410 = vrsqrt.f32 %v2897_v13  ;;  %vm2907_vm10 = vweird.f32 %v2897_v13 }
0x111e   : > { %v9411_v25 = vpop.eup %9410 }
0x111f   : > { %v2902_v31 = vmul.f32 %v9411_v25, %v2897_v13  ;;  %vm2908_vm9 = vweird.f32 %v9411_v25  ;;  %v2992_v13 = vld [vmem:[%s12625_s7] sm:$0xff] }
0x1120   : > { %vm2909_vm11 = vmor %vm2907_vm10, %vm2908_vm9 }
0x1121   : > { %v2903_v16 = vmul.f32 %v9411_v25, %v2902_v31 }
0x1123   : > { %v2904_v5 = vmul.f32 0.5, %v2903_v16 }
0x1125   : > { %v2905_v39 = vsub.f32 1.5, %v2904_v5 }
0x1127   : > { %v2906_v6 = vmul.f32 %v9411_v25, %v2905_v39 }
0x1129   : > { %v2910_v44 = vsel %vm2909_vm11, %v9411_v25, %v2906_v6 }
0x112a   : > { %v10617_v57 = vmul.f32 %v2910_v44, %v2873_v49 }
0x112c   : > { %8840 = vmatmul.msk.f32.vlgmr.msra.gmra.mxu1 %vm393_vm0, %v10617_v57 }
0x1133   : > { %v2886_v24 = vpop.xlane.xlu0 %2885 }
0x1134   : > { %v2894_v45 = vmul.f32 %v2886_v24, %v10593_v30 }
0x1136   : > { %v2898_v19 = vadd.f32 1e-05, %v2894_v45  ;;  %v2858_v28 = vpop.xlane.xlu2 %2857 }
0x1137   : > { %v2871_v29 = vmul.f32 %v10593_v30, %v2858_v28 }
0x1138   : > { %9412 = vrsqrt.f32 %v2898_v19  ;;  %vm2917_vm13 = vweird.f32 %v2898_v19 }
0x1139   : > { %v10641_v42 = vsub.f32 %v2845_v62, %v2871_v29  ;;  %v2994_v62 = vld [vmem:[%s12625_s7 + $0x10] sm:$0xff] }
0x113a   : > { %3021 = vmatpush.msrb.mxu2 %v2994_v62 }
0x113b   : > { %v2879_v3 = vmul.f32 %v10641_v42, %v10641_v42 }
0x113c   : > { %3022 = vmatpush.msrb.mxu2 %v2993_v46 }
0x113d   : > { %v2887_v60 = vsel %vm393_vm0, %v2879_v3, 0.0 }
0x113e   : > { %v9413_v55 = vpop.eup %9412  ;;  %2888 = vadd.xlane.f32.xlu0 %v2887_v60  ;;  %3023 = vmatpush.msrb.mxu2 %v2992_v13 }
0x113f   : > { %v2912_v12 = vmul.f32 %v9413_v55, %v2898_v19  ;;  %vm2918_vm12 = vweird.f32 %v9413_v55 }
0x1140   : > { %vm2919_vm14 = vmor %vm2917_vm13, %vm2918_vm12 }
0x1141   : > { %v2913_v49 = vmul.f32 %v9413_v55, %v2912_v12 }
0x1143   : > { %v2914_v40 = vmul.f32 0.5, %v2913_v49 }
0x1145   : > { %v2915_v51 = vsub.f32 1.5, %v2914_v40 }
0x1147   : > { %v2861_v34 = vpop.xlane.xlu1 %2860  ;;  %v2916_v11 = vmul.f32 %v9413_v55, %v2915_v51 }
0x1148   : > { %v2872_v2 = vmul.f32 %v10593_v30, %v2861_v34 }
0x1149   : > { %v2920_v20 = vsel %vm2919_vm14, %v9413_v55, %v2916_v11 }
0x114a   : > { %v2876_v43 = vsub.f32 %v10606_v23, %v2872_v2  ;;  %v2942_v15 = vmul.f32 %v2920_v20, %v10598_v21 }
0x114c   : > { %8841 = vmatmul.msk.f32.gmra.mxu1 %vm393_vm0, %v2942_v15  ;;  %v2880_v22 = vmul.f32 %v2876_v43, %v2876_v43 }
0x114e   : > { %v2890_v37 = vsel %vm393_vm0, %v2880_v22, 0.0 }
0x114f   : > { %2891 = vadd.xlane.f32.xlu2 %v2890_v37 }
0x11a9   : > { %v2976_v23 = vpop.f32.mrf.mxu1 }
0x11aa   : > { %v2988_v25 = vmax.f32 %v2976_v23, 0.0 }
0x11ac   : > { %3024 = vmatmul.f32.vlgmr.msrb.gmra.mxu2 %v2988_v25 }
0x11b1   : > { %v2889_v21 = vpop.xlane.xlu0 %2888 }
0x11b2   : > { %v2895_v31 = vmul.f32 %v2889_v21, %v10593_v30 }
0x11b4   : > { %v2899_v16 = vadd.f32 1e-05, %v2895_v31 }
0x11b6   : > { %9414 = vrsqrt.f32 %v2899_v16  ;;  %vm2927_vm8 = vweird.f32 %v2899_v16 }
0x11bc   : > { %v9415_v5 = vpop.eup %9414 }
0x11bd   : > { %v2922_v39 = vmul.f32 %v9415_v5, %v2899_v16  ;;  %vm2928_vm15 = vweird.f32 %v9415_v5 }
0x11be   : > { %vm2929_vm9 = vmor %vm2927_vm8, %vm2928_vm15 }
0x11bf   : > { %v2923_v6 = vmul.f32 %v9415_v5, %v2922_v39  ;;  %v8844_v39 = vld [vmem:[%s12622_s4 + $0x10] sm:$0xff] }
0x11c1   : > { %v2924_v44 = vmul.f32 0.5, %v2923_v6 }
0x11c2   : > { %v2892_v14 = vpop.xlane.xlu2 %2891 }
0x11c3   : > { %v2925_v18 = vsub.f32 1.5, %v2924_v44  ;;  %v2896_v33 = vmul.f32 %v2892_v14, %v10593_v30 }
0x11c5   : > { %v2900_v24 = vadd.f32 1e-05, %v2896_v33  ;;  %v2926_v26 = vmul.f32 %v9415_v5, %v2925_v18 }
0x11c7   : > { %9416 = vrsqrt.f32 %v2900_v24  ;;  %v2930_v45 = vsel %vm2929_vm9, %v9415_v5, %v2926_v26  ;;  %vm2937_vm11 = vweird.f32 %v2900_v24  ;;  %v8845_v5 = vld [vmem:[%s12622_s4 + $0x18] sm:$0xff] }
0x11c8   : > { %v2943_v27 = vmul.f32 %v2930_v45, %v10641_v42  ;;  %3154 = vmatpush.msrb.mxu3 %v8845_v5 }
0x11c9   : > { %v2979_v19 = vpop.f32.mrf.mxu1 }
0x11ca   : > { %8842 = vmatmul.msk.f32.gmra.mxu1 %vm393_vm0, %v2943_v27  ;;  %v2989_v28 = vmax.f32 %v2979_v19, 0.0  ;;  %3155 = vmatpush.msrb.mxu3 %v8844_v39 }
0x11cc   : > { %3027 = vmatmul.f32.gmra.mxu2 %v2989_v28 }
0x11cd   : > { %v9417_v29 = vpop.eup %9416 }
0x11ce   : > { %v2932_v8 = vmul.f32 %v9417_v29, %v2900_v24  ;;  %vm2938_vm10 = vweird.f32 %v9417_v29 }
0x11cf   : > { %vm2939_vm12 = vmor %vm2937_vm11, %vm2938_vm10 }
0x11d0   : > { %v2933_v50 = vmul.f32 %v9417_v29, %v2932_v8 }
0x11d2   : > { %v2934_v3 = vmul.f32 0.5, %v2933_v50 }
0x11d4   : > { %v2935_v0 = vsub.f32 1.5, %v2934_v3 }
0x11d6   : > { %v2936_v60 = vmul.f32 %v9417_v29, %v2935_v0 }
0x11d8   : > { %v2940_v56 = vsel %vm2939_vm12, %v9417_v29, %v2936_v60 }
0x11d9   : > { %v2944_v55 = vmul.f32 %v2940_v56, %v2876_v43 }
0x11db   : > { %8843 = vmatmul.msk.f32.gmra.mxu1 %vm393_vm0, %v2944_v55 }
0x122f   : > { %v3025_v12 = vpop.f32.mrf.mxu2 }
0x1230   : > { %v3026_v42 = vadd.f32 %v3025_v12, %v10617_v57 }
0x1232   : > { %v3037_v53 = vsel %vm393_vm0, %v3026_v42, 0.0 }
0x1233   : > { %3038 = vadd.xlane.f32.xlu1 %v3037_v53 }
0x1247   : > { %v2982_v49 = vpop.f32.mrf.mxu1 }
0x1248   : > { %v2990_v17 = vmax.f32 %v2982_v49, 0.0 }
0x124a   : > { %3030 = vmatmul.f32.gmra.mxu2 %v2990_v17 }
0x124f   : > { %v3028_v40 = vpop.f32.mrf.mxu2 }
0x1250   : > { %v3029_v32 = vadd.f32 %v3028_v40, %v2942_v15 }
0x1252   : > { %v3040_v51 = vsel %vm393_vm0, %v3029_v32, 0.0 }
0x1253   : > { %3041 = vadd.xlane.f32.xlu0 %v3040_v51 }
0x1258   : > { %v2985_v38 = vpop.f32.mrf.mxu1 }
0x1259   : > { %v2991_v34 = vmax.f32 %v2985_v38, 0.0 }
0x125b   : > { %3033 = vmatmul.f32.gmra.mxu2 %v2991_v34 }
0x12a6   : > { %v3039_v11 = vpop.xlane.xlu1 %3038 }
0x12a7   : > { %v3049_v62 = vmul.f32 %v3039_v11, %v10593_v30 }
0x12a9   : > { %v3053_v2 = vsub.f32 %v3026_v42, %v3049_v62 }
0x12ab   : > { %v3057_v20 = vmul.f32 %v3053_v2, %v3053_v2 }
0x12ad   : > { %v3061_v57 = vsel %vm393_vm0, %v3057_v20, 0.0 }
0x12ae   : > { %3062 = vadd.xlane.f32.xlu2 %v3061_v57 }
0x12c6   : > { %v3042_v43 = vpop.xlane.xlu0 %3041 }
0x12c7   : > { %v3050_v22 = vmul.f32 %v3042_v43, %v10593_v30 }
0x12c9   : > { %v3054_v37 = vsub.f32 %v3029_v32, %v3050_v22 }
0x12cb   : > { %v3058_v46 = vmul.f32 %v3054_v37, %v3054_v37 }
0x12cd   : > { %v3031_v15 = vpop.f32.mrf.mxu2  ;;  %v3064_v13 = vsel %vm393_vm0, %v3058_v46, 0.0 }
0x12ce   : > { %v3032_v23 = vadd.f32 %v3031_v15, %v2943_v27  ;;  %3065 = vadd.xlane.f32.xlu1 %v3064_v13 }
0x12d0   : > { %v3043_v25 = vsel %vm393_vm0, %v3032_v23, 0.0 }
0x12d1   : > { %3044 = vadd.xlane.f32.xlu0 %v3043_v25 }
0x12de   : > { %v3034_v21 = vpop.f32.mrf.mxu2 }
0x12df   : > { %v3035_v31 = vadd.f32 %v3034_v21, %v2944_v55 }
0x12e1   : > { %v3046_v16 = vsel %vm393_vm0, %v3035_v31, 0.0 }
0x12e2   : > { %3047 = vadd.xlane.f32.xlu2 %v3046_v16 }
0x1321   : > { %v3063_v6 = vpop.xlane.xlu2 %3062 }
0x1322   : > { %v3073_v44 = vmul.f32 %v3063_v6, %v10593_v30 }
0x1324   : > { %v3077_v14 = vadd.f32 1e-05, %v3073_v44 }
0x1326   : > { %9418 = vrsqrt.f32 %v3077_v14  ;;  %vm3087_vm14 = vweird.f32 %v3077_v14 }
0x132c   : > { %v9419_v18 = vpop.eup %9418 }
0x132d   : > { %v3082_v33 = vmul.f32 %v9419_v18, %v3077_v14  ;;  %vm3088_vm13 = vweird.f32 %v9419_v18 }
0x132e   : > { %vm3089_vm15 = vmor %vm3087_vm14, %vm3088_vm13 }
0x132f   : > { %v3083_v24 = vmul.f32 %v9419_v18, %v3082_v33 }
0x1331   : > { %v3084_v26 = vmul.f32 0.5, %v3083_v24 }
0x1333   : > { %v3085_v45 = vsub.f32 1.5, %v3084_v26 }
0x1335   : > { %v3086_v27 = vmul.f32 %v9419_v18, %v3085_v45 }
0x1337   : > { %v3090_v19 = vsel %vm3089_vm15, %v9419_v18, %v3086_v27 }
0x1338   : > { %v10702_v28 = vmul.f32 %v3090_v19, %v3053_v2 }
0x133a   : > { %8846 = vmatmul.msk.f32.vlgmr.msrb.gmra.mxu3 %vm393_vm0, %v10702_v28 }
0x1341   : > { %v3066_v29 = vpop.xlane.xlu1 %3065 }
0x1342   : > { %v3074_v8 = vmul.f32 %v3066_v29, %v10593_v30 }
0x1344   : > { %v3078_v50 = vadd.f32 1e-05, %v3074_v8  ;;  %v3045_v3 = vpop.xlane.xlu0 %3044 }
0x1345   : > { %v3051_v0 = vmul.f32 %v3045_v3, %v10593_v30 }
0x1346   : > { %9420 = vrsqrt.f32 %v3078_v50  ;;  %vm3097_vm9 = vweird.f32 %v3078_v50 }
0x1347   : > { %v3055_v60 = vsub.f32 %v3032_v23, %v3051_v0 }
0x1349   : > { %v3059_v56 = vmul.f32 %v3055_v60, %v3055_v60 }
0x134b   : > { %v3067_v55 = vsel %vm393_vm0, %v3059_v56, 0.0 }
0x134c   : > { %v9421_v12 = vpop.eup %9420  ;;  %3068 = vadd.xlane.f32.xlu1 %v3067_v55 }
0x134d   : > { %v3092_v42 = vmul.f32 %v9421_v12, %v3078_v50  ;;  %vm3098_vm8 = vweird.f32 %v9421_v12 }
0x134e   : > { %vm3099_vm10 = vmor %vm3097_vm9, %vm3098_vm8 }
0x134f   : > { %v3093_v53 = vmul.f32 %v9421_v12, %v3092_v42 }
0x1351   : > { %v3094_v49 = vmul.f32 0.5, %v3093_v53 }
0x1353   : > { %v3095_v17 = vsub.f32 1.5, %v3094_v49 }
0x1355   : > { %v3048_v40 = vpop.xlane.xlu2 %3047  ;;  %v3096_v32 = vmul.f32 %v9421_v12, %v3095_v17 }
0x1356   : > { %v3052_v51 = vmul.f32 %v3048_v40, %v10593_v30 }
0x1357   : > { %v3100_v38 = vsel %vm3099_vm10, %v9421_v12, %v3096_v32 }
0x1358   : > { %v3056_v34 = vsub.f32 %v3035_v31, %v3052_v51  ;;  %v10710_v11 = vmul.f32 %v3100_v38, %v3054_v37 }
0x135a   : > { %8847 = vmatmul.msk.f32.gmra.mxu3 %vm393_vm0, %v10710_v11  ;;  %v3060_v62 = vmul.f32 %v3056_v34, %v3056_v34 }
0x135c   : > { %v3070_v2 = vsel %vm393_vm0, %v3060_v62, 0.0 }
0x135d   : > { %3071 = vadd.xlane.f32.xlu0 %v3070_v2 }
0x13bd   : > { %v10715_v20 = vpop.f32.mrf.mxu3 }
0x13be   : > { %3170 = vrot.lane.b32.xlu0 %v10715_v20, %s12701_s24 }
0x13bf   : > { %v3069_v57 = vpop.xlane.xlu1 %3068 }
0x13c0   : > { %v3075_v43 = vmul.f32 %v3069_v57, %v10593_v30 }
0x13c2   : > { %v3079_v22 = vadd.f32 1e-05, %v3075_v43 }
0x13c4   : > { %9422 = vrsqrt.f32 %v3079_v22  ;;  %vm3107_vm12 = vweird.f32 %v3079_v22 }
0x13ca   : > { %v9423_v46 = vpop.eup %9422 }
0x13cb   : > { %v3102_v37 = vmul.f32 %v9423_v46, %v3079_v22  ;;  %vm3108_vm11 = vweird.f32 %v9423_v46 }
0x13cc   : > { %vm3109_vm13 = vmor %vm3107_vm12, %vm3108_vm11 }
0x13cd   : > { %v3103_v15 = vmul.f32 %v9423_v46, %v3102_v37 }
0x13cf   : > { %v3104_v13 = vmul.f32 0.5, %v3103_v15 }
0x13d0   : > { %v3072_v23 = vpop.xlane.xlu0 %3071 }
0x13d1   : > { %v3105_v25 = vsub.f32 1.5, %v3104_v13  ;;  %v3076_v21 = vmul.f32 %v3072_v23, %v10593_v30 }
0x13d3   : > { %v3080_v31 = vadd.f32 1e-05, %v3076_v21  ;;  %v3106_v16 = vmul.f32 %v9423_v46, %v3105_v25 }
0x13d5   : > { %9424 = vrsqrt.f32 %v3080_v31  ;;  %v3110_v5 = vsel %vm3109_vm13, %v9423_v46, %v3106_v16  ;;  %vm3117_vm15 = vweird.f32 %v3080_v31 }
0x13d6   : > { %v10721_v39 = vmul.f32 %v3110_v5, %v3055_v60 }
0x13d8   : > { %8848 = vmatmul.msk.f32.gmra.mxu3 %vm393_vm0, %v10721_v39 }
0x13db   : > { %v9425_v6 = vpop.eup %9424 }
0x13dc   : > { %v3112_v44 = vmul.f32 %v9425_v6, %v3080_v31  ;;  %vm3118_vm14 = vweird.f32 %v9425_v6 }
0x13dd   : > { %v10725_v14 = vpop.f32.mrf.mxu3  ;;  %vm3119_vm8 = vmor %vm3117_vm15, %vm3118_vm14 }
0x13de   : > { %v3113_v18 = vmul.f32 %v9425_v6, %v3112_v44  ;;  %3197 = vrot.lane.b32.xlu2 %v10725_v14, %s12701_s24 }
0x13e0   : > { %v3114_v33 = vmul.f32 0.5, %v3113_v18 }
0x13e2   : > { %v3115_v24 = vsub.f32 1.5, %v3114_v33 }
0x13e4   : > { %v3116_v26 = vmul.f32 %v9425_v6, %v3115_v24 }
0x13e6   : > { %v3120_v45 = vsel %vm3119_vm8, %v9425_v6, %v3116_v26 }
0x13e7   : > { %v10729_v27 = vmul.f32 %v3120_v45, %v3056_v34 }
0x13e9   : > { %8849 = vmatmul.msk.f32.gmra.mxu3 %vm393_vm0, %v10729_v27 }
0x1430   : > { %v3171_v19 = vpop.permute.xlu0 %3170 }
0x1431   : > { %8850 = vmatpush.xpose.msk.msra.mxu0 %vm438_vm1, %v3171_v19 }
0x1434   : > { %8851 = vmatmul.msk.f32.vlgmr.msra.gmra.mxu0 %vm438_vm1, %v10715_v20 }
0x1438   : > { %v3198_v29 = vpop.permute.xlu2 %3197 }
0x1439   : > { %8852 = vmatpush.xpose.msk.msrb.mxu1 %vm438_vm1, %v3198_v29 }
0x143c   : > { %8853 = vmatmul.msk.f32.vlgmr.msrb.gmra.mxu1 %vm438_vm1, %v10725_v14 }
0x145b   : > { %v10739_v8 = vpop.f32.mrf.mxu3 }
0x145c   : > { %3224 = vrot.lane.b32.xlu1 %v10739_v8, %s12701_s24  ;;  %v9243_v23 = vpack.i.bf16 %v10739_v8, %v10715_v20 }
0x146c   : > { %v10743_v50 = vpop.f32.mrf.mxu3 }
0x146d   : > { %3251 = vrot.lane.b32.xlu2 %v10743_v50, %s12701_s24  ;;  %s12856_s24 = smov 118  }
0x14b1   : > { %v3193_v3 = vpop.f32.mrf.mxu0 }
0x14b2   : > { %v3277_v0 = vmul.f32 0.70710677, %v3193_v3 }
0x14b4   : > { %v3281_v60 = vsel %vm548_vm2, %v3277_v0, -inf }
0x14b5   : > { %3282 = vmax.xlane.f32.xlu2 %v3281_v60 }
0x14b9   : > { %v3220_v56 = vpop.f32.mrf.mxu1 }
0x14ba   : > { %v3278_v55 = vmul.f32 0.70710677, %v3220_v56 }
0x14bc   : > { %v3284_v12 = vsel %vm548_vm2, %v3278_v55, -inf }
0x14bd   : > { %3285 = vmax.xlane.f32.xlu0 %v3284_v12 }
0x14c7   : > { %v3252_v42 = vpop.permute.xlu2 %3251 }
0x14c8   : > { %8856 = vmatpush.xpose.msk.msrb.mxu0 %vm438_vm1, %v3252_v42 }
0x14cb   : > { %8857 = vmatmul.msk.f32.vlgmr.msrb.gmra.mxu0 %vm438_vm1, %v10743_v50 }
0x14ce   : > { %v3225_v53 = vpop.permute.xlu1 %3224 }
0x14cf   : > { %8854 = vmatpush.xpose.msk.msra.mxu3 %vm438_vm1, %v3225_v53 }
0x14d2   : > { %8855 = vmatmul.msk.f32.vlgmr.msra.gmra.mxu3 %vm438_vm1, %v10739_v8 }
0x1528   : > { %v3283_v22 = vpop.xlane.xlu2 %3282 }
0x1529   : > { %v3293_v46 = vsub.f32 %v3277_v0, %v3283_v22 }
0x152b   : > { %v3297_v37 = vmul.f32 1.442695, %v3293_v46 }
0x1530   : > { %v3286_v49 = vpop.xlane.xlu0 %3285 }
0x1531   : > { %v3294_v17 = vsub.f32 %v3278_v55, %v3286_v49 }
0x1533   : > { %v3299_v40 = vmul.f32 1.442695, %v3294_v17 }
0x1535   : > { %9426 = vpow2.f32 %v3299_v40 }
0x1536   : > { %9428 = vpow2.f32 %v3297_v37 }
0x153b   : > { %v9427_v32 = vpop.eup %9426 }
0x153c   : > { %v3308_v51 = vsel %vm548_vm2, %v9427_v32, 0.0  ;;  %v9429_v15 = vpop.eup %9428 }
0x153d   : > { %3309 = vadd.xlane.f32.xlu1 %v3308_v51  ;;  %v3305_v13 = vsel %vm548_vm2, %v9429_v15, 0.0 }
0x1548   : > { %v3274_v38 = vpop.f32.mrf.mxu0 }
0x1549   : > { %v3280_v34 = vmul.f32 0.70710677, %v3274_v38 }
0x154b   : > { %v3290_v62 = vsel %vm548_vm2, %v3280_v34, -inf }
0x154c   : > { %3291 = vmax.xlane.f32.xlu2 %v3290_v62 }
0x1555   : > { %v3247_v2 = vpop.f32.mrf.mxu3 }
0x1556   : > { %v3279_v57 = vmul.f32 0.70710677, %v3247_v2  ;;  %3351 = vrot.lane.b32.xlu1 %v10725_v14, %s12698_s27 }
0x1558   : > { %v3287_v43 = vsel %vm548_vm2, %v3279_v57, -inf }
0x1559   : > { %3288 = vmax.xlane.f32.xlu0 %v3287_v43 }
0x1564   : > { %3429 = vrot.lane.b32.xlu2 %v10715_v20, %s12696_s26 }
0x156c   : > { %3403 = vrot.lane.b32.xlu2 %v10743_v50, %s12698_s27 }
0x156d   : > { %3431 = vrot.lane.b32.xlu0 %v10715_v20, %s12842_s29 }
0x1575   : > { %3459 = vrot.lane.b32.xlu0 %v10725_v14, %s12842_s29 }
0x157d   : > { %3457 = vrot.lane.b32.xlu0 %v10725_v14, %s12696_s26 }
0x1580   : > { %3306 = vadd.xlane.f32.xlu1 %v3305_v13 }
0x1599   : > { %9244 = vrot.lane.b32.xlu1 %v9243_v23, %s12698_s27  ;;  %s12855_s27 = smov 90  }
0x15a1   : > { %3487 = vrot.lane.b32.xlu1 %v10739_v8, %s12842_s29 }
0x15a9   : > { %3515 = vrot.lane.b32.xlu1 %v10743_v50, %s12842_s29 }
0x15b0   : > { %v3310_v25 = vpop.xlane.xlu1 %3309 }
0x15b1   : > { %9430 = vrcp.f32 %v3310_v25 }
0x15b7   : > { %v9431_v5 = vpop.eup %9430 }
0x15b8   : > { %v10778_v6 = vmul.f32 %v9431_v5, %v9427_v32 }
0x15ba   : > { %12843 = vst [vmem:[#allocation49_spill] sm:$0xff] %v10778_v6 }
0x15bf   : > { %v3292_v21 = vpop.xlane.xlu2 %3291 }
0x15c0   : > { %v3296_v31 = vsub.f32 %v3280_v34, %v3292_v21 }
0x15c2   : > { %v3303_v16 = vmul.f32 1.442695, %v3296_v31 }
0x15c4   : > { %9432 = vpow2.f32 %v3303_v16 }
0x15c7   : > { %v3430_v0 = vpop.permute.xlu2 %3429 }
0x15c8   : > { %v3352_v44 = vpop.permute.xlu1 %3351 }
0x15c9   : > { %3372 = vmatpush.msrb.mxu3 %v3352_v44 }
0x15ca   : > { %v9433_v18 = vpop.eup %9432  ;;  %8859 = vmatmul.msk.f32.vlgmr.msrb.gmra.mxu3 %vm548_vm2, %v10778_v6 }
0x15cb   : > { %v3314_v33 = vsel %vm548_vm2, %v9433_v18, 0.0 }
0x15cc   : > { %3315 = vadd.xlane.f32.xlu2 %v3314_v33  ;;  %v3289_v24 = vpop.xlane.xlu0 %3288 }
0x15cd   : > { %v3295_v26 = vsub.f32 %v3279_v57, %v3289_v24 }
0x15cf   : > { %v3301_v45 = vmul.f32 1.442695, %v3295_v26  ;;  %v3404_v17 = vpop.permute.xlu2 %3403 }
0x15d1   : > { %9434 = vpow2.f32 %v3301_v45 }
0x15d7   : > { %v9435_v19 = vpop.eup %9434 }
0x15d8   : > { %v3311_v29 = vsel %vm548_vm2, %v9435_v19, 0.0 }
0x15d9   : > { %3312 = vadd.xlane.f32.xlu0 %v3311_v29 }
0x15df   : > { %v3432_v3 = vpop.permute.xlu0 %3431 }
0x15e0   : > { %8862 = vmatpush.xpose.msk.msra.mxu3 %vm438_vm1, %v3432_v3 }
0x15e3   : > { %8863 = vmatmul.msk.f32.vlgmr.msra.gmra.mxu3 %vm438_vm1, %v3430_v0  ;;  %v10828_v0 = vpack.i.bf16 %v10739_v8, %v10725_v14 }
0x15e4   : > { %3513 = vrot.lane.b32.xlu2 %v10743_v50, %s12696_s26 }
0x15e7   : > { %v3460_v49 = vpop.permute.xlu0 %3459 }
0x15ec   : > { %3695 = vrot.lane.b32.xlu2 %v10715_v20, %s12844_s23 }
0x15ed   : > { %3485 = vrot.lane.b32.xlu0 %v10739_v8, %s12696_s26  ;;  %s12854_s26 = smov 104  }
0x15ef   : > { %v3458_v38 = vpop.permute.xlu0 %3457 }
0x15f3   : > { %v3307_v60 = vpop.xlane.xlu1 %3306 }
0x15f4   : > { %9436 = vrcp.f32 %v3307_v60 }
0x15fa   : > { %v9437_v56 = vpop.eup %9436 }
0x15fb   : > { %v10792_v53 = vmul.f32 %v9437_v56, %v9429_v15 }
0x15fd   : > { %12845 = vst [vmem:[#allocation50_spill] sm:$0xff] %v10792_v53 }
0x160b   : > { %v9245_v55 = vpop.permute.xlu1 %9244 }
0x160c   : > { %v9247_v12 = vunpack.i.h.bf16 %v9245_v55  ;;  %v9246_v42 = vunpack.i.l.bf16 %v9245_v55 }
0x160e   : > { %3346 = vmatpush.msra.mxu1 %v9246_v42  ;;  %3398 = vmatpush.msra.mxu0 %v9247_v12 }
0x160f   : > { %8858 = vmatmul.msk.f32.vlgmr.msra.gmra.mxu1 %vm548_vm2, %v10792_v53 }
0x1610   : > { %8864 = vmatpush.xpose.msk.msrb.mxu0 %vm438_vm1, %v3460_v49  ;;  %3424 = vmatpush.msrb.mxu1 %v3404_v17 }
0x1613   : > { %v3488_v40 = vpop.permute.xlu1 %3487 }
0x1614   : > { %8866 = vmatpush.xpose.msk.msra.mxu1 %vm438_vm1, %v3488_v40 }
0x161b   : > { %v3516_v32 = vpop.permute.xlu1 %3515 }
0x161c   : > { %8868 = vmatpush.xpose.msk.msra.mxu2 %vm438_vm1, %v3516_v32 }
0x163f   : > { %v3316_v51 = vpop.xlane.xlu2 %3315 }
0x1640   : > { %9438 = vrcp.f32 %v3316_v51 }
0x1646   : > { %v9439_v34 = vpop.eup %9438 }
0x1647   : > { %v10799_v62 = vmul.f32 %v9439_v34, %v9433_v18  ;;  %v3514_v2 = vpop.permute.xlu2 %3513 }
0x1648   : > { %8869 = vmatmul.msk.f32.vlgmr.msra.gmra.mxu2 %vm438_vm1, %v3514_v2 }
0x1649   : > { %12846 = vst [vmem:[#allocation51_spill] sm:$0xff] %v10799_v62  ;;  %8861 = vmatmul.msk.f32.vlgmr.msrb.gmra.mxu1 %vm548_vm2, %v10799_v62 }
0x164c   : > { %v3313_v57 = vpop.xlane.xlu0 %3312 }
0x164d   : > { %9440 = vrcp.f32 %v3313_v57  ;;  %v10808_v46 = vpop.f32.mrf.mxu3 }
0x164f   : > { %v3696_v40 = vpop.permute.xlu2 %3695 }
0x1653   : > { %v9441_v43 = vpop.eup %9440 }
0x1654   : > { %v10804_v22 = vmul.f32 %v9441_v43, %v9435_v19 }
0x1656   : > { %12847 = vst [vmem:[#allocation52_spill] sm:$0xff] %v10804_v22  ;;  %8860 = vmatmul.msk.f32.vlgmr.msra.gmra.mxu0 %vm548_vm2, %v10804_v22 }
0x165e   : > { %8865 = vmatmul.msk.f32.vlgmr.msrb.gmra.mxu0 %vm438_vm1, %v3458_v38 }
0x165f   : > { %v3486_v37 = vpop.permute.xlu0 %3485 }
0x1660   : > { %8867 = vmatmul.msk.f32.vlgmr.msra.gmra.mxu1 %vm438_vm1, %v3486_v37 }
0x1666   : > { %v3454_v15 = vpop.f32.mrf.mxu3 }
0x1667   : > { %v3541_v13 = vmul.f32 0.70710677, %v3454_v15 }
0x1669   : > { %v3545_v23 = vsel %vm548_vm2, %v3541_v13, -inf }
0x166a   : > { %3546 = vmax.xlane.f32.xlu0 %v3545_v23 }
0x167e   : > { %3693 = vrot.lane.b32.xlu0 %v10715_v20, %s12848_s25 }
0x168c   : > { %v10815_v25 = vpop.f32.mrf.mxu1 }
0x16c6   : > { %v10819_v31 = vpop.f32.mrf.mxu1 }
0x16cb   : > { %v3538_v60 = vpop.f32.mrf.mxu2 }
0x16cc   : > { %v3544_v56 = vmul.f32 0.70710677, %v3538_v60 }
0x16ce   : > { %v3554_v55 = vsel %vm548_vm2, %v3544_v56, -inf }
0x16d3   : > { %v10817_v21 = vpop.f32.mrf.mxu0 }
0x16db   : > { %v3482_v16 = vpop.f32.mrf.mxu0 }
0x16dc   : > { %v3542_v5 = vmul.f32 0.70710677, %v3482_v16 }
0x16dd   : > { %v3510_v44 = vpop.f32.mrf.mxu1  ;;  %v3547_v18 = vpop.xlane.xlu0 %3546 }
0x16de   : > { %v3543_v33 = vmul.f32 0.70710677, %v3510_v44  ;;  %v3557_v24 = vsub.f32 %v3541_v13, %v3547_v18  ;;  %v3548_v26 = vsel %vm548_vm2, %v3542_v5, -inf }
0x16df   : > { %3549 = vmax.xlane.f32.xlu1 %v3548_v26 }
0x16e0   : > { %v3561_v45 = vmul.f32 1.442695, %v3557_v24  ;;  %v3551_v19 = vsel %vm548_vm2, %v3543_v33, -inf }
0x16e1   : > { %3552 = vmax.xlane.f32.xlu0 %v3551_v19 }
0x16e2   : > { %9442 = vpow2.f32 %v3561_v45 }
0x16e8   : > { %v9443_v29 = vpop.eup %9442 }
0x16e9   : > { %v3569_v3 = vsel %vm548_vm2, %v9443_v29, 0.0 }
0x16ea   : > { %3570 = vadd.xlane.f32.xlu2 %v3569_v3 }
0x16f0   : > { %v3694_v12 = vpop.permute.xlu0 %3693 }
0x16f8   : > { %3589 = vrot.lane.b32.xlu1 %v10715_v20, %s12849_s28 }
0x1702   : > { %9249 = vrot.lane.b32.xlu2 %v10828_v0, %s12849_s28 }
0x1722   : > { %3555 = vmax.xlane.f32.xlu1 %v3554_v55 }
0x173b   : > { %3723 = vrot.lane.b32.xlu1 %v10725_v14, %s12844_s23 }
0x1743   : > { %3749 = vrot.lane.b32.xlu1 %v10739_v8, %s12848_s25 }
0x174b   : > { %3779 = vrot.lane.b32.xlu1 %v10743_v50, %s12844_s23 }
0x1752   : > { %v3550_v42 = vpop.xlane.xlu1 %3549 }
0x1753   : > { %v3558_v49 = vsub.f32 %v3542_v5, %v3550_v42 }
0x1754   : > { %v3553_v17 = vpop.xlane.xlu0 %3552 }
0x1755   : > { %v3563_v32 = vmul.f32 1.442695, %v3558_v49  ;;  %v3559_v51 = vsub.f32 %v3543_v33, %v3553_v17 }
0x1757   : > { %9444 = vpow2.f32 %v3563_v32  ;;  %v3565_v38 = vmul.f32 1.442695, %v3559_v51 }
0x1759   : > { %9446 = vpow2.f32 %v3565_v38 }
0x175d   : > { %v9445_v34 = vpop.eup %9444  ;;  %v3571_v2 = vpop.xlane.xlu2 %3570 }
0x175e   : > { %v3572_v57 = vsel %vm548_vm2, %v9445_v34, 0.0  ;;  %9448 = vrcp.f32 %v3571_v2 }
0x175f   : > { %v9447_v43 = vpop.eup %9446  ;;  %3573 = vadd.xlane.f32.xlu2 %v3572_v57 }
0x1760   : > { %v3575_v37 = vsel %vm548_vm2, %v9447_v43, 0.0 }
0x1761   : > { %3576 = vadd.xlane.f32.xlu0 %v3575_v37 }
0x1764   : > { %v9449_v16 = vpop.eup %9448 }
0x1765   : > { %v9250_v15 = vpop.permute.xlu2 %9249  ;;  %v10841_v5 = vmul.f32 %v9449_v16, %v9443_v29 }
0x1766   : > { %v9252_v13 = vunpack.i.h.bf16 %v9250_v15  ;;  %v9251_v23 = vunpack.i.l.bf16 %v9250_v15 }
0x1768   : > { %3636 = vmatpush.msra.mxu0 %v9251_v23  ;;  %3662 = vmatpush.msrb.mxu1 %v9252_v13 }
0x176a   : > { %v3590_v44 = vpop.permute.xlu1 %3589 }
0x176b   : > { %3610 = vmatpush.msrb.mxu3 %v3590_v44 }
0x176c   : > { %8870 = vmatmul.msk.f32.vlgmr.msrb.gmra.mxu3 %vm548_vm2, %v10841_v5 }
0x176d   : > { %8874 = vmatpush.xpose.msk.msra.mxu3 %vm438_vm1, %v3696_v40 }
0x1774   : > { %8875 = vmatmul.msk.f32.vlgmr.msra.gmra.mxu3 %vm438_vm1, %v3694_v12 }
0x1775   : > { %3721 = vrot.lane.b32.xlu0 %v10725_v14, %s12848_s25 }
0x1777   : > { %3751 = vrot.lane.b32.xlu2 %v10739_v8, %s12844_s23 }
0x177f   : > { %3667 = vrot.lane.b32.xlu2 %v10743_v50, %s12849_s28 }
0x1787   : > { %3777 = vrot.lane.b32.xlu2 %v10743_v50, %s12848_s25 }
0x1795   : > { %v3556_v18 = vpop.xlane.xlu1 %3555 }
0x1796   : > { %v3560_v33 = vsub.f32 %v3544_v56, %v3556_v18 }
0x1798   : > { %v3567_v24 = vmul.f32 1.442695, %v3560_v33 }
0x179a   : > { %9450 = vpow2.f32 %v3567_v24 }
0x17a0   : > { %v9451_v26 = vpop.eup %9450 }
0x17a1   : > { %v3578_v45 = vsel %vm548_vm2, %v9451_v26, 0.0 }
0x17a2   : > { %3579 = vadd.xlane.f32.xlu0 %v3578_v45 }
0x17ad   : > { %v3724_v19 = vpop.permute.xlu1 %3723 }
0x17ae   : > { %8876 = vmatpush.xpose.msk.msrb.mxu0 %vm438_vm1, %v3724_v19 }
0x17b5   : > { %v3750_v55 = vpop.permute.xlu1 %3749 }
0x17bd   : > { %v3780_v40 = vpop.permute.xlu1 %3779 }
0x17d2   : > { %v3574_v29 = vpop.xlane.xlu2 %3573 }
0x17d3   : > { %9452 = vrcp.f32 %v3574_v29 }
0x17d4   : > { %v3577_v3 = vpop.xlane.xlu0 %3576 }
0x17d5   : > { %9454 = vrcp.f32 %v3577_v3 }
0x17d9   : > { %v9453_v60 = vpop.eup %9452 }
0x17da   : > { %v10857_v12 = vmul.f32 %v9453_v60, %v9445_v34  ;;  %v3752_v42 = vpop.permute.xlu2 %3751 }
0x17db   : > { %v9455_v49 = vpop.eup %9454  ;;  %8878 = vmatpush.xpose.msk.msra.mxu1 %vm438_vm1, %v3752_v42 }
0x17dc   : > { %v10860_v56 = vmul.f32 %v9455_v49, %v9447_v43  ;;  %8871 = vmatmul.msk.f32.vlgmr.msra.gmra.mxu0 %vm548_vm2, %v10857_v12 }
0x17de   : > { %8872 = vmatmul.msk.f32.vlgmr.msrb.gmra.mxu1 %vm548_vm2, %v10860_v56 }
0x17e2   : > { %v3668_v17 = vpop.permute.xlu2 %3667 }
0x17e3   : > { %3688 = vmatpush.msrb.mxu2 %v3668_v17 }
0x17e5   : > { %8880 = vmatpush.xpose.msk.msra.mxu2 %vm438_vm1, %v3780_v40 }
0x17e6   : > { %8879 = vmatmul.msk.f32.vlgmr.msra.gmra.mxu1 %vm438_vm1, %v3750_v55 }
0x17e7   : > { %v3722_v32 = vpop.permute.xlu0 %3721 }
0x17e8   : > { %8877 = vmatmul.msk.f32.vlgmr.msrb.gmra.mxu0 %vm438_vm1, %v3722_v32 }
0x17ea   : > { %v3778_v15 = vpop.permute.xlu2 %3777 }
0x17ef   : > { %v10869_v51 = vpop.f32.mrf.mxu3 }
0x17f7   : > { %v3718_v38 = vpop.f32.mrf.mxu3 }
0x17f8   : > { %v3805_v34 = vmul.f32 0.70710677, %v3718_v38 }
0x17fa   : > { %v3809_v2 = vsel %vm548_vm2, %v3805_v34, -inf }
0x17fb   : > { %3810 = vmax.xlane.f32.xlu1 %v3809_v2 }
0x1814   : > { %3959 = vrot.lane.b32.xlu1 %v10715_v20, %s12850_s21 }
0x1815   : > { %v3580_v57 = vpop.xlane.xlu0 %3579 }
0x1816   : > { %9456 = vrcp.f32 %v3580_v57 }
0x181c   : > { %v9457_v43 = vpop.eup %9456 }
0x181d   : > { %v10874_v37 = vmul.f32 %v9457_v43, %v9451_v26 }
0x181f   : > { %8873 = vmatmul.msk.f32.vlgmr.msrb.gmra.mxu2 %vm548_vm2, %v10874_v37 }
0x1827   : > { %8881 = vmatmul.msk.f32.vlgmr.msra.gmra.mxu2 %vm438_vm1, %v3778_v15 }
0x1859   : > { %v10881_v23 = vpop.f32.mrf.mxu0 }
0x185b   : > { %v10879_v13 = vpop.f32.mrf.mxu1 }
0x1863   : > { %v3774_v16 = vpop.f32.mrf.mxu1 }
0x1864   : > { %v3807_v44 = vmul.f32 0.70710677, %v3774_v16 }
0x1865   : > { %v3746_v18 = vpop.f32.mrf.mxu0 }
0x1866   : > { %v3806_v33 = vmul.f32 0.70710677, %v3746_v18  ;;  %v3815_v24 = vsel %vm548_vm2, %v3807_v44, -inf }
0x1867   : > { %3816 = vmax.xlane.f32.xlu0 %v3815_v24 }
0x1868   : > { %v3812_v26 = vsel %vm548_vm2, %v3806_v33, -inf }
0x1869   : > { %3813 = vmax.xlane.f32.xlu2 %v3812_v26 }
0x186e   : > { %v3811_v45 = vpop.xlane.xlu1 %3810 }
0x186f   : > { %v3821_v19 = vsub.f32 %v3805_v34, %v3811_v45 }
0x1871   : > { %v3825_v29 = vmul.f32 1.442695, %v3821_v19 }
0x1873   : > { %9458 = vpow2.f32 %v3825_v29 }
0x1879   : > { %v9459_v3 = vpop.eup %9458 }
0x187a   : > { %v3833_v60 = vsel %vm548_vm2, %v9459_v3, 0.0 }
0x187b   : > { %3834 = vadd.xlane.f32.xlu0 %v3833_v60 }
0x1881   : > { %3957 = vrot.lane.b32.xlu2 %v10715_v20, %s12851_s22 }
0x1886   : > { %v3960_v45 = vpop.permute.xlu1 %3959 }
0x1889   : > { %3985 = vrot.lane.b32.xlu2 %v10725_v14, %s12851_s22 }
0x188f   : > { %3853 = vrot.lane.b32.xlu0 %v10715_v20, %s12852_s14 }
0x18a2   : > { %v10892_v55 = vpop.f32.mrf.mxu2 }
0x18aa   : > { %v3802_v42 = vpop.f32.mrf.mxu2 }
0x18ab   : > { %v3808_v49 = vmul.f32 0.70710677, %v3802_v42 }
0x18ad   : > { %v3818_v17 = vsel %vm548_vm2, %v3808_v49, -inf }
0x18b9   : > { %3819 = vmax.xlane.f32.xlu0 %v3818_v17 }
0x18cd   : > { %9254 = vrot.lane.b32.xlu0 %v10828_v0, %s12852_s14 }
0x18d5   : > { %4015 = vrot.lane.b32.xlu0 %v10739_v8, %s12850_s21 }
0x18da   : > { %v3817_v40 = vpop.xlane.xlu0 %3816 }
0x18db   : > { %v3823_v32 = vsub.f32 %v3807_v44, %v3817_v40 }
0x18dc   : > { %v3814_v38 = vpop.xlane.xlu2 %3813 }
0x18dd   : > { %v3829_v34 = vmul.f32 1.442695, %v3823_v32  ;;  %v3822_v2 = vsub.f32 %v3806_v33, %v3814_v38  ;;  %4013 = vrot.lane.b32.xlu0 %v10739_v8, %s12851_s22 }
0x18df   : > { %9460 = vpow2.f32 %v3829_v34  ;;  %v3827_v57 = vmul.f32 1.442695, %v3822_v2 }
0x18e1   : > { %9462 = vpow2.f32 %v3827_v57 }
0x18e4   : > { %v3958_v19 = vpop.permute.xlu2 %3957 }
0x18e5   : > { %v9461_v43 = vpop.eup %9460  ;;  %3931 = vrot.lane.b32.xlu0 %v10743_v50, %s12852_s14 }
0x18e6   : > { %v3839_v15 = vsel %vm548_vm2, %v9461_v43, 0.0 }
0x18e7   : > { %v9463_v16 = vpop.eup %9462  ;;  %3840 = vadd.xlane.f32.xlu2 %v3839_v15 }
0x18e8   : > { %v3836_v18 = vsel %vm548_vm2, %v9463_v16, 0.0 }
0x18e9   : > { %3837 = vadd.xlane.f32.xlu1 %v3836_v18 }
0x18ec   : > { %v3986_v57 = vpop.permute.xlu2 %3985 }
0x18ed   : > { %4041 = vrot.lane.b32.xlu0 %v10743_v50, %s12851_s22 }
0x18ee   : > { %v3835_v44 = vpop.xlane.xlu0 %3834 }
0x18ef   : > { %9464 = vrcp.f32 %v3835_v44 }
0x18f5   : > { %4221 = vrot.lane.b32.xlu0 %v10715_v20, %s12853_s16  ;;  %v9465_v33 = vpop.eup %9464 }
0x18f6   : > { %v10911_v24 = vmul.f32 %v9465_v33, %v9459_v3 }
0x18ff   : > { %4043 = vrot.lane.b32.xlu2 %v10743_v50, %s12850_s21 }
0x1901   : > { %v3854_v26 = vpop.permute.xlu0 %3853 }
0x1902   : > { %3987 = vrot.lane.b32.xlu1 %v10725_v14, %s12850_s21  ;;  %3874 = vmatpush.msrb.mxu3 %v3854_v26 }
0x1903   : > { %8882 = vmatmul.msk.f32.vlgmr.msrb.gmra.mxu3 %vm548_vm2, %v10911_v24 }
0x1904   : > { %8886 = vmatpush.xpose.msk.msra.mxu3 %vm438_vm1, %v3960_v45 }
0x190b   : > { %8887 = vmatmul.msk.f32.vlgmr.msra.gmra.mxu3 %vm438_vm1, %v3958_v19 }
0x192c   : > { %v3820_v29 = vpop.xlane.xlu0 %3819 }
0x192d   : > { %v3824_v60 = vsub.f32 %v3808_v49, %v3820_v29 }
0x192f   : > { %v3831_v42 = vmul.f32 1.442695, %v3824_v60 }
0x1931   : > { %9466 = vpow2.f32 %v3831_v42 }
0x1937   : > { %v9467_v3 = vpop.eup %9466 }
0x1938   : > { %v3842_v17 = vsel %vm548_vm2, %v9467_v3, 0.0 }
0x1939   : > { %3843 = vadd.xlane.f32.xlu1 %v3842_v17 }
0x193f   : > { %v9255_v40 = vpop.permute.xlu0 %9254 }
0x1940   : > { %v9257_v32 = vunpack.i.h.bf16 %v9255_v40  ;;  %v9256_v38 = vunpack.i.l.bf16 %v9255_v40 }
0x1942   : > { %3900 = vmatpush.msra.mxu0 %v9256_v38  ;;  %3926 = vmatpush.msrb.mxu1 %v9257_v32 }
0x1947   : > { %v4016_v34 = vpop.permute.xlu0 %4015 }
0x1948   : > { %8890 = vmatpush.xpose.msk.msra.mxu1 %vm438_vm1, %v4016_v34 }
0x194f   : > { %v4014_v2 = vpop.permute.xlu0 %4013 }
0x1952   : > { %4223 = vrot.lane.b32.xlu1 %v10715_v20, %s12854_s26 }
0x1957   : > { %v3932_v49 = vpop.permute.xlu0 %3931 }
0x1958   : > { %3952 = vmatpush.msrb.mxu2 %v3932_v49 }
0x195a   : > { %v3841_v15 = vpop.xlane.xlu2 %3840 }
0x195b   : > { %9468 = vrcp.f32 %v3841_v15 }
0x195c   : > { %v3838_v18 = vpop.xlane.xlu1 %3837 }
0x195d   : > { %9470 = vrcp.f32 %v3838_v18 }
0x195f   : > { %v4042_v38 = vpop.permute.xlu0 %4041 }
0x1961   : > { %v9469_v44 = vpop.eup %9468 }
0x1962   : > { %v10923_v33 = vmul.f32 %v9469_v44, %v9461_v43  ;;  %v4044_v26 = vpop.permute.xlu2 %4043 }
0x1963   : > { %v9471_v45 = vpop.eup %9470  ;;  %8892 = vmatpush.xpose.msk.msra.mxu2 %vm438_vm1, %v4044_v26 }
0x1964   : > { %v10926_v19 = vmul.f32 %v9471_v45, %v9463_v16  ;;  %8884 = vmatmul.msk.f32.vlgmr.msrb.gmra.mxu1 %vm548_vm2, %v10923_v33 }
0x1966   : > { %8883 = vmatmul.msk.f32.vlgmr.msra.gmra.mxu0 %vm548_vm2, %v10926_v19 }
0x196c   : > { %8891 = vmatmul.msk.f32.vlgmr.msra.gmra.mxu1 %vm438_vm1, %v4014_v2 }
0x1974   : > { %v3988_v29 = vpop.permute.xlu1 %3987 }
0x1975   : > { %8888 = vmatpush.xpose.msk.msrb.mxu0 %vm438_vm1, %v3988_v29 }
0x1978   : > { %8889 = vmatmul.msk.f32.vlgmr.msrb.gmra.mxu0 %vm438_vm1, %v3986_v57 }
0x1986   : > { %v10935_v43 = vpop.f32.mrf.mxu3 }
0x198e   : > { %v3982_v60 = vpop.f32.mrf.mxu3 }
0x198f   : > { %v4069_v42 = vmul.f32 0.70710677, %v3982_v60 }
0x1991   : > { %v4073_v16 = vsel %vm548_vm2, %v4069_v42, -inf }
0x1992   : > { %4074 = vmax.xlane.f32.xlu2 %v4073_v16 }
0x19aa   : > { %4117 = vrot.lane.b32.xlu2 %v10715_v20, %s12855_s27 }
0x19ac   : > { %v3844_v17 = vpop.xlane.xlu1 %3843 }
0x19ad   : > { %9472 = vrcp.f32 %v3844_v17 }
0x19b3   : > { %v9473_v40 = vpop.eup %9472 }
0x19b4   : > { %v10940_v32 = vmul.f32 %v9473_v40, %v9467_v3 }
0x19b6   : > { %8885 = vmatmul.msk.f32.vlgmr.msrb.gmra.mxu2 %vm548_vm2, %v10940_v32 }
0x19be   : > { %8893 = vmatmul.msk.f32.vlgmr.msra.gmra.mxu2 %vm438_vm1, %v4042_v38 }
0x19c4   : > { %v4224_v16 = vpop.permute.xlu1 %4223 }
0x19e1   : > { %v10945_v34 = vpop.f32.mrf.mxu1 }
0x19e3   : > { %v10948_v15 = vpop.f32.mrf.mxu0 }
0x19e9   : > { %v4038_v2 = vpop.f32.mrf.mxu1 }
0x19ea   : > { %v4071_v57 = vmul.f32 0.70710677, %v4038_v2 }
0x19ec   : > { %v4079_v49 = vsel %vm548_vm2, %v4071_v57, -inf }
0x19ed   : > { %4080 = vmax.xlane.f32.xlu1 %v4079_v49 }
0x19f5   : > { %v4010_v18 = vpop.f32.mrf.mxu0 }
0x19f6   : > { %v4070_v44 = vmul.f32 0.70710677, %v4010_v18 }
0x19f8   : > { %v4076_v3 = vsel %vm548_vm2, %v4070_v44, -inf }
0x19f9   : > { %4077 = vmax.xlane.f32.xlu0 %v4076_v3 }
0x1a05   : > { %v4075_v26 = vpop.xlane.xlu2 %4074 }
0x1a06   : > { %v4085_v45 = vsub.f32 %v4069_v42, %v4075_v26 }
0x1a08   : > { %v4089_v29 = vmul.f32 1.442695, %v4085_v45  ;;  %v4222_v45 = vpop.permute.xlu0 %4221 }
0x1a0a   : > { %9474 = vpow2.f32 %v4089_v29 }
0x1a0d   : > { %v4118_v60 = vpop.permute.xlu2 %4117  ;;  %4251 = vrot.lane.b32.xlu0 %v10725_v14, %s12854_s26 }
0x1a0e   : > { %4138 = vmatpush.msrb.mxu3 %v4118_v60 }
0x1a10   : > { %8898 = vmatpush.xpose.msk.msra.mxu3 %vm438_vm1, %v4224_v16  ;;  %v9475_v17 = vpop.eup %9474 }
0x1a11   : > { %v4097_v40 = vsel %vm548_vm2, %v9475_v17, 0.0 }
0x1a12   : > { %4098 = vadd.xlane.f32.xlu1 %v4097_v40 }
0x1a2b   : > { %4249 = vrot.lane.b32.xlu1 %v10725_v14, %s12853_s16 }
0x1a39   : > { %v10957_v38 = vpop.f32.mrf.mxu2 }
0x1a41   : > { %v4066_v42 = vpop.f32.mrf.mxu2 }
0x1a42   : > { %v4072_v2 = vmul.f32 0.70710677, %v4066_v42 }
0x1a44   : > { %v4082_v49 = vsel %vm548_vm2, %v4072_v2, -inf }
0x1a45   : > { %4083 = vmax.xlane.f32.xlu2 %v4082_v49 }
0x1a5d   : > { %9259 = vrot.lane.b32.xlu2 %v10828_v0, %s12855_s27 }
0x1a60   : > { %v4081_v18 = vpop.xlane.xlu1 %4080 }
0x1a61   : > { %v4087_v3 = vsub.f32 %v4071_v57, %v4081_v18 }
0x1a63   : > { %v4093_v26 = vmul.f32 1.442695, %v4087_v3 }
0x1a65   : > { %9476 = vpow2.f32 %v4093_v26  ;;  %4279 = vrot.lane.b32.xlu2 %v10739_v8, %s12854_s26 }
0x1a6b   : > { %v9477_v29 = vpop.eup %9476 }
0x1a6c   : > { %v4078_v60 = vpop.xlane.xlu0 %4077  ;;  %v4103_v16 = vsel %vm548_vm2, %v9477_v29, 0.0 }
0x1a6d   : > { %v4086_v40 = vsub.f32 %v4070_v44, %v4078_v60  ;;  %4104 = vadd.xlane.f32.xlu1 %v4103_v16 }
0x1a6f   : > { %v4091_v42 = vmul.f32 1.442695, %v4086_v40 }
0x1a71   : > { %9478 = vpow2.f32 %v4091_v42 }
0x1a77   : > { %v9479_v49 = vpop.eup %9478 }
0x1a78   : > { %v4100_v36 = vsel %vm548_vm2, %v9479_v49, 0.0 }
0x1a79   : > { %4101 = vadd.xlane.f32.xlu0 %v4100_v36 }
0x1a7f   : > { %v4252_v40 = vpop.permute.xlu0 %4251 }
0x1a85   : > { %v4099_v0 = vpop.xlane.xlu1 %4098 }
0x1a86   : > { %9480 = vrcp.f32 %v4099_v0  ;;  %4307 = vrot.lane.b32.xlu1 %v10743_v50, %s12854_s26 }
0x1a8c   : > { %v9481_v57 = vpop.eup %9480 }
0x1a8d   : > { %v10968_v18 = vmul.f32 %v9481_v57, %v9475_v17  ;;  %4277 = vrot.lane.b32.xlu0 %v10739_v8, %s12853_s16 }
0x1a8f   : > { %8894 = vmatmul.msk.f32.vlgmr.msrb.gmra.mxu3 %vm548_vm2, %v10968_v18 }
0x1a95   : > { %4195 = vrot.lane.b32.xlu0 %v10743_v50, %s12855_s27 }
0x1a97   : > { %8899 = vmatmul.msk.f32.vlgmr.msra.gmra.mxu3 %vm438_vm1, %v4222_v45 }
0x1a9d   : > { %4305 = vrot.lane.b32.xlu0 %v10743_v50, %s12853_s16  ;;  %v4250_v0 = vpop.permute.xlu1 %4249 }
0x1aa5   : > { %4485 = vrot.lane.b32.xlu0 %v10715_v20, %s12856_s24 }
0x1ab8   : > { %v4084_v36 = vpop.xlane.xlu2 %4083 }
0x1ab9   : > { %v4088_v44 = vsub.f32 %v4072_v2, %v4084_v36 }
0x1abb   : > { %v4095_v17 = vmul.f32 1.442695, %v4088_v44 }
0x1abd   : > { %9482 = vpow2.f32 %v4095_v17 }
0x1ac0   : > { %v9260_v3 = vpop.permute.xlu2 %9259 }
0x1ac1   : > { %v9262_v26 = vunpack.i.h.bf16 %v9260_v3  ;;  %v9261_v60 = vunpack.i.l.bf16 %v9260_v3 }
0x1ac3   : > { %v9483_v16 = vpop.eup %9482  ;;  %4164 = vmatpush.msra.mxu0 %v9261_v60  ;;  %4190 = vmatpush.msrb.mxu1 %v9262_v26 }
0x1ac4   : > { %v4106_v45 = vsel %vm548_vm2, %v9483_v16, 0.0 }
0x1ac5   : > { %8900 = vmatpush.xpose.msk.msrb.mxu0 %vm438_vm1, %v4252_v40  ;;  %4107 = vadd.xlane.f32.xlu2 %v4106_v45 }
0x1ac8   : > { %v4280_v42 = vpop.permute.xlu2 %4279 }
0x1ac9   : > { %8902 = vmatpush.xpose.msk.msra.mxu1 %vm438_vm1, %v4280_v42 }
0x1add   : > { %4487 = vrot.lane.b32.xlu2 %v10715_v20, %s12857_s17 }
0x1ae0   : > { %v4105_v2 = vpop.xlane.xlu1 %4104 }
0x1ae1   : > { %9484 = vrcp.f32 %v4105_v2 }
0x1ae7   : > { %v9485_v57 = vpop.eup %9484 }
0x1ae8   : > { %v10986_v36 = vmul.f32 %v9485_v57, %v9477_v29 }
0x1aea   : > { %8896 = vmatmul.msk.f32.vlgmr.msrb.gmra.mxu1 %vm548_vm2, %v10986_v36 }
0x1aec   : > { %v4102_v44 = vpop.xlane.xlu0 %4101 }
0x1aed   : > { %9486 = vrcp.f32 %v4102_v44 }
0x1af3   : > { %v9487_v17 = vpop.eup %9486 }
0x1af4   : > { %v10990_v3 = vmul.f32 %v9487_v17, %v9479_v49 }
0x1af6   : > { %8895 = vmatmul.msk.f32.vlgmr.msra.gmra.mxu0 %vm548_vm2, %v10990_v3 }
0x1af8   : > { %v4308_v40 = vpop.permute.xlu1 %4307 }
0x1afe   : > { %8901 = vmatmul.msk.f32.vlgmr.msrb.gmra.mxu0 %vm438_vm1, %v4250_v0 }
0x1aff   : > { %v4278_v26 = vpop.permute.xlu0 %4277 }
0x1b00   : > { %8903 = vmatmul.msk.f32.vlgmr.msra.gmra.mxu1 %vm438_vm1, %v4278_v26 }
0x1b07   : > { %v4196_v60 = vpop.permute.xlu0 %4195 }
0x1b08   : > { %4216 = vmatpush.msrb.mxu2 %v4196_v60 }
0x1b0a   : > { %8904 = vmatpush.xpose.msk.msra.mxu2 %vm438_vm1, %v4308_v40 }
0x1b0f   : > { %v4306_v44 = vpop.permute.xlu0 %4305 }
0x1b12   : > { %v10997_v29 = vpop.f32.mrf.mxu3 }
0x1b1a   : > { %v4246_v45 = vpop.f32.mrf.mxu3 }
0x1b1b   : > { %v4333_v42 = vmul.f32 0.70710677, %v4246_v45 }
0x1b1d   : > { %v4337_v49 = vsel %vm548_vm2, %v4333_v42, -inf }
0x1b1e   : > { %4338 = vmax.xlane.f32.xlu1 %v4337_v49 }
0x1b37   : > { %4381 = vrot.lane.b32.xlu1 %v10715_v20, %s12858_s0 }
0x1b38   : > { %v4108_v2 = vpop.xlane.xlu2 %4107 }
0x1b39   : > { %9488 = vrcp.f32 %v4108_v2 }
0x1b3f   : > { %v9489_v0 = vpop.eup %9488 }
0x1b40   : > { %v11002_v57 = vmul.f32 %v9489_v0, %v9483_v16  ;;  %v4488_v62 = vpop.permute.xlu2 %4487 }
0x1b42   : > { %12859 = vst [vmem:[#allocation53_spill] sm:$0xff] %v11002_v57  ;;  %8897 = vmatmul.msk.f32.vlgmr.msrb.gmra.mxu2 %vm548_vm2, %v11002_v57 }
0x1b4a   : > { %8905 = vmatmul.msk.f32.vlgmr.msra.gmra.mxu2 %vm438_vm1, %v4306_v44 }
0x1b67   : > { %v11009_v26 = vpop.f32.mrf.mxu1 }
0x1b73   : > { %v11007_v17 = vpop.f32.mrf.mxu0 }
0x1b7b   : > { %v4274_v60 = vpop.f32.mrf.mxu0 }
0x1b7c   : > { %v4334_v40 = vmul.f32 0.70710677, %v4274_v60 }
0x1b7d   : > { %v4302_v45 = vpop.f32.mrf.mxu1 }
0x1b7e   : > { %v4335_v49 = vmul.f32 0.70710677, %v4302_v45  ;;  %v4340_v48 = vsel %vm548_vm2, %v4334_v40, -inf }
0x1b7f   : > { %4341 = vmax.xlane.f32.xlu0 %v4340_v48 }
0x1b80   : > { %v4343_v16 = vsel %vm548_vm2, %v4335_v49, -inf }
0x1b81   : > { %4344 = vmax.xlane.f32.xlu2 %v4343_v16 }
0x1b91   : > { %v4339_v2 = vpop.xlane.xlu1 %4338 }
0x1b92   : > { %v4349_v0 = vsub.f32 %v4333_v42, %v4339_v2  ;;  %v4486_v2 = vpop.permute.xlu0 %4485 }
0x1b93   : > { %4515 = vrot.lane.b32.xlu0 %v10725_v14, %s12857_s17 }
0x1b94   : > { %v4353_v44 = vmul.f32 1.442695, %v4349_v0 }
0x1b96   : > { %9490 = vpow2.f32 %v4353_v44 }
0x1b9c   : > { %v9491_v1 = vpop.eup %9490 }
0x1b9d   : > { %v4361_v47 = vsel %vm548_vm2, %v9491_v1, 0.0 }
0x1b9e   : > { %4362 = vadd.xlane.f32.xlu2 %v4361_v47 }
0x1ba9   : > { %v4382_v60 = vpop.permute.xlu1 %4381 }
0x1baa   : > { %4402 = vmatpush.msrb.mxu3 %v4382_v60 }
0x1bac   : > { %8910 = vmatpush.xpose.msk.msra.mxu3 %vm438_vm1, %v4488_v62 }
0x1bb6   : > { %4433 = vrot.lane.b32.xlu2 %v10739_v8, %s12858_s0 }
0x1bc5   : > { %v11019_v48 = vpop.f32.mrf.mxu2 }
0x1bcd   : > { %v4330_v42 = vpop.f32.mrf.mxu2 }
0x1bce   : > { %v4336_v45 = vmul.f32 0.70710677, %v4330_v42 }
0x1bd0   : > { %v4346_v16 = vsel %vm548_vm2, %v4336_v45, -inf }
0x1bd1   : > { %4347 = vmax.xlane.f32.xlu1 %v4346_v16 }
0x1bea   : > { %4407 = vrot.lane.b32.xlu1 %v10725_v14, %s12858_s0 }
0x1bf2   : > { %4543 = vrot.lane.b32.xlu1 %v10739_v8, %s12857_s17  ;;  %v4342_v47 = vpop.xlane.xlu0 %4341 }
0x1bf3   : > { %v4350_v0 = vsub.f32 %v4334_v40, %v4342_v47 }
0x1bf4   : > { %v4345_v62 = vpop.xlane.xlu2 %4344 }
0x1bf5   : > { %v4355_v44 = vmul.f32 1.442695, %v4350_v0  ;;  %v4351_v60 = vsub.f32 %v4335_v49, %v4345_v62 }
0x1bf7   : > { %9492 = vpow2.f32 %v4355_v44  ;;  %v4357_v53 = vmul.f32 1.442695, %v4351_v60 }
0x1bf9   : > { %9494 = vpow2.f32 %v4357_v53 }
0x1bfa   : > { %4459 = vrot.lane.b32.xlu1 %v10743_v50, %s12858_s0 }
0x1bfd   : > { %v9493_v42 = vpop.eup %9492 }
0x1bfe   : > { %v4364_v16 = vsel %vm548_vm2, %v9493_v42, 0.0 }
0x1bff   : > { %v9495_v6 = vpop.eup %9494  ;;  %4365 = vadd.xlane.f32.xlu0 %v4364_v16 }
0x1c00   : > { %v4367_v22 = vsel %vm548_vm2, %v9495_v6, 0.0 }
0x1c01   : > { %4368 = vadd.xlane.f32.xlu2 %v4367_v22 }
0x1c02   : > { %4569 = vrot.lane.b32.xlu1 %v10743_v50, %s12856_s24 }
0x1c05   : > { %v4516_v16 = vpop.permute.xlu0 %4515 }
0x1c11   : > { %v4363_v40 = vpop.xlane.xlu2 %4362 }
0x1c12   : > { %9496 = vrcp.f32 %v4363_v40 }
0x1c13   : > { %4513 = vrot.lane.b32.xlu0 %v10725_v14, %s12856_s24 }
0x1c18   : > { %v9497_v53 = vpop.eup %9496 }
0x1c19   : > { %v11034_v49 = vmul.f32 %v9497_v53, %v9491_v1  ;;  %4541 = vrot.lane.b32.xlu2 %v10739_v8, %s12856_s24  ;;  %v4434_v47 = vpop.permute.xlu2 %4433 }
0x1c1a   : > { %4454 = vmatpush.msrb.mxu1 %v4434_v47 }
0x1c1b   : > { %8906 = vmatmul.msk.f32.vlgmr.msrb.gmra.mxu3 %vm548_vm2, %v11034_v49 }
0x1c21   : > { %4571 = vrot.lane.b32.xlu2 %v10743_v50, %s12857_s17 }
0x1c23   : > { %8911 = vmatmul.msk.f32.vlgmr.msra.gmra.mxu3 %vm438_vm1, %v4486_v2 }
0x1c44   : > { %v4348_v22 = vpop.xlane.xlu1 %4347 }
0x1c45   : > { %v4352_v0 = vsub.f32 %v4336_v45, %v4348_v22 }
0x1c47   : > { %v4359_v62 = vmul.f32 1.442695, %v4352_v0 }
0x1c49   : > { %9498 = vpow2.f32 %v4359_v62 }
0x1c4f   : > { %v9499_v44 = vpop.eup %9498 }
0x1c50   : > { %v4370_v1 = vsel %vm548_vm2, %v9499_v44, 0.0 }
0x1c51   : > { %4371 = vadd.xlane.f32.xlu0 %v4370_v1 }
0x1c5c   : > { %v4408_v60 = vpop.permute.xlu1 %4407 }
0x1c5d   : > { %4428 = vmatpush.msra.mxu0 %v4408_v60 }
0x1c5f   : > { %8912 = vmatpush.xpose.msk.msrb.mxu0 %vm438_vm1, %v4516_v16 }
0x1c64   : > { %v4544_v40 = vpop.permute.xlu1 %4543 }
0x1c65   : > { %8914 = vmatpush.xpose.msk.msra.mxu1 %vm438_vm1, %v4544_v40  ;;  %4751 = vrot.lane.b32.xlu0 %v10715_v20, %s12860_s1 }
0x1c6c   : > { %v4460_v2 = vpop.permute.xlu1 %4459 }
0x1c6d   : > { %4480 = vmatpush.msrb.mxu2 %v4460_v2 }
0x1c72   : > { %v4366_v45 = vpop.xlane.xlu0 %4365 }
0x1c73   : > { %9500 = vrcp.f32 %v4366_v45 }
0x1c74   : > { %v4369_v53 = vpop.xlane.xlu2 %4368 }
0x1c75   : > { %9502 = vrcp.f32 %v4369_v53 }
0x1c79   : > { %v9501_v47 = vpop.eup %9500 }
0x1c7a   : > { %v11048_v22 = vmul.f32 %v9501_v47, %v9493_v42 }
0x1c7b   : > { %v9503_v0 = vpop.eup %9502 }
0x1c7c   : > { %12861 = vst [vmem:[#allocation54_spill] sm:$0xff] %v11048_v22  ;;  %v11050_v62 = vmul.f32 %v9503_v0, %v9495_v6  ;;  %v4542_v1 = vpop.permute.xlu2 %4541  ;;  %8907 = vmatmul.msk.f32.vlgmr.msra.gmra.mxu0 %vm548_vm2, %v11048_v22  ;;  %v4570_v0 = vpop.permute.xlu1 %4569 }
0x1c7e   : > { %12862 = vst [vmem:[#allocation55_spill] sm:$0xff] %v11050_v62  ;;  %8908 = vmatmul.msk.f32.vlgmr.msrb.gmra.mxu1 %vm548_vm2, %v11050_v62 }
0x1c84   : > { %v4572_v60 = vpop.permute.xlu2 %4571 }
0x1c85   : > { %8916 = vmatpush.xpose.msk.msra.mxu2 %vm438_vm1, %v4572_v60  ;;  %v4514_v16 = vpop.permute.xlu0 %4513 }
0x1c86   : > { %8913 = vmatmul.msk.f32.vlgmr.msrb.gmra.mxu0 %vm438_vm1, %v4514_v16  ;;  %8915 = vmatmul.msk.f32.vlgmr.msra.gmra.mxu1 %vm438_vm1, %v4542_v1 }
0x1c9e   : > { %v11059_v42 = vpop.f32.mrf.mxu3 }
0x1ca6   : > { %v4510_v40 = vpop.f32.mrf.mxu3 }
0x1ca7   : > { %v4597_v6 = vmul.f32 0.70710677, %v4510_v40 }
0x1ca9   : > { %v4601_v2 = vsel %vm548_vm2, %v4597_v6, -inf }
0x1caa   : > { %4602 = vmax.xlane.f32.xlu2 %v4601_v2 }
0x1cc2   : > { %4645 = vrot.lane.b32.xlu2 %v10715_v20, %s12863_s2 }
0x1cc4   : > { %v4372_v45 = vpop.xlane.xlu0 %4371 }
0x1cc5   : > { %9504 = vrcp.f32 %v4372_v45 }
0x1ccb   : > { %v9505_v53 = vpop.eup %9504 }
0x1ccc   : > { %v11064_v47 = vmul.f32 %v9505_v53, %v9499_v44 }
0x1cce   : > { %8909 = vmatmul.msk.f32.vlgmr.msrb.gmra.mxu2 %vm548_vm2, %v11064_v47 }
0x1cd6   : > { %8917 = vmatmul.msk.f32.vlgmr.msra.gmra.mxu2 %vm438_vm1, %v4570_v0 }
0x1cd7   : > { %v4752_v0 = vpop.permute.xlu0 %4751 }
0x1cf9   : > { %v11069_v1 = vpop.f32.mrf.mxu0 }
0x1cfb   : > { %v11071_v60 = vpop.f32.mrf.mxu1 }
0x1d03   : > { %v4538_v16 = vpop.f32.mrf.mxu0  ;;  %v4566_v40 = vpop.f32.mrf.mxu1 }
0x1d04   : > { %v4598_v2 = vmul.f32 0.70710677, %v4538_v16  ;;  %v4599_v7 = vmul.f32 0.70710677, %v4566_v40 }
0x1d06   : > { %v4607_v58 = vsel %vm548_vm2, %v4599_v7, -inf  ;;  %v4604_v45 = vsel %vm548_vm2, %v4598_v2, -inf }
0x1d07   : > { %4608 = vmax.xlane.f32.xlu0 %v4607_v58  ;;  %4605 = vmax.xlane.f32.xlu1 %v4604_v45 }
0x1d1b   : > { %4779 = vrot.lane.b32.xlu0 %v10725_v14, %s12860_s1 }
0x1d1d   : > { %v4603_v44 = vpop.xlane.xlu2 %4602 }
0x1d1e   : > { %v4613_v16 = vsub.f32 %v4597_v6, %v4603_v44 }
0x1d20   : > { %4749 = vrot.lane.b32.xlu1 %v10715_v20, %s12864_s3  ;;  %v4617_v40 = vmul.f32 1.442695, %v4613_v16 }
0x1d22   : > { %9506 = vpow2.f32 %v4617_v40 }
0x1d25   : > { %v4646_v53 = vpop.permute.xlu2 %4645 }
0x1d26   : > { %4666 = vmatpush.msrb.mxu3 %v4646_v53 }
0x1d28   : > { %8922 = vmatpush.xpose.msk.msra.mxu3 %vm438_vm1, %v4752_v0  ;;  %v9507_v10 = vpop.eup %9506 }
0x1d29   : > { %v4625_v63 = vsel %vm548_vm2, %v9507_v10, 0.0 }
0x1d45   : > { %4626 = vadd.xlane.f32.xlu0 %v4625_v63 }
0x1d51   : > { %v11081_v58 = vpop.f32.mrf.mxu2 }
0x1d59   : > { %v4594_v45 = vpop.f32.mrf.mxu2 }
0x1d5a   : > { %v4600_v4 = vmul.f32 0.70710677, %v4594_v45 }
0x1d5c   : > { %v4610_v9 = vsel %vm548_vm2, %v4600_v4, -inf }
0x1d5d   : > { %4611 = vmax.xlane.f32.xlu2 %v4610_v9 }
0x1d75   : > { %4671 = vrot.lane.b32.xlu2 %v10725_v14, %s12863_s2 }
0x1d7a   : > { %v4606_v53 = vpop.xlane.xlu1 %4605  ;;  %v4609_v52 = vpop.xlane.xlu0 %4608 }
0x1d7b   : > { %v4614_v0 = vsub.f32 %v4598_v2, %v4606_v53  ;;  %v4615_v6 = vsub.f32 %v4599_v7, %v4609_v52 }
0x1d7d   : > { %v4619_v44 = vmul.f32 1.442695, %v4614_v0  ;;  %v4621_v16 = vmul.f32 1.442695, %v4615_v6  ;;  %4807 = vrot.lane.b32.xlu2 %v10739_v8, %s12860_s1 }
0x1d7f   : > { %9508 = vpow2.f32 %v4619_v44 }
0x1d80   : > { %9510 = vpow2.f32 %v4621_v16 }
0x1d85   : > { %v9509_v63 = vpop.eup %9508 }
0x1d86   : > { %v9511_v40 = vpop.eup %9510  ;;  %v4628_v45 = vsel %vm548_vm2, %v9509_v63, 0.0 }
0x1d87   : > { %4629 = vadd.xlane.f32.xlu0 %v4628_v45  ;;  %v4631_v9 = vsel %vm548_vm2, %v9511_v40, 0.0 }
0x1d88   : > { %4632 = vadd.xlane.f32.xlu1 %v4631_v9 }
0x1d8d   : > { %v4780_v52 = vpop.permute.xlu0 %4779 }
0x1d92   : > { %v4750_v0 = vpop.permute.xlu1 %4749 }
0x1d9b   : > { %4777 = vrot.lane.b32.xlu0 %v10725_v14, %s12864_s3 }
0x1da1   : > { %4697 = vrot.lane.b32.xlu1 %v10739_v8, %s12863_s2 }
0x1da3   : > { %4805 = vrot.lane.b32.xlu0 %v10739_v8, %s12864_s3 }
0x1da9   : > { %4723 = vrot.lane.b32.xlu1 %v10743_v50, %s12863_s2 }
0x1dab   : > { %4835 = vrot.lane.b32.xlu0 %v10743_v50, %s12860_s1 }
0x1db1   : > { %4833 = vrot.lane.b32.xlu1 %v10743_v50, %s12864_s3 }
0x1db8   : > { %v4627_v7 = vpop.xlane.xlu0 %4626 }
0x1db9   : > { %9512 = vrcp.f32 %v4627_v7 }
0x1dbf   : > { %v9513_v2 = vpop.eup %9512 }
0x1dc0   : > { %v11102_v53 = vmul.f32 %v9513_v2, %v9507_v10 }
0x1dc2   : > { %12865 = vst [vmem:[#allocation56_spill] sm:$0xff] %v11102_v53  ;;  %8918 = vmatmul.msk.f32.vlgmr.msrb.gmra.mxu3 %vm548_vm2, %v11102_v53 }
0x1dca   : > { %8923 = vmatmul.msk.f32.vlgmr.msra.gmra.mxu3 %vm438_vm1, %v4750_v0 }
0x1dd0   : > { %v4612_v6 = vpop.xlane.xlu2 %4611 }
0x1dd1   : > { %v4616_v44 = vsub.f32 %v4600_v4, %v4612_v6 }
0x1dd3   : > { %v4623_v16 = vmul.f32 1.442695, %v4616_v44 }
0x1dd5   : > { %9514 = vpow2.f32 %v4623_v16 }
0x1dd8   : > { %v4672_v45 = vpop.permute.xlu2 %4671 }
0x1dd9   : > { %4692 = vmatpush.msra.mxu0 %v4672_v45 }
0x1ddb   : > { %8924 = vmatpush.xpose.msk.msrb.mxu0 %vm438_vm1, %v4780_v52  ;;  %v9515_v9 = vpop.eup %9514 }
0x1ddc   : > { %v4634_v7 = vsel %vm548_vm2, %v9515_v9, 0.0 }
0x1ddd   : > { %4635 = vadd.xlane.f32.xlu2 %v4634_v7 }
0x1de0   : > { %v4808_v16 = vpop.permute.xlu2 %4807 }
0x1df5   : > { %5015 = vrot.lane.b32.xlu2 %v10715_v20, %s12866_s18 }
0x1dfa   : > { %v4630_v10 = vpop.xlane.xlu0 %4629 }
0x1dfb   : > { %9516 = vrcp.f32 %v4630_v10  ;;  %v4633_v4 = vpop.xlane.xlu1 %4632 }
0x1dfc   : > { %9518 = vrcp.f32 %v4633_v4 }
0x1e01   : > { %v9517_v2 = vpop.eup %9516 }
0x1e02   : > { %v11111_v54 = vmul.f32 %v9517_v2, %v9509_v63  ;;  %v9519_v52 = vpop.eup %9518 }
0x1e03   : > { %v11116_v6 = vmul.f32 %v9519_v52, %v9511_v40 }
0x1e04   : > { %12867 = vst [vmem:[#allocation57_spill] sm:$0xff] %v11111_v54  ;;  %8919 = vmatmul.msk.f32.vlgmr.msra.gmra.mxu0 %vm548_vm2, %v11111_v54 }
0x1e05   : > { %12868 = vst [vmem:[#allocation58_spill] sm:$0xff] %v11116_v6 }
0x1e0d   : > { %v4778_v0 = vpop.permute.xlu0 %4777 }
0x1e0e   : > { %8925 = vmatmul.msk.f32.vlgmr.msrb.gmra.mxu0 %vm438_vm1, %v4778_v0 }
0x1e13   : > { %v4698_v44 = vpop.permute.xlu1 %4697 }
0x1e14   : > { %4718 = vmatpush.msrb.mxu1 %v4698_v44 }
0x1e15   : > { %8920 = vmatmul.msk.f32.vlgmr.msrb.gmra.mxu1 %vm548_vm2, %v11116_v6  ;;  %v4806_v45 = vpop.permute.xlu0 %4805 }
0x1e16   : > { %8926 = vmatpush.xpose.msk.msra.mxu1 %vm438_vm1, %v4808_v16 }
0x1e1b   : > { %v4724_v63 = vpop.permute.xlu1 %4723 }
0x1e1c   : > { %4744 = vmatpush.msrb.mxu2 %v4724_v63 }
0x1e1d   : > { %8927 = vmatmul.msk.f32.vlgmr.msra.gmra.mxu1 %vm438_vm1, %v4806_v45  ;;  %v4836_v7 = vpop.permute.xlu0 %4835 }
0x1e1e   : > { %8928 = vmatpush.xpose.msk.msra.mxu2 %vm438_vm1, %v4836_v7 }
0x1e23   : > { %v4834_v16 = vpop.permute.xlu1 %4833 }
0x1e45   : > { %v11123_v10 = vpop.f32.mrf.mxu3 }
0x1e4d   : > { %v4774_v40 = vpop.f32.mrf.mxu3 }
0x1e4e   : > { %v4861_v2 = vmul.f32 0.70710677, %v4774_v40 }
0x1e50   : > { %v4636_v4 = vpop.xlane.xlu2 %4635  ;;  %v4865_v0 = vsel %vm548_vm2, %v4861_v2, -inf }
0x1e51   : > { %9520 = vrcp.f32 %v4636_v4  ;;  %4866 = vmax.xlane.f32.xlu0 %v4865_v0 }
0x1e57   : > { %v9521_v52 = vpop.eup %9520 }
0x1e58   : > { %v11126_v44 = vmul.f32 %v9521_v52, %v9515_v9  ;;  %v5016_v59 = vpop.permute.xlu2 %5015 }
0x1e5a   : > { %12869 = vst [vmem:[#allocation59_spill] sm:$0xff] %v11126_v44  ;;  %8921 = vmatmul.msk.f32.vlgmr.msrb.gmra.mxu2 %vm548_vm2, %v11126_v44 }
0x1e62   : > { %8929 = vmatmul.msk.f32.vlgmr.msra.gmra.mxu2 %vm438_vm1, %v4834_v16 }
0x1e65   : > { %4909 = vrot.lane.b32.xlu0 %v10715_v20, %s12870_s11 }
0x1e81   : > { %v11133_v45 = vpop.f32.mrf.mxu0 }
0x1e8b   : > { %v4802_v63 = vpop.f32.mrf.mxu0 }
0x1e8c   : > { %v4862_v7 = vmul.f32 0.70710677, %v4802_v63 }
0x1e8e   : > { %v4868_v40 = vsel %vm548_vm2, %v4862_v7, -inf }
0x1e8f   : > { %4869 = vmax.xlane.f32.xlu1 %v4868_v40 }
0x1e92   : > { %v11136_v4 = vpop.f32.mrf.mxu1 }
0x1e9a   : > { %v4830_v9 = vpop.f32.mrf.mxu1 }
0x1e9b   : > { %v4863_v0 = vmul.f32 0.70710677, %v4830_v9 }
0x1e9d   : > { %v4871_v52 = vsel %vm548_vm2, %v4863_v0, -inf }
0x1e9e   : > { %4872 = vmax.xlane.f32.xlu2 %v4871_v52 }
0x1ea8   : > { %5013 = vrot.lane.b32.xlu1 %v10715_v20, %s12871_s15 }
0x1eb6   : > { %5043 = vrot.lane.b32.xlu2 %v10725_v14, %s12866_s18 }
0x1ec4   : > { %v4867_v16 = vpop.xlane.xlu0 %4866 }
0x1ec5   : > { %v4877_v35 = vsub.f32 %v4861_v2, %v4867_v16 }
0x1ec7   : > { %v4881_v61 = vmul.f32 1.442695, %v4877_v35 }
0x1ec9   : > { %9522 = vpow2.f32 %v4881_v61 }
0x1ecf   : > { %v9523_v40 = vpop.eup %9522 }
0x1ed0   : > { %v4889_v52 = vsel %vm548_vm2, %v9523_v40, 0.0 }
0x1ed7   : > { %v4910_v63 = vpop.permute.xlu0 %4909 }
0x1ed8   : > { %4930 = vmatpush.msrb.mxu3 %v4910_v63 }
0x1eda   : > { %8934 = vmatpush.xpose.msk.msra.mxu3 %vm438_vm1, %v5016_v59 }
0x1edd   : > { %v11144_v9 = vpop.f32.mrf.mxu2 }
0x1edf   : > { %4890 = vadd.xlane.f32.xlu2 %v4889_v52 }
0x1ee5   : > { %v4858_v41 = vpop.f32.mrf.mxu2 }
0x1ee6   : > { %v4864_v44 = vmul.f32 0.70710677, %v4858_v41 }
0x1ee8   : > { %v4874_v54 = vsel %vm548_vm2, %v4864_v44, -inf }
0x1ee9   : > { %4875 = vmax.xlane.f32.xlu0 %v4874_v54 }
0x1efd   : > { %4935 = vrot.lane.b32.xlu0 %v10725_v14, %s12870_s11 }
0x1f02   : > { %v4870_v35 = vpop.xlane.xlu1 %4869 }
0x1f03   : > { %v4878_v61 = vsub.f32 %v4862_v7, %v4870_v35 }
0x1f05   : > { %v4883_v2 = vmul.f32 1.442695, %v4878_v61  ;;  %5041 = vrot.lane.b32.xlu0 %v10725_v14, %s12871_s15 }
0x1f07   : > { %9524 = vpow2.f32 %v4883_v2 }
0x1f0d   : > { %v9525_v59 = vpop.eup %9524  ;;  %5071 = vrot.lane.b32.xlu0 %v10739_v8, %s12866_s18 }
0x1f0e   : > { %v4892_v16 = vsel %vm548_vm2, %v9525_v59, 0.0 }
0x1f0f   : > { %4893 = vadd.xlane.f32.xlu2 %v4892_v16 }
0x1f11   : > { %v4873_v41 = vpop.xlane.xlu2 %4872 }
0x1f12   : > { %v4879_v63 = vsub.f32 %v4863_v0, %v4873_v41 }
0x1f14   : > { %v4885_v54 = vmul.f32 1.442695, %v4879_v63 }
0x1f15   : > { %4987 = vrot.lane.b32.xlu0 %v10743_v50, %s12870_s11 }
0x1f16   : > { %9526 = vpow2.f32 %v4885_v54 }
0x1f19   : > { %v5044_v0 = vpop.permute.xlu2 %5043 }
0x1f1a   : > { %v5014_v54 = vpop.permute.xlu1 %5013 }
0x1f1c   : > { %v9527_v7 = vpop.eup %9526 }
0x1f1d   : > { %v4895_v52 = vsel %vm548_vm2, %v9527_v7, 0.0  ;;  %5097 = vrot.lane.b32.xlu0 %v10743_v50, %s12871_s15 }
0x1f1e   : > { %4896 = vadd.xlane.f32.xlu1 %v4895_v52 }
0x1f27   : > { %5069 = vrot.lane.b32.xlu2 %v10739_v8, %s12871_s15 }
0x1f2f   : > { %5099 = vrot.lane.b32.xlu2 %v10743_v50, %s12866_s18 }
0x1f37   : > { %4961 = vrot.lane.b32.xlu1 %v10739_v8, %s12870_s11  ;;  %s9846_s11 = smov 48  }
0x1f52   : > { %v4891_v35 = vpop.xlane.xlu2 %4890 }
0x1f53   : > { %9528 = vrcp.f32 %v4891_v35 }
0x1f59   : > { %v9529_v61 = vpop.eup %9528 }
0x1f5a   : > { %v11166_v2 = vmul.f32 %v9529_v61, %v9523_v40 }
0x1f5c   : > { %12872 = vst [vmem:[#allocation60_spill] sm:$0xff] %v11166_v2  ;;  %8930 = vmatmul.msk.f32.vlgmr.msrb.gmra.mxu3 %vm548_vm2, %v11166_v2  ;;  %v4876_v16 = vpop.xlane.xlu0 %4875 }
0x1f5d   : > { %v4880_v41 = vsub.f32 %v4864_v44, %v4876_v16 }
0x1f5f   : > { %v4887_v63 = vmul.f32 1.442695, %v4880_v41 }
0x1f61   : > { %9530 = vpow2.f32 %v4887_v63 }
0x1f64   : > { %8935 = vmatmul.msk.f32.vlgmr.msra.gmra.mxu3 %vm438_vm1, %v5014_v54 }
0x1f67   : > { %v9531_v52 = vpop.eup %9530 }
0x1f68   : > { %v4898_v53 = vsel %vm548_vm2, %v9531_v52, 0.0 }
0x1f69   : > { %4899 = vadd.xlane.f32.xlu1 %v4898_v53 }
0x1f6f   : > { %v4936_v62 = vpop.permute.xlu0 %4935 }
0x1f70   : > { %4956 = vmatpush.msra.mxu0 %v4936_v62 }
0x1f72   : > { %8936 = vmatpush.xpose.msk.msrb.mxu0 %vm438_vm1, %v5044_v0 }
0x1f77   : > { %v5042_v40 = vpop.permute.xlu0 %5041 }
0x1f7f   : > { %v5072_v35 = vpop.permute.xlu0 %5071 }
0x1f82   : > { %v4894_v61 = vpop.xlane.xlu2 %4893 }
0x1f83   : > { %9532 = vrcp.f32 %v4894_v61 }
0x1f87   : > { %v4988_v2 = vpop.permute.xlu0 %4987 }
0x1f88   : > { %5008 = vmatpush.msrb.mxu2 %v4988_v2 }
0x1f89   : > { %v9533_v44 = vpop.eup %9532 }
0x1f8a   : > { %v11173_v16 = vmul.f32 %v9533_v44, %v9525_v59  ;;  %v5070_v41 = vpop.permute.xlu2 %5069 }
0x1f8c   : > { %12873 = vst [vmem:[#allocation61_spill] sm:$0xff] %v11173_v16  ;;  %8931 = vmatmul.msk.f32.vlgmr.msra.gmra.mxu0 %vm548_vm2, %v11173_v16 }
0x1f91   : > { %v4897_v62 = vpop.xlane.xlu1 %4896 }
0x1f92   : > { %v5100_v63 = vpop.permute.xlu2 %5099  ;;  %9534 = vrcp.f32 %v4897_v62  ;;  %v5098_v62 = vpop.permute.xlu0 %5097 }
0x1f93   : > { %8940 = vmatpush.xpose.msk.msra.mxu2 %vm438_vm1, %v5100_v63 }
0x1f94   : > { %8937 = vmatmul.msk.f32.vlgmr.msrb.gmra.mxu0 %vm438_vm1, %v5042_v40 }
0x1f98   : > { %v9535_v53 = vpop.eup %9534 }
0x1f99   : > { %v11179_v0 = vmul.f32 %v9535_v53, %v9527_v7 }
0x1f9b   : > { %12874 = vst [vmem:[#allocation62_spill] sm:$0xff] %v11179_v0 }
0x1fa9   : > { %v4962_v54 = vpop.permute.xlu1 %4961 }
0x1faa   : > { %4982 = vmatpush.msrb.mxu1 %v4962_v54 }
0x1fab   : > { %8932 = vmatmul.msk.f32.vlgmr.msrb.gmra.mxu1 %vm548_vm2, %v11179_v0 }
0x1fac   : > { %8938 = vmatpush.xpose.msk.msra.mxu1 %vm438_vm1, %v5072_v35 }
0x1fb3   : > { %8939 = vmatmul.msk.f32.vlgmr.msra.gmra.mxu1 %vm438_vm1, %v5070_v41 }
0x1fdc   : > { %v4900_v59 = vpop.xlane.xlu1 %4899 }
0x1fdd   : > { %9536 = vrcp.f32 %v4900_v59 }
0x1fdf   : > { %v11185_v2 = vpop.f32.mrf.mxu3 }
0x1fe3   : > { %v9537_v61 = vpop.eup %9536 }
0x1fe4   : > { %v11187_v40 = vmul.f32 %v9537_v61, %v9531_v52 }
0x1fe6   : > { %12875 = vst [vmem:[#allocation63_spill] sm:$0xff] %v11187_v40  ;;  %8933 = vmatmul.msk.f32.vlgmr.msrb.gmra.mxu2 %vm548_vm2, %v11187_v40 }
0x1fe7   : > { %v5038_v7 = vpop.f32.mrf.mxu3 }
0x1fe8   : > { %v5125_v44 = vmul.f32 0.70710677, %v5038_v7 }
0x1fea   : > { %v5129_v63 = vsel %vm548_vm2, %v5125_v44, -inf }
0x1feb   : > { %5130 = vmax.xlane.f32.xlu2 %v5129_v63 }
0x1fee   : > { %8941 = vmatmul.msk.f32.vlgmr.msra.gmra.mxu2 %vm438_vm1, %v5098_v62 }
0x2003   : > { %5173 = vrot.lane.b32.xlu2 %v10715_v20, %s12876_s20 }
0x2009   : > { %v11195_v35 = vpop.f32.mrf.mxu0 }
0x2011   : > { %v5066_v41 = vpop.f32.mrf.mxu0 }
0x2012   : > { %v5126_v53 = vmul.f32 0.70710677, %v5066_v41 }
0x2014   : > { %v5132_v52 = vsel %vm548_vm2, %v5126_v53, -inf }
0x2015   : > { %5133 = vmax.xlane.f32.xlu0 %v5132_v52 }
0x2028   : > { %v11198_v54 = vpop.f32.mrf.mxu1 }
0x2030   : > { %v5094_v59 = vpop.f32.mrf.mxu1 }
0x2031   : > { %v5127_v61 = vmul.f32 0.70710677, %v5094_v59 }
0x2033   : > { %v5135_v7 = vsel %vm548_vm2, %v5127_v61, -inf }
0x2034   : > { %5136 = vmax.xlane.f32.xlu1 %v5135_v7  ;;  %v8947_v7 = vld [vmem:[%s12840_s5 + $0x18] sm:$0xff] }
0x205e   : > { %v5131_v63 = vpop.xlane.xlu2 %5130 }
0x205f   : > { %v5141_v40 = vsub.f32 %v5125_v44, %v5131_v63  ;;  %v8946_v63 = vld [vmem:[%s12840_s5 + $0x10] sm:$0xff] }
0x2061   : > { %v5145_v62 = vmul.f32 1.442695, %v5141_v40 }
0x2063   : > { %9538 = vpow2.f32 %v5145_v62 }
0x2066   : > { %v5174_v0 = vpop.permute.xlu2 %5173 }
0x2067   : > { %5194 = vmatpush.msrb.mxu3 %v5174_v0 }
0x2069   : > { %v9539_v20 = vpop.eup %9538  ;;  %v11201_v16 = vpop.f32.mrf.mxu2  ;;  %5558 = vmatpush.msra.mxu3 %v8947_v7 }
0x206a   : > { %v5153_v41 = vsel %vm548_vm2, %v9539_v20, 0.0 }
0x206b   : > { %5154 = vadd.xlane.f32.xlu1 %v5153_v41  ;;  %5559 = vmatpush.msra.mxu3 %v8946_v63 }
0x2071   : > { %v5122_v52 = vpop.f32.mrf.mxu2 }
0x2072   : > { %v5128_v22 = vmul.f32 0.70710677, %v5122_v52 }
0x2074   : > { %v5138_v6 = vsel %vm548_vm2, %v5128_v22, -inf }
0x2075   : > { %5139 = vmax.xlane.f32.xlu0 %v5138_v6 }
0x2088   : > { %v5134_v59 = vpop.xlane.xlu0 %5133 }
0x2089   : > { %v5142_v57 = vsub.f32 %v5126_v53, %v5134_v59  ;;  %5199 = vrot.lane.b32.xlu0 %v10725_v14, %s12876_s20 }
0x208b   : > { %v5147_v40 = vmul.f32 1.442695, %v5142_v57 }
0x208d   : > { %9540 = vpow2.f32 %v5147_v40 }
0x2091   : > { %5251 = vrot.lane.b32.xlu0 %v10743_v50, %s12876_s20 }
0x2093   : > { %v9541_v0 = vpop.eup %9540 }
0x2094   : > { %v5156_v44 = vsel %vm548_vm2, %v9541_v0, 0.0 }
0x2095   : > { %5157 = vadd.xlane.f32.xlu1 %v5156_v44 }
0x2099   : > { %5393 = vrot.lane.b32.xlu0 %v10869_v51, %s12877_s30 }
0x20a1   : > { %5425 = vrot.lane.b32.xlu0 %v10997_v29, %s12878_s12 }
0x20a7   : > { %v5137_v6 = vpop.xlane.xlu1 %5136 }
0x20a8   : > { %v5143_v53 = vsub.f32 %v5127_v61, %v5137_v6 }
0x20a9   : > { %5457 = vrot.lane.b32.xlu0 %v11123_v10, %s12879_s19 }
0x20aa   : > { %v5149_v14 = vmul.f32 1.442695, %v5143_v53 }
0x20ac   : > { %9542 = vpow2.f32 %v5149_v14 }
0x20b1   : > { %5395 = vrot.lane.b32.xlu0 %v10881_v23, %s12877_s30 }
0x20b2   : > { %v9543_v50 = vpop.eup %9542 }
0x20b3   : > { %v5159_v57 = vsel %vm548_vm2, %v9543_v50, 0.0 }
0x20b4   : > { %5160 = vadd.xlane.f32.xlu1 %v5159_v57 }
0x20b9   : > { %5427 = vrot.lane.b32.xlu0 %v11007_v17, %s12878_s12 }
0x20c1   : > { %5459 = vrot.lane.b32.xlu0 %v11133_v45, %s12879_s19 }
0x20c9   : > { %5397 = vrot.lane.b32.xlu0 %v10879_v13, %s12877_s30 }
0x20cd   : > { %5225 = vrot.lane.b32.xlu1 %v10739_v8, %s12876_s20  ;;  %s9847_s20 = smov 56  }
0x20d1   : > { %5445 = vrot.lane.b32.xlu0 %v11071_v60, %s12880_s8 }
0x20d5   : > { %5409 = vrot.lane.b32.xlu1 %v10935_v43, %s12881_s9 }
0x20dd   : > { %5441 = vrot.lane.b32.xlu1 %v11059_v42, %s12880_s8 }
0x20de   : > { %v5155_v51 = vpop.xlane.xlu1 %5154 }
0x20df   : > { %9544 = vrcp.f32 %v5155_v51 }
0x20e5   : > { %v9545_v23 = vpop.eup %9544  ;;  %5473 = vrot.lane.b32.xlu1 %v11185_v2, %s12882_s13 }
0x20e6   : > { %v11235_v29 = vmul.f32 %v9545_v23, %v9539_v20 }
0x20e8   : > { %8942 = vmatmul.msk.f32.vlgmr.msrb.gmra.mxu3 %vm548_vm2, %v11235_v29  ;;  %v5140_v8 = vpop.xlane.xlu0 %5139 }
0x20e9   : > { %v5144_v13 = vsub.f32 %v5128_v22, %v5140_v8 }
0x20eb   : > { %v5151_v17 = vmul.f32 1.442695, %v5144_v13 }
0x20ed   : > { %9546 = vpow2.f32 %v5151_v17  ;;  %5411 = vrot.lane.b32.xlu1 %v10948_v15, %s12881_s9 }
0x20f3   : > { %v9547_v43 = vpop.eup %9546 }
0x20f4   : > { %v5162_v42 = vsel %vm548_vm2, %v9547_v43, 0.0 }
0x20f5   : > { %5443 = vrot.lane.b32.xlu1 %v11069_v1, %s12880_s8  ;;  %5163 = vadd.xlane.f32.xlu2 %v5162_v42 }
0x20fb   : > { %v5200_v60 = vpop.permute.xlu0 %5199 }
0x20fc   : > { %5220 = vmatpush.msra.mxu0 %v5200_v60 }
0x20fd   : > { %5475 = vrot.lane.b32.xlu1 %v11195_v35, %s12882_s13 }
0x2103   : > { %v5252_v10 = vpop.permute.xlu0 %5251 }
0x2104   : > { %5272 = vmatpush.msrb.mxu2 %v5252_v10 }
0x2105   : > { %5413 = vrot.lane.b32.xlu1 %v10945_v34, %s12881_s9 }
0x2108   : > { %v5158_v22 = vpop.xlane.xlu1 %5157 }
0x2109   : > { %9548 = vrcp.f32 %v5158_v22 }
0x210b   : > { %v5394_v20 = vpop.permute.xlu0 %5393 }
0x210c   : > { %v5501_v52 = vsel %vm438_vm1, %v10815_v25, %v5394_v20 }
0x210d   : > { %5461 = vrot.lane.b32.xlu1 %v11136_v4, %s12879_s19  ;;  %5429 = vrot.lane.b32.xlu2 %v11009_v26, %s12878_s12 }
0x210f   : > { %v9549_v15 = vpop.eup %9548 }
0x2110   : > { %v11252_v1 = vmul.f32 %v9549_v15, %v9541_v0 }
0x2112   : > { %12883 = vst [vmem:[#allocation64_spill] sm:$0xff] %v11252_v1  ;;  %8943 = vmatmul.msk.f32.vlgmr.msra.gmra.mxu0 %vm548_vm2, %v11252_v1 }
0x2115   : > { %5399 = vrot.lane.b32.xlu1 %v10892_v55, %s12877_s30  ;;  %s9845_s30 = smov 40  }
0x211d   : > { %5447 = vrot.lane.b32.xlu1 %v11081_v58, %s12880_s8 }
0x2127   : > { %v5161_v34 = vpop.xlane.xlu1 %5160 }
0x2128   : > { %9550 = vrcp.f32 %v5161_v34 }
0x212e   : > { %v9551_v45 = vpop.eup %9550 }
0x212f   : > { %v11260_v2 = vmul.f32 %v9551_v45, %v9543_v50 }
0x2131   : > { %12884 = vst [vmem:[#allocation65_spill] sm:$0xff] %v11260_v2 }
0x213f   : > { %v5226_v4 = vpop.permute.xlu1 %5225 }
0x2140   : > { %5246 = vmatpush.msrb.mxu1 %v5226_v4 }
0x2141   : > { %8944 = vmatmul.msk.f32.vlgmr.msrb.gmra.mxu1 %vm548_vm2, %v11260_v2 }
0x2147   : > { %v5410_v62 = vpop.permute.xlu1 %5409 }
0x2148   : > { %v5505_v59 = vsel %vm2778_vm3, %v5501_v52, %v5410_v62 }
0x214f   : > { %v5442_v41 = vpop.permute.xlu1 %5441 }
0x2157   : > { %v5474_v6 = vpop.permute.xlu1 %5473 }
0x215f   : > { %v5412_v25 = vpop.permute.xlu1 %5411 }
0x2167   : > { %v5444_v23 = vpop.permute.xlu1 %5443 }
0x2168   : > { %v5164_v26 = vpop.xlane.xlu2 %5163 }
0x2169   : > { %9552 = vrcp.f32 %v5164_v26 }
0x216b   : > { %v5196_v35 = vpop.f32.mrf.mxu3 }
0x216c   : > { %5489 = vrot.lane.b32.xlu2 %v5196_v35, %s12885_s10 }
0x216f   : > { %v9553_v61 = vpop.eup %9552  ;;  %v5476_v60 = vpop.permute.xlu1 %5475 }
0x2170   : > { %v11265_v55 = vmul.f32 %v9553_v61, %v9547_v43  ;;  %v5430_v40 = vpop.permute.xlu2 %5429 }
0x2172   : > { %8945 = vmatmul.msk.f32.vlgmr.msrb.gmra.mxu2 %vm548_vm2, %v11265_v55 }
0x2177   : > { %v5414_v45 = vpop.permute.xlu1 %5413 }
0x218f   : > { %v5222_v58 = vpop.f32.mrf.mxu0 }
0x2190   : > { %5491 = vrot.lane.b32.xlu2 %v5222_v58, %s12885_s10  ;;  %v5462_v58 = vpop.permute.xlu1 %5461 }
0x2198   : > { %5477 = vrot.lane.b32.xlu2 %v11198_v54, %s12882_s13  ;;  %v5426_v54 = vpop.permute.xlu0 %5425 }
0x2199   : > { %v5509_v0 = vsel %vm2783_vm4, %v5505_v59, %v5426_v54 }
0x219a   : > { %v5513_v44 = vsel %vm548_vm2, %v5509_v0, %v5442_v41 }
0x21a0   : > { %5415 = vrot.lane.b32.xlu2 %v10957_v38, %s12881_s9 }
0x21a8   : > { %5463 = vrot.lane.b32.xlu2 %v11144_v9, %s12879_s19  ;;  %v5458_v9 = vpop.permute.xlu0 %5457  ;;  %s12887_s19 = smov 96  }
0x21a9   : > { %v5517_v53 = vsel %vm2792_vm5, %v5513_v44, %v5458_v9 }
0x21aa   : > { %v5521_v14 = vsel %vm2797_vm6, %v5517_v53, %v5474_v6 }
0x21b0   : > { %v5396_v51 = vpop.permute.xlu0 %5395 }
0x21b1   : > { %v5502_v13 = vsel %vm438_vm1, %v10808_v46, %v5396_v51 }
0x21b2   : > { %v5506_v17 = vsel %vm2778_vm3, %v5502_v13, %v5412_v25 }
0x21b8   : > { %v5428_v8 = vpop.permute.xlu0 %5427 }
0x21b9   : > { %v5510_v43 = vsel %vm2783_vm4, %v5506_v17, %v5428_v8 }
0x21ba   : > { %v5514_v42 = vsel %vm548_vm2, %v5510_v43, %v5444_v23 }
0x21be   : > { %v5248_v38 = vpop.f32.mrf.mxu1 }
0x21bf   : > { %5493 = vrot.lane.b32.xlu0 %v5248_v38, %s12885_s10 }
0x21c6   : > { %v5490_v50 = vpop.permute.xlu2 %5489 }
0x21c7   : > { %v5525_v57 = vsel %vm2802_vm7, %v5521_v14, %v5490_v50  ;;  %5431 = vrot.lane.b32.xlu0 %v11019_v48, %s12878_s12  ;;  %v5460_v48 = vpop.permute.xlu0 %5459  ;;  %s12888_s12 = smov 126  }
0x21c8   : > { %8948 = vmatmul.msk.f32.vlgmr.msra.gmra.mxu3 %vm393_vm0, %v5525_v57  ;;  %v5518_v10 = vsel %vm2792_vm5, %v5514_v42, %v5460_v48 }
0x21c9   : > { %v5522_v22 = vsel %vm2797_vm6, %v5518_v10, %v5476_v60 }
0x21cf   : > { %5479 = vrot.lane.b32.xlu0 %v11201_v16, %s12882_s13  ;;  %v5398_v46 = vpop.permute.xlu0 %5397 }
0x21d0   : > { %v5503_v4 = vsel %vm438_vm1, %v10817_v21, %v5398_v46 }
0x21d1   : > { %v5507_v35 = vsel %vm2778_vm3, %v5503_v4, %v5414_v45 }
0x21d2   : > { %v5511_v61 = vsel %vm2783_vm4, %v5507_v35, %v5430_v40  ;;  %v5400_v40 = vpop.permute.xlu1 %5399 }
0x21d3   : > { %v5504_v44 = vsel %vm438_vm1, %v10819_v31, %v5400_v40 }
0x21d7   : > { %v5446_v26 = vpop.permute.xlu0 %5445 }
0x21d8   : > { %v5515_v63 = vsel %vm548_vm2, %v5511_v61, %v5446_v26 }
0x21d9   : > { %v5519_v62 = vsel %vm2792_vm5, %v5515_v63, %v5462_v58  ;;  %v8953_v63 = vld [vmem:[%s12841_s6 + $0x18] sm:$0xff] }
0x21da   : > { %v5448_v6 = vpop.permute.xlu1 %5447  ;;  %5690 = vmatpush.msra.mxu1 %v8953_v63  ;;  %v8968_v63 = vld [vmem:[%s12625_s7 + $0xd0] sm:$0xff] }
0x21ea   : > { %v5492_v16 = vpop.permute.xlu2 %5491 }
0x21eb   : > { %v5526_v15 = vsel %vm2802_vm7, %v5522_v22, %v5492_v16 }
0x21ec   : > { %8949 = vmatmul.msk.f32.gmra.mxu3 %vm393_vm0, %v5526_v15 }
0x21f2   : > { %v5478_v7 = vpop.permute.xlu2 %5477 }
0x21f3   : > { %v5523_v20 = vsel %vm2797_vm6, %v5519_v62, %v5478_v7 }
0x21f5   : > { %v5274_v34 = vpop.f32.mrf.mxu2 }
0x21f6   : > { %5495 = vrot.lane.b32.xlu1 %v5274_v34, %s12885_s10  ;;  %s12886_s10 = smov 112  }
0x21fa   : > { %v5416_v0 = vpop.permute.xlu2 %5415 }
0x21fb   : > { %v5508_v9 = vsel %vm2778_vm3, %v5504_v44, %v5416_v0 }
0x2202   : > { %v5464_v57 = vpop.permute.xlu2 %5463 }
0x2231   : > { %v5494_v41 = vpop.permute.xlu0 %5493 }
0x2232   : > { %v5527_v54 = vsel %vm2802_vm7, %v5523_v20, %v5494_v41 }
0x2233   : > { %8950 = vmatmul.msk.f32.gmra.mxu3 %vm393_vm0, %v5527_v54 }
0x2239   : > { %v5432_v38 = vpop.permute.xlu0 %5431 }
0x223a   : > { %v5512_v53 = vsel %vm2783_vm4, %v5508_v9, %v5432_v38 }
0x223b   : > { %v5516_v14 = vsel %vm548_vm2, %v5512_v53, %v5448_v6 }
0x2241   : > { %v5480_v50 = vpop.permute.xlu0 %5479 }
0x224b   : > { %v5561_v52 = vpop.f32.mrf.mxu3 }
0x224c   : > { %v5562_v21 = vadd.f32 %v5561_v52, %v10702_v28  ;;  %v5520_v28 = vsel %vm2792_vm5, %v5516_v14, %v5464_v57 }
0x224d   : > { %v5524_v25 = vsel %vm2797_vm6, %v5520_v28, %v5480_v50 }
0x224e   : > { %v5573_v59 = vsel %vm393_vm0, %v5562_v21, 0.0 }
0x224f   : > { %5574 = vadd.xlane.f32.xlu2 %v5573_v59 }
0x2268   : > { %v5496_v51 = vpop.permute.xlu1 %5495 }
0x2269   : > { %v5528_v23 = vsel %vm2802_vm7, %v5524_v25, %v5496_v51 }
0x226a   : > { %8951 = vmatmul.msk.f32.gmra.mxu3 %vm393_vm0, %v5528_v23 }
0x226f   : > { %v5564_v8 = vpop.f32.mrf.mxu3 }
0x2270   : > { %v5565_v31 = vadd.f32 %v5564_v8, %v10710_v11 }
0x2272   : > { %v5576_v13 = vsel %vm393_vm0, %v5565_v31, 0.0 }
0x2273   : > { %5577 = vadd.xlane.f32.xlu0 %v5576_v13 }
0x22b6   : > { %v5567_v17 = vpop.f32.mrf.mxu3 }
0x22b7   : > { %v5568_v43 = vadd.f32 %v5567_v17, %v10721_v39 }
0x22b9   : > { %v5579_v42 = vsel %vm393_vm0, %v5568_v43, 0.0 }
0x22ba   : > { %5580 = vadd.xlane.f32.xlu1 %v5579_v42 }
0x22c2   : > { %v5575_v60 = vpop.xlane.xlu2 %5574 }
0x22c3   : > { %v5585_v48 = vmul.f32 %v5575_v60, %v10593_v30 }
0x22c5   : > { %v5589_v10 = vsub.f32 %v5562_v21, %v5585_v48 }
0x22c7   : > { %v5593_v22 = vmul.f32 %v5589_v10, %v5589_v10 }
0x22c9   : > { %v5597_v16 = vsel %vm393_vm0, %v5593_v22, 0.0 }
0x22ca   : > { %5598 = vadd.xlane.f32.xlu2 %v5597_v16 }
0x22e6   : > { %v5578_v15 = vpop.xlane.xlu0 %5577 }
0x22e7   : > { %v5586_v11 = vmul.f32 %v5578_v15, %v10593_v30 }
0x22e9   : > { %v5590_v34 = vsub.f32 %v5565_v31, %v5586_v11 }
0x22eb   : > { %v5594_v46 = vmul.f32 %v5590_v34, %v5590_v34 }
0x22ed   : > { %v5570_v45 = vpop.f32.mrf.mxu3  ;;  %v5600_v4 = vsel %vm393_vm0, %v5594_v46, 0.0 }
0x22ee   : > { %v5571_v39 = vadd.f32 %v5570_v45, %v10729_v27  ;;  %5601 = vadd.xlane.f32.xlu0 %v5600_v4  ;;  %v8952_v27 = vld [vmem:[%s12841_s6 + $0x10] sm:$0xff]  ;;  %s13001_s6 = sld [smem:[#allocation97_spill]] }
0x22ef   : > { %5691 = vmatpush.msra.mxu1 %v8952_v27  ;;  %v8966_v27 = vld [vmem:[%s12625_s7 + $0xc0] sm:$0xff] }
0x22f0   : > { %v5582_v26 = vsel %vm393_vm0, %v5571_v39, 0.0 }
0x22f1   : > { %5583 = vadd.xlane.f32.xlu2 %v5582_v26  ;;  %v8973_v26 = vld [vmem:[%s12625_s7 + $0xf8] sm:$0xff] }
0x22f2   : > { %5726 = vmatpush.msrb.mxu1 %v8973_v26 }
0x232d   : > { %v5581_v35 = vpop.xlane.xlu1 %5580 }
0x232e   : > { %v5587_v61 = vmul.f32 %v5581_v35, %v10593_v30  ;;  %v8972_v35 = vld [vmem:[%s12625_s7 + $0xf0] sm:$0xff] }
0x232f   : > { %5727 = vmatpush.msrb.mxu1 %v8972_v35 }
0x2330   : > { %v5591_v58 = vsub.f32 %v5568_v43, %v5587_v61  ;;  %v8971_v61 = vld [vmem:[%s12625_s7 + $0xe8] sm:$0xff] }
0x2331   : > { %5728 = vmatpush.msrb.mxu1 %v8971_v61 }
0x2332   : > { %v5595_v7 = vmul.f32 %v5591_v58, %v5591_v58 }
0x2334   : > { %v5603_v62 = vsel %vm393_vm0, %v5595_v7, 0.0  ;;  %v8969_v7 = vld [vmem:[%s12625_s7 + $0xd8] sm:$0xff] }
0x2335   : > { %5604 = vadd.xlane.f32.xlu1 %v5603_v62  ;;  %v8967_v62 = vld [vmem:[%s12625_s7 + $0xc8] sm:$0xff] }
0x233d   : > { %v5599_v20 = vpop.xlane.xlu2 %5598 }
0x233e   : > { %v5609_v41 = vmul.f32 %v5599_v20, %v10593_v30  ;;  %v8965_v20 = vld [vmem:[%s12625_s7 + $0xb8] sm:$0xff] }
0x2340   : > { %v5613_v54 = vadd.f32 1e-05, %v5609_v41  ;;  %v8964_v41 = vld [vmem:[%s12625_s7 + $0xb0] sm:$0xff] }
0x2342   : > { %9554 = vrsqrt.f32 %v5613_v54  ;;  %vm5623_vm10 = vweird.f32 %v5613_v54 }
0x2348   : > { %v9555_v52 = vpop.eup %9554 }
0x2349   : > { %v5618_v21 = vmul.f32 %v9555_v52, %v5613_v54  ;;  %vm5624_vm9 = vweird.f32 %v9555_v52  ;;  %v8963_v54 = vld [vmem:[%s12625_s7 + $0xa8] sm:$0xff] }
0x234a   : > { %vm5625_vm11 = vmor %vm5623_vm10, %vm5624_vm9 }
0x234b   : > { %v5619_v59 = vmul.f32 %v9555_v52, %v5618_v21  ;;  %v8961_v21 = vld [vmem:[%s12625_s7 + $0x98] sm:$0xff] }
0x234d   : > { %v5620_v40 = vmul.f32 0.5, %v5619_v59  ;;  %v8960_v59 = vld [vmem:[%s12625_s7 + $0x90] sm:$0xff] }
0x234f   : > { %v5621_v38 = vsub.f32 1.5, %v5620_v40  ;;  %v8959_v40 = vld [vmem:[%s12625_s7 + $0x88] sm:$0xff] }
0x2351   : > { %v5622_v0 = vmul.f32 %v9555_v52, %v5621_v38  ;;  %v8958_v38 = vld [vmem:[%s12625_s7 + $0x80] sm:$0xff] }
0x2353   : > { %v5626_v44 = vsel %vm5625_vm11, %v9555_v52, %v5622_v0  ;;  %v8962_v52 = vld [vmem:[%s12625_s7 + $0xa0] sm:$0xff] }
0x2354   : > { %v11345_v6 = vmul.f32 %v5626_v44, %v5589_v10 }
0x2356   : > { %8954 = vmatmul.msk.f32.vlgmr.msra.gmra.mxu1 %vm393_vm0, %v11345_v6 }
0x2361   : > { %v5602_v9 = vpop.xlane.xlu0 %5601 }
0x2362   : > { %v5610_v53 = vmul.f32 %v5602_v9, %v10593_v30 }
0x2364   : > { %v5614_v14 = vadd.f32 1e-05, %v5610_v53  ;;  %v5584_v50 = vpop.xlane.xlu2 %5583 }
0x2365   : > { %v5588_v57 = vmul.f32 %v5584_v50, %v10593_v30 }
0x2366   : > { %9556 = vrsqrt.f32 %v5614_v14  ;;  %vm5633_vm13 = vweird.f32 %v5614_v14 }
0x2367   : > { %v11351_v28 = vsub.f32 %v5571_v39, %v5588_v57 }
0x2369   : > { %v5596_v25 = vmul.f32 %v11351_v28, %v11351_v28 }
0x236b   : > { %v5606_v51 = vsel %vm393_vm0, %v5596_v25, 0.0 }
0x236c   : > { %v9557_v23 = vpop.eup %9556  ;;  %5607 = vadd.xlane.f32.xlu0 %v5606_v51 }
0x236d   : > { %v5628_v8 = vmul.f32 %v9557_v23, %v5614_v14  ;;  %vm5634_vm12 = vweird.f32 %v9557_v23 }
0x236e   : > { %vm5635_vm14 = vmor %vm5633_vm13, %vm5634_vm12 }
0x236f   : > { %v5629_v31 = vmul.f32 %v9557_v23, %v5628_v8 }
0x2371   : > { %v5630_v13 = vmul.f32 0.5, %v5629_v31 }
0x2373   : > { %v5631_v17 = vsub.f32 1.5, %v5630_v13 }
0x2375   : > { %v5632_v43 = vmul.f32 %v9557_v23, %v5631_v17 }
0x2377   : > { %v5636_v42 = vsel %vm5635_vm14, %v9557_v23, %v5632_v43 }
0x2378   : > { %v11356_v60 = vmul.f32 %v5636_v42, %v5590_v34 }
0x237a   : > { %8955 = vmatmul.msk.f32.gmra.mxu1 %vm393_vm0, %v11356_v60 }
0x23a8   : > { %v5605_v48 = vpop.xlane.xlu1 %5604 }
0x23a9   : > { %v5611_v10 = vmul.f32 %v5605_v48, %v10593_v30 }
0x23ab   : > { %v5615_v22 = vadd.f32 1e-05, %v5611_v10 }
0x23ad   : > { %9558 = vrsqrt.f32 %v5615_v22  ;;  %vm5643_vm8 = vweird.f32 %v5615_v22 }
0x23b3   : > { %v9559_v16 = vpop.eup %9558 }
0x23b4   : > { %v5638_v15 = vmul.f32 %v9559_v16, %v5615_v22  ;;  %vm5644_vm15 = vweird.f32 %v9559_v16 }
0x23b5   : > { %vm5645_vm9 = vmor %vm5643_vm8, %vm5644_vm15 }
0x23b6   : > { %v5639_v11 = vmul.f32 %v9559_v16, %v5638_v15 }
0x23b8   : > { %v5640_v46 = vmul.f32 0.5, %v5639_v11 }
0x23ba   : > { %v5641_v45 = vsub.f32 1.5, %v5640_v46 }
0x23bc   : > { %v5642_v4 = vmul.f32 %v9559_v16, %v5641_v45 }
0x23be   : > { %v5646_v39 = vsel %vm5645_vm9, %v9559_v16, %v5642_v4 }
0x23bf   : > { %v11361_v34 = vmul.f32 %v5646_v39, %v5591_v58  ;;  %v8970_v58 = vld [vmem:[%s12625_s7 + $0xe0] sm:$0xff] }
0x23c0   : > { %5729 = vmatpush.msrb.mxu1 %v8970_v58 }
0x23c1   : > { %8956 = vmatmul.msk.f32.gmra.mxu1 %vm393_vm0, %v11361_v34 }
0x23c2   : > { %5730 = vmatpush.msrb.mxu1 %v8969_v7 }
0x23c4   : > { %5731 = vmatpush.msrb.mxu1 %v8968_v63 }
0x23c6   : > { %5732 = vmatpush.msrb.mxu1 %v8967_v62 }
0x23c8   : > { %5733 = vmatpush.msrb.mxu1 %v8966_v27 }
0x23ca   : > { %5734 = vmatpush.msrb.mxu1 %v8965_v20 }
0x23cc   : > { %5735 = vmatpush.msrb.mxu1 %v8964_v41 }
0x23ce   : > { %5736 = vmatpush.msrb.mxu1 %v8963_v54 }
0x23d0   : > { %5737 = vmatpush.msrb.mxu1 %v8962_v52 }
0x23d2   : > { %5738 = vmatpush.msrb.mxu1 %v8961_v21 }
0x23d3   : > { %v5693_v31 = vpop.f32.mrf.mxu1 }
0x23d4   : > { %5739 = vmatpush.msrb.mxu1 %v8960_v59  ;;  %v5705_v13 = vmax.f32 %v5693_v31, 0.0 }
0x23d6   : > { %5740 = vmatpush.msrb.mxu1 %v8959_v40 }
0x23d8   : > { %5741 = vmatpush.msrb.mxu1 %v8958_v38 }
0x23df   : > { %v5608_v0 = vpop.xlane.xlu0 %5607 }
0x23e0   : > { %v5612_v44 = vmul.f32 %v5608_v0, %v10593_v30  ;;  %v8975_v0 = vld [vmem:[%s12622_s4 + $0x28] sm:$0xff] }
0x23e1   : > { %5872 = vmatpush.msra.mxu2 %v8975_v0 }
0x23e2   : > { %v5616_v9 = vadd.f32 1e-05, %v5612_v44  ;;  %v8974_v44 = vld [vmem:[%s12622_s4 + $0x20] sm:$0xff] }
0x23e3   : > { %5873 = vmatpush.msra.mxu2 %v8974_v44 }
0x23e4   : > { %9560 = vrsqrt.f32 %v5616_v9  ;;  %vm5653_vm11 = vweird.f32 %v5616_v9 }
0x23ea   : > { %v9561_v53 = vpop.eup %9560 }
0x23eb   : > { %v5648_v14 = vmul.f32 %v9561_v53, %v5616_v9  ;;  %vm5654_vm10 = vweird.f32 %v9561_v53 }
0x23ec   : > { %vm5655_vm12 = vmor %vm5653_vm11, %vm5654_vm10 }
0x23ed   : > { %v5649_v50 = vmul.f32 %v9561_v53, %v5648_v14 }
0x23ef   : > { %v5650_v57 = vmul.f32 0.5, %v5649_v50 }
0x23f1   : > { %v5651_v25 = vsub.f32 1.5, %v5650_v57 }
0x23f3   : > { %v5652_v51 = vmul.f32 %v9561_v53, %v5651_v25 }
0x23f5   : > { %v5656_v23 = vsel %vm5655_vm12, %v9561_v53, %v5652_v51 }
0x23f6   : > { %v5660_v8 = vmul.f32 %v5656_v23, %v11351_v28 }
0x23f7   : > { %v5696_v17 = vpop.f32.mrf.mxu1 }
0x23f8   : > { %8957 = vmatmul.msk.f32.gmra.mxu1 %vm393_vm0, %v5660_v8  ;;  %v5706_v43 = vmax.f32 %v5696_v17, 0.0 }
0x2400   : > { %5742 = vmatmul.f32.vlgmr.msrb.gmra.mxu1 %v5705_v13 }
0x2408   : > { %5745 = vmatmul.f32.gmra.mxu1 %v5706_v43 }
0x243e   : > { %v5699_v42 = vpop.f32.mrf.mxu1 }
0x243f   : > { %v5707_v48 = vmax.f32 %v5699_v42, 0.0 }
0x2441   : > { %5748 = vmatmul.f32.gmra.mxu1 %v5707_v48 }
0x2475   : > { %v5702_v10 = vpop.f32.mrf.mxu1 }
0x2476   : > { %v5708_v22 = vmax.f32 %v5702_v10, 0.0 }
0x2478   : > { %5751 = vmatmul.f32.gmra.mxu1 %v5708_v22 }
0x247d   : > { %v5743_v16 = vpop.f32.mrf.mxu1 }
0x247e   : > { %v5744_v15 = vadd.f32 %v5743_v16, %v11345_v6 }
0x2480   : > { %v5755_v11 = vsel %vm393_vm0, %v5744_v15, 0.0 }
0x2481   : > { %5756 = vadd.xlane.f32.xlu1 %v5755_v11 }
0x2485   : > { %v5746_v28 = vpop.f32.mrf.mxu1 }
0x2486   : > { %v5747_v46 = vadd.f32 %v5746_v28, %v11356_v60 }
0x2488   : > { %v5758_v45 = vsel %vm393_vm0, %v5747_v46, 0.0 }
0x2489   : > { %5759 = vadd.xlane.f32.xlu2 %v5758_v45 }
0x24be   : > { %v5749_v4 = vpop.f32.mrf.mxu1 }
0x24bf   : > { %v5750_v39 = vadd.f32 %v5749_v4, %v11361_v34 }
0x24c1   : > { %v5761_v26 = vsel %vm393_vm0, %v5750_v39, 0.0 }
0x24c2   : > { %5762 = vadd.xlane.f32.xlu0 %v5761_v26 }
0x24f4   : > { %v5757_v35 = vpop.xlane.xlu1 %5756 }
0x24f5   : > { %v5767_v61 = vmul.f32 %v5757_v35, %v10593_v30  ;;  %v5752_v63 = vpop.f32.mrf.mxu1 }
0x24f6   : > { %v5753_v27 = vadd.f32 %v5752_v63, %v5660_v8 }
0x24f7   : > { %v5771_v58 = vsub.f32 %v5744_v15, %v5767_v61 }
0x24f8   : > { %v5764_v54 = vsel %vm393_vm0, %v5753_v27, 0.0 }
0x24f9   : > { %v5775_v6 = vmul.f32 %v5771_v58, %v5771_v58 }
0x24fb   : > { %v5779_v7 = vsel %vm393_vm0, %v5775_v6, 0.0 }
0x24fc   : > { %v5760_v62 = vpop.xlane.xlu2 %5759  ;;  %5780 = vadd.xlane.f32.xlu1 %v5779_v7 }
0x24fd   : > { %v5768_v60 = vmul.f32 %v5760_v62, %v10593_v30 }
0x24ff   : > { %v5772_v20 = vsub.f32 %v5747_v46, %v5768_v60 }
0x2501   : > { %v5776_v41 = vmul.f32 %v5772_v20, %v5772_v20 }
0x2503   : > { %v5782_v34 = vsel %vm393_vm0, %v5776_v41, 0.0 }
0x2504   : > { %5783 = vadd.xlane.f32.xlu2 %v5782_v34  ;;  %5765 = vadd.xlane.f32.xlu1 %v5764_v54 }
0x2535   : > { %v5763_v52 = vpop.xlane.xlu0 %5762 }
0x2536   : > { %v5769_v21 = vmul.f32 %v5763_v52, %v10593_v30 }
0x2538   : > { %v5773_v59 = vsub.f32 %v5750_v39, %v5769_v21 }
0x253a   : > { %v5777_v40 = vmul.f32 %v5773_v59, %v5773_v59 }
0x253c   : > { %v5785_v38 = vsel %vm393_vm0, %v5777_v40, 0.0 }
0x253d   : > { %5786 = vadd.xlane.f32.xlu0 %v5785_v38 }
0x256f   : > { %v5781_v9 = vpop.xlane.xlu1 %5780 }
0x2570   : > { %v5791_v53 = vmul.f32 %v5781_v9, %v10593_v30 }
0x2572   : > { %v5795_v14 = vadd.f32 1e-05, %v5791_v53 }
0x2574   : > { %9562 = vrsqrt.f32 %v5795_v14  ;;  %vm5805_vm14 = vweird.f32 %v5795_v14 }
0x2577   : > { %v5784_v50 = vpop.xlane.xlu2 %5783  ;;  %v5766_v57 = vpop.xlane.xlu1 %5765 }
0x2578   : > { %v5792_v25 = vmul.f32 %v5784_v50, %v10593_v30  ;;  %v5770_v51 = vmul.f32 %v5766_v57, %v10593_v30 }
0x257a   : > { %v9563_v23 = vpop.eup %9562  ;;  %v5796_v8 = vadd.f32 1e-05, %v5792_v25  ;;  %v5774_v31 = vsub.f32 %v5753_v27, %v5770_v51 }
0x257b   : > { %v5800_v13 = vmul.f32 %v9563_v23, %v5795_v14  ;;  %vm5806_vm13 = vweird.f32 %v9563_v23 }
0x257c   : > { %9564 = vrsqrt.f32 %v5796_v8  ;;  %v5778_v17 = vmul.f32 %v5774_v31, %v5774_v31  ;;  %vm5807_vm15 = vmor %vm5805_vm14, %vm5806_vm13  ;;  %vm5815_vm9 = vweird.f32 %v5796_v8 }
0x257d   : > { %v5801_v43 = vmul.f32 %v9563_v23, %v5800_v13 }
0x257e   : > { %v5788_v42 = vsel %vm393_vm0, %v5778_v17, 0.0 }
0x257f   : > { %v5802_v48 = vmul.f32 0.5, %v5801_v43  ;;  %5789 = vadd.xlane.f32.xlu2 %v5788_v42 }
0x2581   : > { %v5803_v10 = vsub.f32 1.5, %v5802_v48 }
0x2582   : > { %v9565_v22 = vpop.eup %9564 }
0x2583   : > { %v5804_v16 = vmul.f32 %v9563_v23, %v5803_v10  ;;  %v5810_v15 = vmul.f32 %v9565_v22, %v5796_v8  ;;  %vm5816_vm8 = vweird.f32 %v9565_v22 }
0x2584   : > { %vm5817_vm10 = vmor %vm5815_vm9, %vm5816_vm8 }
0x2585   : > { %v5808_v11 = vsel %vm5807_vm15, %v9563_v23, %v5804_v16  ;;  %v5811_v28 = vmul.f32 %v9565_v22, %v5810_v15 }
0x2586   : > { %v11439_v46 = vmul.f32 %v5808_v11, %v5771_v58 }
0x2587   : > { %v5812_v45 = vmul.f32 0.5, %v5811_v28 }
0x2588   : > { %8976 = vmatmul.msk.f32.vlgmr.msra.gmra.mxu2 %vm393_vm0, %v11439_v46 }
0x2589   : > { %v5813_v4 = vsub.f32 1.5, %v5812_v45 }
0x258b   : > { %v5814_v39 = vmul.f32 %v9565_v22, %v5813_v4 }
0x258d   : > { %v5818_v26 = vsel %vm5817_vm10, %v9565_v22, %v5814_v39 }
0x258e   : > { %v11443_v35 = vmul.f32 %v5818_v26, %v5772_v20 }
0x2590   : > { %8977 = vmatmul.msk.f32.gmra.mxu2 %vm393_vm0, %v11443_v35 }
0x25b0   : > { %v5787_v61 = vpop.xlane.xlu0 %5786 }
0x25b1   : > { %v5793_v6 = vmul.f32 %v5787_v61, %v10593_v30 }
0x25b3   : > { %v5797_v58 = vadd.f32 1e-05, %v5793_v6 }
0x25b5   : > { %9566 = vrsqrt.f32 %v5797_v58  ;;  %vm5825_vm12 = vweird.f32 %v5797_v58 }
0x25bb   : > { %v9567_v7 = vpop.eup %9566 }
0x25bc   : > { %v5820_v63 = vmul.f32 %v9567_v7, %v5797_v58  ;;  %vm5826_vm11 = vweird.f32 %v9567_v7 }
0x25bd   : > { %vm5827_vm13 = vmor %vm5825_vm12, %vm5826_vm11 }
0x25be   : > { %v5821_v62 = vmul.f32 %v9567_v7, %v5820_v63 }
0x25c0   : > { %v5822_v60 = vmul.f32 0.5, %v5821_v62 }
0x25c2   : > { %v5823_v27 = vsub.f32 1.5, %v5822_v60 }
0x25c4   : > { %v5824_v41 = vmul.f32 %v9567_v7, %v5823_v27 }
0x25c6   : > { %v5828_v34 = vsel %vm5827_vm13, %v9567_v7, %v5824_v41 }
0x25c7   : > { %v11448_v20 = vmul.f32 %v5828_v34, %v5773_v59 }
0x25c9   : > { %8978 = vmatmul.msk.f32.gmra.mxu2 %vm393_vm0, %v11448_v20 }
0x25f2   : > { %v5790_v54 = vpop.xlane.xlu2 %5789 }
0x25f3   : > { %v5794_v52 = vmul.f32 %v5790_v54, %v10593_v30 }
0x25f5   : > { %v5798_v21 = vadd.f32 1e-05, %v5794_v52 }
0x25f7   : > { %9568 = vrsqrt.f32 %v5798_v21  ;;  %vm5835_vm15 = vweird.f32 %v5798_v21 }
0x25fd   : > { %v9569_v40 = vpop.eup %9568 }
0x25fe   : > { %v5830_v38 = vmul.f32 %v9569_v40, %v5798_v21  ;;  %vm5836_vm14 = vweird.f32 %v9569_v40 }
0x25ff   : > { %vm5837_vm8 = vmor %vm5835_vm15, %vm5836_vm14  ;;  %vm2637_vm14 = vcmask 195584  }
0x2600   : > { %v5831_v0 = vmul.f32 %v9569_v40, %v5830_v38 }
0x2602   : > { %v5832_v44 = vmul.f32 0.5, %v5831_v0 }
0x2604   : > { %v5833_v9 = vsub.f32 1.5, %v5832_v44 }
0x2606   : > { %v5834_v53 = vmul.f32 %v9569_v40, %v5833_v9 }
0x2608   : > { %v5838_v14 = vsel %vm5837_vm8, %v9569_v40, %v5834_v53  ;;  %vm2642_vm8 = vcmask 261120  }
0x2609   : > { %v11453_v59 = vmul.f32 %v5838_v14, %v5774_v31 }
0x260b   : > { %v11455_v50 = vpop.f32.mrf.mxu2  ;;  %8979 = vmatmul.msk.f32.gmra.mxu2 %vm393_vm0, %v11453_v59 }
0x260c   : > { %5888 = vrot.lane.b32.xlu2 %v11455_v50, %s12886_s10 }
0x2613   : > { %v11461_v57 = vpop.f32.mrf.mxu2 }
0x2614   : > { %5915 = vrot.lane.b32.xlu0 %v11461_v57, %s12886_s10 }
0x264c   : > { %v11465_v25 = vpop.f32.mrf.mxu2 }
0x264d   : > { %5942 = vrot.lane.b32.xlu1 %v11465_v25, %s12886_s10 }
0x2655   : > { %6069 = vrot.lane.b32.xlu1 %v11461_v57, %s12887_s19 }
0x265d   : > { %6147 = vrot.lane.b32.xlu1 %v11455_v50, %s12888_s12 }
0x2666   : > { %v5889_v51 = vpop.permute.xlu2 %5888 }
0x2667   : > { %8980 = vmatpush.xpose.msk.msrb.mxu3 %vm438_vm1, %v5889_v51 }
0x266a   : > { %8981 = vmatmul.msk.f32.vlgmr.msrb.gmra.mxu3 %vm438_vm1, %v11455_v50 }
0x2686   : > { %v5916_v23 = vpop.permute.xlu0 %5915 }
0x2687   : > { %8982 = vmatpush.xpose.msk.msrb.mxu0 %vm438_vm1, %v5916_v23 }
0x268a   : > { %8983 = vmatmul.msk.f32.vlgmr.msrb.gmra.mxu0 %vm438_vm1, %v11461_v57 }
0x268e   : > { %v11479_v8 = vpop.f32.mrf.mxu2 }
0x268f   : > { %5969 = vrot.lane.b32.xlu0 %v11479_v8, %s12886_s10 }
0x26bf   : > { %v5943_v31 = vpop.permute.xlu1 %5942 }
0x26c0   : > { %8984 = vmatpush.xpose.msk.msrb.mxu2 %vm438_vm1, %v5943_v31 }
0x26c3   : > { %8985 = vmatmul.msk.f32.vlgmr.msrb.gmra.mxu2 %vm438_vm1, %v11465_v25 }
0x26c7   : > { %v6070_v13 = vpop.permute.xlu1 %6069 }
0x26c8   : > { %6090 = vmatpush.msra.mxu2 %v6070_v13 }
0x26cf   : > { %v6148_v52 = vpop.permute.xlu1 %6147 }
0x26ed   : > { %v5911_v10 = vpop.f32.mrf.mxu3 }
0x26ee   : > { %v5995_v22 = vmul.f32 0.70710677, %v5911_v10 }
0x26f0   : > { %v5999_v16 = vsel %vm548_vm2, %v5995_v22, -inf }
0x2701   : > { %v5970_v17 = vpop.permute.xlu0 %5969 }
0x2702   : > { %8986 = vmatpush.xpose.msk.msra.mxu3 %vm438_vm1, %v5970_v17 }
0x2705   : > { %8987 = vmatmul.msk.f32.vlgmr.msra.gmra.mxu3 %vm438_vm1, %v11479_v8 }
0x2707   : > { %v5938_v43 = vpop.f32.mrf.mxu0 }
0x2708   : > { %v5996_v42 = vmul.f32 0.70710677, %v5938_v43 }
0x270a   : > { %v6002_v48 = vsel %vm548_vm2, %v5996_v42, -inf }
0x270b   : > { %6003 = vmax.xlane.f32.xlu2 %v6002_v48 }
0x2713   : > { %6000 = vmax.xlane.f32.xlu2 %v5999_v16 }
0x2746   : > { %v5965_v15 = vpop.f32.mrf.mxu2 }
0x2747   : > { %v5997_v11 = vmul.f32 0.70710677, %v5965_v15 }
0x2749   : > { %v6005_v28 = vsel %vm548_vm2, %v5997_v11, -inf }
0x274a   : > { %6006 = vmax.xlane.f32.xlu0 %v6005_v28 }
0x275e   : > { %6149 = vrot.lane.b32.xlu0 %v11455_v50, %s12842_s29 }
0x277e   : > { %v6004_v45 = vpop.xlane.xlu2 %6003 }
0x277f   : > { %v6012_v4 = vsub.f32 %v5996_v42, %v6004_v45 }
0x2781   : > { %v6017_v39 = vmul.f32 1.442695, %v6012_v4 }
0x2783   : > { %9570 = vpow2.f32 %v6017_v39 }
0x2786   : > { %v6001_v54 = vpop.xlane.xlu2 %6000 }
0x2787   : > { %v6011_v21 = vsub.f32 %v5995_v22, %v6001_v54 }
0x2788   : > { %v5992_v26 = vpop.f32.mrf.mxu3 }
0x2789   : > { %v9571_v61 = vpop.eup %9570  ;;  %v5998_v6 = vmul.f32 0.70710677, %v5992_v26  ;;  %v6015_v40 = vmul.f32 1.442695, %v6011_v21 }
0x278a   : > { %v6026_v58 = vsel %vm548_vm2, %v9571_v61, 0.0 }
0x278b   : > { %6027 = vadd.xlane.f32.xlu1 %v6026_v58  ;;  %v6008_v7 = vsel %vm548_vm2, %v5998_v6, -inf }
0x278c   : > { %6009 = vmax.xlane.f32.xlu2 %v6008_v7 }
0x27a4   : > { %6095 = vrot.lane.b32.xlu2 %v11465_v25, %s12887_s19  ;;  %6175 = vrot.lane.b32.xlu1 %v11461_v57, %s12888_s12 }
0x27ac   : > { %6043 = vrot.lane.b32.xlu1 %v11455_v50, %s12887_s19 }
0x27b4   : > { %6121 = vrot.lane.b32.xlu1 %v11479_v8, %s12887_s19 }
0x27bc   : > { %6205 = vrot.lane.b32.xlu1 %v11465_v25, %s12842_s29 }
0x27bd   : > { %v6007_v63 = vpop.xlane.xlu0 %6006 }
0x27be   : > { %v6013_v62 = vsub.f32 %v5997_v11, %v6007_v63 }
0x27c0   : > { %v6019_v60 = vmul.f32 1.442695, %v6013_v62 }
0x27c2   : > { %9572 = vpow2.f32 %v6019_v60 }
0x27c3   : > { %9574 = vpow2.f32 %v6015_v40 }
0x27c4   : > { %6203 = vrot.lane.b32.xlu1 %v11465_v25, %s12888_s12 }
0x27c8   : > { %v9573_v27 = vpop.eup %9572 }
0x27c9   : > { %v6029_v41 = vsel %vm548_vm2, %v9573_v27, 0.0  ;;  %v9575_v53 = vpop.eup %9574 }
0x27ca   : > { %6030 = vadd.xlane.f32.xlu0 %v6029_v41  ;;  %v6023_v31 = vsel %vm548_vm2, %v9575_v53, 0.0 }
0x27cc   : > { %6233 = vrot.lane.b32.xlu1 %v11479_v8, %s12842_s29 }
0x27d0   : > { %v6150_v34 = vpop.permute.xlu0 %6149 }
0x27d1   : > { %8992 = vmatpush.xpose.msk.msrb.mxu2 %vm438_vm1, %v6150_v34 }
0x27de   : > { %6177 = vrot.lane.b32.xlu0 %v11461_v57, %s12842_s29  ;;  %s12922_s29 = sld [smem:[#allocation95_spill]] }
0x27fe   : > { %v6028_v38 = vpop.xlane.xlu1 %6027 }
0x27ff   : > { %9576 = vrcp.f32 %v6028_v38  ;;  %v6010_v0 = vpop.xlane.xlu2 %6009 }
0x2800   : > { %v6014_v44 = vsub.f32 %v5998_v6, %v6010_v0 }
0x2802   : > { %v6021_v9 = vmul.f32 1.442695, %v6014_v44 }
0x2804   : > { %9578 = vpow2.f32 %v6021_v9 }
0x2805   : > { %v9577_v14 = vpop.eup %9576 }
0x2806   : > { %v11514_v51 = vmul.f32 %v9577_v14, %v9571_v61 }
0x2807   : > { %v6096_v23 = vpop.permute.xlu2 %6095 }
0x2808   : > { %12889 = vst [vmem:[#allocation66_spill] sm:$0xff] %v11514_v51  ;;  %6024 = vadd.xlane.f32.xlu0 %v6023_v31  ;;  %8989 = vmatmul.msk.f32.vlgmr.msra.gmra.mxu2 %vm548_vm2, %v11514_v51 }
0x2809   : > { %6116 = vmatpush.msrb.mxu3 %v6096_v23 }
0x280a   : > { %v9579_v13 = vpop.eup %9578 }
0x280b   : > { %v6032_v17 = vsel %vm548_vm2, %v9579_v13, 0.0 }
0x280c   : > { %6033 = vadd.xlane.f32.xlu2 %v6032_v17 }
0x2810   : > { %8993 = vmatmul.msk.f32.vlgmr.msrb.gmra.mxu2 %vm438_vm1, %v6148_v52 }
0x2816   : > { %v6176_v43 = vpop.permute.xlu1 %6175 }
0x281c   : > { %6231 = vrot.lane.b32.xlu0 %v11479_v8, %s12888_s12 }
0x281e   : > { %v6044_v42 = vpop.permute.xlu1 %6043 }
0x281f   : > { %6064 = vmatpush.msra.mxu0 %v6044_v42 }
0x2824   : > { %6441 = vrot.lane.b32.xlu0 %v11461_v57, %s12844_s23 }
0x2826   : > { %v6122_v48 = vpop.permute.xlu1 %6121 }
0x2827   : > { %6142 = vmatpush.msrb.mxu0 %v6122_v48 }
0x282e   : > { %v6206_v10 = vpop.permute.xlu1 %6205 }
0x2836   : > { %v6204_v22 = vpop.permute.xlu1 %6203 }
0x283d   : > { %v6031_v16 = vpop.xlane.xlu0 %6030 }
0x283e   : > { %9580 = vrcp.f32 %v6031_v16  ;;  %v6234_v15 = vpop.permute.xlu1 %6233 }
0x283f   : > { %8998 = vmatpush.xpose.msk.msra.mxu1 %vm438_vm1, %v6234_v15 }
0x2844   : > { %v9581_v11 = vpop.eup %9580 }
0x2845   : > { %v11526_v28 = vmul.f32 %v9581_v11, %v9573_v27 }
0x2847   : > { %12890 = vst [vmem:[#allocation67_spill] sm:$0xff] %v11526_v28  ;;  %8990 = vmatmul.msk.f32.vlgmr.msrb.gmra.mxu3 %vm548_vm2, %v11526_v28 }
0x2850   : > { %v6178_v45 = vpop.permute.xlu0 %6177 }
0x2851   : > { %8994 = vmatpush.xpose.msk.msra.mxu3 %vm438_vm1, %v6178_v45 }
0x2854   : > { %8995 = vmatmul.msk.f32.vlgmr.msra.gmra.mxu3 %vm438_vm1, %v6176_v43 }
0x287b   : > { %v6025_v4 = vpop.xlane.xlu0 %6024 }
0x287c   : > { %9582 = vrcp.f32 %v6025_v4 }
0x287f   : > { %v6034_v39 = vpop.xlane.xlu2 %6033 }
0x2880   : > { %9584 = vrcp.f32 %v6034_v39 }
0x2882   : > { %v9583_v26 = vpop.eup %9582 }
0x2883   : > { %v11532_v61 = vmul.f32 %v9583_v26, %v9575_v53 }
0x2885   : > { %12891 = vst [vmem:[#allocation68_spill] sm:$0xff] %v11532_v61  ;;  %8988 = vmatmul.msk.f32.vlgmr.msra.gmra.mxu0 %vm548_vm2, %v11532_v61 }
0x2886   : > { %8996 = vmatpush.xpose.msk.msra.mxu0 %vm438_vm1, %v6206_v10  ;;  %v9585_v6 = vpop.eup %9584 }
0x2887   : > { %v11537_v58 = vmul.f32 %v9585_v6, %v9579_v13 }
0x2889   : > { %12892 = vst [vmem:[#allocation69_spill] sm:$0xff] %v11537_v58 }
0x288b   : > { %v11539_v7 = vpop.f32.mrf.mxu2 }
0x288d   : > { %8991 = vmatmul.msk.f32.vlgmr.msrb.gmra.mxu0 %vm548_vm2, %v11537_v58 }
0x288e   : > { %v6232_v63 = vpop.permute.xlu0 %6231 }
0x288f   : > { %8999 = vmatmul.msk.f32.vlgmr.msra.gmra.mxu1 %vm438_vm1, %v6232_v63 }
0x2893   : > { %v6172_v62 = vpop.f32.mrf.mxu2 }
0x2894   : > { %v6259_v60 = vmul.f32 0.70710677, %v6172_v62 }
0x2895   : > { %8997 = vmatmul.msk.f32.vlgmr.msra.gmra.mxu0 %vm438_vm1, %v6204_v22 }
0x2896   : > { %v6263_v27 = vsel %vm548_vm2, %v6259_v60, -inf }
0x2897   : > { %6264 = vmax.xlane.f32.xlu2 %v6263_v27 }
0x28af   : > { %6307 = vrot.lane.b32.xlu2 %v11455_v50, %s12849_s28 }
0x28b7   : > { %6413 = vrot.lane.b32.xlu2 %v11455_v50, %s12844_s23 }
0x28bf   : > { %6411 = vrot.lane.b32.xlu2 %v11455_v50, %s12848_s25 }
0x28ca   : > { %v11552_v41 = vpop.f32.mrf.mxu3 }
0x28d7   : > { %v6200_v34 = vpop.f32.mrf.mxu3 }
0x28d8   : > { %v6260_v54 = vmul.f32 0.70710677, %v6200_v34 }
0x28da   : > { %v6266_v52 = vsel %vm548_vm2, %v6260_v54, -inf }
0x28db   : > { %6267 = vmax.xlane.f32.xlu1 %v6266_v52 }
0x2902   : > { %v11555_v21 = vpop.f32.mrf.mxu0 }
0x290a   : > { %v11557_v40 = vpop.f32.mrf.mxu0  ;;  %v6265_v38 = vpop.xlane.xlu2 %6264 }
0x290b   : > { %v6275_v0 = vsub.f32 %v6259_v60, %v6265_v38 }
0x290c   : > { %v6256_v44 = vpop.f32.mrf.mxu1 }
0x290d   : > { %v6262_v9 = vmul.f32 0.70710677, %v6256_v44  ;;  %v6279_v14 = vmul.f32 1.442695, %v6275_v0 }
0x290f   : > { %v6272_v53 = vsel %vm548_vm2, %v6262_v9, -inf  ;;  %9586 = vpow2.f32 %v6279_v14 }
0x2910   : > { %6273 = vmax.xlane.f32.xlu1 %v6272_v53 }
0x2912   : > { %v6228_v23 = vpop.f32.mrf.mxu0  ;;  %v6308_v31 = vpop.permute.xlu2 %6307 }
0x2913   : > { %v6261_v13 = vmul.f32 0.70710677, %v6228_v23  ;;  %6328 = vmatpush.msra.mxu2 %v6308_v31 }
0x2915   : > { %v6269_v17 = vsel %vm548_vm2, %v6261_v13, -inf  ;;  %v9587_v43 = vpop.eup %9586 }
0x2916   : > { %6270 = vmax.xlane.f32.xlu2 %v6269_v17  ;;  %v6287_v48 = vsel %vm548_vm2, %v9587_v43, 0.0 }
0x291a   : > { %v6414_v42 = vpop.permute.xlu2 %6413 }
0x291b   : > { %9004 = vmatpush.xpose.msk.msrb.mxu2 %vm438_vm1, %v6414_v42 }
0x291e   : > { %6288 = vadd.xlane.f32.xlu2 %v6287_v48 }
0x2922   : > { %v6412_v45 = vpop.permute.xlu2 %6411 }
0x2929   : > { %6333 = vrot.lane.b32.xlu1 %v11461_v57, %s12849_s28 }
0x2936   : > { %6439 = vrot.lane.b32.xlu2 %v11461_v57, %s12848_s25 }
0x294e   : > { %v6268_v10 = vpop.xlane.xlu1 %6267 }
0x294f   : > { %v6276_v22 = vsub.f32 %v6260_v54, %v6268_v10 }
0x2951   : > { %v6281_v16 = vmul.f32 1.442695, %v6276_v22 }
0x2953   : > { %9588 = vpow2.f32 %v6281_v16 }
0x2959   : > { %v9589_v15 = vpop.eup %9588 }
0x295a   : > { %v6290_v11 = vsel %vm548_vm2, %v9589_v15, 0.0 }
0x295b   : > { %6291 = vadd.xlane.f32.xlu0 %v6290_v11 }
0x296f   : > { %6359 = vrot.lane.b32.xlu0 %v11465_v25, %s12849_s28 }
0x2977   : > { %6469 = vrot.lane.b32.xlu0 %v11465_v25, %s12844_s23 }
0x297f   : > { %6385 = vrot.lane.b32.xlu0 %v11479_v8, %s12849_s28  ;;  %s9843_s28 = smov 24  }
0x2983   : > { %v6274_v4 = vpop.xlane.xlu1 %6273 }
0x2984   : > { %v6278_v39 = vsub.f32 %v6262_v9, %v6274_v4  ;;  %v6442_v9 = vpop.permute.xlu0 %6441 }
0x2986   : > { %v6285_v26 = vmul.f32 1.442695, %v6278_v39 }
0x2987   : > { %6467 = vrot.lane.b32.xlu0 %v11465_v25, %s12848_s25 }
0x2988   : > { %9590 = vpow2.f32 %v6285_v26 }
0x2989   : > { %v6271_v6 = vpop.xlane.xlu2 %6270 }
0x298a   : > { %v6277_v63 = vsub.f32 %v6261_v13, %v6271_v6 }
0x298c   : > { %v6283_v62 = vmul.f32 1.442695, %v6277_v63 }
0x298e   : > { %v9591_v60 = vpop.eup %9590  ;;  %9592 = vpow2.f32 %v6283_v62 }
0x298f   : > { %6497 = vrot.lane.b32.xlu0 %v11479_v8, %s12844_s23  ;;  %v6296_v27 = vsel %vm548_vm2, %v9591_v60, 0.0 }
0x2990   : > { %6297 = vadd.xlane.f32.xlu1 %v6296_v27 }
0x2991   : > { %v6289_v34 = vpop.xlane.xlu2 %6288 }
0x2992   : > { %9594 = vrcp.f32 %v6289_v34 }
0x2994   : > { %v9593_v54 = vpop.eup %9592 }
0x2995   : > { %v6293_v52 = vsel %vm548_vm2, %v9593_v54, 0.0 }
0x2996   : > { %6294 = vadd.xlane.f32.xlu2 %v6293_v52 }
0x2998   : > { %v9595_v38 = vpop.eup %9594 }
0x2999   : > { %v11580_v0 = vmul.f32 %v9595_v38, %v9587_v43  ;;  %v6440_v31 = vpop.permute.xlu2 %6439 }
0x299b   : > { %12893 = vst [vmem:[#allocation70_spill] sm:$0xff] %v11580_v0  ;;  %9000 = vmatmul.msk.f32.vlgmr.msra.gmra.mxu2 %vm548_vm2, %v11580_v0  ;;  %v6334_v44 = vpop.permute.xlu1 %6333 }
0x299c   : > { %6354 = vmatpush.msrb.mxu3 %v6334_v44 }
0x299e   : > { %9006 = vmatpush.xpose.msk.msra.mxu3 %vm438_vm1, %v6442_v9 }
0x29a3   : > { %9005 = vmatmul.msk.f32.vlgmr.msrb.gmra.mxu2 %vm438_vm1, %v6412_v45 }
0x29ae   : > { %6495 = vrot.lane.b32.xlu2 %v11479_v8, %s12848_s25  ;;  %s13000_s25 = sld [smem:[#allocation98_spill]] }
0x29ce   : > { %v6292_v53 = vpop.xlane.xlu0 %6291 }
0x29cf   : > { %9596 = vrcp.f32 %v6292_v53 }
0x29d5   : > { %v9597_v14 = vpop.eup %9596 }
0x29d6   : > { %v11588_v23 = vmul.f32 %v9597_v14, %v9589_v15 }
0x29d8   : > { %12894 = vst [vmem:[#allocation71_spill] sm:$0xff] %v11588_v23  ;;  %9001 = vmatmul.msk.f32.vlgmr.msrb.gmra.mxu3 %vm548_vm2, %v11588_v23 }
0x29e0   : > { %9007 = vmatmul.msk.f32.vlgmr.msra.gmra.mxu3 %vm438_vm1, %v6440_v31 }
0x29e1   : > { %v6360_v13 = vpop.permute.xlu0 %6359 }
0x29e2   : > { %6380 = vmatpush.msrb.mxu0 %v6360_v13 }
0x29e9   : > { %v6470_v17 = vpop.permute.xlu0 %6469 }
0x29ea   : > { %9008 = vmatpush.xpose.msk.msra.mxu0 %vm438_vm1, %v6470_v17 }
0x29f1   : > { %v6386_v43 = vpop.permute.xlu0 %6385 }
0x29f2   : > { %6406 = vmatpush.msrb.mxu1 %v6386_v43 }
0x29f9   : > { %v6468_v42 = vpop.permute.xlu0 %6467 }
0x2a01   : > { %v6498_v48 = vpop.permute.xlu0 %6497 }
0x2a02   : > { %9010 = vmatpush.xpose.msk.msra.mxu1 %vm438_vm1, %v6498_v48 }
0x2a03   : > { %v6298_v10 = vpop.xlane.xlu1 %6297 }
0x2a04   : > { %9598 = vrcp.f32 %v6298_v10 }
0x2a09   : > { %v6295_v22 = vpop.xlane.xlu2 %6294 }
0x2a0a   : > { %v9599_v16 = vpop.eup %9598  ;;  %9600 = vrcp.f32 %v6295_v22 }
0x2a0b   : > { %v11595_v15 = vmul.f32 %v9599_v16, %v9591_v60 }
0x2a0d   : > { %12895 = vst [vmem:[#allocation72_spill] sm:$0xff] %v11595_v15  ;;  %9003 = vmatmul.msk.f32.vlgmr.msrb.gmra.mxu1 %vm548_vm2, %v11595_v15 }
0x2a10   : > { %v9601_v11 = vpop.eup %9600 }
0x2a11   : > { %v11599_v45 = vmul.f32 %v9601_v11, %v9593_v54  ;;  %v6496_v4 = vpop.permute.xlu2 %6495 }
0x2a13   : > { %12896 = vst [vmem:[#allocation73_spill] sm:$0xff] %v11599_v45  ;;  %9002 = vmatmul.msk.f32.vlgmr.msrb.gmra.mxu0 %vm548_vm2, %v11599_v45 }
0x2a15   : > { %9011 = vmatmul.msk.f32.vlgmr.msra.gmra.mxu1 %vm438_vm1, %v6496_v4 }
0x2a1b   : > { %9009 = vmatmul.msk.f32.vlgmr.msra.gmra.mxu0 %vm438_vm1, %v6468_v42 }
0x2a1e   : > { %v11605_v39 = vpop.f32.mrf.mxu2 }
0x2a26   : > { %v6436_v26 = vpop.f32.mrf.mxu2 }
0x2a27   : > { %v6523_v6 = vmul.f32 0.70710677, %v6436_v26 }
0x2a29   : > { %v6527_v63 = vsel %vm548_vm2, %v6523_v6, -inf }
0x2a2a   : > { %6528 = vmax.xlane.f32.xlu1 %v6527_v63 }
0x2a5b   : > { %v11608_v62 = vpop.f32.mrf.mxu3 }
0x2a63   : > { %v6464_v60 = vpop.f32.mrf.mxu3 }
0x2a64   : > { %v6524_v27 = vmul.f32 0.70710677, %v6464_v60 }
0x2a66   : > { %v6530_v34 = vsel %vm548_vm2, %v6524_v27, -inf }
0x2a67   : > { %6531 = vmax.xlane.f32.xlu0 %v6530_v34 }
0x2a7b   : > { %6677 = vrot.lane.b32.xlu0 %v11455_v50, %s12850_s21 }
0x2a83   : > { %6705 = vrot.lane.b32.xlu0 %v11461_v57, %s12850_s21 }
0x2a8a   : > { %v11615_v54 = vpop.f32.mrf.mxu1 }
0x2a90   : > { %v11617_v52 = vpop.f32.mrf.mxu0 }
0x2a92   : > { %v6520_v38 = vpop.f32.mrf.mxu1 }
0x2a93   : > { %v6526_v44 = vmul.f32 0.70710677, %v6520_v38 }
0x2a95   : > { %v6536_v9 = vsel %vm548_vm2, %v6526_v44, -inf }
0x2a96   : > { %6537 = vmax.xlane.f32.xlu2 %v6536_v9 }
0x2a98   : > { %v6492_v53 = vpop.f32.mrf.mxu0 }
0x2a99   : > { %v6525_v14 = vmul.f32 0.70710677, %v6492_v53 }
0x2a9b   : > { %v6533_v31 = vsel %vm548_vm2, %v6525_v14, -inf }
0x2a9c   : > { %6534 = vmax.xlane.f32.xlu1 %v6533_v31 }
0x2a9d   : > { %v6529_v13 = vpop.xlane.xlu1 %6528 }
0x2a9e   : > { %v6539_v17 = vsub.f32 %v6523_v6, %v6529_v13 }
0x2aa0   : > { %v6543_v43 = vmul.f32 1.442695, %v6539_v17 }
0x2aa2   : > { %9602 = vpow2.f32 %v6543_v43 }
0x2aa8   : > { %v9603_v22 = vpop.eup %9602 }
0x2aa9   : > { %v6551_v16 = vsel %vm548_vm2, %v9603_v22, 0.0 }
0x2aae   : > { %6675 = vrot.lane.b32.xlu2 %v11455_v50, %s12851_s22 }
0x2ab5   : > { %6571 = vrot.lane.b32.xlu1 %v11455_v50, %s12852_s14 }
0x2ab6   : > { %6623 = vrot.lane.b32.xlu2 %v11465_v25, %s12852_s14 }
0x2abd   : > { %6597 = vrot.lane.b32.xlu1 %v11461_v57, %s12852_s14 }
0x2abe   : > { %6733 = vrot.lane.b32.xlu2 %v11465_v25, %s12850_s21 }
0x2ac6   : > { %6649 = vrot.lane.b32.xlu2 %v11479_v8, %s12852_s14 }
0x2ace   : > { %6731 = vrot.lane.b32.xlu2 %v11465_v25, %s12851_s22 }
0x2ada   : > { %v6532_v42 = vpop.xlane.xlu0 %6531 }
0x2adb   : > { %v6540_v48 = vsub.f32 %v6524_v27, %v6532_v42 }
0x2add   : > { %v6545_v10 = vmul.f32 1.442695, %v6540_v48 }
0x2adf   : > { %9604 = vpow2.f32 %v6545_v10 }
0x2ae5   : > { %v9605_v11 = vpop.eup %9604 }
0x2ae6   : > { %v6554_v4 = vsel %vm548_vm2, %v9605_v11, 0.0 }
0x2ae7   : > { %6552 = vadd.xlane.f32.xlu1 %v6551_v16 }
0x2aed   : > { %v6678_v17 = vpop.permute.xlu0 %6677 }
0x2aef   : > { %6555 = vadd.xlane.f32.xlu1 %v6554_v4 }
0x2af5   : > { %v6706_v10 = vpop.permute.xlu0 %6705 }
0x2b08   : > { %6703 = vrot.lane.b32.xlu1 %v11461_v57, %s12851_s22 }
0x2b09   : > { %v6538_v26 = vpop.xlane.xlu2 %6537 }
0x2b0a   : > { %v6542_v53 = vsub.f32 %v6526_v44, %v6538_v26 }
0x2b0c   : > { %v6549_v13 = vmul.f32 1.442695, %v6542_v53 }
0x2b0f   : > { %v6535_v63 = vpop.xlane.xlu1 %6534 }
0x2b10   : > { %v6541_v6 = vsub.f32 %v6525_v14, %v6535_v63 }
0x2b11   : > { %v6676_v60 = vpop.permute.xlu2 %6675 }
0x2b12   : > { %v6547_v34 = vmul.f32 1.442695, %v6541_v6 }
0x2b14   : > { %9606 = vpow2.f32 %v6547_v34 }
0x2b15   : > { %9608 = vpow2.f32 %v6549_v13 }
0x2b19   : > { %v6624_v27 = vpop.permute.xlu2 %6623 }
0x2b1a   : > { %v9607_v38 = vpop.eup %9606  ;;  %6644 = vmatpush.msrb.mxu0 %v6624_v27 }
0x2b1b   : > { %v6557_v9 = vsel %vm548_vm2, %v9607_v38, 0.0  ;;  %v9609_v14 = vpop.eup %9608 }
0x2b1c   : > { %6558 = vadd.xlane.f32.xlu0 %v6557_v9  ;;  %v6560_v44 = vsel %vm548_vm2, %v9609_v14, 0.0 }
0x2b21   : > { %v6734_v31 = vpop.permute.xlu2 %6733 }
0x2b22   : > { %9020 = vmatpush.xpose.msk.msra.mxu0 %vm438_vm1, %v6734_v31 }
0x2b27   : > { %v6572_v43 = vpop.permute.xlu1 %6571 }
0x2b28   : > { %6592 = vmatpush.msra.mxu2 %v6572_v43 }
0x2b29   : > { %v6650_v42 = vpop.permute.xlu2 %6649 }
0x2b2a   : > { %9016 = vmatpush.xpose.msk.msrb.mxu2 %vm438_vm1, %v6678_v17  ;;  %6670 = vmatpush.msrb.mxu1 %v6650_v42 }
0x2b2f   : > { %v6598_v48 = vpop.permute.xlu1 %6597 }
0x2b30   : > { %6761 = vrot.lane.b32.xlu0 %v11479_v8, %s12850_s21  ;;  %6618 = vmatpush.msrb.mxu3 %v6598_v48  ;;  %s9844_s21 = smov 32  }
0x2b31   : > { %v6732_v31 = vpop.permute.xlu2 %6731 }
0x2b32   : > { %9018 = vmatpush.xpose.msk.msra.mxu3 %vm438_vm1, %v6706_v10  ;;  %6561 = vadd.xlane.f32.xlu1 %v6560_v44 }
0x2b4b   : > { %6759 = vrot.lane.b32.xlu1 %v11479_v8, %s12851_s22 }
0x2b5a   : > { %v6553_v16 = vpop.xlane.xlu1 %6552 }
0x2b5b   : > { %9610 = vrcp.f32 %v6553_v16 }
0x2b61   : > { %v9611_v4 = vpop.eup %9610 }
0x2b62   : > { %v11648_v26 = vmul.f32 %v9611_v4, %v9603_v22  ;;  %v6556_v63 = vpop.xlane.xlu1 %6555 }
0x2b63   : > { %9612 = vrcp.f32 %v6556_v63 }
0x2b64   : > { %12897 = vst [vmem:[#allocation74_spill] sm:$0xff] %v11648_v26  ;;  %9012 = vmatmul.msk.f32.vlgmr.msra.gmra.mxu2 %vm548_vm2, %v11648_v26 }
0x2b69   : > { %v9613_v6 = vpop.eup %9612 }
0x2b6a   : > { %v11652_v34 = vmul.f32 %v9613_v6, %v9605_v11 }
0x2b6c   : > { %12898 = vst [vmem:[#allocation75_spill] sm:$0xff] %v11652_v34  ;;  %9013 = vmatmul.msk.f32.vlgmr.msrb.gmra.mxu3 %vm548_vm2, %v11652_v34  ;;  %9017 = vmatmul.msk.f32.vlgmr.msrb.gmra.mxu2 %vm438_vm1, %v6676_v60 }
0x2b7a   : > { %v6704_v27 = vpop.permute.xlu1 %6703 }
0x2b7b   : > { %9019 = vmatmul.msk.f32.vlgmr.msra.gmra.mxu3 %vm438_vm1, %v6704_v27 }
0x2b8f   : > { %v6559_v9 = vpop.xlane.xlu0 %6558 }
0x2b90   : > { %9614 = vrcp.f32 %v6559_v9 }
0x2b96   : > { %v9615_v22 = vpop.eup %9614 }
0x2b97   : > { %v11658_v53 = vmul.f32 %v9615_v22, %v9607_v38 }
0x2b99   : > { %12899 = vst [vmem:[#allocation76_spill] sm:$0xff] %v11658_v53  ;;  %9014 = vmatmul.msk.f32.vlgmr.msrb.gmra.mxu0 %vm548_vm2, %v11658_v53 }
0x2ba1   : > { %9021 = vmatmul.msk.f32.vlgmr.msra.gmra.mxu0 %vm438_vm1, %v6732_v31 }
0x2ba2   : > { %v6762_v11 = vpop.permute.xlu0 %6761 }
0x2ba3   : > { %9022 = vmatpush.xpose.msk.msra.mxu1 %vm438_vm1, %v6762_v11 }
0x2ba5   : > { %v6562_v13 = vpop.xlane.xlu1 %6561 }
0x2ba6   : > { %9616 = vrcp.f32 %v6562_v13 }
0x2bac   : > { %v9617_v60 = vpop.eup %9616 }
0x2bad   : > { %v11664_v17 = vmul.f32 %v9617_v60, %v9609_v14 }
0x2baf   : > { %12900 = vst [vmem:[#allocation77_spill] sm:$0xff] %v11664_v17  ;;  %9015 = vmatmul.msk.f32.vlgmr.msrb.gmra.mxu1 %vm548_vm2, %v11664_v17 }
0x2bbd   : > { %v6760_v43 = vpop.permute.xlu1 %6759 }
0x2bbe   : > { %9023 = vmatmul.msk.f32.vlgmr.msra.gmra.mxu1 %vm438_vm1, %v6760_v43 }
0x2be7   : > { %v11669_v38 = vpop.f32.mrf.mxu2 }
0x2bef   : > { %v6700_v42 = vpop.f32.mrf.mxu2  ;;  %v11672_v44 = vpop.f32.mrf.mxu3 }
0x2bf0   : > { %v6787_v48 = vmul.f32 0.70710677, %v6700_v42 }
0x2bf2   : > { %v6791_v10 = vsel %vm548_vm2, %v6787_v48, -inf }
0x2bf3   : > { %6792 = vmax.xlane.f32.xlu2 %v6791_v10 }
0x2bfe   : > { %v6728_v16 = vpop.f32.mrf.mxu3 }
0x2bff   : > { %v6788_v4 = vmul.f32 0.70710677, %v6728_v16 }
0x2c01   : > { %v6794_v14 = vsel %vm548_vm2, %v6788_v4, -inf }
0x2c02   : > { %6795 = vmax.xlane.f32.xlu0 %v6794_v14 }
0x2c16   : > { %v11675_v63 = vpop.f32.mrf.mxu0  ;;  %6835 = vrot.lane.b32.xlu0 %v11455_v50, %s12855_s27 }
0x2c1e   : > { %v6756_v6 = vpop.f32.mrf.mxu0  ;;  %6939 = vrot.lane.b32.xlu0 %v11455_v50, %s12853_s16 }
0x2c1f   : > { %v6789_v27 = vmul.f32 0.70710677, %v6756_v6 }
0x2c21   : > { %v6797_v9 = vsel %vm548_vm2, %v6789_v27, -inf }
0x2c22   : > { %6798 = vmax.xlane.f32.xlu1 %v6797_v9 }
0x2c26   : > { %6969 = vrot.lane.b32.xlu0 %v11461_v57, %s12854_s26 }
0x2c2c   : > { %v11684_v22 = vpop.f32.mrf.mxu1 }
0x2c3b   : > { %6861 = vrot.lane.b32.xlu1 %v11461_v57, %s12855_s27  ;;  %v6784_v31 = vpop.f32.mrf.mxu1 }
0x2c3c   : > { %v6790_v11 = vmul.f32 0.70710677, %v6784_v31 }
0x2c3e   : > { %v6800_v13 = vsel %vm548_vm2, %v6790_v11, -inf }
0x2c3f   : > { %6801 = vmax.xlane.f32.xlu2 %v6800_v13 }
0x2c57   : > { %6941 = vrot.lane.b32.xlu2 %v11455_v50, %s12854_s26 }
0x2c5f   : > { %6967 = vrot.lane.b32.xlu2 %v11461_v57, %s12853_s16 }
0x2c66   : > { %v6793_v60 = vpop.xlane.xlu2 %6792 }
0x2c67   : > { %6887 = vrot.lane.b32.xlu2 %v11465_v25, %s12855_s27  ;;  %v6803_v43 = vsub.f32 %v6787_v48, %v6793_v60 }
0x2c69   : > { %v6807_v10 = vmul.f32 1.442695, %v6803_v43 }
0x2c6b   : > { %9618 = vpow2.f32 %v6807_v10 }
0x2c71   : > { %v9619_v9 = vpop.eup %9618 }
0x2c72   : > { %v6815_v31 = vsel %vm548_vm2, %v9619_v9, 0.0 }
0x2c75   : > { %v6796_v42 = vpop.xlane.xlu0 %6795 }
0x2c76   : > { %v6804_v16 = vsub.f32 %v6788_v4, %v6796_v42 }
0x2c78   : > { %v6809_v6 = vmul.f32 1.442695, %v6804_v16 }
0x2c7a   : > { %9620 = vpow2.f32 %v6809_v6 }
0x2c80   : > { %v9621_v13 = vpop.eup %9620 }
0x2c81   : > { %v6818_v51 = vsel %vm548_vm2, %v9621_v13, 0.0 }
0x2c88   : > { %v6836_v14 = vpop.permute.xlu0 %6835 }
0x2c89   : > { %6856 = vmatpush.msra.mxu2 %v6836_v14 }
0x2c90   : > { %6816 = vadd.xlane.f32.xlu2 %v6815_v31  ;;  %v6940_v4 = vpop.permute.xlu0 %6939 }
0x2c95   : > { %v6799_v28 = vpop.xlane.xlu1 %6798 }
0x2c96   : > { %v6805_v58 = vsub.f32 %v6789_v27, %v6799_v28 }
0x2c98   : > { %v6811_v61 = vmul.f32 1.442695, %v6805_v58  ;;  %6819 = vadd.xlane.f32.xlu2 %v6818_v51  ;;  %v6970_v42 = vpop.permute.xlu0 %6969 }
0x2c9a   : > { %9622 = vpow2.f32 %v6811_v61 }
0x2ca0   : > { %v9623_v48 = vpop.eup %9622 }
0x2ca1   : > { %v6821_v60 = vsel %vm548_vm2, %v9623_v48, 0.0 }
0x2ca2   : > { %6822 = vadd.xlane.f32.xlu1 %v6821_v60 }
0x2cad   : > { %v6862_v43 = vpop.permute.xlu1 %6861 }
0x2cae   : > { %6882 = vmatpush.msrb.mxu3 %v6862_v43 }
0x2cb0   : > { %9030 = vmatpush.xpose.msk.msra.mxu3 %vm438_vm1, %v6970_v42  ;;  %6997 = vrot.lane.b32.xlu2 %v11465_v25, %s12854_s26 }
0x2cb2   : > { %v6802_v10 = vpop.xlane.xlu2 %6801 }
0x2cb3   : > { %v6806_v28 = vsub.f32 %v6790_v11, %v6802_v10 }
0x2cb5   : > { %v6813_v27 = vmul.f32 1.442695, %v6806_v28 }
0x2cb7   : > { %9624 = vpow2.f32 %v6813_v27 }
0x2cb8   : > { %6913 = vrot.lane.b32.xlu2 %v11479_v8, %s12855_s27  ;;  %s12999_s27 = sld [smem:[#allocation12_spill]] }
0x2cba   : > { %v6942_v51 = vpop.permute.xlu2 %6941 }
0x2cbb   : > { %9028 = vmatpush.xpose.msk.msrb.mxu2 %vm438_vm1, %v6942_v51  ;;  %7023 = vrot.lane.b32.xlu1 %v11479_v8, %s12853_s16 }
0x2cbd   : > { %v9625_v61 = vpop.eup %9624 }
0x2cbe   : > { %v6824_v58 = vsel %vm548_vm2, %v9625_v61, 0.0  ;;  %s9113_s14 = sshll.u32 %s12999_s27, 5 }
0x2cbf   : > { %6825 = vadd.xlane.f32.xlu0 %v6824_v58  ;;  %s12555_s10 = scalar_lea.hbm %s13001_s6, %s9113_s14 }
0x2cc0   : > { %6995 = vrot.lane.b32.xlu2 %v11465_v25, %s12853_s16  ;;  %s12923_s16 = sld [smem:[#allocation96_spill]] }
0x2cc2   : > { %v6968_v16 = vpop.permute.xlu2 %6967 }
0x2cc3   : > { %7233 = vrot.lane.b32.xlu1 %v11461_v57, %s12857_s17 }
0x2cc8   : > { %7025 = vrot.lane.b32.xlu2 %v11479_v8, %s12854_s26  ;;  %s12921_s26 = smov 14  }
0x2cca   : > { %v6888_v11 = vpop.permute.xlu2 %6887 }
0x2ccb   : > { %6908 = vmatpush.msrb.mxu0 %v6888_v11 }
0x2d03   : > { %v6817_v14 = vpop.xlane.xlu2 %6816 }
0x2d04   : > { %9626 = vrcp.f32 %v6817_v14 }
0x2d0a   : > { %v9627_v6 = vpop.eup %9626 }
0x2d0b   : > { %v11713_v31 = vmul.f32 %v9627_v6, %v9619_v9  ;;  %v6820_v60 = vpop.xlane.xlu2 %6819 }
0x2d0c   : > { %9628 = vrcp.f32 %v6820_v60 }
0x2d0d   : > { %12901 = vst [vmem:[#allocation78_spill] sm:$0xff] %v11713_v31  ;;  %9024 = vmatmul.msk.f32.vlgmr.msra.gmra.mxu2 %vm548_vm2, %v11713_v31 }
0x2d12   : > { %v9629_v43 = vpop.eup %9628 }
0x2d13   : > { %v11717_v42 = vmul.f32 %v9629_v43, %v9621_v13  ;;  %v6998_v10 = vpop.permute.xlu2 %6997 }
0x2d14   : > { %9032 = vmatpush.xpose.msk.msra.mxu0 %vm438_vm1, %v6998_v10 }
0x2d15   : > { %12902 = vst [vmem:[#allocation79_spill] sm:$0xff] %v11717_v42  ;;  %9025 = vmatmul.msk.f32.vlgmr.msrb.gmra.mxu3 %vm548_vm2, %v11717_v42  ;;  %9029 = vmatmul.msk.f32.vlgmr.msrb.gmra.mxu2 %vm438_vm1, %v6940_v4  ;;  %v6823_v28 = vpop.xlane.xlu1 %6822 }
0x2d16   : > { %9630 = vrcp.f32 %v6823_v28 }
0x2d1b   : > { %v6914_v9 = vpop.permute.xlu2 %6913 }
0x2d1c   : > { %v9631_v27 = vpop.eup %9630  ;;  %6934 = vmatpush.msrb.mxu1 %v6914_v9 }
0x2d1d   : > { %v11723_v51 = vmul.f32 %v9631_v27, %v9623_v48  ;;  %9031 = vmatmul.msk.f32.vlgmr.msra.gmra.mxu3 %vm438_vm1, %v6968_v16 }
0x2d1f   : > { %12903 = vst [vmem:[#allocation80_spill] sm:$0xff] %v11723_v51  ;;  %9026 = vmatmul.msk.f32.vlgmr.msrb.gmra.mxu0 %vm548_vm2, %v11723_v51 }
0x2d23   : > { %v6996_v13 = vpop.permute.xlu2 %6995 }
0x2d27   : > { %9033 = vmatmul.msk.f32.vlgmr.msra.gmra.mxu0 %vm438_vm1, %v6996_v13 }
0x2d2b   : > { %v7026_v58 = vpop.permute.xlu2 %7025 }
0x2d2c   : > { %9034 = vmatpush.xpose.msk.msra.mxu1 %vm438_vm1, %v7026_v58 }
0x2d2d   : > { %v7024_v48 = vpop.permute.xlu1 %7023 }
0x2d32   : > { %v6826_v11 = vpop.xlane.xlu0 %6825 }
0x2d33   : > { %9632 = vrcp.f32 %v6826_v11 }
0x2d39   : > { %v9633_v4 = vpop.eup %9632 }
0x2d3a   : > { %v11730_v14 = vmul.f32 %v9633_v4, %v9625_v61 }
0x2d3c   : > { %12904 = vst [vmem:[#allocation81_spill] sm:$0xff] %v11730_v14  ;;  %9027 = vmatmul.msk.f32.vlgmr.msrb.gmra.mxu1 %vm548_vm2, %v11730_v14 }
0x2d44   : > { %9035 = vmatmul.msk.f32.vlgmr.msra.gmra.mxu1 %vm438_vm1, %v7024_v48 }
0x2d90   : > { %v11735_v16 = vpop.f32.mrf.mxu2 }
0x2d98   : > { %v6964_v6 = vpop.f32.mrf.mxu2  ;;  %v11752_v4 = vpop.f32.mrf.mxu3 }
0x2d99   : > { %v7051_v60 = vmul.f32 0.70710677, %v6964_v6 }
0x2d9b   : > { %v7055_v43 = vsel %vm548_vm2, %v7051_v60, -inf }
0x2d9c   : > { %7056 = vmax.xlane.f32.xlu2 %v7055_v43  ;;  %v11738_v10 = vpop.f32.mrf.mxu0 }
0x2da0   : > { %v6992_v48 = vpop.f32.mrf.mxu3 }
0x2da1   : > { %v7052_v6 = vmul.f32 0.70710677, %v6992_v48 }
0x2da3   : > { %v7058_v43 = vsel %vm548_vm2, %v7052_v6, -inf }
0x2da4   : > { %v7020_v28 = vpop.f32.mrf.mxu0 }
0x2da5   : > { %v7053_v9 = vmul.f32 0.70710677, %v7020_v28 }
0x2da7   : > { %v7061_v61 = vsel %vm548_vm2, %v7053_v9, -inf }
0x2da8   : > { %7062 = vmax.xlane.f32.xlu0 %v7061_v61 }
0x2db4   : > { %7205 = vrot.lane.b32.xlu2 %v11455_v50, %s12857_s17 }
0x2db9   : > { %v11743_v27 = vpop.f32.mrf.mxu1 }
0x2dbc   : > { %7231 = vrot.lane.b32.xlu2 %v11461_v57, %s12856_s24 }
0x2dc1   : > { %v7048_v13 = vpop.f32.mrf.mxu1 }
0x2dc2   : > { %v7054_v58 = vmul.f32 0.70710677, %v7048_v13 }
0x2dc4   : > { %v7064_v11 = vsel %vm548_vm2, %v7054_v58, -inf }
0x2dc5   : > { %7065 = vmax.xlane.f32.xlu0 %v7064_v11 }
0x2dd9   : > { %7099 = vrot.lane.b32.xlu0 %v11455_v50, %s12858_s0 }
0x2de1   : > { %7125 = vrot.lane.b32.xlu0 %v11461_v57, %s12858_s0 }
0x2e0b   : > { %7059 = vmax.xlane.f32.xlu0 %v7058_v43 }
0x2e0f   : > { %v7057_v28 = vpop.xlane.xlu2 %7056 }
0x2e10   : > { %v7067_v61 = vsub.f32 %v7051_v60, %v7057_v28 }
0x2e12   : > { %v7071_v14 = vmul.f32 1.442695, %v7067_v61 }
0x2e14   : > { %9634 = vpow2.f32 %v7071_v14 }
0x2e17   : > { %v7206_v28 = vpop.permute.xlu2 %7205 }
0x2e1a   : > { %v9635_v13 = vpop.eup %9634 }
0x2e1b   : > { %v7079_v11 = vsel %vm548_vm2, %v9635_v13, 0.0  ;;  %v7063_v42 = vpop.xlane.xlu0 %7062 }
0x2e1c   : > { %7080 = vadd.xlane.f32.xlu1 %v7079_v11  ;;  %v7069_v11 = vsub.f32 %v7053_v9, %v7063_v42 }
0x2e1f   : > { %7203 = vrot.lane.b32.xlu0 %v11455_v50, %s12856_s24 }
0x2e35   : > { %7151 = vrot.lane.b32.xlu1 %v11465_v25, %s12858_s0 }
0x2e38   : > { %v7066_v31 = vpop.xlane.xlu0 %7065 }
0x2e39   : > { %v7070_v48 = vsub.f32 %v7054_v58, %v7066_v31 }
0x2e3b   : > { %v7077_v51 = vmul.f32 1.442695, %v7070_v48 }
0x2e3d   : > { %9636 = vpow2.f32 %v7077_v51  ;;  %7261 = vrot.lane.b32.xlu1 %v11465_v25, %s12857_s17  ;;  %v7234_v51 = vpop.permute.xlu1 %7233 }
0x2e43   : > { %v9637_v60 = vpop.eup %9636 }
0x2e44   : > { %v7088_v14 = vsel %vm548_vm2, %v9637_v60, 0.0 }
0x2e45   : > { %7177 = vrot.lane.b32.xlu1 %v11479_v8, %s12858_s0  ;;  %7089 = vadd.xlane.f32.xlu2 %v7088_v14  ;;  %v7075_v14 = vmul.f32 1.442695, %v7069_v11  ;;  %s12913_s0 = smov 84  }
0x2e4b   : > { %v7100_v43 = vpop.permute.xlu0 %7099 }
0x2e4c   : > { %7120 = vmatpush.msra.mxu2 %v7100_v43 }
0x2e4d   : > { %7289 = vrot.lane.b32.xlu1 %v11479_v8, %s12857_s17  ;;  %s9115_s17 = sshll.u32 %s12999_s27, 6 }
0x2e4e   : > { %9040 = vmatpush.xpose.msk.msrb.mxu2 %vm438_vm1, %v7206_v28  ;;  %s8629_s22 = scalar_lea.hbm %s13000_s25, %s9115_s17 }
0x2e4f   : > { %s8632_s13 = sshll.u32 %s8629_s22, 4  ;;  %s8633_s13 = int_to_ptr.hbm [resolvable:$true] %s8632_s13 }
0x2e53   : > { %v7126_v31 = vpop.permute.xlu0 %7125 }
0x2e54   : > { %7146 = vmatpush.msrb.mxu3 %v7126_v31 }
0x2e56   : > { %9042 = vmatpush.xpose.msk.msra.mxu3 %vm438_vm1, %v7234_v51 }
0x2e5d   : > { %7287 = vrot.lane.b32.xlu2 %v11479_v8, %s12856_s24 }
0x2e7e   : > { %v7060_v58 = vpop.xlane.xlu0 %7059 }
0x2e7f   : > { %v7068_v61 = vsub.f32 %v7052_v6, %v7060_v58  ;;  %v7232_v6 = vpop.permute.xlu2 %7231 }
0x2e81   : > { %v7073_v48 = vmul.f32 1.442695, %v7068_v61 }
0x2e83   : > { %9638 = vpow2.f32 %v7073_v48 }
0x2e84   : > { %9640 = vpow2.f32 %v7075_v14 }
0x2e89   : > { %v9639_v43 = vpop.eup %9638 }
0x2e8a   : > { %v7082_v17 = vsel %vm548_vm2, %v9639_v43, 0.0  ;;  %v9641_v28 = vpop.eup %9640 }
0x2e8b   : > { %7083 = vadd.xlane.f32.xlu0 %v7082_v17  ;;  %v7085_v31 = vsel %vm548_vm2, %v9641_v28, 0.0 }
0x2e8f   : > { %v7081_v53 = vpop.xlane.xlu1 %7080 }
0x2e90   : > { %9642 = vrcp.f32 %v7081_v53 }
0x2e91   : > { %v7204_v42 = vpop.permute.xlu0 %7203 }
0x2e93   : > { %7086 = vadd.xlane.f32.xlu0 %v7085_v31 }
0x2e96   : > { %v9643_v51 = vpop.eup %9642 }
0x2e97   : > { %v11773_v26 = vmul.f32 %v9643_v51, %v9635_v13 }
0x2e99   : > { %12905 = vst [vmem:[#allocation82_spill] sm:$0xff] %v11773_v26  ;;  %9036 = vmatmul.msk.f32.vlgmr.msra.gmra.mxu2 %vm548_vm2, %v11773_v26 }
0x2ea1   : > { %9041 = vmatmul.msk.f32.vlgmr.msrb.gmra.mxu2 %vm438_vm1, %v7204_v42 }
0x2ea7   : > { %7259 = vrot.lane.b32.xlu0 %v11465_v25, %s12856_s24  ;;  %v7152_v9 = vpop.permute.xlu1 %7151  ;;  %s12920_s24 = smov 8  }
0x2ea8   : > { %7172 = vmatpush.msrb.mxu0 %v7152_v9 }
0x2eaf   : > { %v7262_v17 = vpop.permute.xlu1 %7261 }
0x2eb0   : > { %9044 = vmatpush.xpose.msk.msra.mxu0 %vm438_vm1, %v7262_v17 }
0x2eb7   : > { %v7178_v53 = vpop.permute.xlu1 %7177 }
0x2eb8   : > { %v7090_v58 = vpop.xlane.xlu2 %7089  ;;  %7198 = vmatpush.msrb.mxu1 %v7178_v53 }
0x2eb9   : > { %9644 = vrcp.f32 %v7090_v58 }
0x2ebf   : > { %v9645_v13 = vpop.eup %9644  ;;  %v7290_v61 = vpop.permute.xlu1 %7289 }
0x2ec0   : > { %v11781_v11 = vmul.f32 %v9645_v13, %v9637_v60  ;;  %9046 = vmatpush.xpose.msk.msra.mxu1 %vm438_vm1, %v7290_v61  ;;  %v7288_v48 = vpop.permute.xlu2 %7287 }
0x2ec2   : > { %12906 = vst [vmem:[#allocation83_spill] sm:$0xff] %v11781_v11  ;;  %9039 = vmatmul.msk.f32.vlgmr.msrb.gmra.mxu1 %vm548_vm2, %v11781_v11 }
0x2eca   : > { %9047 = vmatmul.msk.f32.vlgmr.msra.gmra.mxu1 %vm438_vm1, %v7288_v48 }
0x2efe   : > { %v7084_v14 = vpop.xlane.xlu0 %7083 }
0x2eff   : > { %9646 = vrcp.f32 %v7084_v14 }
0x2f05   : > { %v9647_v31 = vpop.eup %9646 }
0x2f06   : > { %v11787_v51 = vmul.f32 %v9647_v31, %v9639_v43  ;;  %v7087_v42 = vpop.xlane.xlu0 %7086 }
0x2f07   : > { %9648 = vrcp.f32 %v7087_v42 }
0x2f08   : > { %12907 = vst [vmem:[#allocation84_spill] sm:$0xff] %v11787_v51  ;;  %9037 = vmatmul.msk.f32.vlgmr.msrb.gmra.mxu3 %vm548_vm2, %v11787_v51 }
0x2f0d   : > { %v9649_v60 = vpop.eup %9648 }
0x2f0e   : > { %v11791_v9 = vmul.f32 %v9649_v60, %v9641_v28 }
0x2f10   : > { %12908 = vst [vmem:[#allocation85_spill] sm:$0xff] %v11791_v9  ;;  %9038 = vmatmul.msk.f32.vlgmr.msrb.gmra.mxu0 %vm548_vm2, %v11791_v9  ;;  %9043 = vmatmul.msk.f32.vlgmr.msra.gmra.mxu3 %vm438_vm1, %v7232_v6 }
0x2f19   : > { %v7260_v17 = vpop.permute.xlu0 %7259 }
0x2f1a   : > { %9045 = vmatmul.msk.f32.vlgmr.msra.gmra.mxu0 %vm438_vm1, %v7260_v17 }
0x2f1c   : > { %v11799_v43 = vpop.f32.mrf.mxu2 }
0x2f24   : > { %v7228_v28 = vpop.f32.mrf.mxu2 }
0x2f25   : > { %v7315_v48 = vmul.f32 0.70710677, %v7228_v28 }
0x2f27   : > { %v7319_v14 = vsel %vm548_vm2, %v7315_v48, -inf }
0x2f3f   : > { %v11797_v53 = vpop.f32.mrf.mxu1 }
0x2f47   : > { %v7312_v58 = vpop.f32.mrf.mxu1 }
0x2f48   : > { %v11801_v13 = vmul.f32 0.70710677, %v7312_v58 }
0x2f4a   : > { %v7328_v61 = vsel %vm548_vm2, %v11801_v13, -inf }
0x2f4b   : > { %7329 = vmax.xlane.f32.xlu1 %v7328_v61 }
0x2f53   : > { %7320 = vmax.xlane.f32.xlu1 %v7319_v14 }
0x2f8b   : > { %v11806_v6 = vpop.f32.mrf.mxu3 }
0x2f8d   : > { %v11808_v31 = vpop.f32.mrf.mxu0 }
0x2f93   : > { %v7256_v42 = vpop.f32.mrf.mxu3 }
0x2f94   : > { %v7316_v60 = vmul.f32 0.70710677, %v7256_v42 }
0x2f96   : > { %v7322_v17 = vsel %vm548_vm2, %v7316_v60, -inf }
0x2f97   : > { %7323 = vmax.xlane.f32.xlu0 %v7322_v17  ;;  %v7284_v58 = vpop.f32.mrf.mxu0 }
0x2f98   : > { %v7317_v9 = vmul.f32 0.70710677, %v7284_v58 }
0x2f9a   : > { %v7325_v51 = vsel %vm548_vm2, %v7317_v9, -inf }
0x2f9b   : > { %7326 = vmax.xlane.f32.xlu2 %v7325_v51 }
0x2fab   : > { %7467 = vrot.lane.b32.xlu0 %v11455_v50, %s12864_s3 }
0x2fb3   : > { %7469 = vrot.lane.b32.xlu2 %v11455_v50, %s12860_s1 }
0x2fbb   : > { %7495 = vrot.lane.b32.xlu2 %v11461_v57, %s12864_s3 }
0x2fbe   : > { %v7330_v61 = vpop.xlane.xlu1 %7329 }
0x2fc3   : > { %7415 = vrot.lane.b32.xlu2 %v11465_v25, %s12863_s2 }
0x2fc6   : > { %v7321_v28 = vpop.xlane.xlu1 %7320 }
0x2fc7   : > { %v7331_v14 = vsub.f32 %v7315_v48, %v7321_v28  ;;  %v11831_v48 = vpack.i.bf16 %v11461_v57, %v11455_v50 }
0x2fc9   : > { %v7335_v42 = vmul.f32 1.442695, %v7331_v14 }
0x2fcb   : > { %9650 = vpow2.f32 %v7335_v42  ;;  %7525 = vrot.lane.b32.xlu2 %v11465_v25, %s12860_s1 }
0x2fd1   : > { %v9651_v51 = vpop.eup %9650 }
0x2fd2   : > { %v7343_v17 = vsel %vm548_vm2, %v9651_v51, 0.0 }
0x2fd3   : > { %7441 = vrot.lane.b32.xlu2 %v11479_v8, %s12863_s2  ;;  %7344 = vadd.xlane.f32.xlu1 %v7343_v17 }
0x2fdb   : > { %7523 = vrot.lane.b32.xlu2 %v11465_v25, %s12864_s3 }
0x2fe3   : > { %7553 = vrot.lane.b32.xlu2 %v11479_v8, %s12860_s1 }
0x2fec   : > { %9264 = vrot.lane.b32.xlu1 %v11831_v48, %s12863_s2  ;;  %s12916_s2 = smov 2  }
0x300a   : > { %v7324_v58 = vpop.xlane.xlu0 %7323 }
0x300b   : > { %v7332_v28 = vsub.f32 %v7316_v60, %v7324_v58 }
0x300d   : > { %v7337_v14 = vmul.f32 1.442695, %v7332_v28 }
0x300e   : > { %v7327_v42 = vpop.xlane.xlu2 %7326 }
0x300f   : > { %9652 = vpow2.f32 %v7337_v14  ;;  %v7333_v11 = vsub.f32 %v7317_v9, %v7327_v42 }
0x3011   : > { %v7339_v17 = vmul.f32 1.442695, %v7333_v11 }
0x3013   : > { %9654 = vpow2.f32 %v7339_v17 }
0x3015   : > { %v9653_v26 = vpop.eup %9652 }
0x3016   : > { %v7470_v34 = vpop.permute.xlu2 %7469  ;;  %v7346_v45 = vsel %vm548_vm2, %v9653_v26, 0.0 }
0x3017   : > { %7347 = vadd.xlane.f32.xlu0 %v7346_v45 }
0x3019   : > { %v9655_v23 = vpop.eup %9654 }
0x301a   : > { %v7349_v15 = vsel %vm548_vm2, %v9655_v23, 0.0 }
0x301b   : > { %7350 = vadd.xlane.f32.xlu1 %v7349_v15  ;;  %v7334_v15 = vsub.f32 %v11801_v13, %v7330_v61 }
0x301d   : > { %v7341_v58 = vmul.f32 1.442695, %v7334_v15  ;;  %v7468_v13 = vpop.permute.xlu0 %7467 }
0x301e   : > { %v7496_v0 = vpop.permute.xlu2 %7495 }
0x301f   : > { %9656 = vpow2.f32 %v7341_v58 }
0x3026   : > { %v7416_v2 = vpop.permute.xlu2 %7415 }
0x3027   : > { %7436 = vmatpush.msrb.mxu0 %v7416_v2  ;;  %v9657_v2 = vpop.eup %9656 }
0x3028   : > { %v7352_v14 = vsel %vm548_vm2, %v9657_v2, 0.0 }
0x302b   : > { %7497 = vrot.lane.b32.xlu0 %v11461_v57, %s12860_s1  ;;  %s12915_s1 = smov 82  }
0x302e   : > { %v7526_v60 = vpop.permute.xlu2 %7525 }
0x302f   : > { %9056 = vmatpush.xpose.msk.msra.mxu0 %vm438_vm1, %v7526_v60 }
0x3034   : > { %7551 = vrot.lane.b32.xlu1 %v11479_v8, %s12864_s3  ;;  %s12917_s3 = smov 6  }
0x3036   : > { %v7442_v11 = vpop.permute.xlu2 %7441 }
0x3037   : > { %7462 = vmatpush.msrb.mxu1 %v7442_v11 }
0x303c   : > { %7759 = vrot.lane.b32.xlu1 %v11461_v57, %s12871_s15 }
0x303e   : > { %v7524_v45 = vpop.permute.xlu2 %7523 }
0x3046   : > { %v7554_v9 = vpop.permute.xlu2 %7553  ;;  %v7345_v28 = vpop.xlane.xlu1 %7344 }
0x3047   : > { %9058 = vmatpush.xpose.msk.msra.mxu1 %vm438_vm1, %v7554_v9  ;;  %9658 = vrcp.f32 %v7345_v28 }
0x304d   : > { %v9659_v42 = vpop.eup %9658 }
0x304e   : > { %v11847_v1 = vmul.f32 %v9659_v42, %v9651_v51 }
0x3050   : > { %12909 = vst [vmem:[#allocation86_spill] sm:$0xff] %v11847_v1 }
0x3055   : > { %7353 = vadd.xlane.f32.xlu0 %v7352_v14 }
0x305e   : > { %v9265_v17 = vpop.permute.xlu1 %9264 }
0x305f   : > { %v9267_v60 = vunpack.i.h.bf16 %v9265_v17  ;;  %v9266_v11 = vunpack.i.l.bf16 %v9265_v17 }
0x3061   : > { %7384 = vmatpush.msra.mxu2 %v9266_v11  ;;  %7410 = vmatpush.msrb.mxu3 %v9267_v60 }
0x3062   : > { %9048 = vmatmul.msk.f32.vlgmr.msra.gmra.mxu2 %vm548_vm2, %v11847_v1 }
0x3063   : > { %9052 = vmatpush.xpose.msk.msrb.mxu2 %vm438_vm1, %v7470_v34 }
0x306a   : > { %9053 = vmatmul.msk.f32.vlgmr.msrb.gmra.mxu2 %vm438_vm1, %v7468_v13 }
0x308a   : > { %v7348_v61 = vpop.xlane.xlu0 %7347 }
0x308b   : > { %9660 = vrcp.f32 %v7348_v61 }
0x308e   : > { %v7351_v15 = vpop.xlane.xlu1 %7350 }
0x308f   : > { %9662 = vrcp.f32 %v7351_v15 }
0x3091   : > { %v9661_v9 = vpop.eup %9660 }
0x3092   : > { %v11853_v58 = vmul.f32 %v9661_v9, %v9653_v26 }
0x3094   : > { %12910 = vst [vmem:[#allocation87_spill] sm:$0xff] %v11853_v58  ;;  %9049 = vmatmul.msk.f32.vlgmr.msrb.gmra.mxu3 %vm548_vm2, %v11853_v58 }
0x3095   : > { %v9663_v51 = vpop.eup %9662 }
0x3096   : > { %v11857_v28 = vmul.f32 %v9663_v51, %v9655_v23 }
0x3098   : > { %12911 = vst [vmem:[#allocation88_spill] sm:$0xff] %v11857_v28  ;;  %9050 = vmatmul.msk.f32.vlgmr.msrb.gmra.mxu0 %vm548_vm2, %v11857_v28 }
0x309d   : > { %v7498_v34 = vpop.permute.xlu0 %7497 }
0x309e   : > { %9054 = vmatpush.xpose.msk.msra.mxu3 %vm438_vm1, %v7498_v34 }
0x30a0   : > { %9057 = vmatmul.msk.f32.vlgmr.msra.gmra.mxu0 %vm438_vm1, %v7524_v45 }
0x30a1   : > { %9055 = vmatmul.msk.f32.vlgmr.msra.gmra.mxu3 %vm438_vm1, %v7496_v0 }
0x30a6   : > { %v7552_v23 = vpop.permute.xlu1 %7551 }
0x30c8   : > { %v7354_v14 = vpop.xlane.xlu0 %7353 }
0x30c9   : > { %9664 = vrcp.f32 %v7354_v14 }
0x30cf   : > { %v9665_v26 = vpop.eup %9664 }
0x30d0   : > { %v11864_v42 = vmul.f32 %v9665_v26, %v9657_v2 }
0x30d2   : > { %12912 = vst [vmem:[#allocation89_spill] sm:$0xff] %v11864_v42  ;;  %9051 = vmatmul.msk.f32.vlgmr.msrb.gmra.mxu1 %vm548_vm2, %v11864_v42 }
0x30da   : > { %9059 = vmatmul.msk.f32.vlgmr.msra.gmra.mxu1 %vm438_vm1, %v7552_v23 }
0x30e5   : > { %v11869_v17 = vpop.f32.mrf.mxu2 }
0x30ed   : > { %v7492_v60 = vpop.f32.mrf.mxu2 }
0x30ee   : > { %v7579_v11 = vmul.f32 0.70710677, %v7492_v60 }
0x30f0   : > { %v7583_v13 = vsel %vm548_vm2, %v7579_v11, -inf }
0x30f1   : > { %7584 = vmax.xlane.f32.xlu2 %v7583_v13 }
0x3109   : > { %7733 = vrot.lane.b32.xlu2 %v11455_v50, %s12866_s18 }
0x3115   : > { %v11880_v26 = vpop.f32.mrf.mxu0 }
0x3117   : > { %v11893_v13 = vpop.f32.mrf.mxu3 }
0x311d   : > { %v7548_v23 = vpop.f32.mrf.mxu0 }
0x311e   : > { %v7581_v60 = vmul.f32 0.70710677, %v7548_v23 }
0x314f   : > { %v11874_v0 = vpop.f32.mrf.mxu1 }
0x3157   : > { %v7576_v45 = vpop.f32.mrf.mxu1 }
0x3158   : > { %v7582_v2 = vmul.f32 0.70710677, %v7576_v45  ;;  %v7520_v45 = vpop.f32.mrf.mxu3 }
0x315a   : > { %v7592_v61 = vsel %vm548_vm2, %v7582_v2, -inf }
0x315b   : > { %7593 = vmax.xlane.f32.xlu0 %v7592_v61  ;;  %v7580_v61 = vmul.f32 0.70710677, %v7520_v45 }
0x3164   : > { %v7585_v15 = vpop.xlane.xlu2 %7584 }
0x3165   : > { %v7595_v9 = vsub.f32 %v7579_v11, %v7585_v15  ;;  %v7589_v11 = vsel %vm548_vm2, %v7581_v60, -inf  ;;  %v7586_v15 = vsel %vm548_vm2, %v7580_v61, -inf }
0x3167   : > { %v7599_v51 = vmul.f32 1.442695, %v7595_v9 }
0x3169   : > { %9666 = vpow2.f32 %v7599_v51  ;;  %v11896_v51 = vpop.permute.xlu1 %7759 }
0x316c   : > { %v7734_v42 = vpop.permute.xlu2 %7733 }
0x316f   : > { %v9667_v34 = vpop.eup %9666  ;;  %9269 = vrot.lane.b32.xlu0 %v11831_v48, %s12913_s0 }
0x3170   : > { %v7607_v14 = vsel %vm548_vm2, %v9667_v34, 0.0 }
0x3171   : > { %7608 = vadd.xlane.f32.xlu1 %v7607_v14 }
0x318a   : > { %7679 = vrot.lane.b32.xlu1 %v11465_v25, %s12913_s0 }
0x3192   : > { %7789 = vrot.lane.b32.xlu1 %v11465_v25, %s12866_s18 }
0x3199   : > { %7590 = vmax.xlane.f32.xlu0 %v7589_v11 }
0x319a   : > { %7705 = vrot.lane.b32.xlu1 %v11479_v8, %s12913_s0  ;;  %s8614_s0 = sshll.u32 %s12555_s10, 4  ;;  %s8615_s0 = int_to_ptr.hbm [resolvable:$true] %s8614_s0 }
0x31a2   : > { %7815 = vrot.lane.b32.xlu1 %v11479_v8, %s12871_s15 }
0x31ad   : > { %7731 = vrot.lane.b32.xlu0 %v11455_v50, %s12871_s15 }
0x31ce   : > { %v7594_v9 = vpop.xlane.xlu0 %7593 }
0x31d7   : > { %7587 = vmax.xlane.f32.xlu0 %v7586_v15 }
0x31e1   : > { %v9270_v14 = vpop.permute.xlu0 %9269 }
0x31e2   : > { %v9272_v23 = vunpack.i.h.bf16 %v9270_v14  ;;  %v9271_v11 = vunpack.i.l.bf16 %v9270_v14 }
0x31e4   : > { %7648 = vmatpush.msra.mxu2 %v9271_v11  ;;  %7674 = vmatpush.msrb.mxu3 %v9272_v23  ;;  %v7609_v28 = vpop.xlane.xlu1 %7608 }
0x31e5   : > { %9668 = vrcp.f32 %v7609_v28 }
0x31e6   : > { %9064 = vmatpush.xpose.msk.msrb.mxu2 %vm438_vm1, %v7734_v42 }
0x31eb   : > { %v9669_v50 = vpop.eup %9668  ;;  %7761 = vrot.lane.b32.xlu0 %v11461_v57, %s12866_s18 }
0x31ec   : > { %v11901_v45 = vmul.f32 %v9669_v50, %v9667_v34 }
0x31ee   : > { %12914 = vst [vmem:[#allocation90_spill] sm:$0xff] %v11901_v45  ;;  %9060 = vmatmul.msk.f32.vlgmr.msra.gmra.mxu2 %vm548_vm2, %v11901_v45 }
0x31fc   : > { %v7680_v15 = vpop.permute.xlu1 %7679 }
0x31fd   : > { %7700 = vmatpush.msrb.mxu0 %v7680_v15  ;;  %v7598_v15 = vsub.f32 %v7582_v2, %v7594_v9 }
0x31ff   : > { %v7605_v45 = vmul.f32 1.442695, %v7598_v15 }
0x3204   : > { %v7790_v1 = vpop.permute.xlu1 %7789 }
0x3205   : > { %9068 = vmatpush.xpose.msk.msra.mxu0 %vm438_vm1, %v7790_v1 }
0x320c   : > { %v7591_v14 = vpop.xlane.xlu0 %7590  ;;  %v7706_v23 = vpop.permute.xlu1 %7705 }
0x320d   : > { %v7597_v11 = vsub.f32 %v7581_v60, %v7591_v14  ;;  %7726 = vmatpush.msrb.mxu1 %v7706_v23 }
0x320f   : > { %v7603_v28 = vmul.f32 1.442695, %v7597_v11 }
0x3211   : > { %9670 = vpow2.f32 %v7603_v28 }
0x3217   : > { %v9671_v42 = vpop.eup %9670 }
0x3218   : > { %v7613_v58 = vsel %vm548_vm2, %v9671_v42, 0.0 }
0x3219   : > { %7614 = vadd.xlane.f32.xlu2 %v7613_v58 }
0x321f   : > { %v7732_v57 = vpop.permute.xlu0 %7731 }
0x3220   : > { %9065 = vmatmul.msk.f32.vlgmr.msrb.gmra.mxu2 %vm438_vm1, %v7732_v57 }
0x3231   : > { %7787 = vrot.lane.b32.xlu2 %v11465_v25, %s12871_s15  ;;  %s12918_s15 = smov 12  }
0x324a   : > { %v7588_v34 = vpop.xlane.xlu0 %7587 }
0x324b   : > { %v7596_v50 = vsub.f32 %v7580_v61, %v7588_v34 }
0x324d   : > { %v7601_v1 = vmul.f32 1.442695, %v7596_v50 }
0x324f   : > { %9672 = vpow2.f32 %v7601_v1 }
0x3250   : > { %9674 = vpow2.f32 %v7605_v45 }
0x3255   : > { %v9673_v60 = vpop.eup %9672 }
0x3256   : > { %v7610_v14 = vsel %vm548_vm2, %v9673_v60, 0.0  ;;  %v9675_v23 = vpop.eup %9674 }
0x3257   : > { %7611 = vadd.xlane.f32.xlu0 %v7610_v14  ;;  %v7616_v58 = vsel %vm548_vm2, %v9675_v23, 0.0 }
0x325d   : > { %v7762_v11 = vpop.permute.xlu0 %7761 }
0x325e   : > { %9066 = vmatpush.xpose.msk.msra.mxu3 %vm438_vm1, %v7762_v11 }
0x325f   : > { %7617 = vadd.xlane.f32.xlu0 %v7616_v58 }
0x3271   : > { %v7650_v45 = vpop.f32.mrf.mxu2 }
0x3273   : > { %7817 = vrot.lane.b32.xlu0 %v11479_v8, %s12866_s18  ;;  %s12919_s18 = smov 10  }
0x328c   : > { %v7615_v61 = vpop.xlane.xlu2 %7614 }
0x328d   : > { %9676 = vrcp.f32 %v7615_v61 }
0x3293   : > { %v9677_v2 = vpop.eup %9676 }
0x3294   : > { %v11915_v9 = vmul.f32 %v9677_v2, %v9671_v42  ;;  %v7788_v28 = vpop.permute.xlu2 %7787  ;;  %v7816_v2 = vpop.permute.xlu1 %7815 }
0x3296   : > { %9062 = vmatmul.msk.f32.vlgmr.msrb.gmra.mxu0 %vm548_vm2, %v11915_v9 }
0x329e   : > { %9069 = vmatmul.msk.f32.vlgmr.msra.gmra.mxu0 %vm438_vm1, %v7788_v28 }
0x32a3   : > { %v7756_v57 = vpop.f32.mrf.mxu2 }
0x32a4   : > { %v7843_v34 = vmul.f32 0.70710677, %v7756_v57 }
0x32a6   : > { %v7847_v50 = vsel %vm548_vm2, %v7843_v34, -inf }
0x32a7   : > { %7848 = vmax.xlane.f32.xlu1 %v7847_v50 }
0x32ca   : > { %v7612_v15 = vpop.xlane.xlu0 %7611 }
0x32cb   : > { %9678 = vrcp.f32 %v7612_v15 }
0x32d1   : > { %v9679_v1 = vpop.eup %9678 }
0x32d2   : > { %v11921_v14 = vmul.f32 %v9679_v1, %v9673_v60  ;;  %v7618_v11 = vpop.xlane.xlu0 %7617 }
0x32d3   : > { %9680 = vrcp.f32 %v7618_v11 }
0x32d4   : > { %9061 = vmatmul.msk.f32.vlgmr.msrb.gmra.mxu3 %vm548_vm2, %v11921_v14 }
0x32d9   : > { %v9681_v42 = vpop.eup %9680 }
0x32da   : > { %v11925_v58 = vmul.f32 %v9681_v42, %v9675_v23 }
0x32dc   : > { %9063 = vmatmul.msk.f32.vlgmr.msrb.gmra.mxu1 %vm548_vm2, %v11925_v58  ;;  %9067 = vmatmul.msk.f32.vlgmr.msra.gmra.mxu3 %vm438_vm1, %v11896_v51 }
0x32e5   : > { %v7818_v61 = vpop.permute.xlu0 %7817 }
0x32e6   : > { %9070 = vmatpush.xpose.msk.msra.mxu1 %vm438_vm1, %v7818_v61 }
0x32e9   : > { %9071 = vmatmul.msk.f32.vlgmr.msra.gmra.mxu1 %vm438_vm1, %v7816_v2 }
0x3313   : > { %v11933_v60 = vpop.f32.mrf.mxu0 }
0x331b   : > { %v7812_v28 = vpop.f32.mrf.mxu0 }
0x331c   : > { %v7845_v57 = vmul.f32 0.70710677, %v7812_v28 }
0x331e   : > { %v7853_v50 = vsel %vm548_vm2, %v7845_v57, -inf }
0x331f   : > { %7854 = vmax.xlane.f32.xlu0 %v7853_v50 }
0x3333   : > { %9274 = vrot.lane.b32.xlu0 %v11831_v48, %s12915_s1 }
0x333b   : > { %8111 = vrot.lane.b32.xlu0 %v11605_v39, %s12916_s2 }
0x3343   : > { %8127 = vrot.lane.b32.xlu0 %v11669_v38, %s12881_s9 }
0x334b   : > { %8143 = vrot.lane.b32.xlu0 %v11735_v16, %s12917_s3 }
0x3353   : > { %8191 = vrot.lane.b32.xlu0 %v7650_v45, %s12918_s15 }
0x3357   : > { %v7676_v51 = vpop.f32.mrf.mxu3 }
0x3359   : > { %v11947_v23 = vpop.f32.mrf.mxu1 }
0x335b   : > { %8129 = vrot.lane.b32.xlu0 %v11672_v44, %s12881_s9  ;;  %v7849_v44 = vpop.xlane.xlu1 %7848 }
0x335c   : > { %v7859_v42 = vsub.f32 %v7843_v34, %v7849_v44 }
0x335e   : > { %v7863_v2 = vmul.f32 1.442695, %v7859_v42 }
0x335f   : > { %v7784_v15 = vpop.f32.mrf.mxu3 }
0x3360   : > { %v7844_v1 = vmul.f32 0.70710677, %v7784_v15 }
0x3362   : > { %v7850_v48 = vsel %vm548_vm2, %v7844_v1, -inf }
0x3363   : > { %7851 = vmax.xlane.f32.xlu2 %v7850_v48  ;;  %8177 = vrot.lane.b32.xlu0 %v11893_v13, %s12919_s18 }
0x3366   : > { %v7840_v39 = vpop.f32.mrf.mxu1 }
0x3367   : > { %v7846_v38 = vmul.f32 0.70710677, %v7840_v39 }
0x3369   : > { %v7856_v16 = vsel %vm548_vm2, %v7846_v38, -inf }
0x336a   : > { %7857 = vmax.xlane.f32.xlu1 %v7856_v16 }
0x336b   : > { %8115 = vrot.lane.b32.xlu0 %v11617_v52, %s12916_s2 }
0x3373   : > { %8163 = vrot.lane.b32.xlu0 %v11808_v31, %s12920_s24 }
0x3392   : > { %v7855_v45 = vpop.xlane.xlu0 %7854 }
0x3393   : > { %v7861_v11 = vsub.f32 %v7845_v57, %v7855_v45 }
0x3395   : > { %v7867_v61 = vmul.f32 1.442695, %v7861_v11 }
0x3397   : > { %9682 = vpow2.f32 %v7867_v61 }
0x3398   : > { %9684 = vpow2.f32 %v7863_v2 }
0x339d   : > { %v9683_v28 = vpop.eup %9682 }
0x339e   : > { %v7877_v13 = vsel %vm548_vm2, %v9683_v28, 0.0  ;;  %v9685_v50 = vpop.eup %9684 }
0x339f   : > { %7878 = vadd.xlane.f32.xlu1 %v7877_v13  ;;  %v7871_v52 = vsel %vm548_vm2, %v9685_v50, 0.0 }
0x33a5   : > { %v9275_v15 = vpop.permute.xlu0 %9274 }
0x33a6   : > { %v9277_v48 = vunpack.i.h.bf16 %v9275_v15  ;;  %v9276_v39 = vunpack.i.l.bf16 %v9275_v15 }
0x33a7   : > { %7872 = vadd.xlane.f32.xlu1 %v7871_v52 }
0x33a8   : > { %7912 = vmatpush.msra.mxu2 %v9276_v39  ;;  %7938 = vmatpush.msrb.mxu3 %v9277_v48 }
0x33c0   : > { %7943 = vrot.lane.b32.xlu1 %v11465_v25, %s12915_s1 }
0x33c8   : > { %8159 = vrot.lane.b32.xlu1 %v11799_v43, %s12920_s24 }
0x33d0   : > { %8145 = vrot.lane.b32.xlu1 %v11752_v4, %s12917_s3 }
0x33d6   : > { %v7852_v31 = vpop.xlane.xlu2 %7851 }
0x33d7   : > { %v7860_v16 = vsub.f32 %v7844_v1, %v7852_v31 }
0x33d8   : > { %8193 = vrot.lane.b32.xlu1 %v7676_v51, %s12918_s15 }
0x33d9   : > { %v7865_v45 = vmul.f32 1.442695, %v7860_v16 }
0x33dd   : > { %v7858_v34 = vpop.xlane.xlu1 %7857 }
0x33de   : > { %v7862_v57 = vsub.f32 %v7846_v38, %v7858_v34 }
0x33e0   : > { %v7869_v44 = vmul.f32 1.442695, %v7862_v57  ;;  %8131 = vrot.lane.b32.xlu1 %v11675_v63, %s12881_s9 }
0x33e2   : > { %9686 = vpow2.f32 %v7869_v44 }
0x33e3   : > { %9688 = vpow2.f32 %v7865_v45 }
0x33e8   : > { %v9687_v11 = vpop.eup %9686  ;;  %8179 = vrot.lane.b32.xlu1 %v11880_v26, %s12919_s18 }
0x33e9   : > { %v7880_v25 = vsel %vm548_vm2, %v9687_v11, 0.0  ;;  %v9689_v4 = vpop.eup %9688 }
0x33ea   : > { %7881 = vadd.xlane.f32.xlu2 %v7880_v25  ;;  %v7874_v43 = vsel %vm548_vm2, %v9689_v4, 0.0 }
0x33f2   : > { %7875 = vadd.xlane.f32.xlu2 %v7874_v43 }
0x340a   : > { %7969 = vrot.lane.b32.xlu2 %v11479_v8, %s12915_s1  ;;  %s9728_s1 = sshra.s32 %s8633_s13, 4  ;;  %s9729_s1 = int_to_ptr.hbm [resolvable:$true] %s9728_s1 }
0x340b   : > { %p9735_p0 = scmp.lt.s32.totalorder %s9729_s1, %s13000_s25 }
0x3412   : > { %v7879_v51 = vpop.xlane.xlu1 %7878  ;;  %8175 = vrot.lane.b32.xlu2 %v11869_v17, %s12919_s18 }
0x341a   : > { %v7873_v63 = vpop.xlane.xlu1 %7872  ;;  %8113 = vrot.lane.b32.xlu2 %v11608_v62, %s12916_s2  ;;  %v8112_v62 = vpop.permute.xlu0 %8111 }
0x341b   : > { %9690 = vrcp.f32 %v7873_v63 }
0x341c   : > { %9692 = vrcp.f32 %v7879_v51 }
0x3421   : > { %v9691_v26 = vpop.eup %9690 }
0x3422   : > { %v11978_v1 = vmul.f32 %v9691_v26, %v9685_v50  ;;  %8161 = vrot.lane.b32.xlu2 %v11806_v6, %s12920_s24  ;;  %v9693_v8 = vpop.eup %9692  ;;  %v8128_v6 = vpop.permute.xlu0 %8127 }
0x3423   : > { %v11986_v17 = vmul.f32 %v9693_v8, %v9683_v28 }
0x3424   : > { %9072 = vmatmul.msk.f32.vlgmr.msra.gmra.mxu2 %vm548_vm2, %v11978_v1 }
0x342a   : > { %8147 = vrot.lane.b32.xlu2 %v11738_v10, %s12917_s3  ;;  %v8144_v42 = vpop.permute.xlu0 %8143 }
0x3432   : > { %v7944_v38 = vpop.permute.xlu1 %7943  ;;  %8195 = vrot.lane.b32.xlu2 %v11933_v60, %s12918_s15  ;;  %v8192_v13 = vpop.permute.xlu0 %8191 }
0x3433   : > { %7964 = vmatpush.msrb.mxu0 %v7944_v38 }
0x3434   : > { %9074 = vmatmul.msk.f32.vlgmr.msrb.gmra.mxu0 %vm548_vm2, %v11986_v17 }
0x343a   : > { %v8160_v10 = vpop.permute.xlu1 %8159  ;;  %v8130_v39 = vpop.permute.xlu0 %8129 }
0x3442   : > { %v8146_v52 = vpop.permute.xlu1 %8145  ;;  %v8178_v34 = vpop.permute.xlu0 %8177 }
0x344a   : > { %v8194_v57 = vpop.permute.xlu1 %8193 }
0x3452   : > { %v8132_v25 = vpop.permute.xlu1 %8131 }
0x345d   : > { %v7882_v61 = vpop.xlane.xlu2 %7881 }
0x345e   : > { %9694 = vrcp.f32 %v7882_v61 }
0x3464   : > { %v9695_v50 = vpop.eup %9694 }
0x3465   : > { %v7876_v2 = vpop.xlane.xlu2 %7875  ;;  %v11992_v15 = vmul.f32 %v9695_v50, %v9687_v11  ;;  %v8116_v11 = vpop.permute.xlu0 %8115 }
0x3466   : > { %9696 = vrcp.f32 %v7876_v2  ;;  %v8221_v8 = vsel %vm438_vm1, %v11552_v41, %v8116_v11  ;;  %v8180_v50 = vpop.permute.xlu1 %8179  ;;  %v9077_v41 = vld [vmem:[%s12922_s29 + $0x28] sm:$0xff] }
0x3467   : > { %v8225_v38 = vsel %vm2778_vm3, %v8221_v8, %v8132_v25  ;;  %8276 = vmatpush.msrb.mxu2 %v9077_v41 }
0x346c   : > { %v9697_v28 = vpop.eup %9696 }
0x346d   : > { %v11994_v48 = vmul.f32 %v9697_v28, %v9689_v4  ;;  %v7970_v60 = vpop.permute.xlu2 %7969 }
0x346e   : > { %7990 = vmatpush.msrb.mxu1 %v7970_v60 }
0x346f   : > { %9073 = vmatmul.msk.f32.vlgmr.msrb.gmra.mxu3 %vm548_vm2, %v11994_v48  ;;  %9075 = vmatmul.msk.f32.vlgmr.msrb.gmra.mxu1 %vm548_vm2, %v11992_v15 }
0x3475   : > { %v8176_v31 = vpop.permute.xlu2 %8175 }
0x347d   : > { %v8114_v16 = vpop.permute.xlu2 %8113 }
0x347e   : > { %v8220_v44 = vsel %vm438_vm1, %v11539_v7, %v8114_v16  ;;  %v8164_v7 = vpop.permute.xlu0 %8163 }
0x347f   : > { %v8224_v45 = vsel %vm2778_vm3, %v8220_v44, %v8130_v39 }
0x3480   : > { %v8228_v4 = vsel %vm2783_vm4, %v8224_v45, %v8146_v52 }
0x3485   : > { %v8162_v43 = vpop.permute.xlu2 %8161 }
0x3486   : > { %v8232_v51 = vsel %vm548_vm2, %v8228_v4, %v8162_v43 }
0x3487   : > { %v8236_v63 = vsel %vm2792_vm5, %v8232_v51, %v8178_v34 }
0x3488   : > { %v8240_v26 = vsel %vm2797_vm6, %v8236_v63, %v8194_v57 }
0x348d   : > { %v8148_v61 = vpop.permute.xlu2 %8147 }
0x348e   : > { %v8229_v2 = vsel %vm2783_vm4, %v8225_v38, %v8148_v61 }
0x348f   : > { %v8233_v28 = vsel %vm548_vm2, %v8229_v2, %v8164_v7 }
0x3490   : > { %v8237_v60 = vsel %vm2792_vm5, %v8233_v28, %v8180_v50 }
0x3495   : > { %v8196_v25 = vpop.permute.xlu2 %8195 }
0x34a7   : > { %v7914_v39 = vpop.f32.mrf.mxu2 }
0x34a8   : > { %8207 = vrot.lane.b32.xlu1 %v7914_v39, %s12921_s26 }
0x34b0   : > { %8117 = vrot.lane.b32.xlu1 %v11615_v54, %s12916_s2  ;;  %s9730_s2 = scalar_lea.hbm %s9729_s1, 64 }
0x34b1   : > { %v7966_v52 = vpop.f32.mrf.mxu0  ;;  %p9731_p11 = scmp.ne.s32.totalorder %s9729_s1, %s9730_s2 }
0x34b2   : > { %8211 = vrot.lane.b32.xlu0 %v7966_v52, %s12921_s26 }
0x34b3   : > { %p9732_p12 = pnand %p9731_p11, %p9939_p5 }
0x34b5   : > { %p9733_p13 = pneg %p9732_p12 }
0x34b8   : > { %8165 = vrot.lane.b32.xlu1 %v11797_v53, %s12920_s24  ;;  %v8219_v53 = vsel %vm438_vm1, %v11555_v21, %v8112_v62 }
0x34ba   : > { %8149 = vrot.lane.b32.xlu0 %v11743_v27, %s12917_s3  ;;  %v9076_v27 = vld [vmem:[%s12922_s29 + $0x20] sm:$0xff] }
0x34bb   : > { %8277 = vmatpush.msrb.mxu2 %v9076_v27 }
0x34c2   : > { %8197 = vrot.lane.b32.xlu0 %v11947_v23, %s12918_s15  ;;  %v8223_v23 = vsel %vm2778_vm3, %v8219_v53, %v8128_v6  ;;  %v8241_v6 = vsel %vm2797_vm6, %v8237_v60, %v8196_v25 }
0x34c3   : > { %v8227_v57 = vsel %vm2783_vm4, %v8223_v23, %v8144_v42 }
0x34c4   : > { %v8231_v16 = vsel %vm548_vm2, %v8227_v57, %v8160_v10 }
0x34c5   : > { %v8235_v44 = vsel %vm2792_vm5, %v8231_v16, %v8176_v31 }
0x34c6   : > { %v8239_v45 = vsel %vm2797_vm6, %v8235_v44, %v8192_v13 }
0x34ec   : > { %v7992_v34 = vpop.f32.mrf.mxu1 }
0x34ed   : > { %8213 = vrot.lane.b32.xlu1 %v7992_v34, %s12921_s26 }
0x34f2   : > { %v7940_v54 = vpop.f32.mrf.mxu3 }
0x34f3   : > { %8209 = vrot.lane.b32.xlu2 %v7940_v54, %s12921_s26 }
0x34fb   : > { %8133 = vrot.lane.b32.xlu2 %v11684_v22, %s12881_s9  ;;  %s9842_s9 = smov 16  }
0x3503   : > { %8181 = vrot.lane.b32.xlu2 %v11874_v0, %s12919_s18  ;;  %s9848_s18 = smov 64  }
0x351a   : > { %v8208_v22 = vpop.permute.xlu1 %8207 }
0x351b   : > { %v8243_v11 = vsel %vm2802_vm7, %v8239_v45, %v8208_v22 }
0x351c   : > { %9078 = vmatmul.msk.f32.vlgmr.msrb.gmra.mxu2 %vm393_vm0, %v8243_v11 }
0x3522   : > { %v8118_v4 = vpop.permute.xlu1 %8117 }
0x3523   : > { %v8222_v10 = vsel %vm438_vm1, %v11557_v40, %v8118_v4 }
0x3524   : > { %v8212_v0 = vpop.permute.xlu0 %8211 }
0x3525   : > { %v8245_v13 = vsel %vm2802_vm7, %v8241_v6, %v8212_v0 }
0x352a   : > { %v8166_v31 = vpop.permute.xlu1 %8165 }
0x352c   : > { %v8150_v62 = vpop.permute.xlu0 %8149 }
0x3534   : > { %v8198_v38 = vpop.permute.xlu0 %8197 }
0x354d   : > { %v8210_v43 = vpop.permute.xlu2 %8209 }
0x354e   : > { %v8244_v21 = vsel %vm2802_vm7, %v8240_v26, %v8210_v43 }
0x354f   : > { %9079 = vmatmul.msk.f32.gmra.mxu2 %vm393_vm0, %v8244_v21 }
0x3555   : > { %v8134_v42 = vpop.permute.xlu2 %8133 }
0x3556   : > { %v8226_v51 = vsel %vm2778_vm3, %v8222_v10, %v8134_v42 }
0x3557   : > { %9080 = vmatmul.msk.f32.gmra.mxu2 %vm393_vm0, %v8245_v13  ;;  %v8230_v63 = vsel %vm2783_vm4, %v8226_v51, %v8150_v62  ;;  %v12929_v51 = vld [vmem:[#allocation56_spill] sm:$0xff] }
0x3558   : > { %v8234_v26 = vsel %vm548_vm2, %v8230_v63, %v8166_v31 }
0x355d   : > { %v8182_v8 = vpop.permute.xlu2 %8181 }
0x355e   : > { %v8238_v61 = vsel %vm2792_vm5, %v8234_v26, %v8182_v8  ;;  %v12930_v26 = vld [vmem:[#allocation57_spill] sm:$0xff] }
0x355f   : > { %v8214_v7 = vpop.permute.xlu1 %8213  ;;  %v8242_v2 = vsel %vm2797_vm6, %v8238_v61, %v8198_v38 }
0x3560   : > { %v8246_v40 = vsel %vm2802_vm7, %v8242_v2, %v8214_v7  ;;  %v12931_v7 = vld [vmem:[#allocation59_spill] sm:$0xff] }
0x3561   : > { %9081 = vmatmul.msk.f32.gmra.mxu2 %vm393_vm0, %v8246_v40  ;;  %v12932_v40 = vld [vmem:[#allocation60_spill] sm:$0xff] }
0x359f   : > { %v8279_v50 = vpop.f32.mrf.mxu2 }
0x35a0   : > { %v8280_v28 = vadd.f32 %v8279_v50, %v11439_v46  ;;  %v12934_v50 = vld [vmem:[#allocation63_spill] sm:$0xff] }
0x35a2   : > { %v8291_v60 = vsel %vm393_vm0, %v8280_v28, 0.0 }
0x35a3   : > { %8292 = vadd.xlane.f32.xlu2 %v8291_v60  ;;  %v12936_v60 = vld [vmem:[#allocation64_spill] sm:$0xff] }
0x35d2   : > { %v8282_v39 = vpop.f32.mrf.mxu2 }
0x35d3   : > { %v8283_v52 = vadd.f32 %v8282_v39, %v11443_v35  ;;  %v12937_v39 = vld [vmem:[#allocation65_spill] sm:$0xff] }
0x35d5   : > { %v8294_v41 = vsel %vm393_vm0, %v8283_v52, 0.0 }
0x35d6   : > { %8295 = vadd.xlane.f32.xlu0 %v8294_v41  ;;  %v12940_v41 = vld [vmem:[#allocation21_spill] sm:$0xff] }
0x35da   : > { %v8285_v34 = vpop.f32.mrf.mxu2 }
0x35db   : > { %v8286_v54 = vadd.f32 %v8285_v34, %v11448_v20  ;;  %v12941_v34 = vld [vmem:[#allocation70_spill] sm:$0xff] }
0x35dd   : > { %v8297_v27 = vsel %vm393_vm0, %v8286_v54, 0.0 }
0x35de   : > { %8298 = vadd.xlane.f32.xlu1 %v8297_v27 }
0x35e4   : > { %v8288_v53 = vpop.f32.mrf.mxu2 }
0x35e5   : > { %v8289_v23 = vadd.f32 %v8288_v53, %v11453_v59 }
0x35e7   : > { %v8300_v46 = vsel %vm393_vm0, %v8289_v23, 0.0 }
0x35e8   : > { %8301 = vadd.xlane.f32.xlu2 %v8300_v46  ;;  %v12943_v46 = vld [vmem:[#allocation25_spill] sm:$0xff] }
0x3616   : > { %v8293_v57 = vpop.xlane.xlu2 %8292 }
0x3617   : > { %v8303_v16 = vmul.f32 %v8293_v57, %v10593_v30  ;;  %v12944_v57 = vld [vmem:[#allocation72_spill] sm:$0xff] }
0x3619   : > { %v12067_v44 = vsub.f32 %v8280_v28, %v8303_v16  ;;  %v12935_v28 = vld [vmem:[#allocation22_spill] sm:$0xff] }
0x361b   : > { %v8311_v35 = vmul.f32 %v12067_v44, %v12067_v44 }
0x361d   : > { %v8315_v22 = vsel %vm393_vm0, %v8311_v35, 0.0 }
0x361e   : > { %8316 = vadd.xlane.f32.xlu0 %v8315_v22 }
0x3649   : > { %v8296_v20 = vpop.xlane.xlu0 %8295 }
0x364a   : > { %v8304_v45 = vmul.f32 %v8296_v20, %v10593_v30  ;;  %v12945_v20 = vld [vmem:[#allocation28_spill] sm:$0xff] }
0x364c   : > { %v12073_v11 = vsub.f32 %v8283_v52, %v8304_v45  ;;  %v12939_v52 = vld [vmem:[#allocation24_spill] sm:$0xff] }
0x364e   : > { %v8312_v59 = vmul.f32 %v12073_v11, %v12073_v11 }
0x3650   : > { %v8318_v25 = vsel %vm393_vm0, %v8312_v59, 0.0  ;;  %v12946_v59 = vld [vmem:[#allocation27_spill] sm:$0xff] }
0x3651   : > { %v8299_v0 = vpop.xlane.xlu1 %8298  ;;  %8319 = vadd.xlane.f32.xlu1 %v8318_v25 }
0x3652   : > { %v8305_v4 = vmul.f32 %v8299_v0, %v10593_v30  ;;  %v12947_v0 = vld [vmem:[#allocation32_spill] sm:$0xff] }
0x3654   : > { %v12079_v43 = vsub.f32 %v8286_v54, %v8305_v4 }
0x3656   : > { %v8313_v21 = vmul.f32 %v12079_v43, %v12079_v43 }
0x3658   : > { %v8321_v62 = vsel %vm393_vm0, %v8313_v21, 0.0 }
0x3659   : > { %8322 = vadd.xlane.f32.xlu2 %v8321_v62 }
0x365b   : > { %v8302_v6 = vpop.xlane.xlu2 %8301 }
0x365c   : > { %v8306_v42 = vmul.f32 %v8302_v6, %v10593_v30 }
0x365e   : > { %v12085_v10 = vsub.f32 %v8289_v23, %v8306_v42  ;;  %v12942_v23 = vld [vmem:[#allocation23_spill] sm:$0xff] }
0x3660   : > { %v8314_v13 = vmul.f32 %v12085_v10, %v12085_v10 }
0x3662   : > { %v8324_v31 = vsel %vm393_vm0, %v8314_v13, 0.0 }
0x3663   : > { %8325 = vadd.xlane.f32.xlu0 %v8324_v31  ;;  %v12948_v31 = vld [vmem:[#allocation71_spill] sm:$0xff] }
0x366a   : > { %5281 = vrot.lane.b32.xlu1 %v10860_v56, %s12920_s24  ;;  %v12924_v56 = vld [vmem:[#allocation53_spill] sm:$0xff] }
0x3671   : > { %5277 = vrot.lane.b32.xlu2 %v10841_v5, %s12920_s24  ;;  %v9083_v5 = vld [vmem:[%s12923_s16 + $0x28] sm:$0xff] }
0x3672   : > { %5293 = vrot.lane.b32.xlu1 %v10923_v33, %s9842_s9  ;;  %8408 = vmatpush.msra.mxu3 %v9083_v5  ;;  %v12925_v33 = vld [vmem:[#allocation58_spill] sm:$0xff] }
0x3677   : > { %5279 = vrot.lane.b32.xlu0 %v10857_v12, %s12920_s24  ;;  %v9082_v12 = vld [vmem:[%s12923_s16 + $0x20] sm:$0xff] }
0x3678   : > { %8409 = vmatpush.msra.mxu3 %v9082_v12 }
0x3679   : > { %5283 = vrot.lane.b32.xlu2 %v10874_v37, %s12920_s24 }
0x367a   : > { %5303 = vrot.lane.b32.xlu1 %v10990_v3, %s9843_s28 }
0x367f   : > { %5289 = vrot.lane.b32.xlu0 %v10911_v24, %s9842_s9 }
0x3681   : > { %5291 = vrot.lane.b32.xlu2 %v10926_v19, %s9842_s9 }
0x3682   : > { %5313 = vrot.lane.b32.xlu1 %v11034_v49, %s9844_s21 }
0x3687   : > { %5295 = vrot.lane.b32.xlu0 %v10940_v32, %s9842_s9  ;;  %v12926_v32 = vld [vmem:[#allocation54_spill] sm:$0xff] }
0x3689   : > { %5301 = vrot.lane.b32.xlu2 %v10968_v18, %s9843_s28  ;;  %v12927_v18 = vld [vmem:[#allocation55_spill] sm:$0xff] }
0x368a   : > { %5319 = vrot.lane.b32.xlu1 %v11064_v47, %s9844_s21 }
0x368f   : > { %5305 = vrot.lane.b32.xlu0 %v10986_v36, %s9843_s28  ;;  %v12928_v36 = vld [vmem:[#allocation61_spill] sm:$0xff] }
0x3691   : > { %5307 = vrot.lane.b32.xlu2 %v12924_v56, %s9843_s28  ;;  %v8317_v37 = vpop.xlane.xlu0 %8316 }
0x3692   : > { %v8327_v24 = vmul.f32 %v8317_v37, %v10593_v30  ;;  %5329 = vrot.lane.b32.xlu1 %v12925_v33, %s9845_s30  ;;  %v12949_v37 = vld [vmem:[#allocation73_spill] sm:$0xff]  ;;  %v12950_v33 = vld [vmem:[#allocation75_spill] sm:$0xff] }
0x3694   : > { %v8331_v19 = vadd.f32 1e-05, %v8327_v24 }
0x3696   : > { %9698 = vrsqrt.f32 %v8331_v19  ;;  %vm8341_vm3 = vweird.f32 %v8331_v19 }
0x3697   : > { %5315 = vrot.lane.b32.xlu0 %v12926_v32, %s9844_s21 }
0x3699   : > { %5317 = vrot.lane.b32.xlu2 %v12927_v18, %s9844_s21 }
0x369a   : > { %5339 = vrot.lane.b32.xlu1 %v12928_v36, %s9846_s11 }
0x369c   : > { %v9699_v3 = vpop.eup %9698 }
0x369d   : > { %v8336_v49 = vmul.f32 %v9699_v3, %v8331_v19  ;;  %vm8342_vm1 = vweird.f32 %v9699_v3 }
0x369e   : > { %vm8343_vm4 = vmor %vm8341_vm3, %vm8342_vm1  ;;  %vm2647_vm1 = vcmask 326656   ;;  %vm2652_vm3 = vcmask 392192  }
0x369f   : > { %v8337_v47 = vmul.f32 %v9699_v3, %v8336_v49  ;;  %5325 = vrot.lane.b32.xlu0 %v12929_v51, %s9845_s30 }
0x36a1   : > { %v8338_v63 = vmul.f32 0.5, %v8337_v47  ;;  %5327 = vrot.lane.b32.xlu2 %v12930_v26, %s9845_s30  ;;  %v12951_v47 = vld [vmem:[#allocation29_spill] sm:$0xff]  ;;  %v12952_v26 = vld [vmem:[#allocation31_spill] sm:$0xff] }
0x36a2   : > { %5349 = vrot.lane.b32.xlu1 %v11235_v29, %s9847_s20  ;;  %v12933_v29 = vld [vmem:[#allocation62_spill] sm:$0xff] }
0x36a3   : > { %v8339_v8 = vsub.f32 1.5, %v8338_v63 }
0x36a5   : > { %v8340_v38 = vmul.f32 %v9699_v3, %v8339_v8  ;;  %v12953_v8 = vld [vmem:[#allocation33_spill] sm:$0xff] }
0x36a7   : > { %v8344_v61 = vsel %vm8343_vm4, %v9699_v3, %v8340_v38  ;;  %5331 = vrot.lane.b32.xlu0 %v12931_v7, %s9845_s30  ;;  %vm2657_vm4 = vcmask 457728  }
0x36a8   : > { %v12142_v2 = vmul.f32 %v8344_v61, %v12067_v44 }
0x36a9   : > { %5337 = vrot.lane.b32.xlu2 %v12932_v40, %s9846_s11  ;;  %v12954_v40 = vld [vmem:[#allocation52_spill] sm:$0xff] }
0x36aa   : > { %5355 = vrot.lane.b32.xlu1 %v11265_v55, %s9847_s20  ;;  %9084 = vmatmul.msk.f32.vlgmr.msra.gmra.mxu3 %vm393_vm0, %v12142_v2  ;;  %v12938_v55 = vld [vmem:[#allocation26_spill] sm:$0xff] }
0x36af   : > { %5341 = vrot.lane.b32.xlu0 %v12933_v29, %s9846_s11 }
0x36b1   : > { %5343 = vrot.lane.b32.xlu2 %v12934_v50, %s9846_s11 }
0x36b2   : > { %2547 = vrot.lane.b32.xlu1 %v12935_v28, %s12920_s24 }
0x36b7   : > { %5351 = vrot.lane.b32.xlu0 %v12936_v60, %s9847_s20 }
0x36b9   : > { %5353 = vrot.lane.b32.xlu2 %v12937_v39, %s9847_s20 }
0x36ba   : > { %2559 = vrot.lane.b32.xlu1 %v12938_v55, %s9842_s9  ;;  %v12955_v55 = vld [vmem:[#allocation30_spill] sm:$0xff] }
0x36bf   : > { %2549 = vrot.lane.b32.xlu0 %v12939_v52, %s12920_s24 }
0x36c1   : > { %2545 = vrot.lane.b32.xlu2 %v12940_v41, %s12920_s24 }
0x36c2   : > { %7995 = vrot.lane.b32.xlu1 %v12941_v34, %s12920_s24 }
0x36c4   : > { %v8320_v54 = vpop.xlane.xlu1 %8319 }
0x36c5   : > { %v8328_v27 = vmul.f32 %v8320_v54, %v10593_v30  ;;  %v12957_v54 = vld [vmem:[#allocation49_spill] sm:$0xff] }
0x36c7   : > { %v8332_v53 = vadd.f32 1e-05, %v8328_v27  ;;  %2551 = vrot.lane.b32.xlu0 %v12942_v23, %s12920_s24 }
0x36c9   : > { %9700 = vrsqrt.f32 %v8332_v53  ;;  %2557 = vrot.lane.b32.xlu2 %v12943_v46, %s9842_s9  ;;  %vm8351_vm6 = vweird.f32 %v8332_v53 }
0x36ca   : > { %8001 = vrot.lane.b32.xlu1 %v12944_v57, %s12920_s24 }
0x36cc   : > { %v8323_v16 = vpop.xlane.xlu2 %8322 }
0x36cd   : > { %v8329_v44 = vmul.f32 %v8323_v16, %v10593_v30 }
0x36cf   : > { %v9701_v35 = vpop.eup %9700  ;;  %v8333_v22 = vadd.f32 1e-05, %v8329_v44  ;;  %2561 = vrot.lane.b32.xlu0 %v12945_v20, %s9842_s9  ;;  %v9103_v20 = vld [vmem:[%s12625_s7 + $0x178] sm:$0xff] }
0x36d0   : > { %v8346_v45 = vmul.f32 %v9701_v35, %v8332_v53  ;;  %vm8352_vm5 = vweird.f32 %v9701_v35  ;;  %v12958_v53 = vld [vmem:[#allocation36_spill] sm:$0xff]  ;;  %8444 = vmatpush.msra.mxu0 %v9103_v20 }
0x36d1   : > { %9702 = vrsqrt.f32 %v8333_v22  ;;  %2563 = vrot.lane.b32.xlu2 %v12946_v59, %s9842_s9  ;;  %vm8353_vm7 = vmor %vm8351_vm6, %vm8352_vm5  ;;  %vm8361_vm10 = vweird.f32 %v8333_v22 }
0x36d2   : > { %v8347_v25 = vmul.f32 %v9701_v35, %v8346_v45  ;;  %2573 = vrot.lane.b32.xlu1 %v12947_v0, %s9843_s28  ;;  %v12960_v45 = vld [vmem:[#allocation50_spill] sm:$0xff] }
0x36d4   : > { %v8348_v4 = vmul.f32 0.5, %v8347_v25  ;;  %v12182_v21 = vpop.permute.xlu2 %5277  ;;  %v12961_v25 = vld [vmem:[#allocation77_spill] sm:$0xff] }
0x36d5   : > { %v5361_v59 = vsel %vm548_vm2, %v12960_v45, %v12182_v21 }
0x36d6   : > { %v8349_v62 = vsub.f32 1.5, %v8348_v4  ;;  %v8326_v6 = vpop.xlane.xlu0 %8325  ;;  %v12962_v4 = vld [vmem:[#allocation80_spill] sm:$0xff] }
0x36d7   : > { %v9703_v42 = vpop.eup %9702  ;;  %v8330_v13 = vmul.f32 %v8326_v6, %v10593_v30  ;;  %7997 = vrot.lane.b32.xlu0 %v12948_v31, %s12920_s24  ;;  %v9101_v31 = vld [vmem:[%s12625_s7 + $0x168] sm:$0xff] }
0x36d8   : > { %v8350_v5 = vmul.f32 %v9701_v35, %v8349_v62  ;;  %v8356_v12 = vmul.f32 %v9703_v42, %v8333_v22  ;;  %vm8362_vm9 = vweird.f32 %v9703_v42  ;;  %v12959_v22 = vld [vmem:[#allocation76_spill] sm:$0xff]  ;;  %v9102_v62 = vld [vmem:[%s12625_s7 + $0x170] sm:$0xff] }
0x36d9   : > { %v8334_v56 = vadd.f32 1e-05, %v8330_v13  ;;  %7999 = vrot.lane.b32.xlu2 %v12949_v37, %s12920_s24  ;;  %vm8363_vm11 = vmor %vm8361_vm10, %vm8362_vm9  ;;  %8445 = vmatpush.msra.mxu0 %v9102_v62  ;;  %v12964_v37 = vld [vmem:[#allocation51_spill] sm:$0xff]  ;;  %v12975_v62 = vld [vmem:[#allocation44_spill] sm:$0xff] }
0x36da   : > { %v8357_v24 = vmul.f32 %v9703_v42, %v8356_v12  ;;  %8009 = vrot.lane.b32.xlu1 %v12950_v33, %s9842_s9  ;;  %v8354_v19 = vsel %vm8353_vm7, %v9701_v35, %v8350_v5  ;;  %v9100_v5 = vld [vmem:[%s12625_s7 + $0x160] sm:$0xff]  ;;  %v12963_v12 = vld [vmem:[#allocation34_spill] sm:$0xff]  ;;  %v12965_v33 = vld [vmem:[#allocation35_spill] sm:$0xff] }
0x36db   : > { %9704 = vrsqrt.f32 %v8334_v56  ;;  %v12192_v32 = vmul.f32 %v8354_v19, %v12073_v11  ;;  %vm8371_vm13 = vweird.f32 %v8334_v56  ;;  %8446 = vmatpush.msra.mxu0 %v9101_v31 }
0x36dc   : > { %v8358_v18 = vmul.f32 0.5, %v8357_v24  ;;  %v5282_v36 = vpop.permute.xlu1 %5281  ;;  %v5284_v3 = vpop.permute.xlu2 %5283 }
0x36dd   : > { %9085 = vmatmul.msk.f32.gmra.mxu3 %vm393_vm0, %v12192_v32  ;;  %v5363_v29 = vsel %vm548_vm2, %v12954_v40, %v5282_v36  ;;  %8447 = vmatpush.msra.mxu0 %v9100_v5  ;;  %v5364_v24 = vsel %vm548_vm2, %v12964_v37, %v5284_v3  ;;  %v12966_v36 = vld [vmem:[#allocation38_spill] sm:$0xff]  ;;  %v12976_v5 = vld [vmem:[#allocation84_spill] sm:$0xff]  ;;  %v12978_v37 = vld [vmem:[#allocation87_spill] sm:$0xff] }
0x36de   : > { %v8359_v49 = vsub.f32 1.5, %v8358_v18 }
0x36df   : > { %2569 = vrot.lane.b32.xlu0 %v12951_v47, %s9843_s28 }
0x36e0   : > { %v8360_v51 = vmul.f32 %v9703_v42, %v8359_v49  ;;  %v9098_v49 = vld [vmem:[%s12625_s7 + $0x150] sm:$0xff] }
0x36e1   : > { %v9705_v63 = vpop.eup %9704  ;;  %2571 = vrot.lane.b32.xlu2 %v12952_v26, %s9843_s28  ;;  %v9097_v26 = vld [vmem:[%s12625_s7 + $0x148] sm:$0xff] }
0x36e2   : > { %v8366_v11 = vmul.f32 %v9705_v63, %v8334_v56  ;;  %2581 = vrot.lane.b32.xlu1 %v12953_v8, %s9844_s21  ;;  %v8364_v38 = vsel %vm8363_vm11, %v9703_v42, %v8360_v51  ;;  %vm8372_vm12 = vweird.f32 %v9705_v63  ;;  %v9099_v56 = vld [vmem:[%s12625_s7 + $0x158] sm:$0xff]  ;;  %v12967_v8 = vld [vmem:[#allocation78_spill] sm:$0xff] }
0x36e3   : > { %v12203_v61 = vmul.f32 %v8364_v38, %v12079_v43  ;;  %v12956_v43 = vld [vmem:[#allocation74_spill] sm:$0xff]  ;;  %vm8373_vm15 = vmor %vm8371_vm13, %vm8372_vm12  ;;  %8448 = vmatpush.msra.mxu0 %v9099_v56  ;;  %v9095_v38 = vld [vmem:[%s12625_s7 + $0x138] sm:$0xff] }
0x36e4   : > { %v8367_v7 = vmul.f32 %v9705_v63, %v8366_v11  ;;  %v5294_v50 = vpop.permute.xlu1 %5293  ;;  %v5292_v28 = vpop.permute.xlu2 %5291  ;;  %v9096_v11 = vld [vmem:[%s12625_s7 + $0x140] sm:$0xff] }
0x36e5   : > { %v12208_v60 = vsel %vm393_vm0, %v5363_v29, %v5294_v50  ;;  %9086 = vmatmul.msk.f32.gmra.mxu3 %vm393_vm0, %v12203_v61  ;;  %8449 = vmatpush.msra.mxu0 %v9098_v49  ;;  %v12969_v50 = vld [vmem:[#allocation82_spill] sm:$0xff]  ;;  %v12980_v49 = vld [vmem:[#allocation41_spill] sm:$0xff] }
0x36e6   : > { %v8368_v39 = vmul.f32 0.5, %v8367_v7  ;;  %v12968_v7 = vld [vmem:[#allocation79_spill] sm:$0xff] }
0x36e7   : > { %2575 = vrot.lane.b32.xlu0 %v12955_v55, %s9843_s28  ;;  %8450 = vmatpush.msra.mxu0 %v9097_v26 }
0x36e8   : > { %v8369_v52 = vsub.f32 1.5, %v8368_v39 }
0x36e9   : > { %8007 = vrot.lane.b32.xlu2 %v12956_v43, %s9842_s9  ;;  %v5280_v41 = vpop.permute.xlu0 %5279  ;;  %8451 = vmatpush.msra.mxu0 %v9096_v11 }
0x36ea   : > { %v8370_v34 = vmul.f32 %v9705_v63, %v8369_v52  ;;  %v5362_v27 = vsel %vm548_vm2, %v12957_v54, %v5280_v41  ;;  %2587 = vrot.lane.b32.xlu1 %v12958_v53, %s9844_s21  ;;  %v9092_v41 = vld [vmem:[%s12625_s7 + $0x120] sm:$0xff]  ;;  %v9091_v54 = vld [vmem:[%s12625_s7 + $0x118] sm:$0xff] }
0x36eb   : > { %v5366_v23 = vsel %vm393_vm0, %v5362_v27, %v5292_v28  ;;  %8452 = vmatpush.msra.mxu0 %v9095_v38  ;;  %v9094_v28 = vld [vmem:[%s12625_s7 + $0x130] sm:$0xff]  ;;  %v12971_v27 = vld [vmem:[#allocation37_spill] sm:$0xff]  ;;  %v12983_v38 = vld [vmem:[#allocation86_spill] sm:$0xff] }
0x36ec   : > { %v5304_v46 = vpop.permute.xlu1 %5303  ;;  %v5302_v57 = vpop.permute.xlu2 %5301  ;;  %v8374_v16 = vsel %vm8373_vm15, %v9705_v63, %v8370_v34  ;;  %v12970_v34 = vld [vmem:[#allocation81_spill] sm:$0xff] }
0x36ed   : > { %v12222_v44 = vsel %vm2637_vm14, %v5366_v23, %v5304_v46  ;;  %v12225_v35 = vmul.f32 %v8374_v16, %v12085_v10  ;;  %8453 = vmatpush.msra.mxu0 %v9094_v28  ;;  %v12972_v46 = vld [vmem:[#allocation83_spill] sm:$0xff] }
0x36ef   : > { %8011 = vrot.lane.b32.xlu0 %v12959_v22, %s9842_s9  ;;  %9087 = vmatmul.msk.f32.gmra.mxu3 %vm393_vm0, %v12225_v35 }
0x36f1   : > { %8013 = vrot.lane.b32.xlu2 %v12961_v25, %s9842_s9  ;;  %v5290_v10 = vpop.permute.xlu0 %5289  ;;  %v12973_v25 = vld [vmem:[#allocation40_spill] sm:$0xff] }
0x36f2   : > { %v5365_v0 = vsel %vm393_vm0, %v5361_v59, %v5290_v10  ;;  %8023 = vrot.lane.b32.xlu1 %v12962_v4, %s9843_s28  ;;  %v9088_v59 = vld [vmem:[%s12625_s7 + $0x100] sm:$0xff]  ;;  %v12974_v10 = vld [vmem:[#allocation39_spill] sm:$0xff] }
0x36f3   : > { %v5369_v6 = vsel %vm2637_vm14, %v5365_v0, %v5302_v57  ;;  %v9090_v57 = vld [vmem:[%s12625_s7 + $0x110] sm:$0xff] }
0x36f4   : > { %v5314_v42 = vpop.permute.xlu1 %5313  ;;  %v5308_v13 = vpop.permute.xlu2 %5307 }
0x36f5   : > { %v12247_v21 = vsel %vm2642_vm8, %v5369_v6, %v5314_v42 }
0x36f7   : > { %2583 = vrot.lane.b32.xlu0 %v12963_v12, %s9844_s21  ;;  %v12977_v12 = vld [vmem:[#allocation85_spill] sm:$0xff] }
0x36f9   : > { %2585 = vrot.lane.b32.xlu2 %v12965_v33, %s9844_s21  ;;  %v5296_v19 = vpop.permute.xlu0 %5295 }
0x36fa   : > { %v5368_v18 = vsel %vm393_vm0, %v5364_v24, %v5296_v19  ;;  %2595 = vrot.lane.b32.xlu1 %v12966_v36, %s9845_s30  ;;  %v12979_v36 = vld [vmem:[#allocation42_spill] sm:$0xff] }
0x36fb   : > { %v5372_v47 = vsel %vm2637_vm14, %v5368_v18, %v5308_v13 }
0x36fc   : > { %v5320_v51 = vpop.permute.xlu1 %5319  ;;  %v5318_v63 = vpop.permute.xlu2 %5317 }
0x36fd   : > { %v5376_v3 = vsel %vm2642_vm8, %v5372_v47, %v5320_v51 }
0x36ff   : > { %8019 = vrot.lane.b32.xlu0 %v12967_v8, %s9843_s28  ;;  %v12982_v8 = vld [vmem:[#allocation43_spill] sm:$0xff] }
0x3701   : > { %8021 = vrot.lane.b32.xlu2 %v12968_v7, %s9843_s28  ;;  %v5306_v40 = vpop.permute.xlu0 %5305 }
0x3702   : > { %v5371_v29 = vsel %vm2637_vm14, %v12208_v60, %v5306_v40  ;;  %8031 = vrot.lane.b32.xlu1 %v12969_v50, %s9844_s21  ;;  %v9093_v60 = vld [vmem:[%s12625_s7 + $0x128] sm:$0xff]  ;;  %v12985_v50 = vld [vmem:[#allocation17_spill] sm:$0xff] }
0x3703   : > { %v5375_v39 = vsel %vm2642_vm8, %v5371_v29, %v5318_v63  ;;  %8454 = vmatpush.msra.mxu0 %v9093_v60  ;;  %v12981_v63 = vld [vmem:[#allocation45_spill] sm:$0xff]  ;;  %v12984_v29 = vld [vmem:[#allocation48_spill] sm:$0xff] }
0x3704   : > { %v5330_v55 = vpop.permute.xlu1 %5329  ;;  %v5328_v52 = vpop.permute.xlu2 %5327 }
0x3705   : > { %v5379_v43 = vsel %vm2647_vm1, %v5375_v39, %v5330_v55  ;;  %8455 = vmatpush.msra.mxu0 %v9092_v41  ;;  %v12986_v39 = vld [vmem:[#allocation18_spill] sm:$0xff] }
0x3707   : > { %8025 = vrot.lane.b32.xlu0 %v12970_v34, %s9843_s28  ;;  %8456 = vmatpush.msra.mxu0 %v9091_v54 }
0x3709   : > { %2593 = vrot.lane.b32.xlu2 %v12971_v27, %s9845_s30  ;;  %v5316_v53 = vpop.permute.xlu0 %5315  ;;  %8457 = vmatpush.msra.mxu0 %v9090_v57  ;;  %v12987_v27 = vld [vmem:[#allocation88_spill] sm:$0xff] }
0x370a   : > { %v5374_v23 = vsel %vm2642_vm8, %v12222_v44, %v5316_v53  ;;  %8037 = vrot.lane.b32.xlu1 %v12972_v46, %s9844_s21  ;;  %v9089_v44 = vld [vmem:[%s12625_s7 + $0x108] sm:$0xff]  ;;  %v12988_v53 = vld [vmem:[#allocation89_spill] sm:$0xff] }
0x370b   : > { %v5378_v16 = vsel %vm2647_vm1, %v5374_v23, %v5328_v52  ;;  %8458 = vmatpush.msra.mxu0 %v9089_v44 }
0x370c   : > { %v5340_v22 = vpop.permute.xlu1 %5339  ;;  %v5338_v20 = vpop.permute.xlu2 %5337 }
0x370d   : > { %v5382_v45 = vsel %vm2652_vm3, %v5378_v16, %v5340_v22  ;;  %8459 = vmatpush.msra.mxu0 %v9088_v59  ;;  %v12989_v16 = vld [vmem:[#allocation46_spill] sm:$0xff]  ;;  %v12990_v22 = vld [vmem:[#allocation47_spill] sm:$0xff] }
0x370f   : > { %2597 = vrot.lane.b32.xlu0 %v12973_v25, %s9845_s30 }
0x3711   : > { %2599 = vrot.lane.b32.xlu2 %v12974_v10, %s9845_s30  ;;  %v5326_v0 = vpop.permute.xlu0 %5325 }
0x3712   : > { %v5377_v4 = vsel %vm2647_vm1, %v12247_v21, %v5326_v0  ;;  %2609 = vrot.lane.b32.xlu1 %v12975_v62, %s9846_s11  ;;  %v12993_v0 = vld [vmem:[#allocation19_spill] sm:$0xff] }
0x3713   : > { %v5381_v6 = vsel %vm2652_vm3, %v5377_v4, %v5338_v20 }
0x3714   : > { %v5350_v42 = vpop.permute.xlu1 %5349  ;;  %v5344_v13 = vpop.permute.xlu2 %5343 }
0x3715   : > { %v12332_v31 = vsel %vm2657_vm4, %v5381_v6, %v5350_v42 }
0x3717   : > { %8033 = vrot.lane.b32.xlu0 %v12976_v5, %s9844_s21 }
0x3719   : > { %8035 = vrot.lane.b32.xlu2 %v12977_v12, %s9844_s21  ;;  %v5332_v56 = vpop.permute.xlu0 %5331  ;;  %s12998_s21 = sld [smem:[#allocation9_spill]] }
0x371a   : > { %v5380_v21 = vsel %vm2647_vm1, %v5376_v3, %v5332_v56  ;;  %8045 = vrot.lane.b32.xlu1 %v12978_v37, %s9845_s30  ;;  %v12994_v56 = vld [vmem:[#allocation68_spill] sm:$0xff] }
0x371b   : > { %v5384_v24 = vsel %vm2652_vm3, %v5380_v21, %v5344_v13 }
0x371c   : > { %v5356_v33 = vpop.permute.xlu1 %5355  ;;  %v5354_v19 = vpop.permute.xlu2 %5353 }
0x371d   : > { %v12343_v18 = vsel %vm2657_vm4, %v5384_v24, %v5356_v33 }
0x371f   : > { %2605 = vrot.lane.b32.xlu0 %v12979_v36, %s9846_s11 }
0x3721   : > { %2607 = vrot.lane.b32.xlu2 %v12980_v49, %s9846_s11  ;;  %v5342_v47 = vpop.permute.xlu0 %5341 }
0x3722   : > { %v5383_v51 = vsel %vm2652_vm3, %v5379_v43, %v5342_v47  ;;  %2617 = vrot.lane.b32.xlu1 %v12981_v63, %s9847_s20  ;;  %v12996_v47 = vld [vmem:[#allocation69_spill] sm:$0xff] }
0x3723   : > { %v12353_v3 = vsel %vm2657_vm4, %v5383_v51, %v5354_v19 }
0x3724   : > { %v2548_v26 = vpop.permute.xlu1 %2547  ;;  %v2546_v11 = vpop.permute.xlu2 %2545 }
0x3725   : > { %v2630_v28 = vsel %vm548_vm2, %v12985_v50, %v2548_v26  ;;  %v2629_v55 = vsel %vm548_vm2, %v12986_v39, %v2546_v11 }
0x3727   : > { %2611 = vrot.lane.b32.xlu0 %v12982_v8, %s9846_s11 }
0x3729   : > { %8043 = vrot.lane.b32.xlu2 %v12983_v38, %s9845_s30  ;;  %v5352_v7 = vpop.permute.xlu0 %5351 }
0x372a   : > { %v12360_v40 = vsel %vm2657_vm4, %v5382_v45, %v5352_v7  ;;  %2623 = vrot.lane.b32.xlu1 %v12984_v29, %s9847_s20  ;;  %v12991_v45 = vld [vmem:[#allocation20_spill] sm:$0xff] }
0x372c   : > { %v2560_v52 = vpop.permute.xlu1 %2559  ;;  %v2558_v43 = vpop.permute.xlu2 %2557 }
0x372d   : > { %v2634_v60 = vsel %vm393_vm0, %v2630_v28, %v2560_v52  ;;  %v2633_v41 = vsel %vm393_vm0, %v2629_v55, %v2558_v43  ;;  %v8411_v34 = vpop.f32.mrf.mxu3  ;;  %v12997_v55 = vld [vmem:[#allocation67_spill] sm:$0xff] }
0x372e   : > { %v8423_v54 = vmax.f32 %v8411_v34, 0.0 }
0x372f   : > { %8047 = vrot.lane.b32.xlu0 %v12987_v27, %s9845_s30 }
0x3730   : > { %8460 = vmatmul.f32.vlgmr.msra.gmra.mxu0 %v8423_v54 }
0x3731   : > { %8049 = vrot.lane.b32.xlu2 %v12988_v53, %s9845_s30  ;;  %v2550_v23 = vpop.permute.xlu0 %2549  ;;  %s12449_s30 = sand.u32 1, %s12998_s21  }
0x3732   : > { %8059 = vrot.lane.b32.xlu1 %v11915_v9, %s9846_s11  ;;  %v12992_v9 = vld [vmem:[#allocation90_spill] sm:$0xff]  ;;  %v2631_v4 = vsel %vm548_vm2, %v12993_v0, %v2550_v23  ;;  %s8600_s28 = scalar_lea.sflag [#allocation5], %s12449_s30 }
0x3734   : > { %v7996_v46 = vpop.permute.xlu1 %7995  ;;  %v2564_v57 = vpop.permute.xlu2 %2563 }
0x3735   : > { %v8079_v21 = vsel %vm548_vm2, %v12994_v56, %v7996_v46 }
0x3737   : > { %2619 = vrot.lane.b32.xlu0 %v12989_v16, %s9847_s20 }
0x3739   : > { %2621 = vrot.lane.b32.xlu2 %v12990_v22, %s9847_s20  ;;  %v2552_v20 = vpop.permute.xlu0 %2551 }
0x373a   : > { %v2632_v44 = vsel %vm548_vm2, %v12991_v45, %v2552_v20  ;;  %8069 = vrot.lane.b32.xlu1 %v11994_v48, %s9847_s20 }
0x373b   : > { %v2636_v59 = vsel %vm393_vm0, %v2632_v44, %v2564_v57 }
0x373c   : > { %v8002_v25 = vpop.permute.xlu1 %8001  ;;  %v8000_v10 = vpop.permute.xlu2 %7999 }
0x373d   : > { %v8081_v52 = vsel %vm548_vm2, %v12997_v55, %v8000_v10 }
0x373f   : > { %8055 = vrot.lane.b32.xlu0 %v12992_v9, %s9846_s11 }
0x3741   : > { %8057 = vrot.lane.b32.xlu2 %v11921_v14, %s9846_s11  ;;  %v2562_v62 = vpop.permute.xlu0 %2561  ;;  %v12995_v14 = vld [vmem:[#allocation66_spill] sm:$0xff] }
0x3742   : > { %v2635_v6 = vsel %vm393_vm0, %v2631_v4, %v2562_v62 }
0x3744   : > { %v2574_v42 = vpop.permute.xlu1 %2573  ;;  %v2572_v13 = vpop.permute.xlu2 %2571 }
0x3745   : > { %v2640_v48 = vsel %vm2637_vm14, %v2635_v6, %v2574_v42  ;;  %v2639_v5 = vsel %vm2637_vm14, %v2634_v60, %v2572_v13 }
0x3747   : > { %8061 = vrot.lane.b32.xlu0 %v11925_v58, %s9846_s11  ;;  %s8733_s11 = sshll.u32 %s12449_s30, 6 }
0x3748   : > { %s12461_s15 = scalar_lea.vmem [#allocation4], %s8733_s11  ;;  %s9734_s11 = scalar_lea.hbm %s13000_s25, 128 }
0x3749   : > { %8067 = vrot.lane.b32.xlu2 %v11978_v1, %s9847_s20  ;;  %v7998_v12 = vpop.permute.xlu0 %7997  ;;  %v8082_v1 = vsel %vm548_vm2, %v12996_v47, %v8002_v25  ;;  %s8630_s16 = sshll.u32 %s12461_s15, 4  ;;  %p9736_p1 = scmp.lt.s32.totalorder %s9734_s11, %s9730_s2  ;;  %s12558_s16 = int_to_ptr.vmem [resolvable:$true] %s8630_s16 }
0x374a   : > { %v8080_v37 = vsel %vm548_vm2, %v12995_v14, %v7998_v12  ;;  %vm8581_vm2 = vcmask 523264  }
0x374b   : > { %p9737_p2 = por %p9736_p1, %p9735_p0 }
0x374c   : > { %v8010_v24 = vpop.permute.xlu1 %8009  ;;  %v8008_v33 = vpop.permute.xlu2 %8007 }
0x374d   : > { %v12403_v19 = vsel %vm393_vm0, %v8080_v37, %v8010_v24  ;;  %v12406_v36 = vsel %vm393_vm0, %v8079_v21, %v8008_v33  ;;  %p9738_p3 = pnand %p9737_p2, %p9733_p13 }
0x3751   : > { %v2570_v49 = vpop.permute.xlu0 %2569 }
0x3752   : > { %v2638_v58 = vsel %vm2637_vm14, %v2633_v41, %v2570_v49 }
0x3754   : > { %v2582_v51 = vpop.permute.xlu1 %2581  ;;  %v8014_v63 = vpop.permute.xlu2 %8013 }
0x3755   : > { %v2643_v26 = vsel %vm2642_vm8, %v2638_v58, %v2582_v51  ;;  %v8086_v11 = vsel %vm393_vm0, %v8082_v1, %v8014_v63 }
0x3759   : > { %v2576_v8 = vpop.permute.xlu0 %2575 }
0x375a   : > { %v2641_v38 = vsel %vm2637_vm14, %v2636_v59, %v2576_v8 }
0x375c   : > { %v2588_v7 = vpop.permute.xlu1 %2587  ;;  %v2586_v29 = vpop.permute.xlu2 %2585 }
0x375d   : > { %v2646_v50 = vsel %vm2642_vm8, %v2641_v38, %v2588_v7  ;;  %v2645_v28 = vsel %vm2642_vm8, %v2640_v48, %v2586_v29 }
0x3760   : > { %v8414_v39 = vpop.f32.mrf.mxu3 }
0x3761   : > { %v8424_v43 = vmax.f32 %v8414_v39, 0.0  ;;  %v8012_v60 = vpop.permute.xlu0 %8011 }
0x3762   : > { %v8085_v41 = vsel %vm393_vm0, %v8081_v52, %v8012_v60 }
0x3763   : > { %8463 = vmatmul.f32.gmra.mxu0 %v8424_v43 }
0x3764   : > { %v8024_v34 = vpop.permute.xlu1 %8023  ;;  %v8022_v54 = vpop.permute.xlu2 %8021 }
0x3765   : > { %v8089_v27 = vsel %vm2637_vm14, %v8085_v41, %v8024_v34  ;;  %v8088_v60 = vsel %vm2637_vm14, %v12403_v19, %v8022_v54 }
0x3768   : > { %v8417_v53 = vpop.f32.mrf.mxu3 }
0x3769   : > { %v8425_v23 = vmax.f32 %v8417_v53, 0.0  ;;  %v2584_v46 = vpop.permute.xlu0 %2583 }
0x376a   : > { %v2644_v57 = vsel %vm2642_vm8, %v2639_v5, %v2584_v46 }
0x376b   : > { %8466 = vmatmul.f32.gmra.mxu0 %v8425_v23 }
0x376c   : > { %v2596_v16 = vpop.permute.xlu1 %2595  ;;  %v2594_v22 = vpop.permute.xlu2 %2593 }
0x376d   : > { %v2649_v20 = vsel %vm2647_vm1, %v2644_v57, %v2596_v16  ;;  %v2648_v45 = vsel %vm2647_vm1, %v2643_v26, %v2594_v22 }
0x3771   : > { %v8020_v44 = vpop.permute.xlu0 %8019 }
0x3772   : > { %v8420_v59 = vpop.f32.mrf.mxu3  ;;  %v8087_v54 = vsel %vm2637_vm14, %v12406_v36, %v8020_v44 }
0x3773   : > { %v8426_v25 = vmax.f32 %v8420_v59, 0.0 }
0x3774   : > { %v8032_v10 = vpop.permute.xlu1 %8031  ;;  %v2600_v9 = vpop.permute.xlu2 %2599 }
0x3775   : > { %v2651_v0 = vsel %vm2647_vm1, %v2646_v50, %v2600_v9  ;;  %8469 = vmatmul.f32.gmra.mxu0 %v8426_v25  ;;  %v8091_v22 = vsel %vm2642_vm8, %v8087_v54, %v8032_v10 }
0x3779   : > { %v8026_v4 = vpop.permute.xlu0 %8025 }
0x377a   : > { %v8090_v62 = vsel %vm2637_vm14, %v8086_v11, %v8026_v4 }
0x377c   : > { %v8038_v6 = vpop.permute.xlu1 %8037  ;;  %v8036_v42 = vpop.permute.xlu2 %8035 }
0x377d   : > { %v8094_v13 = vsel %vm2642_vm8, %v8090_v62, %v8038_v6  ;;  %v8093_v48 = vsel %vm2642_vm8, %v8089_v27, %v8036_v42 }
0x3781   : > { %v2598_v5 = vpop.permute.xlu0 %2597 }
0x3782   : > { %v2650_v12 = vsel %vm2647_vm1, %v2645_v28, %v2598_v5 }
0x3784   : > { %v2610_v56 = vpop.permute.xlu1 %2609  ;;  %v2608_v21 = vpop.permute.xlu2 %2607 }
0x3785   : > { %v2655_v14 = vsel %vm2652_vm3, %v2650_v12, %v2610_v56  ;;  %v2654_v37 = vsel %vm2652_vm3, %v2649_v20, %v2608_v21 }
0x3789   : > { %v8034_v24 = vpop.permute.xlu0 %8033 }
0x378a   : > { %v8092_v34 = vsel %vm2642_vm8, %v8088_v60, %v8034_v24 }
0x378c   : > { %v8046_v33 = vpop.permute.xlu1 %8045  ;;  %v8044_v49 = vpop.permute.xlu2 %8043 }
0x378d   : > { %v8096_v53 = vsel %vm2647_vm1, %v8092_v34, %v8046_v33 }
0x3791   : > { %v2606_v58 = vpop.permute.xlu0 %2605 }
0x3792   : > { %v2653_v47 = vsel %vm2652_vm3, %v2648_v45, %v2606_v58  ;;  %v8095_v45 = vsel %vm2647_vm1, %v8091_v22, %v8044_v49 }
0x3794   : > { %v2618_v1 = vpop.permute.xlu1 %2617  ;;  %v8050_v51 = vpop.permute.xlu2 %8049 }
0x3795   : > { %v12432_v63 = vsel %vm2657_vm4, %v2653_v47, %v2618_v1  ;;  %v12435_v26 = vsel %vm2647_vm1, %v8094_v13, %v8050_v51 }
0x3799   : > { %v2612_v11 = vpop.permute.xlu0 %2611 }
0x379a   : > { %v2656_v8 = vsel %vm2652_vm3, %v2651_v0, %v2612_v11 }
0x379c   : > { %v2624_v38 = vpop.permute.xlu1 %2623  ;;  %v2622_v7 = vpop.permute.xlu2 %2621 }
0x379d   : > { %v12439_v29 = vsel %vm2657_vm4, %v2656_v8, %v2624_v38  ;;  %v12442_v50 = vsel %vm2657_vm4, %v2655_v14, %v2622_v7 }
0x37a1   : > { %v8048_v28 = vpop.permute.xlu0 %8047 }
0x37a2   : > { %v8097_v39 = vsel %vm2647_vm1, %v8093_v48, %v8048_v28 }
0x37a4   : > { %v8060_v55 = vpop.permute.xlu1 %8059  ;;  %v8058_v43 = vpop.permute.xlu2 %8057 }
0x37a5   : > { %v12446_v52 = vsel %vm2652_vm3, %v8097_v39, %v8060_v55  ;;  %v8100_v23 = vsel %vm2652_vm3, %v8096_v53, %v8058_v43 }
0x37a9   : > { %v2620_v41 = vpop.permute.xlu0 %2619 }
0x37aa   : > { %v12456_v27 = vsel %vm2657_vm4, %v2654_v37, %v2620_v41 }
0x37ac   : > { %v8070_v46 = vpop.permute.xlu1 %8069  ;;  %v8068_v25 = vpop.permute.xlu2 %8067 }
0x37ad   : > { %v8104_v57 = vsel %vm2657_vm4, %v8100_v23, %v8070_v46  ;;  %v8461_v16 = vpop.f32.mrf.mxu0 }
0x37ae   : > { %8589 = vst.msk [vmem:[%s12461_s15 + $0x18] sm:$0xff] %vm8581_vm2, %v8104_v57  ;;  %v8462_v19 = vadd.f32 %v8461_v16, %v12142_v2 }
0x37b0   : > { %v8473_v20 = vsel %vm393_vm0, %v8462_v19, 0.0 }
0x37b1   : > { %8474 = vadd.xlane.f32.xlu1 %v8473_v20  ;;  %v8056_v59 = vpop.permute.xlu0 %8055 }
0x37b2   : > { %v8099_v9 = vsel %vm2652_vm3, %v8095_v45, %v8056_v59 }
0x37b3   : > { %v8103_v0 = vsel %vm2657_vm4, %v8099_v9, %v8068_v25 }
0x37b4   : > { %8587 = vst.msk [vmem:[%s12461_s15 + $0x8] sm:$0xff] %vm8581_vm2, %v8103_v0 }
0x37b9   : > { %v8062_v12 = vpop.permute.xlu0 %8061 }
0x37ba   : > { %v8102_v14 = vsel %vm2652_vm3, %v12435_v26, %v8062_v12 }
0x37e0   : > { %v8464_v4 = vpop.f32.mrf.mxu0 }
0x37e1   : > { %v8465_v2 = vadd.f32 %v8464_v4, %v12192_v32 }
0x37e3   : > { %v8476_v36 = vsel %vm393_vm0, %v8465_v2, 0.0 }
0x37e4   : > { %8477 = vadd.xlane.f32.xlu2 %v8476_v36 }
0x37e8   : > { %v8467_v44 = vpop.f32.mrf.mxu0 }
0x37e9   : > { %v8468_v10 = vadd.f32 %v8467_v44, %v12203_v61 }
0x37eb   : > { %v8479_v62 = vsel %vm393_vm0, %v8468_v10, 0.0 }
0x37ec   : > { %8480 = vadd.xlane.f32.xlu0 %v8479_v62 }
0x37f2   : > { %v8470_v6 = vpop.f32.mrf.mxu0 }
0x37f3   : > { %v8471_v42 = vadd.f32 %v8470_v6, %v12225_v35 }
0x37f5   : > { %v8482_v13 = vsel %vm393_vm0, %v8471_v42, 0.0 }
0x37f6   : > { %8483 = vadd.xlane.f32.xlu1 %v8482_v13 }
0x37fc   : > { %8073 = vrot.lane.b32.xlu2 %v11992_v15, %s9847_s20 }
0x3800   : > { %8071 = vrot.lane.b32.xlu0 %v11986_v17, %s9847_s20  ;;  %s8732_s20 = sshll.u32 %s12449_s30, 5 }
0x3801   : > { %s12527_s26 = scalar_lea.vmem [#allocation2], %s8732_s20 }
0x3802   : > { %s8612_s19 = sshll.u32 %s12527_s26, 4  ;;  %s12568_s19 = int_to_ptr.vmem [resolvable:$true] %s8612_s19 }
0x380f   : > { %8569 = vrot.lane.b32.xlu1 %v12332_v31, %s9848_s18 }
0x3824   : > { %v8475_v32 = vpop.xlane.xlu1 %8474 }
0x3825   : > { %v8485_v61 = vmul.f32 %v8475_v32, %v10593_v30 }
0x3827   : > { %v8489_v48 = vsub.f32 %v8462_v19, %v8485_v61 }
0x3829   : > { %v8493_v5 = vmul.f32 %v8489_v48, %v8489_v48 }
0x382b   : > { %v8497_v35 = vsel %vm393_vm0, %v8493_v5, 0.0 }
0x382c   : > { %8498 = vadd.xlane.f32.xlu0 %v8497_v35 }
0x3857   : > { %v8478_v56 = vpop.xlane.xlu2 %8477 }
0x3858   : > { %v8486_v15 = vmul.f32 %v8478_v56, %v10593_v30 }
0x385a   : > { %v12490_v21 = vsub.f32 %v8465_v2, %v8486_v15 }
0x385c   : > { %v8494_v17 = vmul.f32 %v12490_v21, %v12490_v21 }
0x385e   : > { %v8500_v31 = vsel %vm393_vm0, %v8494_v17, 0.0 }
0x385f   : > { %v8481_v37 = vpop.xlane.xlu0 %8480  ;;  %8501 = vadd.xlane.f32.xlu2 %v8500_v31  ;;  %v8074_v24 = vpop.permute.xlu2 %8073 }
0x3860   : > { %v8487_v33 = vmul.f32 %v8481_v37, %v10593_v30  ;;  %v8106_v49 = vsel %vm2657_vm4, %v8102_v14, %v8074_v24 }
0x3861   : > { %8593 = vst.msk [vmem:[%s12461_s15 + $0x38] sm:$0xff] %vm8581_vm2, %v8106_v49 }
0x3862   : > { %v12501_v58 = vsub.f32 %v8468_v10, %v8487_v33 }
0x3864   : > { %v8495_v47 = vmul.f32 %v12501_v58, %v12501_v58 }
0x3866   : > { %v8503_v1 = vsel %vm393_vm0, %v8495_v47, 0.0 }
0x3867   : > { %8504 = vadd.xlane.f32.xlu1 %v8503_v1 }
0x3869   : > { %v8484_v51 = vpop.xlane.xlu1 %8483 }
0x386a   : > { %v8488_v26 = vmul.f32 %v8484_v51, %v10593_v30 }
0x386c   : > { %v12507_v11 = vsub.f32 %v8471_v42, %v8488_v26 }
0x386e   : > { %v8496_v8 = vmul.f32 %v12507_v11, %v12507_v11 }
0x3870   : > { %v8506_v38 = vsel %vm393_vm0, %v8496_v8, 0.0 }
0x3871   : > { %8507 = vadd.xlane.f32.xlu0 %v8506_v38 }
0x3872   : > { %v8072_v7 = vpop.permute.xlu0 %8071 }
0x3873   : > { %v8105_v28 = vsel %vm2657_vm4, %v12446_v52, %v8072_v7 }
0x3874   : > { %8591 = vst.msk [vmem:[%s12461_s15 + $0x28] sm:$0xff] %vm8581_vm2, %v8105_v28 }
0x3877   : > { %8573 = vrot.lane.b32.xlu2 %v12353_v3, %s9848_s18 }
0x3880   : > { %8575 = vrot.lane.b32.xlu1 %v12343_v18, %s9848_s18 }
0x3881   : > { %v8570_v39 = vpop.permute.xlu1 %8569 }
0x3882   : > { %v8582_v55 = vsel %vm8581_vm2, %v12432_v63, %v8570_v39 }
0x3883   : > { %8586 = vst [vmem:[%s12461_s15] sm:$0xff] %v8582_v55 }
0x3885   : > { %8571 = vrot.lane.b32.xlu0 %v12360_v40, %s9848_s18 }
0x389f   : > { %v8499_v43 = vpop.xlane.xlu0 %8498 }
0x38a0   : > { %v8509_v52 = vmul.f32 %v8499_v43, %v10593_v30 }
0x38a2   : > { %v8513_v60 = vadd.f32 1e-05, %v8509_v52 }
0x38a4   : > { %9706 = vrsqrt.f32 %v8513_v60  ;;  %vm8523_vm6 = vweird.f32 %v8513_v60 }
0x38aa   : > { %v9707_v41 = vpop.eup %9706 }
0x38ab   : > { %v8518_v34 = vmul.f32 %v9707_v41, %v8513_v60  ;;  %vm8524_vm5 = vweird.f32 %v9707_v41 }
0x38ac   : > { %vm8525_vm7 = vmor %vm8523_vm6, %vm8524_vm5 }
0x38ad   : > { %v8519_v3 = vmul.f32 %v9707_v41, %v8518_v34 }
0x38af   : > { %v8520_v53 = vmul.f32 0.5, %v8519_v3 }
0x38b1   : > { %v8521_v23 = vsub.f32 1.5, %v8520_v53 }
0x38b3   : > { %v8522_v18 = vmul.f32 %v9707_v41, %v8521_v23 }
0x38b5   : > { %v8526_v63 = vsel %vm8525_vm7, %v9707_v41, %v8522_v18 }
0x38b6   : > { %v8557_v46 = vmul.f32 %v8526_v63, %v8489_v48 }
0x38b8   : > { %8561 = vst.msk [vmem:[%s12527_s26] sm:$0xff] %vm393_vm0, %v8557_v46 }
0x38d2   : > { %v8502_v40 = vpop.xlane.xlu2 %8501 }
0x38d3   : > { %v8510_v57 = vmul.f32 %v8502_v40, %v10593_v30 }
0x38d5   : > { %v8514_v16 = vadd.f32 1e-05, %v8510_v57 }
0x38d7   : > { %9708 = vrsqrt.f32 %v8514_v16  ;;  %vm8533_vm10 = vweird.f32 %v8514_v16 }
0x38da   : > { %v8505_v19 = vpop.xlane.xlu1 %8504  ;;  %v8574_v54 = vpop.permute.xlu2 %8573 }
0x38db   : > { %v8511_v22 = vmul.f32 %v8505_v19, %v10593_v30  ;;  %v8584_v20 = vsel %vm8581_vm2, %v12442_v50, %v8574_v54 }
0x38dc   : > { %8590 = vst [vmem:[%s12461_s15 + $0x20] sm:$0xff] %v8584_v20 }
0x38dd   : > { %v9709_v45 = vpop.eup %9708  ;;  %v8515_v59 = vadd.f32 1e-05, %v8511_v22 }
0x38de   : > { %v8528_v25 = vmul.f32 %v9709_v45, %v8514_v16  ;;  %vm8534_vm9 = vweird.f32 %v9709_v45 }
0x38df   : > { %9710 = vrsqrt.f32 %v8515_v59  ;;  %vm8535_vm11 = vmor %vm8533_vm10, %vm8534_vm9  ;;  %vm8543_vm13 = vweird.f32 %v8515_v59 }
0x38e0   : > { %v8529_v9 = vmul.f32 %v9709_v45, %v8528_v25 }
0x38e2   : > { %v8530_v0 = vmul.f32 0.5, %v8529_v9 }
0x38e4   : > { %v8531_v4 = vsub.f32 1.5, %v8530_v0  ;;  %v8508_v2 = vpop.xlane.xlu0 %8507 }
0x38e5   : > { %v9711_v36 = vpop.eup %9710  ;;  %v8512_v44 = vmul.f32 %v8508_v2, %v10593_v30 }
0x38e6   : > { %v8532_v10 = vmul.f32 %v9709_v45, %v8531_v4  ;;  %v8538_v62 = vmul.f32 %v9711_v36, %v8515_v59  ;;  %vm8544_vm12 = vweird.f32 %v9711_v36 }
0x38e7   : > { %v8516_v50 = vadd.f32 1e-05, %v8512_v44  ;;  %vm8545_vm14 = vmor %vm8543_vm13, %vm8544_vm12 }
0x38e8   : > { %v8536_v6 = vsel %vm8535_vm11, %v9709_v45, %v8532_v10  ;;  %v8539_v42 = vmul.f32 %v9711_v36, %v8538_v62 }
0x38e9   : > { %v8558_v13 = vmul.f32 %v8536_v6, %v12490_v21  ;;  %9712 = vrsqrt.f32 %v8516_v50  ;;  %vm8553_vm8 = vweird.f32 %v8516_v50 }
0x38ea   : > { %v8540_v32 = vmul.f32 0.5, %v8539_v42 }
0x38eb   : > { %8562 = vst.msk [vmem:[%s12527_s26 + $0x8] sm:$0xff] %vm393_vm0, %v8558_v13 }
0x38ec   : > { %v8541_v61 = vsub.f32 1.5, %v8540_v32 }
0x38ee   : > { %v8542_v30 = vmul.f32 %v9711_v36, %v8541_v61 }
0x38ef   : > { %v9713_v48 = vpop.eup %9712 }
0x38f0   : > { %v8546_v5 = vsel %vm8545_vm14, %v9711_v36, %v8542_v30  ;;  %v8548_v35 = vmul.f32 %v9713_v48, %v8516_v50  ;;  %vm8554_vm15 = vweird.f32 %v9713_v48 }
0x38f1   : > { %v8559_v12 = vmul.f32 %v8546_v5, %v12501_v58  ;;  %vm12563_vm1 = vmor %vm8553_vm8, %vm8554_vm15 }
0x38f2   : > { %v8549_v56 = vmul.f32 %v9713_v48, %v8548_v35  ;;  %v8576_v15 = vpop.permute.xlu1 %8575 }
0x38f3   : > { %8563 = vst.msk [vmem:[%s12527_s26 + $0x10] sm:$0xff] %vm393_vm0, %v8559_v12  ;;  %v8585_v21 = vsel %vm8581_vm2, %v12439_v29, %v8576_v15 }
0x38f4   : > { %v8550_v17 = vmul.f32 0.5, %v8549_v56  ;;  %8592 = vst [vmem:[%s12461_s15 + $0x30] sm:$0xff] %v8585_v21 }
0x38f6   : > { %v8551_v31 = vsub.f32 1.5, %v8550_v17 }
0x38f7   : > { %v8572_v14 = vpop.permute.xlu0 %8571 }
0x38f8   : > { %v8552_v29 = vmul.f32 %v9713_v48, %v8551_v31  ;;  %v8583_v37 = vsel %vm8581_vm2, %v12456_v27, %v8572_v14 }
0x38f9   : > { %8588 = vst [vmem:[%s12461_s15 + $0x10] sm:$0xff] %v8583_v37 }
0x38fa   : > { %v8556_v33 = vsel %vm12563_vm1, %v9713_v48, %v8552_v29 }
0x38fb   : > { %9741 = shalt.err (!%p9738_p3)
}
0x38fc   : > { %s9849_s15 = smov 256   ;;  %v8560_v27 = vmul.f32 %v8556_v33, %v12507_v11  ;;  %s8595_s27 = scalar_lea.sflag [#allocation3], %s12449_s30 }
0x38fd   : > { %9117 = dma.vmem_to_hbm [thread:$0]  (%p9939_p5), %s12558_s16, 1024, %s8633_s13, %s8600_s28, %s9849_s15, %s9849_s15, %s9842_s9  }
0x38fe   : > { %8564 = vst.msk [vmem:[%s12527_s26 + $0x18] sm:$0xff] %vm393_vm0, %v8560_v27  ;;  %s9756_s17 = sshra.s32 %s8615_s0, 4  ;;  %s9762_s14 = scalar_lea.hbm %s13001_s6, 64  ;;  %s9757_s17 = int_to_ptr.hbm [resolvable:$true] %s9756_s17 }
0x38ff   : > { %s9758_s29 = scalar_lea.hbm %s9757_s17, 32  ;;  %p9763_p9 = scmp.lt.s32.totalorder %s9757_s17, %s13001_s6 }
0x3900   : > { %p9759_p4 = scmp.ne.s32.totalorder %s9757_s17, %s9758_s29  ;;  %p9764_p10 = scmp.lt.s32.totalorder %s9762_s14, %s9758_s29 }
0x3902   : > { %p9760_p7 = pnand %p9759_p4, %p9939_p5  ;;  %p9765_p11 = por %p9764_p10, %p9763_p9 }
0x3904   : > { %p9761_p8 = pneg %p9760_p7 }
0x3906   : > { %p9766_p12 = pnand %p9765_p11, %p9761_p8 }
0x3908   : > { %9769 = shalt.err (!%p9766_p12)
}
0x3909   : > { %s9850_s9 = smov 128  }
0x390a   : > { %9116 = dma.vmem_to_hbm [thread:$0]  (%p9939_p5), %s12568_s19, 512, %s8615_s0, %s8595_s27, %s9850_s9, %s9850_s9, %s12920_s24  }
0x390b PF: > { %s13005_s30 = sld [smem:[#allocation11_spill]] }
0x390c   : > { %s13006_s26 = sld [smem:[#allocation8_spill]] }
0x3911   : > { %p9127_p13 = scmp.ge.s32.totalorder %s13005_s30, 2 }
0x3912   : > { %s8647_s13 = sand.u32 1, %s13006_s26  }
0x3913   : > { %p9121_p0 = pnand %p9127_p13, %p9943_p6  ;;  %s8648_s10 = scalar_lea.sflag [#allocation3], %s8647_s13 }
0x3915   : > { %p9122_p1 = pneg %p9121_p0 }
0x3917   : > { %9787 = dma.done.wait (%p9122_p1), %s8648_s10, 512  }
0x3918   : > { %9789 = vsyncadd (%p9122_p1), %s8648_s10, 4294966784  ;;  %s8658_s28 = scalar_lea.sflag [#allocation5], %s8647_s13 }
0x3919   : > { %9791 = dma.done.wait (%p9122_p1), %s8658_s28, 1024  }
0x391a   : > { %9793 = vsyncadd (%p9122_p1), %s8658_s28, 4294966272  ;;  %s13008_s12 = sld [smem:[#allocation13_spill]] }
0x391b   : > { %s13009_s30 = sld [smem:[#allocation9_spill]] }
0x391c   : > { %s13010_s10 = sld [smem:[#allocation10_spill]] }
0x391d   : > { %s13011_s11 = sld [smem:[#allocation14_spill]] }
0x3920   : > { %p23_p5 = scmp.ge.s32.totalorder %s13008_s12, 4  }
0x3922   :  { %25 = sbr.rel (!%p23_p5) target bundleno = 14 (0xe), region = 112 }
0x3927   :  { %8664 = vsyncpa [#allocation3], 1 }
0x3928   :  { %8666 = vsyncpa [#allocation3 + $0x1], 1 }
0x3929   :  { %8667 = vsyncpa [#allocation5], 1 }
0x392a   :  { %8669 = vsyncpa [#allocation5 + $0x1], 1 }

</bundles_post_ra>
